<compile_context>
chip_gen: v7x
topology: tpu7x:2x2x1
jax: 0.10.0
libtpu: 0.0.40
codegen_flags: <defaults>
</compile_context>

<pallas_src>
import functools

import jax
import jax.numpy as jnp
from jax.experimental import pallas as pl
from jax.experimental.pallas import tpu as pltpu

# ---------------------------------------------------------------------------
# Config
# ---------------------------------------------------------------------------
NUM_GRIDS = 5
GRID_MIN, GRID_MAX = -2.0, 2.0
DENOM = (GRID_MAX - GRID_MIN) / (NUM_GRIDS - 1)
GRID_PTS = [GRID_MIN + i * DENOM for i in range(NUM_GRIDS)]
LN_EPS = 1e-5


def _round8(n):
    return ((n + 7) // 8) * 8


def _w_offsets(dins):
    """Row offsets of each fused-W chunk inside the packed weight slab."""
    offs, off = [], 0
    for din in dins:
        offs.append(off)
        off += _round8(6 * din)
    return offs, off


# ---------------------------------------------------------------------------
# Pallas kernel: whole sequence in ONE invocation (no grid)
# ---------------------------------------------------------------------------
def _kan_lstm_kernel(
    x_ref,        # (T*B_pad, Din)   time-major rows
    w_ref,        # (sum_K, PAD)     4 fused KAN weight matrices, stacked
    lnb_ref,      # (12, PAD)        rows 0-7: [gamma;beta] x4, rows 8-11: biases
    fc_ref,       # (H+1, FCPAD)     rows 0:H = fc weight, row H = fc bias
    y_ref,        # (T*B_pad, FCPAD) fc(output sequence), lane-dense
    h_ref,        # (B_pad, H)       final hidden state
    c_ref,        # (B_pad, H)       final cell state
    kx_scr,       # (T*B_pad, H)     VMEM scratch: batched KAN_x results
    hs_scr,       # (T*B_pad, H)     VMEM scratch: h sequence
    *, T, B_pad, Din, KH, H,
):
    f32 = jnp.float32
    layer_dims = [(Din, KH), (KH, H), (H, KH), (KH, H)]   # xl1, xl2, hl1, hl2
    w_offs, _ = _w_offsets([d for d, _ in layer_dims])

    def get_params(idx):
        din, dout = layer_dims[idx]
        gamma = lnb_ref[2 * idx:2 * idx + 1, 0:din]
        beta = lnb_ref[2 * idx + 1:2 * idx + 2, 0:din]
        bias = lnb_ref[8 + idx:9 + idx, 0:dout]
        w = w_ref[w_offs[idx]:w_offs[idx] + 6 * din, 0:dout]
        return gamma, beta, w, bias

    px = (get_params(0), get_params(1))   # KAN_x
    ph = (get_params(2), get_params(3))   # KAN_h

    def kan_layer(x, p):
        gamma, beta, w, bias = p
        n = x.shape[-1]
        # Single-pass LN stats: two independent cross-lane reductions.
        s1 = jnp.sum(x, axis=-1, keepdims=True)
        s2 = jnp.sum(x * x, axis=-1, keepdims=True)
        mu = s1 * (1.0 / n)
        var = jnp.maximum(s2 * (1.0 / n) - mu * mu, 0.0)
        xn = (x - mu) * jax.lax.rsqrt(var + LN_EPS) * gamma + beta
        # Features: [SiLU(x), phi_0..phi_4]  (direct exps — no 0*inf hazard).
        feats = [x * jax.nn.sigmoid(x)]
        for gpt in GRID_PTS:
            u = (xn - gpt) * (1.0 / DENOM)
            feats.append(jnp.exp(-u * u))
        z = jnp.concatenate(feats, axis=-1)          # (M, 6*din)
        # Single fused MXU push: base + all spline grid points in one matmul.
        return jnp.dot(z, w, preferred_element_type=f32) + bias

    def kan_net(x, ps):
        return kan_layer(kan_layer(x, ps[0]), ps[1])

    # Input-path KAN has no h/c dependence -> batch it over all timesteps.
    kx_scr[...] = kan_net(x_ref[...], px)            # (T*B_pad, H)

    h = jnp.zeros((B_pad, H), f32)
    c = jnp.zeros((B_pad, H), f32)
    kh0 = kan_net(h, ph)                              # h == 0: parameter-only

    for t in range(T):                                # static unroll (T small)
        kx_t = kx_scr[t * B_pad:(t + 1) * B_pad, :]
        kh = kh0 if t == 0 else kan_net(h, ph)
        s = kx_t + kh
        g = jax.nn.sigmoid(s)                         # i == f == o in reference
        c = g * (c + jnp.tanh(s))                     # f*c + i*c_tilde
        h = g * jnp.tanh(c)
        hs_scr[t * B_pad:(t + 1) * B_pad, :] = h

    h_ref[...] = h
    c_ref[...] = c

    # Final fc applied to the whole h-sequence in one lane-dense matmul.
    fcw = fc_ref[0:H, :]
    fcb = fc_ref[H:H + 1, :]
    y_ref[...] = (
        jnp.dot(hs_scr[...], fcw, preferred_element_type=f32) + fcb
    ).astype(y_ref.dtype)


# ---------------------------------------------------------------------------
# Host-side packing helpers
# ---------------------------------------------------------------------------
def _pad2(a, rows, cols):
    return jnp.pad(a, ((0, rows - a.shape[0]), (0, cols - a.shape[1])))


def _fuse_layer(p):
    """(gamma, beta, sw(G,in,out), sb, bw, bb) -> (ln(2,in), W(6*in,out), b(1,out))."""
    gamma, beta, sw, sb, bw, bb = p
    ln = jnp.concatenate([gamma, beta], axis=0)
    w = jnp.concatenate([bw] + [sw[g] for g in range(NUM_GRIDS)], axis=0)
    b = sb + bb
    return ln, w, b


# ---------------------------------------------------------------------------
# Wrapper
# ---------------------------------------------------------------------------
@jax.jit
def kan_lstm_forward(x, params):
    """x: (B, T, input_size) f32.  Returns (y, (h_n, c_n)) like the PyTorch module."""
    B, T, Din = x.shape
    kanx_l1, kanx_l2, kanh_l1, kanh_l2, fcw, fcb = params
    KH = kanx_l1[2].shape[-1]           # spline weight (G, Din, KH)
    H = fcw.shape[0]
    B_pad = _round8(B)                  # f32 sublane multiple
    PAD = max(Din, KH, H)               # lane width of the KAN param slabs
    FCPAD = ((Din + 127) // 128) * 128  # lane-dense fc output

    # Pack params: 14 tiny arrays -> 3 slabs.
    fused = [_fuse_layer(kanx_l1), _fuse_layer(kanx_l2),
             _fuse_layer(kanh_l1), _fuse_layer(kanh_l2)]
    w_chunks, ln_rows, b_rows = [], [], []
    for ln, w, b in fused:
        w_chunks.append(_pad2(w, _round8(w.shape[0]), PAD))
        ln_rows.append(_pad2(ln, 2, PAD))
        b_rows.append(_pad2(b, 1, PAD))
    w_slab = jnp.concatenate(w_chunks, axis=0)                  # (280, PAD)
    lnb_slab = jnp.concatenate(ln_rows + b_rows, axis=0)        # (12, PAD)
    fc_slab = jnp.concatenate(
        [_pad2(fcw, H, FCPAD), _pad2(fcb, 1, FCPAD)], axis=0)   # (H+1, FCPAD)

    # Time-major rows for the batched KAN_x / fc matmuls.
    x_pad = jnp.pad(x, ((0, B_pad - B), (0, 0), (0, 0)))
    x2d = jnp.transpose(x_pad, (1, 0, 2)).reshape(T * B_pad, Din)

    kernel = functools.partial(_kan_lstm_kernel, T=T, B_pad=B_pad,
                               Din=Din, KH=KH, H=H)
    vmem = pltpu.MemorySpace.VMEM
    y2d, h_last, c_last = pl.pallas_call(
        kernel,
        out_shape=(
            jax.ShapeDtypeStruct((T * B_pad, FCPAD), jnp.float32),
            jax.ShapeDtypeStruct((B_pad, H), jnp.float32),
            jax.ShapeDtypeStruct((B_pad, H), jnp.float32),
        ),
        in_specs=[pl.BlockSpec(memory_space=vmem)] * 4,
        out_specs=(pl.BlockSpec(memory_space=vmem),) * 3,
        scratch_shapes=[
            pltpu.VMEM((T * B_pad, H), jnp.float32),   # kx sequence
            pltpu.VMEM((T * B_pad, H), jnp.float32),   # h sequence
        ],
    )(x2d, w_slab, lnb_slab, fc_slab)

    y = y2d[:, :Din].reshape(T, B_pad, Din).transpose(1, 0, 2)[:B]   # (B, T, Din)
    h_n = h_last[:B][None]                                           # (1, B, H)
    c_n = c_last[:B][None]
    return y, (h_n, c_n)


# ---------------------------------------------------------------------------
# Deterministic parameter construction (unpacked FastKAN form)
# ---------------------------------------------------------------------------
def _make_kan_layer_params(key, din, dout, scale=0.1):
    k1, k2 = jax.random.split(key)
    gamma = jnp.ones((1, din), jnp.float32)
    beta = jnp.zeros((1, din), jnp.float32)
    sw = scale * jax.random.normal(k1, (NUM_GRIDS, din, dout), jnp.float32)
    sb = jnp.zeros((1, dout), jnp.float32)
    bw = scale * jax.random.normal(k2, (din, dout), jnp.float32)
    bb = jnp.zeros((1, dout), jnp.float32)
    return (gamma, beta, sw, sb, bw, bb)


def make_params(key, input_size, hidden_size, kan_hidden_size):
    keys = jax.random.split(key, 6)
    kanx_l1 = _make_kan_layer_params(keys[0], input_size, kan_hidden_size)
    kanx_l2 = _make_kan_layer_params(keys[1], kan_hidden_size, hidden_size)
    kanh_l1 = _make_kan_layer_params(keys[2], hidden_size, kan_hidden_size)
    kanh_l2 = _make_kan_layer_params(keys[3], kan_hidden_size, hidden_size)
    fcw = 0.1 * jax.random.normal(keys[4], (hidden_size, input_size), jnp.float32)
    fcb = 0.01 * jax.random.normal(keys[5], (1, input_size), jnp.float32)
    return (kanx_l1, kanx_l2, kanh_l1, kanh_l2, fcw, fcb)


# ---------------------------------------------------------------------------
# Pure-JAX reference (direct, unfused formulation) for correctness checking
# ---------------------------------------------------------------------------
def _kan_layer_ref(x, p):
    gamma, beta, sw, sb, bw, bb = p
    mu = x.mean(-1, keepdims=True)
    var = ((x - mu) ** 2).mean(-1, keepdims=True)
    xn = (x - mu) / jnp.sqrt(var + LN_EPS) * gamma + beta
    out = (x * jax.nn.sigmoid(x)) @ bw + bb + sb
    for gi in range(NUM_GRIDS):
        phi = jnp.exp(-((xn - GRID_PTS[gi]) / DENOM) ** 2)
        out = out + phi @ sw[gi]
    return out


def kan_lstm_reference(x, params):
    (kanx_l1, kanx_l2, kanh_l1, kanh_l2, fcw, fcb) = params
    B, T, Din = x.shape
    H = fcw.shape[0]
    h = jnp.zeros((B, H), jnp.float32)
    c = jnp.zeros((B, H), jnp.float32)
    outs = []
    for t in range(T):
        xt = x[:, t, :]
        kx = _kan_layer_ref(_kan_layer_ref(xt, kanx_l1), kanx_l2)
        kh = _kan_layer_ref(_kan_layer_ref(h, kanh_l1), kanh_l2)
        s = kx + kh
        g = jax.nn.sigmoid(s)
        ct = jnp.tanh(s)
        c = g * c + g * ct
        h = g * jnp.tanh(c)
        outs.append(h)
    hseq = jnp.stack(outs, axis=1)              # (B, T, H)
    y = hseq @ fcw + fcb                        # (B, T, Din)
    return y, (h[None], c[None])


# ---------------------------------------------------------------------------
if __name__ == "__main__":
    B, T = 2, 8
    INPUT_SIZE, HIDDEN_SIZE, KAN_HIDDEN = 4, 32, 5

    key = jax.random.PRNGKey(0)
    kx, kp = jax.random.split(key)
    x = jax.random.normal(kx, (B, T, INPUT_SIZE), jnp.float32)
    params = make_params(kp, INPUT_SIZE, HIDDEN_SIZE, KAN_HIDDEN)

    y, (h_n, c_n) = kan_lstm_forward(x, params)
    jax.block_until_ready((y, h_n, c_n))

    y_ref, (h_ref, c_ref) = kan_lstm_reference(x, params)
    assert y.shape == (B, T, INPUT_SIZE)
    assert h_n.shape == (1, B, HIDDEN_SIZE) and c_n.shape == (1, B, HIDDEN_SIZE)
    assert jnp.allclose(y, y_ref, rtol=1e-4, atol=1e-4)
    assert jnp.allclose(h_n, h_ref, rtol=1e-4, atol=1e-4)
    assert jnp.allclose(c_n, c_ref, rtol=1e-4, atol=1e-4)

    print("KERNEL_OK")
</pallas_src>

<mosaic_0001>
module attributes {stable_mosaic.version = 11 : i64} {
  func.func @_kan_lstm_kernel(%arg0: memref<64x4xf32, #tpu.memory_space<vmem>>, %arg1: memref<280x32xf32, #tpu.memory_space<vmem>>, %arg2: memref<12x32xf32, #tpu.memory_space<vmem>>, %arg3: memref<33x128xf32, #tpu.memory_space<vmem>>, %arg4: memref<64x128xf32, #tpu.memory_space<vmem>>, %arg5: memref<8x32xf32, #tpu.memory_space<vmem>>, %arg6: memref<8x32xf32, #tpu.memory_space<vmem>>, %arg7: memref<64x32xf32, #tpu.memory_space<vmem>>, %arg8: memref<64x32xf32, #tpu.memory_space<vmem>>) attributes {dimension_semantics = [], scalar_prefetch = 0 : i64, scratch_operands = 2 : i64, tpu.core_type = #tpu.core_type<tc>} {
    %c0 = arith.constant 0 : index
    %c0_0 = arith.constant 0 : index
    %0 = vector.load %arg2[%c0, %c0_0] : memref<12x32xf32, #tpu.memory_space<vmem>>, vector<1x4xf32>
    %c1 = arith.constant 1 : index
    %c0_1 = arith.constant 0 : index
    %1 = vector.load %arg2[%c1, %c0_1] : memref<12x32xf32, #tpu.memory_space<vmem>>, vector<1x4xf32>
    %c8 = arith.constant 8 : index
    %c0_2 = arith.constant 0 : index
    %2 = vector.load %arg2[%c8, %c0_2] : memref<12x32xf32, #tpu.memory_space<vmem>>, vector<1x5xf32>
    %c0_3 = arith.constant 0 : index
    %c0_4 = arith.constant 0 : index
    %3 = vector.load %arg1[%c0_3, %c0_4] : memref<280x32xf32, #tpu.memory_space<vmem>>, vector<24x5xf32>
    %c2 = arith.constant 2 : index
    %c0_5 = arith.constant 0 : index
    %4 = vector.load %arg2[%c2, %c0_5] : memref<12x32xf32, #tpu.memory_space<vmem>>, vector<1x5xf32>
    %c3 = arith.constant 3 : index
    %c0_6 = arith.constant 0 : index
    %5 = vector.load %arg2[%c3, %c0_6] : memref<12x32xf32, #tpu.memory_space<vmem>>, vector<1x5xf32>
    %c9 = arith.constant 9 : index
    %c0_7 = arith.constant 0 : index
    %6 = vector.load %arg2[%c9, %c0_7] : memref<12x32xf32, #tpu.memory_space<vmem>>, vector<1x32xf32>
    %c24 = arith.constant 24 : index
    %c0_8 = arith.constant 0 : index
    %7 = vector.load %arg1[%c24, %c0_8] : memref<280x32xf32, #tpu.memory_space<vmem>>, vector<30x32xf32>
    %c4 = arith.constant 4 : index
    %c0_9 = arith.constant 0 : index
    %8 = vector.load %arg2[%c4, %c0_9] : memref<12x32xf32, #tpu.memory_space<vmem>>, vector<1x32xf32>
    %c5 = arith.constant 5 : index
    %c0_10 = arith.constant 0 : index
    %9 = vector.load %arg2[%c5, %c0_10] : memref<12x32xf32, #tpu.memory_space<vmem>>, vector<1x32xf32>
    %c10 = arith.constant 10 : index
    %c0_11 = arith.constant 0 : index
    %10 = vector.load %arg2[%c10, %c0_11] : memref<12x32xf32, #tpu.memory_space<vmem>>, vector<1x5xf32>
    %c56 = arith.constant 56 : index
    %c0_12 = arith.constant 0 : index
    %11 = vector.load %arg1[%c56, %c0_12] : memref<280x32xf32, #tpu.memory_space<vmem>>, vector<192x5xf32>
    %c6 = arith.constant 6 : index
    %c0_13 = arith.constant 0 : index
    %12 = vector.load %arg2[%c6, %c0_13] : memref<12x32xf32, #tpu.memory_space<vmem>>, vector<1x5xf32>
    %c7 = arith.constant 7 : index
    %c0_14 = arith.constant 0 : index
    %13 = vector.load %arg2[%c7, %c0_14] : memref<12x32xf32, #tpu.memory_space<vmem>>, vector<1x5xf32>
    %c11 = arith.constant 11 : index
    %c0_15 = arith.constant 0 : index
    %14 = vector.load %arg2[%c11, %c0_15] : memref<12x32xf32, #tpu.memory_space<vmem>>, vector<1x32xf32>
    %c248 = arith.constant 248 : index
    %c0_16 = arith.constant 0 : index
    %15 = vector.load %arg1[%c248, %c0_16] : memref<280x32xf32, #tpu.memory_space<vmem>>, vector<30x32xf32>
    %c0_17 = arith.constant 0 : index
    %c0_18 = arith.constant 0 : index
    %16 = vector.load %arg0[%c0_17, %c0_18] : memref<64x4xf32, #tpu.memory_space<vmem>>, vector<64x4xf32>
    %cst = arith.constant dense<0.000000e+00> : vector<64xf32>
    %17 = vector.multi_reduction <add>, %16, %cst [1] : vector<64x4xf32> to vector<64xf32>
    %18 = vector.shape_cast %17 : vector<64xf32> to vector<64x1xf32>
    %19 = arith.mulf %16, %16 : vector<64x4xf32>
    %cst_19 = arith.constant dense<0.000000e+00> : vector<64xf32>
    %20 = vector.multi_reduction <add>, %19, %cst_19 [1] : vector<64x4xf32> to vector<64xf32>
    %21 = vector.shape_cast %20 : vector<64xf32> to vector<64x1xf32>
    %cst_20 = arith.constant 2.500000e-01 : f32
    %22 = vector.broadcast %cst_20 : f32 to vector<64x1xf32>
    %23 = arith.mulf %18, %22 : vector<64x1xf32>
    %cst_21 = arith.constant 2.500000e-01 : f32
    %24 = vector.broadcast %cst_21 : f32 to vector<64x1xf32>
    %25 = arith.mulf %21, %24 : vector<64x1xf32>
    %26 = arith.mulf %23, %23 : vector<64x1xf32>
    %27 = arith.subf %25, %26 : vector<64x1xf32>
    %cst_22 = arith.constant 0.000000e+00 : f32
    %28 = vector.broadcast %cst_22 : f32 to vector<64x1xf32>
    %29 = arith.maximumf %27, %28 : vector<64x1xf32>
    %30 = vector.broadcast %23 : vector<64x1xf32> to vector<64x4xf32>
    %31 = arith.subf %16, %30 : vector<64x4xf32>
    %cst_23 = arith.constant 9.99999974E-6 : f32
    %32 = vector.broadcast %cst_23 : f32 to vector<64x1xf32>
    %33 = arith.addf %29, %32 : vector<64x1xf32>
    %34 = math.rsqrt %33 : vector<64x1xf32>
    %35 = vector.broadcast %34 : vector<64x1xf32> to vector<64x4xf32>
    %36 = arith.mulf %31, %35 : vector<64x4xf32>
    %37 = vector.broadcast %0 : vector<1x4xf32> to vector<64x4xf32>
    %38 = arith.mulf %36, %37 : vector<64x4xf32>
    %39 = vector.broadcast %1 : vector<1x4xf32> to vector<64x4xf32>
    %40 = arith.addf %38, %39 : vector<64x4xf32>
    %41 = arith.negf %16 : vector<64x4xf32>
    %42 = math.exp %41 : vector<64x4xf32>
    %cst_24 = arith.constant 1.000000e+00 : f32
    %43 = vector.broadcast %cst_24 : f32 to vector<64x4xf32>
    %44 = arith.addf %43, %42 : vector<64x4xf32>
    %45 = arith.divf %43, %44 : vector<64x4xf32>
    %46 = arith.mulf %16, %45 : vector<64x4xf32>
    %cst_25 = arith.constant -2.000000e+00 : f32
    %47 = vector.broadcast %cst_25 : f32 to vector<64x4xf32>
    %48 = arith.subf %40, %47 : vector<64x4xf32>
    %cst_26 = arith.constant 1.000000e+00 : f32
    %49 = vector.broadcast %cst_26 : f32 to vector<64x4xf32>
    %50 = arith.mulf %48, %49 : vector<64x4xf32>
    %cst_27 = arith.constant 0.000000e+00 : f32
    %51 = vector.broadcast %cst_27 : f32 to vector<64x4xf32>
    %52 = arith.subf %51, %50 : vector<64x4xf32>
    %53 = arith.mulf %52, %50 : vector<64x4xf32>
    %54 = math.exp %53 : vector<64x4xf32>
    %cst_28 = arith.constant -1.000000e+00 : f32
    %55 = vector.broadcast %cst_28 : f32 to vector<64x4xf32>
    %56 = arith.subf %40, %55 : vector<64x4xf32>
    %cst_29 = arith.constant 1.000000e+00 : f32
    %57 = vector.broadcast %cst_29 : f32 to vector<64x4xf32>
    %58 = arith.mulf %56, %57 : vector<64x4xf32>
    %cst_30 = arith.constant 0.000000e+00 : f32
    %59 = vector.broadcast %cst_30 : f32 to vector<64x4xf32>
    %60 = arith.subf %59, %58 : vector<64x4xf32>
    %61 = arith.mulf %60, %58 : vector<64x4xf32>
    %62 = math.exp %61 : vector<64x4xf32>
    %cst_31 = arith.constant 0.000000e+00 : f32
    %63 = vector.broadcast %cst_31 : f32 to vector<64x4xf32>
    %64 = arith.subf %40, %63 : vector<64x4xf32>
    %cst_32 = arith.constant 1.000000e+00 : f32
    %65 = vector.broadcast %cst_32 : f32 to vector<64x4xf32>
    %66 = arith.mulf %64, %65 : vector<64x4xf32>
    %cst_33 = arith.constant 0.000000e+00 : f32
    %67 = vector.broadcast %cst_33 : f32 to vector<64x4xf32>
    %68 = arith.subf %67, %66 : vector<64x4xf32>
    %69 = arith.mulf %68, %66 : vector<64x4xf32>
    %70 = math.exp %69 : vector<64x4xf32>
    %cst_34 = arith.constant 1.000000e+00 : f32
    %71 = vector.broadcast %cst_34 : f32 to vector<64x4xf32>
    %72 = arith.subf %40, %71 : vector<64x4xf32>
    %cst_35 = arith.constant 1.000000e+00 : f32
    %73 = vector.broadcast %cst_35 : f32 to vector<64x4xf32>
    %74 = arith.mulf %72, %73 : vector<64x4xf32>
    %cst_36 = arith.constant 0.000000e+00 : f32
    %75 = vector.broadcast %cst_36 : f32 to vector<64x4xf32>
    %76 = arith.subf %75, %74 : vector<64x4xf32>
    %77 = arith.mulf %76, %74 : vector<64x4xf32>
    %78 = math.exp %77 : vector<64x4xf32>
    %cst_37 = arith.constant 2.000000e+00 : f32
    %79 = vector.broadcast %cst_37 : f32 to vector<64x4xf32>
    %80 = arith.subf %40, %79 : vector<64x4xf32>
    %cst_38 = arith.constant 1.000000e+00 : f32
    %81 = vector.broadcast %cst_38 : f32 to vector<64x4xf32>
    %82 = arith.mulf %80, %81 : vector<64x4xf32>
    %cst_39 = arith.constant 0.000000e+00 : f32
    %83 = vector.broadcast %cst_39 : f32 to vector<64x4xf32>
    %84 = arith.subf %83, %82 : vector<64x4xf32>
    %85 = arith.mulf %84, %82 : vector<64x4xf32>
    %86 = math.exp %85 : vector<64x4xf32>
    %87 = tpu.concatenate %46, %54, %62, %70, %78, %86 in 1 : vector<64x4xf32>, vector<64x4xf32>, vector<64x4xf32>, vector<64x4xf32>, vector<64x4xf32>, vector<64x4xf32> -> vector<64x24xf32>
    %cst_40 = arith.constant dense<0.000000e+00> : vector<64x5xf32>
    %88 = tpu.matmul %87, %3, %cst_40 {dimension_numbers = #tpu.dot_dimension_numbers<[1], [0], [0], [1], [0, 0, 1, 1], [], []>} : vector<64x24xf32>, vector<24x5xf32>, vector<64x5xf32> -> vector<64x5xf32>
    %89 = vector.broadcast %2 : vector<1x5xf32> to vector<64x5xf32>
    %90 = arith.addf %88, %89 : vector<64x5xf32>
    %cst_41 = arith.constant dense<0.000000e+00> : vector<64xf32>
    %91 = vector.multi_reduction <add>, %90, %cst_41 [1] : vector<64x5xf32> to vector<64xf32>
    %92 = vector.shape_cast %91 : vector<64xf32> to vector<64x1xf32>
    %93 = arith.mulf %90, %90 : vector<64x5xf32>
    %cst_42 = arith.constant dense<0.000000e+00> : vector<64xf32>
    %94 = vector.multi_reduction <add>, %93, %cst_42 [1] : vector<64x5xf32> to vector<64xf32>
    %95 = vector.shape_cast %94 : vector<64xf32> to vector<64x1xf32>
    %cst_43 = arith.constant 2.000000e-01 : f32
    %96 = vector.broadcast %cst_43 : f32 to vector<64x1xf32>
    %97 = arith.mulf %92, %96 : vector<64x1xf32>
    %cst_44 = arith.constant 2.000000e-01 : f32
    %98 = vector.broadcast %cst_44 : f32 to vector<64x1xf32>
    %99 = arith.mulf %95, %98 : vector<64x1xf32>
    %100 = arith.mulf %97, %97 : vector<64x1xf32>
    %101 = arith.subf %99, %100 : vector<64x1xf32>
    %cst_45 = arith.constant 0.000000e+00 : f32
    %102 = vector.broadcast %cst_45 : f32 to vector<64x1xf32>
    %103 = arith.maximumf %101, %102 : vector<64x1xf32>
    %104 = vector.broadcast %97 : vector<64x1xf32> to vector<64x5xf32>
    %105 = arith.subf %90, %104 : vector<64x5xf32>
    %cst_46 = arith.constant 9.99999974E-6 : f32
    %106 = vector.broadcast %cst_46 : f32 to vector<64x1xf32>
    %107 = arith.addf %103, %106 : vector<64x1xf32>
    %108 = math.rsqrt %107 : vector<64x1xf32>
    %109 = vector.broadcast %108 : vector<64x1xf32> to vector<64x5xf32>
    %110 = arith.mulf %105, %109 : vector<64x5xf32>
    %111 = vector.broadcast %4 : vector<1x5xf32> to vector<64x5xf32>
    %112 = arith.mulf %110, %111 : vector<64x5xf32>
    %113 = vector.broadcast %5 : vector<1x5xf32> to vector<64x5xf32>
    %114 = arith.addf %112, %113 : vector<64x5xf32>
    %115 = arith.negf %90 : vector<64x5xf32>
    %116 = math.exp %115 : vector<64x5xf32>
    %cst_47 = arith.constant 1.000000e+00 : f32
    %117 = vector.broadcast %cst_47 : f32 to vector<64x5xf32>
    %118 = arith.addf %117, %116 : vector<64x5xf32>
    %119 = arith.divf %117, %118 : vector<64x5xf32>
    %120 = arith.mulf %90, %119 : vector<64x5xf32>
    %cst_48 = arith.constant -2.000000e+00 : f32
    %121 = vector.broadcast %cst_48 : f32 to vector<64x5xf32>
    %122 = arith.subf %114, %121 : vector<64x5xf32>
    %cst_49 = arith.constant 1.000000e+00 : f32
    %123 = vector.broadcast %cst_49 : f32 to vector<64x5xf32>
    %124 = arith.mulf %122, %123 : vector<64x5xf32>
    %cst_50 = arith.constant 0.000000e+00 : f32
    %125 = vector.broadcast %cst_50 : f32 to vector<64x5xf32>
    %126 = arith.subf %125, %124 : vector<64x5xf32>
    %127 = arith.mulf %126, %124 : vector<64x5xf32>
    %128 = math.exp %127 : vector<64x5xf32>
    %cst_51 = arith.constant -1.000000e+00 : f32
    %129 = vector.broadcast %cst_51 : f32 to vector<64x5xf32>
    %130 = arith.subf %114, %129 : vector<64x5xf32>
    %cst_52 = arith.constant 1.000000e+00 : f32
    %131 = vector.broadcast %cst_52 : f32 to vector<64x5xf32>
    %132 = arith.mulf %130, %131 : vector<64x5xf32>
    %cst_53 = arith.constant 0.000000e+00 : f32
    %133 = vector.broadcast %cst_53 : f32 to vector<64x5xf32>
    %134 = arith.subf %133, %132 : vector<64x5xf32>
    %135 = arith.mulf %134, %132 : vector<64x5xf32>
    %136 = math.exp %135 : vector<64x5xf32>
    %cst_54 = arith.constant 0.000000e+00 : f32
    %137 = vector.broadcast %cst_54 : f32 to vector<64x5xf32>
    %138 = arith.subf %114, %137 : vector<64x5xf32>
    %cst_55 = arith.constant 1.000000e+00 : f32
    %139 = vector.broadcast %cst_55 : f32 to vector<64x5xf32>
    %140 = arith.mulf %138, %139 : vector<64x5xf32>
    %cst_56 = arith.constant 0.000000e+00 : f32
    %141 = vector.broadcast %cst_56 : f32 to vector<64x5xf32>
    %142 = arith.subf %141, %140 : vector<64x5xf32>
    %143 = arith.mulf %142, %140 : vector<64x5xf32>
    %144 = math.exp %143 : vector<64x5xf32>
    %cst_57 = arith.constant 1.000000e+00 : f32
    %145 = vector.broadcast %cst_57 : f32 to vector<64x5xf32>
    %146 = arith.subf %114, %145 : vector<64x5xf32>
    %cst_58 = arith.constant 1.000000e+00 : f32
    %147 = vector.broadcast %cst_58 : f32 to vector<64x5xf32>
    %148 = arith.mulf %146, %147 : vector<64x5xf32>
    %cst_59 = arith.constant 0.000000e+00 : f32
    %149 = vector.broadcast %cst_59 : f32 to vector<64x5xf32>
    %150 = arith.subf %149, %148 : vector<64x5xf32>
    %151 = arith.mulf %150, %148 : vector<64x5xf32>
    %152 = math.exp %151 : vector<64x5xf32>
    %cst_60 = arith.constant 2.000000e+00 : f32
    %153 = vector.broadcast %cst_60 : f32 to vector<64x5xf32>
    %154 = arith.subf %114, %153 : vector<64x5xf32>
    %cst_61 = arith.constant 1.000000e+00 : f32
    %155 = vector.broadcast %cst_61 : f32 to vector<64x5xf32>
    %156 = arith.mulf %154, %155 : vector<64x5xf32>
    %cst_62 = arith.constant 0.000000e+00 : f32
    %157 = vector.broadcast %cst_62 : f32 to vector<64x5xf32>
    %158 = arith.subf %157, %156 : vector<64x5xf32>
    %159 = arith.mulf %158, %156 : vector<64x5xf32>
    %160 = math.exp %159 : vector<64x5xf32>
    %161 = tpu.concatenate %120, %128, %136, %144, %152, %160 in 1 : vector<64x5xf32>, vector<64x5xf32>, vector<64x5xf32>, vector<64x5xf32>, vector<64x5xf32>, vector<64x5xf32> -> vector<64x30xf32>
    %cst_63 = arith.constant dense<0.000000e+00> : vector<64x32xf32>
    %162 = tpu.matmul %161, %7, %cst_63 {dimension_numbers = #tpu.dot_dimension_numbers<[1], [0], [0], [1], [0, 0, 1, 1], [], []>} : vector<64x30xf32>, vector<30x32xf32>, vector<64x32xf32> -> vector<64x32xf32>
    %163 = vector.broadcast %6 : vector<1x32xf32> to vector<64x32xf32>
    %164 = arith.addf %162, %163 : vector<64x32xf32>
    %c0_64 = arith.constant 0 : index
    %c0_65 = arith.constant 0 : index
    %165 = vector.load %arg7[%c0_64, %c0_65] : memref<64x32xf32, #tpu.memory_space<vmem>>, vector<64x32xf32>
    tpu.vector_store %arg7[%c0_64, %c0_65], %164 {strides = array<i32>} : memref<64x32xf32, #tpu.memory_space<vmem>>, vector<64x32xf32>,
    %cst_66 = arith.constant 0.000000e+00 : f32
    %166 = vector.broadcast %cst_66 : f32 to vector<8x32xf32>
    %cst_67 = arith.constant 0.000000e+00 : f32
    %167 = vector.broadcast %cst_67 : f32 to vector<8x32xf32>
    %cst_68 = arith.constant dense<0.000000e+00> : vector<8xf32>
    %168 = vector.multi_reduction <add>, %166, %cst_68 [1] : vector<8x32xf32> to vector<8xf32>
    %169 = vector.shape_cast %168 : vector<8xf32> to vector<8x1xf32>
    %170 = arith.mulf %166, %166 : vector<8x32xf32>
    %cst_69 = arith.constant dense<0.000000e+00> : vector<8xf32>
    %171 = vector.multi_reduction <add>, %170, %cst_69 [1] : vector<8x32xf32> to vector<8xf32>
    %172 = vector.shape_cast %171 : vector<8xf32> to vector<8x1xf32>
    %cst_70 = arith.constant 3.125000e-02 : f32
    %173 = vector.broadcast %cst_70 : f32 to vector<8x1xf32>
    %174 = arith.mulf %169, %173 : vector<8x1xf32>
    %cst_71 = arith.constant 3.125000e-02 : f32
    %175 = vector.broadcast %cst_71 : f32 to vector<8x1xf32>
    %176 = arith.mulf %172, %175 : vector<8x1xf32>
    %177 = arith.mulf %174, %174 : vector<8x1xf32>
    %178 = arith.subf %176, %177 : vector<8x1xf32>
    %cst_72 = arith.constant 0.000000e+00 : f32
    %179 = vector.broadcast %cst_72 : f32 to vector<8x1xf32>
    %180 = arith.maximumf %178, %179 : vector<8x1xf32>
    %181 = vector.broadcast %174 : vector<8x1xf32> to vector<8x32xf32>
    %182 = arith.subf %166, %181 : vector<8x32xf32>
    %cst_73 = arith.constant 9.99999974E-6 : f32
    %183 = vector.broadcast %cst_73 : f32 to vector<8x1xf32>
    %184 = arith.addf %180, %183 : vector<8x1xf32>
    %185 = math.rsqrt %184 : vector<8x1xf32>
    %186 = vector.broadcast %185 : vector<8x1xf32> to vector<8x32xf32>
    %187 = arith.mulf %182, %186 : vector<8x32xf32>
    %188 = vector.broadcast %8 : vector<1x32xf32> to vector<8x32xf32>
    %189 = arith.mulf %187, %188 : vector<8x32xf32>
    %190 = vector.broadcast %9 : vector<1x32xf32> to vector<8x32xf32>
    %191 = arith.addf %189, %190 : vector<8x32xf32>
    %192 = arith.negf %166 : vector<8x32xf32>
    %193 = math.exp %192 : vector<8x32xf32>
    %cst_74 = arith.constant 1.000000e+00 : f32
    %194 = vector.broadcast %cst_74 : f32 to vector<8x32xf32>
    %195 = arith.addf %194, %193 : vector<8x32xf32>
    %196 = arith.divf %194, %195 : vector<8x32xf32>
    %197 = arith.mulf %166, %196 : vector<8x32xf32>
    %cst_75 = arith.constant -2.000000e+00 : f32
    %198 = vector.broadcast %cst_75 : f32 to vector<8x32xf32>
    %199 = arith.subf %191, %198 : vector<8x32xf32>
    %cst_76 = arith.constant 1.000000e+00 : f32
    %200 = vector.broadcast %cst_76 : f32 to vector<8x32xf32>
    %201 = arith.mulf %199, %200 : vector<8x32xf32>
    %cst_77 = arith.constant 0.000000e+00 : f32
    %202 = vector.broadcast %cst_77 : f32 to vector<8x32xf32>
    %203 = arith.subf %202, %201 : vector<8x32xf32>
    %204 = arith.mulf %203, %201 : vector<8x32xf32>
    %205 = math.exp %204 : vector<8x32xf32>
    %cst_78 = arith.constant -1.000000e+00 : f32
    %206 = vector.broadcast %cst_78 : f32 to vector<8x32xf32>
    %207 = arith.subf %191, %206 : vector<8x32xf32>
    %cst_79 = arith.constant 1.000000e+00 : f32
    %208 = vector.broadcast %cst_79 : f32 to vector<8x32xf32>
    %209 = arith.mulf %207, %208 : vector<8x32xf32>
    %cst_80 = arith.constant 0.000000e+00 : f32
    %210 = vector.broadcast %cst_80 : f32 to vector<8x32xf32>
    %211 = arith.subf %210, %209 : vector<8x32xf32>
    %212 = arith.mulf %211, %209 : vector<8x32xf32>
    %213 = math.exp %212 : vector<8x32xf32>
    %cst_81 = arith.constant 0.000000e+00 : f32
    %214 = vector.broadcast %cst_81 : f32 to vector<8x32xf32>
    %215 = arith.subf %191, %214 : vector<8x32xf32>
    %cst_82 = arith.constant 1.000000e+00 : f32
    %216 = vector.broadcast %cst_82 : f32 to vector<8x32xf32>
    %217 = arith.mulf %215, %216 : vector<8x32xf32>
    %cst_83 = arith.constant 0.000000e+00 : f32
    %218 = vector.broadcast %cst_83 : f32 to vector<8x32xf32>
    %219 = arith.subf %218, %217 : vector<8x32xf32>
    %220 = arith.mulf %219, %217 : vector<8x32xf32>
    %221 = math.exp %220 : vector<8x32xf32>
    %cst_84 = arith.constant 1.000000e+00 : f32
    %222 = vector.broadcast %cst_84 : f32 to vector<8x32xf32>
    %223 = arith.subf %191, %222 : vector<8x32xf32>
    %cst_85 = arith.constant 1.000000e+00 : f32
    %224 = vector.broadcast %cst_85 : f32 to vector<8x32xf32>
    %225 = arith.mulf %223, %224 : vector<8x32xf32>
    %cst_86 = arith.constant 0.000000e+00 : f32
    %226 = vector.broadcast %cst_86 : f32 to vector<8x32xf32>
    %227 = arith.subf %226, %225 : vector<8x32xf32>
    %228 = arith.mulf %227, %225 : vector<8x32xf32>
    %229 = math.exp %228 : vector<8x32xf32>
    %cst_87 = arith.constant 2.000000e+00 : f32
    %230 = vector.broadcast %cst_87 : f32 to vector<8x32xf32>
    %231 = arith.subf %191, %230 : vector<8x32xf32>
    %cst_88 = arith.constant 1.000000e+00 : f32
    %232 = vector.broadcast %cst_88 : f32 to vector<8x32xf32>
    %233 = arith.mulf %231, %232 : vector<8x32xf32>
    %cst_89 = arith.constant 0.000000e+00 : f32
    %234 = vector.broadcast %cst_89 : f32 to vector<8x32xf32>
    %235 = arith.subf %234, %233 : vector<8x32xf32>
    %236 = arith.mulf %235, %233 : vector<8x32xf32>
    %237 = math.exp %236 : vector<8x32xf32>
    %238 = tpu.concatenate %197, %205, %213, %221, %229, %237 in 1 : vector<8x32xf32>, vector<8x32xf32>, vector<8x32xf32>, vector<8x32xf32>, vector<8x32xf32>, vector<8x32xf32> -> vector<8x192xf32>
    %cst_90 = arith.constant dense<0.000000e+00> : vector<8x5xf32>
    %239 = tpu.matmul %238, %11, %cst_90 {dimension_numbers = #tpu.dot_dimension_numbers<[1], [0], [0], [1], [0, 0, 1, 1], [], []>} : vector<8x192xf32>, vector<192x5xf32>, vector<8x5xf32> -> vector<8x5xf32>
    %240 = vector.broadcast %10 : vector<1x5xf32> to vector<8x5xf32>
    %241 = arith.addf %239, %240 : vector<8x5xf32>
    %cst_91 = arith.constant dense<0.000000e+00> : vector<8xf32>
    %242 = vector.multi_reduction <add>, %241, %cst_91 [1] : vector<8x5xf32> to vector<8xf32>
    %243 = vector.shape_cast %242 : vector<8xf32> to vector<8x1xf32>
    %244 = arith.mulf %241, %241 : vector<8x5xf32>
    %cst_92 = arith.constant dense<0.000000e+00> : vector<8xf32>
    %245 = vector.multi_reduction <add>, %244, %cst_92 [1] : vector<8x5xf32> to vector<8xf32>
    %246 = vector.shape_cast %245 : vector<8xf32> to vector<8x1xf32>
    %cst_93 = arith.constant 2.000000e-01 : f32
    %247 = vector.broadcast %cst_93 : f32 to vector<8x1xf32>
    %248 = arith.mulf %243, %247 : vector<8x1xf32>
    %cst_94 = arith.constant 2.000000e-01 : f32
    %249 = vector.broadcast %cst_94 : f32 to vector<8x1xf32>
    %250 = arith.mulf %246, %249 : vector<8x1xf32>
    %251 = arith.mulf %248, %248 : vector<8x1xf32>
    %252 = arith.subf %250, %251 : vector<8x1xf32>
    %cst_95 = arith.constant 0.000000e+00 : f32
    %253 = vector.broadcast %cst_95 : f32 to vector<8x1xf32>
    %254 = arith.maximumf %252, %253 : vector<8x1xf32>
    %255 = vector.broadcast %248 : vector<8x1xf32> to vector<8x5xf32>
    %256 = arith.subf %241, %255 : vector<8x5xf32>
    %cst_96 = arith.constant 9.99999974E-6 : f32
    %257 = vector.broadcast %cst_96 : f32 to vector<8x1xf32>
    %258 = arith.addf %254, %257 : vector<8x1xf32>
    %259 = math.rsqrt %258 : vector<8x1xf32>
    %260 = vector.broadcast %259 : vector<8x1xf32> to vector<8x5xf32>
    %261 = arith.mulf %256, %260 : vector<8x5xf32>
    %262 = vector.broadcast %12 : vector<1x5xf32> to vector<8x5xf32>
    %263 = arith.mulf %261, %262 : vector<8x5xf32>
    %264 = vector.broadcast %13 : vector<1x5xf32> to vector<8x5xf32>
    %265 = arith.addf %263, %264 : vector<8x5xf32>
    %266 = arith.negf %241 : vector<8x5xf32>
    %267 = math.exp %266 : vector<8x5xf32>
    %cst_97 = arith.constant 1.000000e+00 : f32
    %268 = vector.broadcast %cst_97 : f32 to vector<8x5xf32>
    %269 = arith.addf %268, %267 : vector<8x5xf32>
    %270 = arith.divf %268, %269 : vector<8x5xf32>
    %271 = arith.mulf %241, %270 : vector<8x5xf32>
    %cst_98 = arith.constant -2.000000e+00 : f32
    %272 = vector.broadcast %cst_98 : f32 to vector<8x5xf32>
    %273 = arith.subf %265, %272 : vector<8x5xf32>
    %cst_99 = arith.constant 1.000000e+00 : f32
    %274 = vector.broadcast %cst_99 : f32 to vector<8x5xf32>
    %275 = arith.mulf %273, %274 : vector<8x5xf32>
    %cst_100 = arith.constant 0.000000e+00 : f32
    %276 = vector.broadcast %cst_100 : f32 to vector<8x5xf32>
    %277 = arith.subf %276, %275 : vector<8x5xf32>
    %278 = arith.mulf %277, %275 : vector<8x5xf32>
    %279 = math.exp %278 : vector<8x5xf32>
    %cst_101 = arith.constant -1.000000e+00 : f32
    %280 = vector.broadcast %cst_101 : f32 to vector<8x5xf32>
    %281 = arith.subf %265, %280 : vector<8x5xf32>
    %cst_102 = arith.constant 1.000000e+00 : f32
    %282 = vector.broadcast %cst_102 : f32 to vector<8x5xf32>
    %283 = arith.mulf %281, %282 : vector<8x5xf32>
    %cst_103 = arith.constant 0.000000e+00 : f32
    %284 = vector.broadcast %cst_103 : f32 to vector<8x5xf32>
    %285 = arith.subf %284, %283 : vector<8x5xf32>
    %286 = arith.mulf %285, %283 : vector<8x5xf32>
    %287 = math.exp %286 : vector<8x5xf32>
    %cst_104 = arith.constant 0.000000e+00 : f32
    %288 = vector.broadcast %cst_104 : f32 to vector<8x5xf32>
    %289 = arith.subf %265, %288 : vector<8x5xf32>
    %cst_105 = arith.constant 1.000000e+00 : f32
    %290 = vector.broadcast %cst_105 : f32 to vector<8x5xf32>
    %291 = arith.mulf %289, %290 : vector<8x5xf32>
    %cst_106 = arith.constant 0.000000e+00 : f32
    %292 = vector.broadcast %cst_106 : f32 to vector<8x5xf32>
    %293 = arith.subf %292, %291 : vector<8x5xf32>
    %294 = arith.mulf %293, %291 : vector<8x5xf32>
    %295 = math.exp %294 : vector<8x5xf32>
    %cst_107 = arith.constant 1.000000e+00 : f32
    %296 = vector.broadcast %cst_107 : f32 to vector<8x5xf32>
    %297 = arith.subf %265, %296 : vector<8x5xf32>
    %cst_108 = arith.constant 1.000000e+00 : f32
    %298 = vector.broadcast %cst_108 : f32 to vector<8x5xf32>
    %299 = arith.mulf %297, %298 : vector<8x5xf32>
    %cst_109 = arith.constant 0.000000e+00 : f32
    %300 = vector.broadcast %cst_109 : f32 to vector<8x5xf32>
    %301 = arith.subf %300, %299 : vector<8x5xf32>
    %302 = arith.mulf %301, %299 : vector<8x5xf32>
    %303 = math.exp %302 : vector<8x5xf32>
    %cst_110 = arith.constant 2.000000e+00 : f32
    %304 = vector.broadcast %cst_110 : f32 to vector<8x5xf32>
    %305 = arith.subf %265, %304 : vector<8x5xf32>
    %cst_111 = arith.constant 1.000000e+00 : f32
    %306 = vector.broadcast %cst_111 : f32 to vector<8x5xf32>
    %307 = arith.mulf %305, %306 : vector<8x5xf32>
    %cst_112 = arith.constant 0.000000e+00 : f32
    %308 = vector.broadcast %cst_112 : f32 to vector<8x5xf32>
    %309 = arith.subf %308, %307 : vector<8x5xf32>
    %310 = arith.mulf %309, %307 : vector<8x5xf32>
    %311 = math.exp %310 : vector<8x5xf32>
    %312 = tpu.concatenate %271, %279, %287, %295, %303, %311 in 1 : vector<8x5xf32>, vector<8x5xf32>, vector<8x5xf32>, vector<8x5xf32>, vector<8x5xf32>, vector<8x5xf32> -> vector<8x30xf32>
    %cst_113 = arith.constant dense<0.000000e+00> : vector<8x32xf32>
    %313 = tpu.matmul %312, %15, %cst_113 {dimension_numbers = #tpu.dot_dimension_numbers<[1], [0], [0], [1], [0, 0, 1, 1], [], []>} : vector<8x30xf32>, vector<30x32xf32>, vector<8x32xf32> -> vector<8x32xf32>
    %314 = vector.broadcast %14 : vector<1x32xf32> to vector<8x32xf32>
    %315 = arith.addf %313, %314 : vector<8x32xf32>
    %c0_114 = arith.constant 0 : index
    %c0_115 = arith.constant 0 : index
    %316 = vector.load %arg7[%c0_114, %c0_115] : memref<64x32xf32, #tpu.memory_space<vmem>>, vector<8x32xf32>
    %317 = arith.addf %316, %315 : vector<8x32xf32>
    %318 = arith.negf %317 : vector<8x32xf32>
    %319 = math.exp %318 : vector<8x32xf32>
    %cst_116 = arith.constant 1.000000e+00 : f32
    %320 = vector.broadcast %cst_116 : f32 to vector<8x32xf32>
    %321 = arith.addf %320, %319 : vector<8x32xf32>
    %322 = arith.divf %320, %321 : vector<8x32xf32>
    %323 = math.tanh %317 : vector<8x32xf32>
    %324 = arith.addf %167, %323 : vector<8x32xf32>
    %325 = arith.mulf %322, %324 : vector<8x32xf32>
    %326 = math.tanh %325 : vector<8x32xf32>
    %327 = arith.mulf %322, %326 : vector<8x32xf32>
    %c0_117 = arith.constant 0 : index
    %c0_118 = arith.constant 0 : index
    %328 = vector.load %arg8[%c0_117, %c0_118] : memref<64x32xf32, #tpu.memory_space<vmem>>, vector<8x32xf32>
    tpu.vector_store %arg8[%c0_117, %c0_118], %327 {strides = array<i32>} : memref<64x32xf32, #tpu.memory_space<vmem>>, vector<8x32xf32>,
    %c8_119 = arith.constant 8 : index
    %c0_120 = arith.constant 0 : index
    %329 = vector.load %arg7[%c8_119, %c0_120] : memref<64x32xf32, #tpu.memory_space<vmem>>, vector<8x32xf32>
    %cst_121 = arith.constant dense<0.000000e+00> : vector<8xf32>
    %330 = vector.multi_reduction <add>, %327, %cst_121 [1] : vector<8x32xf32> to vector<8xf32>
    %331 = vector.shape_cast %330 : vector<8xf32> to vector<8x1xf32>
    %332 = arith.mulf %327, %327 : vector<8x32xf32>
    %cst_122 = arith.constant dense<0.000000e+00> : vector<8xf32>
    %333 = vector.multi_reduction <add>, %332, %cst_122 [1] : vector<8x32xf32> to vector<8xf32>
    %334 = vector.shape_cast %333 : vector<8xf32> to vector<8x1xf32>
    %cst_123 = arith.constant 3.125000e-02 : f32
    %335 = vector.broadcast %cst_123 : f32 to vector<8x1xf32>
    %336 = arith.mulf %331, %335 : vector<8x1xf32>
    %cst_124 = arith.constant 3.125000e-02 : f32
    %337 = vector.broadcast %cst_124 : f32 to vector<8x1xf32>
    %338 = arith.mulf %334, %337 : vector<8x1xf32>
    %339 = arith.mulf %336, %336 : vector<8x1xf32>
    %340 = arith.subf %338, %339 : vector<8x1xf32>
    %cst_125 = arith.constant 0.000000e+00 : f32
    %341 = vector.broadcast %cst_125 : f32 to vector<8x1xf32>
    %342 = arith.maximumf %340, %341 : vector<8x1xf32>
    %343 = vector.broadcast %336 : vector<8x1xf32> to vector<8x32xf32>
    %344 = arith.subf %327, %343 : vector<8x32xf32>
    %cst_126 = arith.constant 9.99999974E-6 : f32
    %345 = vector.broadcast %cst_126 : f32 to vector<8x1xf32>
    %346 = arith.addf %342, %345 : vector<8x1xf32>
    %347 = math.rsqrt %346 : vector<8x1xf32>
    %348 = vector.broadcast %347 : vector<8x1xf32> to vector<8x32xf32>
    %349 = arith.mulf %344, %348 : vector<8x32xf32>
    %350 = vector.broadcast %8 : vector<1x32xf32> to vector<8x32xf32>
    %351 = arith.mulf %349, %350 : vector<8x32xf32>
    %352 = vector.broadcast %9 : vector<1x32xf32> to vector<8x32xf32>
    %353 = arith.addf %351, %352 : vector<8x32xf32>
    %354 = arith.negf %327 : vector<8x32xf32>
    %355 = math.exp %354 : vector<8x32xf32>
    %cst_127 = arith.constant 1.000000e+00 : f32
    %356 = vector.broadcast %cst_127 : f32 to vector<8x32xf32>
    %357 = arith.addf %356, %355 : vector<8x32xf32>
    %358 = arith.divf %356, %357 : vector<8x32xf32>
    %359 = arith.mulf %327, %358 : vector<8x32xf32>
    %cst_128 = arith.constant -2.000000e+00 : f32
    %360 = vector.broadcast %cst_128 : f32 to vector<8x32xf32>
    %361 = arith.subf %353, %360 : vector<8x32xf32>
    %cst_129 = arith.constant 1.000000e+00 : f32
    %362 = vector.broadcast %cst_129 : f32 to vector<8x32xf32>
    %363 = arith.mulf %361, %362 : vector<8x32xf32>
    %cst_130 = arith.constant 0.000000e+00 : f32
    %364 = vector.broadcast %cst_130 : f32 to vector<8x32xf32>
    %365 = arith.subf %364, %363 : vector<8x32xf32>
    %366 = arith.mulf %365, %363 : vector<8x32xf32>
    %367 = math.exp %366 : vector<8x32xf32>
    %cst_131 = arith.constant -1.000000e+00 : f32
    %368 = vector.broadcast %cst_131 : f32 to vector<8x32xf32>
    %369 = arith.subf %353, %368 : vector<8x32xf32>
    %cst_132 = arith.constant 1.000000e+00 : f32
    %370 = vector.broadcast %cst_132 : f32 to vector<8x32xf32>
    %371 = arith.mulf %369, %370 : vector<8x32xf32>
    %cst_133 = arith.constant 0.000000e+00 : f32
    %372 = vector.broadcast %cst_133 : f32 to vector<8x32xf32>
    %373 = arith.subf %372, %371 : vector<8x32xf32>
    %374 = arith.mulf %373, %371 : vector<8x32xf32>
    %375 = math.exp %374 : vector<8x32xf32>
    %cst_134 = arith.constant 0.000000e+00 : f32
    %376 = vector.broadcast %cst_134 : f32 to vector<8x32xf32>
    %377 = arith.subf %353, %376 : vector<8x32xf32>
    %cst_135 = arith.constant 1.000000e+00 : f32
    %378 = vector.broadcast %cst_135 : f32 to vector<8x32xf32>
    %379 = arith.mulf %377, %378 : vector<8x32xf32>
    %cst_136 = arith.constant 0.000000e+00 : f32
    %380 = vector.broadcast %cst_136 : f32 to vector<8x32xf32>
    %381 = arith.subf %380, %379 : vector<8x32xf32>
    %382 = arith.mulf %381, %379 : vector<8x32xf32>
    %383 = math.exp %382 : vector<8x32xf32>
    %cst_137 = arith.constant 1.000000e+00 : f32
    %384 = vector.broadcast %cst_137 : f32 to vector<8x32xf32>
    %385 = arith.subf %353, %384 : vector<8x32xf32>
    %cst_138 = arith.constant 1.000000e+00 : f32
    %386 = vector.broadcast %cst_138 : f32 to vector<8x32xf32>
    %387 = arith.mulf %385, %386 : vector<8x32xf32>
    %cst_139 = arith.constant 0.000000e+00 : f32
    %388 = vector.broadcast %cst_139 : f32 to vector<8x32xf32>
    %389 = arith.subf %388, %387 : vector<8x32xf32>
    %390 = arith.mulf %389, %387 : vector<8x32xf32>
    %391 = math.exp %390 : vector<8x32xf32>
    %cst_140 = arith.constant 2.000000e+00 : f32
    %392 = vector.broadcast %cst_140 : f32 to vector<8x32xf32>
    %393 = arith.subf %353, %392 : vector<8x32xf32>
    %cst_141 = arith.constant 1.000000e+00 : f32
    %394 = vector.broadcast %cst_141 : f32 to vector<8x32xf32>
    %395 = arith.mulf %393, %394 : vector<8x32xf32>
    %cst_142 = arith.constant 0.000000e+00 : f32
    %396 = vector.broadcast %cst_142 : f32 to vector<8x32xf32>
    %397 = arith.subf %396, %395 : vector<8x32xf32>
    %398 = arith.mulf %397, %395 : vector<8x32xf32>
    %399 = math.exp %398 : vector<8x32xf32>
    %400 = tpu.concatenate %359, %367, %375, %383, %391, %399 in 1 : vector<8x32xf32>, vector<8x32xf32>, vector<8x32xf32>, vector<8x32xf32>, vector<8x32xf32>, vector<8x32xf32> -> vector<8x192xf32>
    %cst_143 = arith.constant dense<0.000000e+00> : vector<8x5xf32>
    %401 = tpu.matmul %400, %11, %cst_143 {dimension_numbers = #tpu.dot_dimension_numbers<[1], [0], [0], [1], [0, 0, 1, 1], [], []>} : vector<8x192xf32>, vector<192x5xf32>, vector<8x5xf32> -> vector<8x5xf32>
    %402 = vector.broadcast %10 : vector<1x5xf32> to vector<8x5xf32>
    %403 = arith.addf %401, %402 : vector<8x5xf32>
    %cst_144 = arith.constant dense<0.000000e+00> : vector<8xf32>
    %404 = vector.multi_reduction <add>, %403, %cst_144 [1] : vector<8x5xf32> to vector<8xf32>
    %405 = vector.shape_cast %404 : vector<8xf32> to vector<8x1xf32>
    %406 = arith.mulf %403, %403 : vector<8x5xf32>
    %cst_145 = arith.constant dense<0.000000e+00> : vector<8xf32>
    %407 = vector.multi_reduction <add>, %406, %cst_145 [1] : vector<8x5xf32> to vector<8xf32>
    %408 = vector.shape_cast %407 : vector<8xf32> to vector<8x1xf32>
    %cst_146 = arith.constant 2.000000e-01 : f32
    %409 = vector.broadcast %cst_146 : f32 to vector<8x1xf32>
    %410 = arith.mulf %405, %409 : vector<8x1xf32>
    %cst_147 = arith.constant 2.000000e-01 : f32
    %411 = vector.broadcast %cst_147 : f32 to vector<8x1xf32>
    %412 = arith.mulf %408, %411 : vector<8x1xf32>
    %413 = arith.mulf %410, %410 : vector<8x1xf32>
    %414 = arith.subf %412, %413 : vector<8x1xf32>
    %cst_148 = arith.constant 0.000000e+00 : f32
    %415 = vector.broadcast %cst_148 : f32 to vector<8x1xf32>
    %416 = arith.maximumf %414, %415 : vector<8x1xf32>
    %417 = vector.broadcast %410 : vector<8x1xf32> to vector<8x5xf32>
    %418 = arith.subf %403, %417 : vector<8x5xf32>
    %cst_149 = arith.constant 9.99999974E-6 : f32
    %419 = vector.broadcast %cst_149 : f32 to vector<8x1xf32>
    %420 = arith.addf %416, %419 : vector<8x1xf32>
    %421 = math.rsqrt %420 : vector<8x1xf32>
    %422 = vector.broadcast %421 : vector<8x1xf32> to vector<8x5xf32>
    %423 = arith.mulf %418, %422 : vector<8x5xf32>
    %424 = vector.broadcast %12 : vector<1x5xf32> to vector<8x5xf32>
    %425 = arith.mulf %423, %424 : vector<8x5xf32>
    %426 = vector.broadcast %13 : vector<1x5xf32> to vector<8x5xf32>
    %427 = arith.addf %425, %426 : vector<8x5xf32>
    %428 = arith.negf %403 : vector<8x5xf32>
    %429 = math.exp %428 : vector<8x5xf32>
    %cst_150 = arith.constant 1.000000e+00 : f32
    %430 = vector.broadcast %cst_150 : f32 to vector<8x5xf32>
    %431 = arith.addf %430, %429 : vector<8x5xf32>
    %432 = arith.divf %430, %431 : vector<8x5xf32>
    %433 = arith.mulf %403, %432 : vector<8x5xf32>
    %cst_151 = arith.constant -2.000000e+00 : f32
    %434 = vector.broadcast %cst_151 : f32 to vector<8x5xf32>
    %435 = arith.subf %427, %434 : vector<8x5xf32>
    %cst_152 = arith.constant 1.000000e+00 : f32
    %436 = vector.broadcast %cst_152 : f32 to vector<8x5xf32>
    %437 = arith.mulf %435, %436 : vector<8x5xf32>
    %cst_153 = arith.constant 0.000000e+00 : f32
    %438 = vector.broadcast %cst_153 : f32 to vector<8x5xf32>
    %439 = arith.subf %438, %437 : vector<8x5xf32>
    %440 = arith.mulf %439, %437 : vector<8x5xf32>
    %441 = math.exp %440 : vector<8x5xf32>
    %cst_154 = arith.constant -1.000000e+00 : f32
    %442 = vector.broadcast %cst_154 : f32 to vector<8x5xf32>
    %443 = arith.subf %427, %442 : vector<8x5xf32>
    %cst_155 = arith.constant 1.000000e+00 : f32
    %444 = vector.broadcast %cst_155 : f32 to vector<8x5xf32>
    %445 = arith.mulf %443, %444 : vector<8x5xf32>
    %cst_156 = arith.constant 0.000000e+00 : f32
    %446 = vector.broadcast %cst_156 : f32 to vector<8x5xf32>
    %447 = arith.subf %446, %445 : vector<8x5xf32>
    %448 = arith.mulf %447, %445 : vector<8x5xf32>
    %449 = math.exp %448 : vector<8x5xf32>
    %cst_157 = arith.constant 0.000000e+00 : f32
    %450 = vector.broadcast %cst_157 : f32 to vector<8x5xf32>
    %451 = arith.subf %427, %450 : vector<8x5xf32>
    %cst_158 = arith.constant 1.000000e+00 : f32
    %452 = vector.broadcast %cst_158 : f32 to vector<8x5xf32>
    %453 = arith.mulf %451, %452 : vector<8x5xf32>
    %cst_159 = arith.constant 0.000000e+00 : f32
    %454 = vector.broadcast %cst_159 : f32 to vector<8x5xf32>
    %455 = arith.subf %454, %453 : vector<8x5xf32>
    %456 = arith.mulf %455, %453 : vector<8x5xf32>
    %457 = math.exp %456 : vector<8x5xf32>
    %cst_160 = arith.constant 1.000000e+00 : f32
    %458 = vector.broadcast %cst_160 : f32 to vector<8x5xf32>
    %459 = arith.subf %427, %458 : vector<8x5xf32>
    %cst_161 = arith.constant 1.000000e+00 : f32
    %460 = vector.broadcast %cst_161 : f32 to vector<8x5xf32>
    %461 = arith.mulf %459, %460 : vector<8x5xf32>
    %cst_162 = arith.constant 0.000000e+00 : f32
    %462 = vector.broadcast %cst_162 : f32 to vector<8x5xf32>
    %463 = arith.subf %462, %461 : vector<8x5xf32>
    %464 = arith.mulf %463, %461 : vector<8x5xf32>
    %465 = math.exp %464 : vector<8x5xf32>
    %cst_163 = arith.constant 2.000000e+00 : f32
    %466 = vector.broadcast %cst_163 : f32 to vector<8x5xf32>
    %467 = arith.subf %427, %466 : vector<8x5xf32>
    %cst_164 = arith.constant 1.000000e+00 : f32
    %468 = vector.broadcast %cst_164 : f32 to vector<8x5xf32>
    %469 = arith.mulf %467, %468 : vector<8x5xf32>
    %cst_165 = arith.constant 0.000000e+00 : f32
    %470 = vector.broadcast %cst_165 : f32 to vector<8x5xf32>
    %471 = arith.subf %470, %469 : vector<8x5xf32>
    %472 = arith.mulf %471, %469 : vector<8x5xf32>
    %473 = math.exp %472 : vector<8x5xf32>
    %474 = tpu.concatenate %433, %441, %449, %457, %465, %473 in 1 : vector<8x5xf32>, vector<8x5xf32>, vector<8x5xf32>, vector<8x5xf32>, vector<8x5xf32>, vector<8x5xf32> -> vector<8x30xf32>
    %cst_166 = arith.constant dense<0.000000e+00> : vector<8x32xf32>
    %475 = tpu.matmul %474, %15, %cst_166 {dimension_numbers = #tpu.dot_dimension_numbers<[1], [0], [0], [1], [0, 0, 1, 1], [], []>} : vector<8x30xf32>, vector<30x32xf32>, vector<8x32xf32> -> vector<8x32xf32>
    %476 = vector.broadcast %14 : vector<1x32xf32> to vector<8x32xf32>
    %477 = arith.addf %475, %476 : vector<8x32xf32>
    %478 = arith.addf %329, %477 : vector<8x32xf32>
    %479 = arith.negf %478 : vector<8x32xf32>
    %480 = math.exp %479 : vector<8x32xf32>
    %cst_167 = arith.constant 1.000000e+00 : f32
    %481 = vector.broadcast %cst_167 : f32 to vector<8x32xf32>
    %482 = arith.addf %481, %480 : vector<8x32xf32>
    %483 = arith.divf %481, %482 : vector<8x32xf32>
    %484 = math.tanh %478 : vector<8x32xf32>
    %485 = arith.addf %325, %484 : vector<8x32xf32>
    %486 = arith.mulf %483, %485 : vector<8x32xf32>
    %487 = math.tanh %486 : vector<8x32xf32>
    %488 = arith.mulf %483, %487 : vector<8x32xf32>
    %c8_168 = arith.constant 8 : index
    %c0_169 = arith.constant 0 : index
    %489 = vector.load %arg8[%c8_168, %c0_169] : memref<64x32xf32, #tpu.memory_space<vmem>>, vector<8x32xf32>
    tpu.vector_store %arg8[%c8_168, %c0_169], %488 {strides = array<i32>} : memref<64x32xf32, #tpu.memory_space<vmem>>, vector<8x32xf32>,
    %c16 = arith.constant 16 : index
    %c0_170 = arith.constant 0 : index
    %490 = vector.load %arg7[%c16, %c0_170] : memref<64x32xf32, #tpu.memory_space<vmem>>, vector<8x32xf32>
    %cst_171 = arith.constant dense<0.000000e+00> : vector<8xf32>
    %491 = vector.multi_reduction <add>, %488, %cst_171 [1] : vector<8x32xf32> to vector<8xf32>
    %492 = vector.shape_cast %491 : vector<8xf32> to vector<8x1xf32>
    %493 = arith.mulf %488, %488 : vector<8x32xf32>
    %cst_172 = arith.constant dense<0.000000e+00> : vector<8xf32>
    %494 = vector.multi_reduction <add>, %493, %cst_172 [1] : vector<8x32xf32> to vector<8xf32>
    %495 = vector.shape_cast %494 : vector<8xf32> to vector<8x1xf32>
    %cst_173 = arith.constant 3.125000e-02 : f32
    %496 = vector.broadcast %cst_173 : f32 to vector<8x1xf32>
    %497 = arith.mulf %492, %496 : vector<8x1xf32>
    %cst_174 = arith.constant 3.125000e-02 : f32
    %498 = vector.broadcast %cst_174 : f32 to vector<8x1xf32>
    %499 = arith.mulf %495, %498 : vector<8x1xf32>
    %500 = arith.mulf %497, %497 : vector<8x1xf32>
    %501 = arith.subf %499, %500 : vector<8x1xf32>
    %cst_175 = arith.constant 0.000000e+00 : f32
    %502 = vector.broadcast %cst_175 : f32 to vector<8x1xf32>
    %503 = arith.maximumf %501, %502 : vector<8x1xf32>
    %504 = vector.broadcast %497 : vector<8x1xf32> to vector<8x32xf32>
    %505 = arith.subf %488, %504 : vector<8x32xf32>
    %cst_176 = arith.constant 9.99999974E-6 : f32
    %506 = vector.broadcast %cst_176 : f32 to vector<8x1xf32>
    %507 = arith.addf %503, %506 : vector<8x1xf32>
    %508 = math.rsqrt %507 : vector<8x1xf32>
    %509 = vector.broadcast %508 : vector<8x1xf32> to vector<8x32xf32>
    %510 = arith.mulf %505, %509 : vector<8x32xf32>
    %511 = vector.broadcast %8 : vector<1x32xf32> to vector<8x32xf32>
    %512 = arith.mulf %510, %511 : vector<8x32xf32>
    %513 = vector.broadcast %9 : vector<1x32xf32> to vector<8x32xf32>
    %514 = arith.addf %512, %513 : vector<8x32xf32>
    %515 = arith.negf %488 : vector<8x32xf32>
    %516 = math.exp %515 : vector<8x32xf32>
    %cst_177 = arith.constant 1.000000e+00 : f32
    %517 = vector.broadcast %cst_177 : f32 to vector<8x32xf32>
    %518 = arith.addf %517, %516 : vector<8x32xf32>
    %519 = arith.divf %517, %518 : vector<8x32xf32>
    %520 = arith.mulf %488, %519 : vector<8x32xf32>
    %cst_178 = arith.constant -2.000000e+00 : f32
    %521 = vector.broadcast %cst_178 : f32 to vector<8x32xf32>
    %522 = arith.subf %514, %521 : vector<8x32xf32>
    %cst_179 = arith.constant 1.000000e+00 : f32
    %523 = vector.broadcast %cst_179 : f32 to vector<8x32xf32>
    %524 = arith.mulf %522, %523 : vector<8x32xf32>
    %cst_180 = arith.constant 0.000000e+00 : f32
    %525 = vector.broadcast %cst_180 : f32 to vector<8x32xf32>
    %526 = arith.subf %525, %524 : vector<8x32xf32>
    %527 = arith.mulf %526, %524 : vector<8x32xf32>
    %528 = math.exp %527 : vector<8x32xf32>
    %cst_181 = arith.constant -1.000000e+00 : f32
    %529 = vector.broadcast %cst_181 : f32 to vector<8x32xf32>
    %530 = arith.subf %514, %529 : vector<8x32xf32>
    %cst_182 = arith.constant 1.000000e+00 : f32
    %531 = vector.broadcast %cst_182 : f32 to vector<8x32xf32>
    %532 = arith.mulf %530, %531 : vector<8x32xf32>
    %cst_183 = arith.constant 0.000000e+00 : f32
    %533 = vector.broadcast %cst_183 : f32 to vector<8x32xf32>
    %534 = arith.subf %533, %532 : vector<8x32xf32>
    %535 = arith.mulf %534, %532 : vector<8x32xf32>
    %536 = math.exp %535 : vector<8x32xf32>
    %cst_184 = arith.constant 0.000000e+00 : f32
    %537 = vector.broadcast %cst_184 : f32 to vector<8x32xf32>
    %538 = arith.subf %514, %537 : vector<8x32xf32>
    %cst_185 = arith.constant 1.000000e+00 : f32
    %539 = vector.broadcast %cst_185 : f32 to vector<8x32xf32>
    %540 = arith.mulf %538, %539 : vector<8x32xf32>
    %cst_186 = arith.constant 0.000000e+00 : f32
    %541 = vector.broadcast %cst_186 : f32 to vector<8x32xf32>
    %542 = arith.subf %541, %540 : vector<8x32xf32>
    %543 = arith.mulf %542, %540 : vector<8x32xf32>
    %544 = math.exp %543 : vector<8x32xf32>
    %cst_187 = arith.constant 1.000000e+00 : f32
    %545 = vector.broadcast %cst_187 : f32 to vector<8x32xf32>
    %546 = arith.subf %514, %545 : vector<8x32xf32>
    %cst_188 = arith.constant 1.000000e+00 : f32
    %547 = vector.broadcast %cst_188 : f32 to vector<8x32xf32>
    %548 = arith.mulf %546, %547 : vector<8x32xf32>
    %cst_189 = arith.constant 0.000000e+00 : f32
    %549 = vector.broadcast %cst_189 : f32 to vector<8x32xf32>
    %550 = arith.subf %549, %548 : vector<8x32xf32>
    %551 = arith.mulf %550, %548 : vector<8x32xf32>
    %552 = math.exp %551 : vector<8x32xf32>
    %cst_190 = arith.constant 2.000000e+00 : f32
    %553 = vector.broadcast %cst_190 : f32 to vector<8x32xf32>
    %554 = arith.subf %514, %553 : vector<8x32xf32>
    %cst_191 = arith.constant 1.000000e+00 : f32
    %555 = vector.broadcast %cst_191 : f32 to vector<8x32xf32>
    %556 = arith.mulf %554, %555 : vector<8x32xf32>
    %cst_192 = arith.constant 0.000000e+00 : f32
    %557 = vector.broadcast %cst_192 : f32 to vector<8x32xf32>
    %558 = arith.subf %557, %556 : vector<8x32xf32>
    %559 = arith.mulf %558, %556 : vector<8x32xf32>
    %560 = math.exp %559 : vector<8x32xf32>
    %561 = tpu.concatenate %520, %528, %536, %544, %552, %560 in 1 : vector<8x32xf32>, vector<8x32xf32>, vector<8x32xf32>, vector<8x32xf32>, vector<8x32xf32>, vector<8x32xf32> -> vector<8x192xf32>
    %cst_193 = arith.constant dense<0.000000e+00> : vector<8x5xf32>
    %562 = tpu.matmul %561, %11, %cst_193 {dimension_numbers = #tpu.dot_dimension_numbers<[1], [0], [0], [1], [0, 0, 1, 1], [], []>} : vector<8x192xf32>, vector<192x5xf32>, vector<8x5xf32> -> vector<8x5xf32>
    %563 = vector.broadcast %10 : vector<1x5xf32> to vector<8x5xf32>
    %564 = arith.addf %562, %563 : vector<8x5xf32>
    %cst_194 = arith.constant dense<0.000000e+00> : vector<8xf32>
    %565 = vector.multi_reduction <add>, %564, %cst_194 [1] : vector<8x5xf32> to vector<8xf32>
    %566 = vector.shape_cast %565 : vector<8xf32> to vector<8x1xf32>
    %567 = arith.mulf %564, %564 : vector<8x5xf32>
    %cst_195 = arith.constant dense<0.000000e+00> : vector<8xf32>
    %568 = vector.multi_reduction <add>, %567, %cst_195 [1] : vector<8x5xf32> to vector<8xf32>
    %569 = vector.shape_cast %568 : vector<8xf32> to vector<8x1xf32>
    %cst_196 = arith.constant 2.000000e-01 : f32
    %570 = vector.broadcast %cst_196 : f32 to vector<8x1xf32>
    %571 = arith.mulf %566, %570 : vector<8x1xf32>
    %cst_197 = arith.constant 2.000000e-01 : f32
    %572 = vector.broadcast %cst_197 : f32 to vector<8x1xf32>
    %573 = arith.mulf %569, %572 : vector<8x1xf32>
    %574 = arith.mulf %571, %571 : vector<8x1xf32>
    %575 = arith.subf %573, %574 : vector<8x1xf32>
    %cst_198 = arith.constant 0.000000e+00 : f32
    %576 = vector.broadcast %cst_198 : f32 to vector<8x1xf32>
    %577 = arith.maximumf %575, %576 : vector<8x1xf32>
    %578 = vector.broadcast %571 : vector<8x1xf32> to vector<8x5xf32>
    %579 = arith.subf %564, %578 : vector<8x5xf32>
    %cst_199 = arith.constant 9.99999974E-6 : f32
    %580 = vector.broadcast %cst_199 : f32 to vector<8x1xf32>
    %581 = arith.addf %577, %580 : vector<8x1xf32>
    %582 = math.rsqrt %581 : vector<8x1xf32>
    %583 = vector.broadcast %582 : vector<8x1xf32> to vector<8x5xf32>
    %584 = arith.mulf %579, %583 : vector<8x5xf32>
    %585 = vector.broadcast %12 : vector<1x5xf32> to vector<8x5xf32>
    %586 = arith.mulf %584, %585 : vector<8x5xf32>
    %587 = vector.broadcast %13 : vector<1x5xf32> to vector<8x5xf32>
    %588 = arith.addf %586, %587 : vector<8x5xf32>
    %589 = arith.negf %564 : vector<8x5xf32>
    %590 = math.exp %589 : vector<8x5xf32>
    %cst_200 = arith.constant 1.000000e+00 : f32
    %591 = vector.broadcast %cst_200 : f32 to vector<8x5xf32>
    %592 = arith.addf %591, %590 : vector<8x5xf32>
    %593 = arith.divf %591, %592 : vector<8x5xf32>
    %594 = arith.mulf %564, %593 : vector<8x5xf32>
    %cst_201 = arith.constant -2.000000e+00 : f32
    %595 = vector.broadcast %cst_201 : f32 to vector<8x5xf32>
    %596 = arith.subf %588, %595 : vector<8x5xf32>
    %cst_202 = arith.constant 1.000000e+00 : f32
    %597 = vector.broadcast %cst_202 : f32 to vector<8x5xf32>
    %598 = arith.mulf %596, %597 : vector<8x5xf32>
    %cst_203 = arith.constant 0.000000e+00 : f32
    %599 = vector.broadcast %cst_203 : f32 to vector<8x5xf32>
    %600 = arith.subf %599, %598 : vector<8x5xf32>
    %601 = arith.mulf %600, %598 : vector<8x5xf32>
    %602 = math.exp %601 : vector<8x5xf32>
    %cst_204 = arith.constant -1.000000e+00 : f32
    %603 = vector.broadcast %cst_204 : f32 to vector<8x5xf32>
    %604 = arith.subf %588, %603 : vector<8x5xf32>
    %cst_205 = arith.constant 1.000000e+00 : f32
    %605 = vector.broadcast %cst_205 : f32 to vector<8x5xf32>
    %606 = arith.mulf %604, %605 : vector<8x5xf32>
    %cst_206 = arith.constant 0.000000e+00 : f32
    %607 = vector.broadcast %cst_206 : f32 to vector<8x5xf32>
    %608 = arith.subf %607, %606 : vector<8x5xf32>
    %609 = arith.mulf %608, %606 : vector<8x5xf32>
    %610 = math.exp %609 : vector<8x5xf32>
    %cst_207 = arith.constant 0.000000e+00 : f32
    %611 = vector.broadcast %cst_207 : f32 to vector<8x5xf32>
    %612 = arith.subf %588, %611 : vector<8x5xf32>
    %cst_208 = arith.constant 1.000000e+00 : f32
    %613 = vector.broadcast %cst_208 : f32 to vector<8x5xf32>
    %614 = arith.mulf %612, %613 : vector<8x5xf32>
    %cst_209 = arith.constant 0.000000e+00 : f32
    %615 = vector.broadcast %cst_209 : f32 to vector<8x5xf32>
    %616 = arith.subf %615, %614 : vector<8x5xf32>
    %617 = arith.mulf %616, %614 : vector<8x5xf32>
    %618 = math.exp %617 : vector<8x5xf32>
    %cst_210 = arith.constant 1.000000e+00 : f32
    %619 = vector.broadcast %cst_210 : f32 to vector<8x5xf32>
    %620 = arith.subf %588, %619 : vector<8x5xf32>
    %cst_211 = arith.constant 1.000000e+00 : f32
    %621 = vector.broadcast %cst_211 : f32 to vector<8x5xf32>
    %622 = arith.mulf %620, %621 : vector<8x5xf32>
    %cst_212 = arith.constant 0.000000e+00 : f32
    %623 = vector.broadcast %cst_212 : f32 to vector<8x5xf32>
    %624 = arith.subf %623, %622 : vector<8x5xf32>
    %625 = arith.mulf %624, %622 : vector<8x5xf32>
    %626 = math.exp %625 : vector<8x5xf32>
    %cst_213 = arith.constant 2.000000e+00 : f32
    %627 = vector.broadcast %cst_213 : f32 to vector<8x5xf32>
    %628 = arith.subf %588, %627 : vector<8x5xf32>
    %cst_214 = arith.constant 1.000000e+00 : f32
    %629 = vector.broadcast %cst_214 : f32 to vector<8x5xf32>
    %630 = arith.mulf %628, %629 : vector<8x5xf32>
    %cst_215 = arith.constant 0.000000e+00 : f32
    %631 = vector.broadcast %cst_215 : f32 to vector<8x5xf32>
    %632 = arith.subf %631, %630 : vector<8x5xf32>
    %633 = arith.mulf %632, %630 : vector<8x5xf32>
    %634 = math.exp %633 : vector<8x5xf32>
    %635 = tpu.concatenate %594, %602, %610, %618, %626, %634 in 1 : vector<8x5xf32>, vector<8x5xf32>, vector<8x5xf32>, vector<8x5xf32>, vector<8x5xf32>, vector<8x5xf32> -> vector<8x30xf32>
    %cst_216 = arith.constant dense<0.000000e+00> : vector<8x32xf32>
    %636 = tpu.matmul %635, %15, %cst_216 {dimension_numbers = #tpu.dot_dimension_numbers<[1], [0], [0], [1], [0, 0, 1, 1], [], []>} : vector<8x30xf32>, vector<30x32xf32>, vector<8x32xf32> -> vector<8x32xf32>
    %637 = vector.broadcast %14 : vector<1x32xf32> to vector<8x32xf32>
    %638 = arith.addf %636, %637 : vector<8x32xf32>
    %639 = arith.addf %490, %638 : vector<8x32xf32>
    %640 = arith.negf %639 : vector<8x32xf32>
    %641 = math.exp %640 : vector<8x32xf32>
    %cst_217 = arith.constant 1.000000e+00 : f32
    %642 = vector.broadcast %cst_217 : f32 to vector<8x32xf32>
    %643 = arith.addf %642, %641 : vector<8x32xf32>
    %644 = arith.divf %642, %643 : vector<8x32xf32>
    %645 = math.tanh %639 : vector<8x32xf32>
    %646 = arith.addf %486, %645 : vector<8x32xf32>
    %647 = arith.mulf %644, %646 : vector<8x32xf32>
    %648 = math.tanh %647 : vector<8x32xf32>
    %649 = arith.mulf %644, %648 : vector<8x32xf32>
    %c16_218 = arith.constant 16 : index
    %c0_219 = arith.constant 0 : index
    %650 = vector.load %arg8[%c16_218, %c0_219] : memref<64x32xf32, #tpu.memory_space<vmem>>, vector<8x32xf32>
    tpu.vector_store %arg8[%c16_218, %c0_219], %649 {strides = array<i32>} : memref<64x32xf32, #tpu.memory_space<vmem>>, vector<8x32xf32>,
    %c24_220 = arith.constant 24 : index
    %c0_221 = arith.constant 0 : index
    %651 = vector.load %arg7[%c24_220, %c0_221] : memref<64x32xf32, #tpu.memory_space<vmem>>, vector<8x32xf32>
    %cst_222 = arith.constant dense<0.000000e+00> : vector<8xf32>
    %652 = vector.multi_reduction <add>, %649, %cst_222 [1] : vector<8x32xf32> to vector<8xf32>
    %653 = vector.shape_cast %652 : vector<8xf32> to vector<8x1xf32>
    %654 = arith.mulf %649, %649 : vector<8x32xf32>
    %cst_223 = arith.constant dense<0.000000e+00> : vector<8xf32>
    %655 = vector.multi_reduction <add>, %654, %cst_223 [1] : vector<8x32xf32> to vector<8xf32>
    %656 = vector.shape_cast %655 : vector<8xf32> to vector<8x1xf32>
    %cst_224 = arith.constant 3.125000e-02 : f32
    %657 = vector.broadcast %cst_224 : f32 to vector<8x1xf32>
    %658 = arith.mulf %653, %657 : vector<8x1xf32>
    %cst_225 = arith.constant 3.125000e-02 : f32
    %659 = vector.broadcast %cst_225 : f32 to vector<8x1xf32>
    %660 = arith.mulf %656, %659 : vector<8x1xf32>
    %661 = arith.mulf %658, %658 : vector<8x1xf32>
    %662 = arith.subf %660, %661 : vector<8x1xf32>
    %cst_226 = arith.constant 0.000000e+00 : f32
    %663 = vector.broadcast %cst_226 : f32 to vector<8x1xf32>
    %664 = arith.maximumf %662, %663 : vector<8x1xf32>
    %665 = vector.broadcast %658 : vector<8x1xf32> to vector<8x32xf32>
    %666 = arith.subf %649, %665 : vector<8x32xf32>
    %cst_227 = arith.constant 9.99999974E-6 : f32
    %667 = vector.broadcast %cst_227 : f32 to vector<8x1xf32>
    %668 = arith.addf %664, %667 : vector<8x1xf32>
    %669 = math.rsqrt %668 : vector<8x1xf32>
    %670 = vector.broadcast %669 : vector<8x1xf32> to vector<8x32xf32>
    %671 = arith.mulf %666, %670 : vector<8x32xf32>
    %672 = vector.broadcast %8 : vector<1x32xf32> to vector<8x32xf32>
    %673 = arith.mulf %671, %672 : vector<8x32xf32>
    %674 = vector.broadcast %9 : vector<1x32xf32> to vector<8x32xf32>
    %675 = arith.addf %673, %674 : vector<8x32xf32>
    %676 = arith.negf %649 : vector<8x32xf32>
    %677 = math.exp %676 : vector<8x32xf32>
    %cst_228 = arith.constant 1.000000e+00 : f32
    %678 = vector.broadcast %cst_228 : f32 to vector<8x32xf32>
    %679 = arith.addf %678, %677 : vector<8x32xf32>
    %680 = arith.divf %678, %679 : vector<8x32xf32>
    %681 = arith.mulf %649, %680 : vector<8x32xf32>
    %cst_229 = arith.constant -2.000000e+00 : f32
    %682 = vector.broadcast %cst_229 : f32 to vector<8x32xf32>
    %683 = arith.subf %675, %682 : vector<8x32xf32>
    %cst_230 = arith.constant 1.000000e+00 : f32
    %684 = vector.broadcast %cst_230 : f32 to vector<8x32xf32>
    %685 = arith.mulf %683, %684 : vector<8x32xf32>
    %cst_231 = arith.constant 0.000000e+00 : f32
    %686 = vector.broadcast %cst_231 : f32 to vector<8x32xf32>
    %687 = arith.subf %686, %685 : vector<8x32xf32>
    %688 = arith.mulf %687, %685 : vector<8x32xf32>
    %689 = math.exp %688 : vector<8x32xf32>
    %cst_232 = arith.constant -1.000000e+00 : f32
    %690 = vector.broadcast %cst_232 : f32 to vector<8x32xf32>
    %691 = arith.subf %675, %690 : vector<8x32xf32>
    %cst_233 = arith.constant 1.000000e+00 : f32
    %692 = vector.broadcast %cst_233 : f32 to vector<8x32xf32>
    %693 = arith.mulf %691, %692 : vector<8x32xf32>
    %cst_234 = arith.constant 0.000000e+00 : f32
    %694 = vector.broadcast %cst_234 : f32 to vector<8x32xf32>
    %695 = arith.subf %694, %693 : vector<8x32xf32>
    %696 = arith.mulf %695, %693 : vector<8x32xf32>
    %697 = math.exp %696 : vector<8x32xf32>
    %cst_235 = arith.constant 0.000000e+00 : f32
    %698 = vector.broadcast %cst_235 : f32 to vector<8x32xf32>
    %699 = arith.subf %675, %698 : vector<8x32xf32>
    %cst_236 = arith.constant 1.000000e+00 : f32
    %700 = vector.broadcast %cst_236 : f32 to vector<8x32xf32>
    %701 = arith.mulf %699, %700 : vector<8x32xf32>
    %cst_237 = arith.constant 0.000000e+00 : f32
    %702 = vector.broadcast %cst_237 : f32 to vector<8x32xf32>
    %703 = arith.subf %702, %701 : vector<8x32xf32>
    %704 = arith.mulf %703, %701 : vector<8x32xf32>
    %705 = math.exp %704 : vector<8x32xf32>
    %cst_238 = arith.constant 1.000000e+00 : f32
    %706 = vector.broadcast %cst_238 : f32 to vector<8x32xf32>
    %707 = arith.subf %675, %706 : vector<8x32xf32>
    %cst_239 = arith.constant 1.000000e+00 : f32
    %708 = vector.broadcast %cst_239 : f32 to vector<8x32xf32>
    %709 = arith.mulf %707, %708 : vector<8x32xf32>
    %cst_240 = arith.constant 0.000000e+00 : f32
    %710 = vector.broadcast %cst_240 : f32 to vector<8x32xf32>
    %711 = arith.subf %710, %709 : vector<8x32xf32>
    %712 = arith.mulf %711, %709 : vector<8x32xf32>
    %713 = math.exp %712 : vector<8x32xf32>
    %cst_241 = arith.constant 2.000000e+00 : f32
    %714 = vector.broadcast %cst_241 : f32 to vector<8x32xf32>
    %715 = arith.subf %675, %714 : vector<8x32xf32>
    %cst_242 = arith.constant 1.000000e+00 : f32
    %716 = vector.broadcast %cst_242 : f32 to vector<8x32xf32>
    %717 = arith.mulf %715, %716 : vector<8x32xf32>
    %cst_243 = arith.constant 0.000000e+00 : f32
    %718 = vector.broadcast %cst_243 : f32 to vector<8x32xf32>
    %719 = arith.subf %718, %717 : vector<8x32xf32>
    %720 = arith.mulf %719, %717 : vector<8x32xf32>
    %721 = math.exp %720 : vector<8x32xf32>
    %722 = tpu.concatenate %681, %689, %697, %705, %713, %721 in 1 : vector<8x32xf32>, vector<8x32xf32>, vector<8x32xf32>, vector<8x32xf32>, vector<8x32xf32>, vector<8x32xf32> -> vector<8x192xf32>
    %cst_244 = arith.constant dense<0.000000e+00> : vector<8x5xf32>
    %723 = tpu.matmul %722, %11, %cst_244 {dimension_numbers = #tpu.dot_dimension_numbers<[1], [0], [0], [1], [0, 0, 1, 1], [], []>} : vector<8x192xf32>, vector<192x5xf32>, vector<8x5xf32> -> vector<8x5xf32>
    %724 = vector.broadcast %10 : vector<1x5xf32> to vector<8x5xf32>
    %725 = arith.addf %723, %724 : vector<8x5xf32>
    %cst_245 = arith.constant dense<0.000000e+00> : vector<8xf32>
    %726 = vector.multi_reduction <add>, %725, %cst_245 [1] : vector<8x5xf32> to vector<8xf32>
    %727 = vector.shape_cast %726 : vector<8xf32> to vector<8x1xf32>
    %728 = arith.mulf %725, %725 : vector<8x5xf32>
    %cst_246 = arith.constant dense<0.000000e+00> : vector<8xf32>
    %729 = vector.multi_reduction <add>, %728, %cst_246 [1] : vector<8x5xf32> to vector<8xf32>
    %730 = vector.shape_cast %729 : vector<8xf32> to vector<8x1xf32>
    %cst_247 = arith.constant 2.000000e-01 : f32
    %731 = vector.broadcast %cst_247 : f32 to vector<8x1xf32>
    %732 = arith.mulf %727, %731 : vector<8x1xf32>
    %cst_248 = arith.constant 2.000000e-01 : f32
    %733 = vector.broadcast %cst_248 : f32 to vector<8x1xf32>
    %734 = arith.mulf %730, %733 : vector<8x1xf32>
    %735 = arith.mulf %732, %732 : vector<8x1xf32>
    %736 = arith.subf %734, %735 : vector<8x1xf32>
    %cst_249 = arith.constant 0.000000e+00 : f32
    %737 = vector.broadcast %cst_249 : f32 to vector<8x1xf32>
    %738 = arith.maximumf %736, %737 : vector<8x1xf32>
    %739 = vector.broadcast %732 : vector<8x1xf32> to vector<8x5xf32>
    %740 = arith.subf %725, %739 : vector<8x5xf32>
    %cst_250 = arith.constant 9.99999974E-6 : f32
    %741 = vector.broadcast %cst_250 : f32 to vector<8x1xf32>
    %742 = arith.addf %738, %741 : vector<8x1xf32>
    %743 = math.rsqrt %742 : vector<8x1xf32>
    %744 = vector.broadcast %743 : vector<8x1xf32> to vector<8x5xf32>
    %745 = arith.mulf %740, %744 : vector<8x5xf32>
    %746 = vector.broadcast %12 : vector<1x5xf32> to vector<8x5xf32>
    %747 = arith.mulf %745, %746 : vector<8x5xf32>
    %748 = vector.broadcast %13 : vector<1x5xf32> to vector<8x5xf32>
    %749 = arith.addf %747, %748 : vector<8x5xf32>
    %750 = arith.negf %725 : vector<8x5xf32>
    %751 = math.exp %750 : vector<8x5xf32>
    %cst_251 = arith.constant 1.000000e+00 : f32
    %752 = vector.broadcast %cst_251 : f32 to vector<8x5xf32>
    %753 = arith.addf %752, %751 : vector<8x5xf32>
    %754 = arith.divf %752, %753 : vector<8x5xf32>
    %755 = arith.mulf %725, %754 : vector<8x5xf32>
    %cst_252 = arith.constant -2.000000e+00 : f32
    %756 = vector.broadcast %cst_252 : f32 to vector<8x5xf32>
    %757 = arith.subf %749, %756 : vector<8x5xf32>
    %cst_253 = arith.constant 1.000000e+00 : f32
    %758 = vector.broadcast %cst_253 : f32 to vector<8x5xf32>
    %759 = arith.mulf %757, %758 : vector<8x5xf32>
    %cst_254 = arith.constant 0.000000e+00 : f32
    %760 = vector.broadcast %cst_254 : f32 to vector<8x5xf32>
    %761 = arith.subf %760, %759 : vector<8x5xf32>
    %762 = arith.mulf %761, %759 : vector<8x5xf32>
    %763 = math.exp %762 : vector<8x5xf32>
    %cst_255 = arith.constant -1.000000e+00 : f32
    %764 = vector.broadcast %cst_255 : f32 to vector<8x5xf32>
    %765 = arith.subf %749, %764 : vector<8x5xf32>
    %cst_256 = arith.constant 1.000000e+00 : f32
    %766 = vector.broadcast %cst_256 : f32 to vector<8x5xf32>
    %767 = arith.mulf %765, %766 : vector<8x5xf32>
    %cst_257 = arith.constant 0.000000e+00 : f32
    %768 = vector.broadcast %cst_257 : f32 to vector<8x5xf32>
    %769 = arith.subf %768, %767 : vector<8x5xf32>
    %770 = arith.mulf %769, %767 : vector<8x5xf32>
    %771 = math.exp %770 : vector<8x5xf32>
    %cst_258 = arith.constant 0.000000e+00 : f32
    %772 = vector.broadcast %cst_258 : f32 to vector<8x5xf32>
    %773 = arith.subf %749, %772 : vector<8x5xf32>
    %cst_259 = arith.constant 1.000000e+00 : f32
    %774 = vector.broadcast %cst_259 : f32 to vector<8x5xf32>
    %775 = arith.mulf %773, %774 : vector<8x5xf32>
    %cst_260 = arith.constant 0.000000e+00 : f32
    %776 = vector.broadcast %cst_260 : f32 to vector<8x5xf32>
    %777 = arith.subf %776, %775 : vector<8x5xf32>
    %778 = arith.mulf %777, %775 : vector<8x5xf32>
    %779 = math.exp %778 : vector<8x5xf32>
    %cst_261 = arith.constant 1.000000e+00 : f32
    %780 = vector.broadcast %cst_261 : f32 to vector<8x5xf32>
    %781 = arith.subf %749, %780 : vector<8x5xf32>
    %cst_262 = arith.constant 1.000000e+00 : f32
    %782 = vector.broadcast %cst_262 : f32 to vector<8x5xf32>
    %783 = arith.mulf %781, %782 : vector<8x5xf32>
    %cst_263 = arith.constant 0.000000e+00 : f32
    %784 = vector.broadcast %cst_263 : f32 to vector<8x5xf32>
    %785 = arith.subf %784, %783 : vector<8x5xf32>
    %786 = arith.mulf %785, %783 : vector<8x5xf32>
    %787 = math.exp %786 : vector<8x5xf32>
    %cst_264 = arith.constant 2.000000e+00 : f32
    %788 = vector.broadcast %cst_264 : f32 to vector<8x5xf32>
    %789 = arith.subf %749, %788 : vector<8x5xf32>
    %cst_265 = arith.constant 1.000000e+00 : f32
    %790 = vector.broadcast %cst_265 : f32 to vector<8x5xf32>
    %791 = arith.mulf %789, %790 : vector<8x5xf32>
    %cst_266 = arith.constant 0.000000e+00 : f32
    %792 = vector.broadcast %cst_266 : f32 to vector<8x5xf32>
    %793 = arith.subf %792, %791 : vector<8x5xf32>
    %794 = arith.mulf %793, %791 : vector<8x5xf32>
    %795 = math.exp %794 : vector<8x5xf32>
    %796 = tpu.concatenate %755, %763, %771, %779, %787, %795 in 1 : vector<8x5xf32>, vector<8x5xf32>, vector<8x5xf32>, vector<8x5xf32>, vector<8x5xf32>, vector<8x5xf32> -> vector<8x30xf32>
    %cst_267 = arith.constant dense<0.000000e+00> : vector<8x32xf32>
    %797 = tpu.matmul %796, %15, %cst_267 {dimension_numbers = #tpu.dot_dimension_numbers<[1], [0], [0], [1], [0, 0, 1, 1], [], []>} : vector<8x30xf32>, vector<30x32xf32>, vector<8x32xf32> -> vector<8x32xf32>
    %798 = vector.broadcast %14 : vector<1x32xf32> to vector<8x32xf32>
    %799 = arith.addf %797, %798 : vector<8x32xf32>
    %800 = arith.addf %651, %799 : vector<8x32xf32>
    %801 = arith.negf %800 : vector<8x32xf32>
    %802 = math.exp %801 : vector<8x32xf32>
    %cst_268 = arith.constant 1.000000e+00 : f32
    %803 = vector.broadcast %cst_268 : f32 to vector<8x32xf32>
    %804 = arith.addf %803, %802 : vector<8x32xf32>
    %805 = arith.divf %803, %804 : vector<8x32xf32>
    %806 = math.tanh %800 : vector<8x32xf32>
    %807 = arith.addf %647, %806 : vector<8x32xf32>
    %808 = arith.mulf %805, %807 : vector<8x32xf32>
    %809 = math.tanh %808 : vector<8x32xf32>
    %810 = arith.mulf %805, %809 : vector<8x32xf32>
    %c24_269 = arith.constant 24 : index
    %c0_270 = arith.constant 0 : index
    %811 = vector.load %arg8[%c24_269, %c0_270] : memref<64x32xf32, #tpu.memory_space<vmem>>, vector<8x32xf32>
    tpu.vector_store %arg8[%c24_269, %c0_270], %810 {strides = array<i32>} : memref<64x32xf32, #tpu.memory_space<vmem>>, vector<8x32xf32>,
    %c32 = arith.constant 32 : index
    %c0_271 = arith.constant 0 : index
    %812 = vector.load %arg7[%c32, %c0_271] : memref<64x32xf32, #tpu.memory_space<vmem>>, vector<8x32xf32>
    %cst_272 = arith.constant dense<0.000000e+00> : vector<8xf32>
    %813 = vector.multi_reduction <add>, %810, %cst_272 [1] : vector<8x32xf32> to vector<8xf32>
    %814 = vector.shape_cast %813 : vector<8xf32> to vector<8x1xf32>
    %815 = arith.mulf %810, %810 : vector<8x32xf32>
    %cst_273 = arith.constant dense<0.000000e+00> : vector<8xf32>
    %816 = vector.multi_reduction <add>, %815, %cst_273 [1] : vector<8x32xf32> to vector<8xf32>
    %817 = vector.shape_cast %816 : vector<8xf32> to vector<8x1xf32>
    %cst_274 = arith.constant 3.125000e-02 : f32
    %818 = vector.broadcast %cst_274 : f32 to vector<8x1xf32>
    %819 = arith.mulf %814, %818 : vector<8x1xf32>
    %cst_275 = arith.constant 3.125000e-02 : f32
    %820 = vector.broadcast %cst_275 : f32 to vector<8x1xf32>
    %821 = arith.mulf %817, %820 : vector<8x1xf32>
    %822 = arith.mulf %819, %819 : vector<8x1xf32>
    %823 = arith.subf %821, %822 : vector<8x1xf32>
    %cst_276 = arith.constant 0.000000e+00 : f32
    %824 = vector.broadcast %cst_276 : f32 to vector<8x1xf32>
    %825 = arith.maximumf %823, %824 : vector<8x1xf32>
    %826 = vector.broadcast %819 : vector<8x1xf32> to vector<8x32xf32>
    %827 = arith.subf %810, %826 : vector<8x32xf32>
    %cst_277 = arith.constant 9.99999974E-6 : f32
    %828 = vector.broadcast %cst_277 : f32 to vector<8x1xf32>
    %829 = arith.addf %825, %828 : vector<8x1xf32>
    %830 = math.rsqrt %829 : vector<8x1xf32>
    %831 = vector.broadcast %830 : vector<8x1xf32> to vector<8x32xf32>
    %832 = arith.mulf %827, %831 : vector<8x32xf32>
    %833 = vector.broadcast %8 : vector<1x32xf32> to vector<8x32xf32>
    %834 = arith.mulf %832, %833 : vector<8x32xf32>
    %835 = vector.broadcast %9 : vector<1x32xf32> to vector<8x32xf32>
    %836 = arith.addf %834, %835 : vector<8x32xf32>
    %837 = arith.negf %810 : vector<8x32xf32>
    %838 = math.exp %837 : vector<8x32xf32>
    %cst_278 = arith.constant 1.000000e+00 : f32
    %839 = vector.broadcast %cst_278 : f32 to vector<8x32xf32>
    %840 = arith.addf %839, %838 : vector<8x32xf32>
    %841 = arith.divf %839, %840 : vector<8x32xf32>
    %842 = arith.mulf %810, %841 : vector<8x32xf32>
    %cst_279 = arith.constant -2.000000e+00 : f32
    %843 = vector.broadcast %cst_279 : f32 to vector<8x32xf32>
    %844 = arith.subf %836, %843 : vector<8x32xf32>
    %cst_280 = arith.constant 1.000000e+00 : f32
    %845 = vector.broadcast %cst_280 : f32 to vector<8x32xf32>
    %846 = arith.mulf %844, %845 : vector<8x32xf32>
    %cst_281 = arith.constant 0.000000e+00 : f32
    %847 = vector.broadcast %cst_281 : f32 to vector<8x32xf32>
    %848 = arith.subf %847, %846 : vector<8x32xf32>
    %849 = arith.mulf %848, %846 : vector<8x32xf32>
    %850 = math.exp %849 : vector<8x32xf32>
    %cst_282 = arith.constant -1.000000e+00 : f32
    %851 = vector.broadcast %cst_282 : f32 to vector<8x32xf32>
    %852 = arith.subf %836, %851 : vector<8x32xf32>
    %cst_283 = arith.constant 1.000000e+00 : f32
    %853 = vector.broadcast %cst_283 : f32 to vector<8x32xf32>
    %854 = arith.mulf %852, %853 : vector<8x32xf32>
    %cst_284 = arith.constant 0.000000e+00 : f32
    %855 = vector.broadcast %cst_284 : f32 to vector<8x32xf32>
    %856 = arith.subf %855, %854 : vector<8x32xf32>
    %857 = arith.mulf %856, %854 : vector<8x32xf32>
    %858 = math.exp %857 : vector<8x32xf32>
    %cst_285 = arith.constant 0.000000e+00 : f32
    %859 = vector.broadcast %cst_285 : f32 to vector<8x32xf32>
    %860 = arith.subf %836, %859 : vector<8x32xf32>
    %cst_286 = arith.constant 1.000000e+00 : f32
    %861 = vector.broadcast %cst_286 : f32 to vector<8x32xf32>
    %862 = arith.mulf %860, %861 : vector<8x32xf32>
    %cst_287 = arith.constant 0.000000e+00 : f32
    %863 = vector.broadcast %cst_287 : f32 to vector<8x32xf32>
    %864 = arith.subf %863, %862 : vector<8x32xf32>
    %865 = arith.mulf %864, %862 : vector<8x32xf32>
    %866 = math.exp %865 : vector<8x32xf32>
    %cst_288 = arith.constant 1.000000e+00 : f32
    %867 = vector.broadcast %cst_288 : f32 to vector<8x32xf32>
    %868 = arith.subf %836, %867 : vector<8x32xf32>
    %cst_289 = arith.constant 1.000000e+00 : f32
    %869 = vector.broadcast %cst_289 : f32 to vector<8x32xf32>
    %870 = arith.mulf %868, %869 : vector<8x32xf32>
    %cst_290 = arith.constant 0.000000e+00 : f32
    %871 = vector.broadcast %cst_290 : f32 to vector<8x32xf32>
    %872 = arith.subf %871, %870 : vector<8x32xf32>
    %873 = arith.mulf %872, %870 : vector<8x32xf32>
    %874 = math.exp %873 : vector<8x32xf32>
    %cst_291 = arith.constant 2.000000e+00 : f32
    %875 = vector.broadcast %cst_291 : f32 to vector<8x32xf32>
    %876 = arith.subf %836, %875 : vector<8x32xf32>
    %cst_292 = arith.constant 1.000000e+00 : f32
    %877 = vector.broadcast %cst_292 : f32 to vector<8x32xf32>
    %878 = arith.mulf %876, %877 : vector<8x32xf32>
    %cst_293 = arith.constant 0.000000e+00 : f32
    %879 = vector.broadcast %cst_293 : f32 to vector<8x32xf32>
    %880 = arith.subf %879, %878 : vector<8x32xf32>
    %881 = arith.mulf %880, %878 : vector<8x32xf32>
    %882 = math.exp %881 : vector<8x32xf32>
    %883 = tpu.concatenate %842, %850, %858, %866, %874, %882 in 1 : vector<8x32xf32>, vector<8x32xf32>, vector<8x32xf32>, vector<8x32xf32>, vector<8x32xf32>, vector<8x32xf32> -> vector<8x192xf32>
    %cst_294 = arith.constant dense<0.000000e+00> : vector<8x5xf32>
    %884 = tpu.matmul %883, %11, %cst_294 {dimension_numbers = #tpu.dot_dimension_numbers<[1], [0], [0], [1], [0, 0, 1, 1], [], []>} : vector<8x192xf32>, vector<192x5xf32>, vector<8x5xf32> -> vector<8x5xf32>
    %885 = vector.broadcast %10 : vector<1x5xf32> to vector<8x5xf32>
    %886 = arith.addf %884, %885 : vector<8x5xf32>
    %cst_295 = arith.constant dense<0.000000e+00> : vector<8xf32>
    %887 = vector.multi_reduction <add>, %886, %cst_295 [1] : vector<8x5xf32> to vector<8xf32>
    %888 = vector.shape_cast %887 : vector<8xf32> to vector<8x1xf32>
    %889 = arith.mulf %886, %886 : vector<8x5xf32>
    %cst_296 = arith.constant dense<0.000000e+00> : vector<8xf32>
    %890 = vector.multi_reduction <add>, %889, %cst_296 [1] : vector<8x5xf32> to vector<8xf32>
    %891 = vector.shape_cast %890 : vector<8xf32> to vector<8x1xf32>
    %cst_297 = arith.constant 2.000000e-01 : f32
    %892 = vector.broadcast %cst_297 : f32 to vector<8x1xf32>
    %893 = arith.mulf %888, %892 : vector<8x1xf32>
    %cst_298 = arith.constant 2.000000e-01 : f32
    %894 = vector.broadcast %cst_298 : f32 to vector<8x1xf32>
    %895 = arith.mulf %891, %894 : vector<8x1xf32>
    %896 = arith.mulf %893, %893 : vector<8x1xf32>
    %897 = arith.subf %895, %896 : vector<8x1xf32>
    %cst_299 = arith.constant 0.000000e+00 : f32
    %898 = vector.broadcast %cst_299 : f32 to vector<8x1xf32>
    %899 = arith.maximumf %897, %898 : vector<8x1xf32>
    %900 = vector.broadcast %893 : vector<8x1xf32> to vector<8x5xf32>
    %901 = arith.subf %886, %900 : vector<8x5xf32>
    %cst_300 = arith.constant 9.99999974E-6 : f32
    %902 = vector.broadcast %cst_300 : f32 to vector<8x1xf32>
    %903 = arith.addf %899, %902 : vector<8x1xf32>
    %904 = math.rsqrt %903 : vector<8x1xf32>
    %905 = vector.broadcast %904 : vector<8x1xf32> to vector<8x5xf32>
    %906 = arith.mulf %901, %905 : vector<8x5xf32>
    %907 = vector.broadcast %12 : vector<1x5xf32> to vector<8x5xf32>
    %908 = arith.mulf %906, %907 : vector<8x5xf32>
    %909 = vector.broadcast %13 : vector<1x5xf32> to vector<8x5xf32>
    %910 = arith.addf %908, %909 : vector<8x5xf32>
    %911 = arith.negf %886 : vector<8x5xf32>
    %912 = math.exp %911 : vector<8x5xf32>
    %cst_301 = arith.constant 1.000000e+00 : f32
    %913 = vector.broadcast %cst_301 : f32 to vector<8x5xf32>
    %914 = arith.addf %913, %912 : vector<8x5xf32>
    %915 = arith.divf %913, %914 : vector<8x5xf32>
    %916 = arith.mulf %886, %915 : vector<8x5xf32>
    %cst_302 = arith.constant -2.000000e+00 : f32
    %917 = vector.broadcast %cst_302 : f32 to vector<8x5xf32>
    %918 = arith.subf %910, %917 : vector<8x5xf32>
    %cst_303 = arith.constant 1.000000e+00 : f32
    %919 = vector.broadcast %cst_303 : f32 to vector<8x5xf32>
    %920 = arith.mulf %918, %919 : vector<8x5xf32>
    %cst_304 = arith.constant 0.000000e+00 : f32
    %921 = vector.broadcast %cst_304 : f32 to vector<8x5xf32>
    %922 = arith.subf %921, %920 : vector<8x5xf32>
    %923 = arith.mulf %922, %920 : vector<8x5xf32>
    %924 = math.exp %923 : vector<8x5xf32>
    %cst_305 = arith.constant -1.000000e+00 : f32
    %925 = vector.broadcast %cst_305 : f32 to vector<8x5xf32>
    %926 = arith.subf %910, %925 : vector<8x5xf32>
    %cst_306 = arith.constant 1.000000e+00 : f32
    %927 = vector.broadcast %cst_306 : f32 to vector<8x5xf32>
    %928 = arith.mulf %926, %927 : vector<8x5xf32>
    %cst_307 = arith.constant 0.000000e+00 : f32
    %929 = vector.broadcast %cst_307 : f32 to vector<8x5xf32>
    %930 = arith.subf %929, %928 : vector<8x5xf32>
    %931 = arith.mulf %930, %928 : vector<8x5xf32>
    %932 = math.exp %931 : vector<8x5xf32>
    %cst_308 = arith.constant 0.000000e+00 : f32
    %933 = vector.broadcast %cst_308 : f32 to vector<8x5xf32>
    %934 = arith.subf %910, %933 : vector<8x5xf32>
    %cst_309 = arith.constant 1.000000e+00 : f32
    %935 = vector.broadcast %cst_309 : f32 to vector<8x5xf32>
    %936 = arith.mulf %934, %935 : vector<8x5xf32>
    %cst_310 = arith.constant 0.000000e+00 : f32
    %937 = vector.broadcast %cst_310 : f32 to vector<8x5xf32>
    %938 = arith.subf %937, %936 : vector<8x5xf32>
    %939 = arith.mulf %938, %936 : vector<8x5xf32>
    %940 = math.exp %939 : vector<8x5xf32>
    %cst_311 = arith.constant 1.000000e+00 : f32
    %941 = vector.broadcast %cst_311 : f32 to vector<8x5xf32>
    %942 = arith.subf %910, %941 : vector<8x5xf32>
    %cst_312 = arith.constant 1.000000e+00 : f32
    %943 = vector.broadcast %cst_312 : f32 to vector<8x5xf32>
    %944 = arith.mulf %942, %943 : vector<8x5xf32>
    %cst_313 = arith.constant 0.000000e+00 : f32
    %945 = vector.broadcast %cst_313 : f32 to vector<8x5xf32>
    %946 = arith.subf %945, %944 : vector<8x5xf32>
    %947 = arith.mulf %946, %944 : vector<8x5xf32>
    %948 = math.exp %947 : vector<8x5xf32>
    %cst_314 = arith.constant 2.000000e+00 : f32
    %949 = vector.broadcast %cst_314 : f32 to vector<8x5xf32>
    %950 = arith.subf %910, %949 : vector<8x5xf32>
    %cst_315 = arith.constant 1.000000e+00 : f32
    %951 = vector.broadcast %cst_315 : f32 to vector<8x5xf32>
    %952 = arith.mulf %950, %951 : vector<8x5xf32>
    %cst_316 = arith.constant 0.000000e+00 : f32
    %953 = vector.broadcast %cst_316 : f32 to vector<8x5xf32>
    %954 = arith.subf %953, %952 : vector<8x5xf32>
    %955 = arith.mulf %954, %952 : vector<8x5xf32>
    %956 = math.exp %955 : vector<8x5xf32>
    %957 = tpu.concatenate %916, %924, %932, %940, %948, %956 in 1 : vector<8x5xf32>, vector<8x5xf32>, vector<8x5xf32>, vector<8x5xf32>, vector<8x5xf32>, vector<8x5xf32> -> vector<8x30xf32>
    %cst_317 = arith.constant dense<0.000000e+00> : vector<8x32xf32>
    %958 = tpu.matmul %957, %15, %cst_317 {dimension_numbers = #tpu.dot_dimension_numbers<[1], [0], [0], [1], [0, 0, 1, 1], [], []>} : vector<8x30xf32>, vector<30x32xf32>, vector<8x32xf32> -> vector<8x32xf32>
    %959 = vector.broadcast %14 : vector<1x32xf32> to vector<8x32xf32>
    %960 = arith.addf %958, %959 : vector<8x32xf32>
    %961 = arith.addf %812, %960 : vector<8x32xf32>
    %962 = arith.negf %961 : vector<8x32xf32>
    %963 = math.exp %962 : vector<8x32xf32>
    %cst_318 = arith.constant 1.000000e+00 : f32
    %964 = vector.broadcast %cst_318 : f32 to vector<8x32xf32>
    %965 = arith.addf %964, %963 : vector<8x32xf32>
    %966 = arith.divf %964, %965 : vector<8x32xf32>
    %967 = math.tanh %961 : vector<8x32xf32>
    %968 = arith.addf %808, %967 : vector<8x32xf32>
    %969 = arith.mulf %966, %968 : vector<8x32xf32>
    %970 = math.tanh %969 : vector<8x32xf32>
    %971 = arith.mulf %966, %970 : vector<8x32xf32>
    %c32_319 = arith.constant 32 : index
    %c0_320 = arith.constant 0 : index
    %972 = vector.load %arg8[%c32_319, %c0_320] : memref<64x32xf32, #tpu.memory_space<vmem>>, vector<8x32xf32>
    tpu.vector_store %arg8[%c32_319, %c0_320], %971 {strides = array<i32>} : memref<64x32xf32, #tpu.memory_space<vmem>>, vector<8x32xf32>,
    %c40 = arith.constant 40 : index
    %c0_321 = arith.constant 0 : index
    %973 = vector.load %arg7[%c40, %c0_321] : memref<64x32xf32, #tpu.memory_space<vmem>>, vector<8x32xf32>
    %cst_322 = arith.constant dense<0.000000e+00> : vector<8xf32>
    %974 = vector.multi_reduction <add>, %971, %cst_322 [1] : vector<8x32xf32> to vector<8xf32>
    %975 = vector.shape_cast %974 : vector<8xf32> to vector<8x1xf32>
    %976 = arith.mulf %971, %971 : vector<8x32xf32>
    %cst_323 = arith.constant dense<0.000000e+00> : vector<8xf32>
    %977 = vector.multi_reduction <add>, %976, %cst_323 [1] : vector<8x32xf32> to vector<8xf32>
    %978 = vector.shape_cast %977 : vector<8xf32> to vector<8x1xf32>
    %cst_324 = arith.constant 3.125000e-02 : f32
    %979 = vector.broadcast %cst_324 : f32 to vector<8x1xf32>
    %980 = arith.mulf %975, %979 : vector<8x1xf32>
    %cst_325 = arith.constant 3.125000e-02 : f32
    %981 = vector.broadcast %cst_325 : f32 to vector<8x1xf32>
    %982 = arith.mulf %978, %981 : vector<8x1xf32>
    %983 = arith.mulf %980, %980 : vector<8x1xf32>
    %984 = arith.subf %982, %983 : vector<8x1xf32>
    %cst_326 = arith.constant 0.000000e+00 : f32
    %985 = vector.broadcast %cst_326 : f32 to vector<8x1xf32>
    %986 = arith.maximumf %984, %985 : vector<8x1xf32>
    %987 = vector.broadcast %980 : vector<8x1xf32> to vector<8x32xf32>
    %988 = arith.subf %971, %987 : vector<8x32xf32>
    %cst_327 = arith.constant 9.99999974E-6 : f32
    %989 = vector.broadcast %cst_327 : f32 to vector<8x1xf32>
    %990 = arith.addf %986, %989 : vector<8x1xf32>
    %991 = math.rsqrt %990 : vector<8x1xf32>
    %992 = vector.broadcast %991 : vector<8x1xf32> to vector<8x32xf32>
    %993 = arith.mulf %988, %992 : vector<8x32xf32>
    %994 = vector.broadcast %8 : vector<1x32xf32> to vector<8x32xf32>
    %995 = arith.mulf %993, %994 : vector<8x32xf32>
    %996 = vector.broadcast %9 : vector<1x32xf32> to vector<8x32xf32>
    %997 = arith.addf %995, %996 : vector<8x32xf32>
    %998 = arith.negf %971 : vector<8x32xf32>
    %999 = math.exp %998 : vector<8x32xf32>
    %cst_328 = arith.constant 1.000000e+00 : f32
    %1000 = vector.broadcast %cst_328 : f32 to vector<8x32xf32>
    %1001 = arith.addf %1000, %999 : vector<8x32xf32>
    %1002 = arith.divf %1000, %1001 : vector<8x32xf32>
    %1003 = arith.mulf %971, %1002 : vector<8x32xf32>
    %cst_329 = arith.constant -2.000000e+00 : f32
    %1004 = vector.broadcast %cst_329 : f32 to vector<8x32xf32>
    %1005 = arith.subf %997, %1004 : vector<8x32xf32>
    %cst_330 = arith.constant 1.000000e+00 : f32
    %1006 = vector.broadcast %cst_330 : f32 to vector<8x32xf32>
    %1007 = arith.mulf %1005, %1006 : vector<8x32xf32>
    %cst_331 = arith.constant 0.000000e+00 : f32
    %1008 = vector.broadcast %cst_331 : f32 to vector<8x32xf32>
    %1009 = arith.subf %1008, %1007 : vector<8x32xf32>
    %1010 = arith.mulf %1009, %1007 : vector<8x32xf32>
    %1011 = math.exp %1010 : vector<8x32xf32>
    %cst_332 = arith.constant -1.000000e+00 : f32
    %1012 = vector.broadcast %cst_332 : f32 to vector<8x32xf32>
    %1013 = arith.subf %997, %1012 : vector<8x32xf32>
    %cst_333 = arith.constant 1.000000e+00 : f32
    %1014 = vector.broadcast %cst_333 : f32 to vector<8x32xf32>
    %1015 = arith.mulf %1013, %1014 : vector<8x32xf32>
    %cst_334 = arith.constant 0.000000e+00 : f32
    %1016 = vector.broadcast %cst_334 : f32 to vector<8x32xf32>
    %1017 = arith.subf %1016, %1015 : vector<8x32xf32>
    %1018 = arith.mulf %1017, %1015 : vector<8x32xf32>
    %1019 = math.exp %1018 : vector<8x32xf32>
    %cst_335 = arith.constant 0.000000e+00 : f32
    %1020 = vector.broadcast %cst_335 : f32 to vector<8x32xf32>
    %1021 = arith.subf %997, %1020 : vector<8x32xf32>
    %cst_336 = arith.constant 1.000000e+00 : f32
    %1022 = vector.broadcast %cst_336 : f32 to vector<8x32xf32>
    %1023 = arith.mulf %1021, %1022 : vector<8x32xf32>
    %cst_337 = arith.constant 0.000000e+00 : f32
    %1024 = vector.broadcast %cst_337 : f32 to vector<8x32xf32>
    %1025 = arith.subf %1024, %1023 : vector<8x32xf32>
    %1026 = arith.mulf %1025, %1023 : vector<8x32xf32>
    %1027 = math.exp %1026 : vector<8x32xf32>
    %cst_338 = arith.constant 1.000000e+00 : f32
    %1028 = vector.broadcast %cst_338 : f32 to vector<8x32xf32>
    %1029 = arith.subf %997, %1028 : vector<8x32xf32>
    %cst_339 = arith.constant 1.000000e+00 : f32
    %1030 = vector.broadcast %cst_339 : f32 to vector<8x32xf32>
    %1031 = arith.mulf %1029, %1030 : vector<8x32xf32>
    %cst_340 = arith.constant 0.000000e+00 : f32
    %1032 = vector.broadcast %cst_340 : f32 to vector<8x32xf32>
    %1033 = arith.subf %1032, %1031 : vector<8x32xf32>
    %1034 = arith.mulf %1033, %1031 : vector<8x32xf32>
    %1035 = math.exp %1034 : vector<8x32xf32>
    %cst_341 = arith.constant 2.000000e+00 : f32
    %1036 = vector.broadcast %cst_341 : f32 to vector<8x32xf32>
    %1037 = arith.subf %997, %1036 : vector<8x32xf32>
    %cst_342 = arith.constant 1.000000e+00 : f32
    %1038 = vector.broadcast %cst_342 : f32 to vector<8x32xf32>
    %1039 = arith.mulf %1037, %1038 : vector<8x32xf32>
    %cst_343 = arith.constant 0.000000e+00 : f32
    %1040 = vector.broadcast %cst_343 : f32 to vector<8x32xf32>
    %1041 = arith.subf %1040, %1039 : vector<8x32xf32>
    %1042 = arith.mulf %1041, %1039 : vector<8x32xf32>
    %1043 = math.exp %1042 : vector<8x32xf32>
    %1044 = tpu.concatenate %1003, %1011, %1019, %1027, %1035, %1043 in 1 : vector<8x32xf32>, vector<8x32xf32>, vector<8x32xf32>, vector<8x32xf32>, vector<8x32xf32>, vector<8x32xf32> -> vector<8x192xf32>
    %cst_344 = arith.constant dense<0.000000e+00> : vector<8x5xf32>
    %1045 = tpu.matmul %1044, %11, %cst_344 {dimension_numbers = #tpu.dot_dimension_numbers<[1], [0], [0], [1], [0, 0, 1, 1], [], []>} : vector<8x192xf32>, vector<192x5xf32>, vector<8x5xf32> -> vector<8x5xf32>
    %1046 = vector.broadcast %10 : vector<1x5xf32> to vector<8x5xf32>
    %1047 = arith.addf %1045, %1046 : vector<8x5xf32>
    %cst_345 = arith.constant dense<0.000000e+00> : vector<8xf32>
    %1048 = vector.multi_reduction <add>, %1047, %cst_345 [1] : vector<8x5xf32> to vector<8xf32>
    %1049 = vector.shape_cast %1048 : vector<8xf32> to vector<8x1xf32>
    %1050 = arith.mulf %1047, %1047 : vector<8x5xf32>
    %cst_346 = arith.constant dense<0.000000e+00> : vector<8xf32>
    %1051 = vector.multi_reduction <add>, %1050, %cst_346 [1] : vector<8x5xf32> to vector<8xf32>
    %1052 = vector.shape_cast %1051 : vector<8xf32> to vector<8x1xf32>
    %cst_347 = arith.constant 2.000000e-01 : f32
    %1053 = vector.broadcast %cst_347 : f32 to vector<8x1xf32>
    %1054 = arith.mulf %1049, %1053 : vector<8x1xf32>
    %cst_348 = arith.constant 2.000000e-01 : f32
    %1055 = vector.broadcast %cst_348 : f32 to vector<8x1xf32>
    %1056 = arith.mulf %1052, %1055 : vector<8x1xf32>
    %1057 = arith.mulf %1054, %1054 : vector<8x1xf32>
    %1058 = arith.subf %1056, %1057 : vector<8x1xf32>
    %cst_349 = arith.constant 0.000000e+00 : f32
    %1059 = vector.broadcast %cst_349 : f32 to vector<8x1xf32>
    %1060 = arith.maximumf %1058, %1059 : vector<8x1xf32>
    %1061 = vector.broadcast %1054 : vector<8x1xf32> to vector<8x5xf32>
    %1062 = arith.subf %1047, %1061 : vector<8x5xf32>
    %cst_350 = arith.constant 9.99999974E-6 : f32
    %1063 = vector.broadcast %cst_350 : f32 to vector<8x1xf32>
    %1064 = arith.addf %1060, %1063 : vector<8x1xf32>
    %1065 = math.rsqrt %1064 : vector<8x1xf32>
    %1066 = vector.broadcast %1065 : vector<8x1xf32> to vector<8x5xf32>
    %1067 = arith.mulf %1062, %1066 : vector<8x5xf32>
    %1068 = vector.broadcast %12 : vector<1x5xf32> to vector<8x5xf32>
    %1069 = arith.mulf %1067, %1068 : vector<8x5xf32>
    %1070 = vector.broadcast %13 : vector<1x5xf32> to vector<8x5xf32>
    %1071 = arith.addf %1069, %1070 : vector<8x5xf32>
    %1072 = arith.negf %1047 : vector<8x5xf32>
    %1073 = math.exp %1072 : vector<8x5xf32>
    %cst_351 = arith.constant 1.000000e+00 : f32
    %1074 = vector.broadcast %cst_351 : f32 to vector<8x5xf32>
    %1075 = arith.addf %1074, %1073 : vector<8x5xf32>
    %1076 = arith.divf %1074, %1075 : vector<8x5xf32>
    %1077 = arith.mulf %1047, %1076 : vector<8x5xf32>
    %cst_352 = arith.constant -2.000000e+00 : f32
    %1078 = vector.broadcast %cst_352 : f32 to vector<8x5xf32>
    %1079 = arith.subf %1071, %1078 : vector<8x5xf32>
    %cst_353 = arith.constant 1.000000e+00 : f32
    %1080 = vector.broadcast %cst_353 : f32 to vector<8x5xf32>
    %1081 = arith.mulf %1079, %1080 : vector<8x5xf32>
    %cst_354 = arith.constant 0.000000e+00 : f32
    %1082 = vector.broadcast %cst_354 : f32 to vector<8x5xf32>
    %1083 = arith.subf %1082, %1081 : vector<8x5xf32>
    %1084 = arith.mulf %1083, %1081 : vector<8x5xf32>
    %1085 = math.exp %1084 : vector<8x5xf32>
    %cst_355 = arith.constant -1.000000e+00 : f32
    %1086 = vector.broadcast %cst_355 : f32 to vector<8x5xf32>
    %1087 = arith.subf %1071, %1086 : vector<8x5xf32>
    %cst_356 = arith.constant 1.000000e+00 : f32
    %1088 = vector.broadcast %cst_356 : f32 to vector<8x5xf32>
    %1089 = arith.mulf %1087, %1088 : vector<8x5xf32>
    %cst_357 = arith.constant 0.000000e+00 : f32
    %1090 = vector.broadcast %cst_357 : f32 to vector<8x5xf32>
    %1091 = arith.subf %1090, %1089 : vector<8x5xf32>
    %1092 = arith.mulf %1091, %1089 : vector<8x5xf32>
    %1093 = math.exp %1092 : vector<8x5xf32>
    %cst_358 = arith.constant 0.000000e+00 : f32
    %1094 = vector.broadcast %cst_358 : f32 to vector<8x5xf32>
    %1095 = arith.subf %1071, %1094 : vector<8x5xf32>
    %cst_359 = arith.constant 1.000000e+00 : f32
    %1096 = vector.broadcast %cst_359 : f32 to vector<8x5xf32>
    %1097 = arith.mulf %1095, %1096 : vector<8x5xf32>
    %cst_360 = arith.constant 0.000000e+00 : f32
    %1098 = vector.broadcast %cst_360 : f32 to vector<8x5xf32>
    %1099 = arith.subf %1098, %1097 : vector<8x5xf32>
    %1100 = arith.mulf %1099, %1097 : vector<8x5xf32>
    %1101 = math.exp %1100 : vector<8x5xf32>
    %cst_361 = arith.constant 1.000000e+00 : f32
    %1102 = vector.broadcast %cst_361 : f32 to vector<8x5xf32>
    %1103 = arith.subf %1071, %1102 : vector<8x5xf32>
    %cst_362 = arith.constant 1.000000e+00 : f32
    %1104 = vector.broadcast %cst_362 : f32 to vector<8x5xf32>
    %1105 = arith.mulf %1103, %1104 : vector<8x5xf32>
    %cst_363 = arith.constant 0.000000e+00 : f32
    %1106 = vector.broadcast %cst_363 : f32 to vector<8x5xf32>
    %1107 = arith.subf %1106, %1105 : vector<8x5xf32>
    %1108 = arith.mulf %1107, %1105 : vector<8x5xf32>
    %1109 = math.exp %1108 : vector<8x5xf32>
    %cst_364 = arith.constant 2.000000e+00 : f32
    %1110 = vector.broadcast %cst_364 : f32 to vector<8x5xf32>
    %1111 = arith.subf %1071, %1110 : vector<8x5xf32>
    %cst_365 = arith.constant 1.000000e+00 : f32
    %1112 = vector.broadcast %cst_365 : f32 to vector<8x5xf32>
    %1113 = arith.mulf %1111, %1112 : vector<8x5xf32>
    %cst_366 = arith.constant 0.000000e+00 : f32
    %1114 = vector.broadcast %cst_366 : f32 to vector<8x5xf32>
    %1115 = arith.subf %1114, %1113 : vector<8x5xf32>
    %1116 = arith.mulf %1115, %1113 : vector<8x5xf32>
    %1117 = math.exp %1116 : vector<8x5xf32>
    %1118 = tpu.concatenate %1077, %1085, %1093, %1101, %1109, %1117 in 1 : vector<8x5xf32>, vector<8x5xf32>, vector<8x5xf32>, vector<8x5xf32>, vector<8x5xf32>, vector<8x5xf32> -> vector<8x30xf32>
    %cst_367 = arith.constant dense<0.000000e+00> : vector<8x32xf32>
    %1119 = tpu.matmul %1118, %15, %cst_367 {dimension_numbers = #tpu.dot_dimension_numbers<[1], [0], [0], [1], [0, 0, 1, 1], [], []>} : vector<8x30xf32>, vector<30x32xf32>, vector<8x32xf32> -> vector<8x32xf32>
    %1120 = vector.broadcast %14 : vector<1x32xf32> to vector<8x32xf32>
    %1121 = arith.addf %1119, %1120 : vector<8x32xf32>
    %1122 = arith.addf %973, %1121 : vector<8x32xf32>
    %1123 = arith.negf %1122 : vector<8x32xf32>
    %1124 = math.exp %1123 : vector<8x32xf32>
    %cst_368 = arith.constant 1.000000e+00 : f32
    %1125 = vector.broadcast %cst_368 : f32 to vector<8x32xf32>
    %1126 = arith.addf %1125, %1124 : vector<8x32xf32>
    %1127 = arith.divf %1125, %1126 : vector<8x32xf32>
    %1128 = math.tanh %1122 : vector<8x32xf32>
    %1129 = arith.addf %969, %1128 : vector<8x32xf32>
    %1130 = arith.mulf %1127, %1129 : vector<8x32xf32>
    %1131 = math.tanh %1130 : vector<8x32xf32>
    %1132 = arith.mulf %1127, %1131 : vector<8x32xf32>
    %c40_369 = arith.constant 40 : index
    %c0_370 = arith.constant 0 : index
    %1133 = vector.load %arg8[%c40_369, %c0_370] : memref<64x32xf32, #tpu.memory_space<vmem>>, vector<8x32xf32>
    tpu.vector_store %arg8[%c40_369, %c0_370], %1132 {strides = array<i32>} : memref<64x32xf32, #tpu.memory_space<vmem>>, vector<8x32xf32>,
    %c48 = arith.constant 48 : index
    %c0_371 = arith.constant 0 : index
    %1134 = vector.load %arg7[%c48, %c0_371] : memref<64x32xf32, #tpu.memory_space<vmem>>, vector<8x32xf32>
    %cst_372 = arith.constant dense<0.000000e+00> : vector<8xf32>
    %1135 = vector.multi_reduction <add>, %1132, %cst_372 [1] : vector<8x32xf32> to vector<8xf32>
    %1136 = vector.shape_cast %1135 : vector<8xf32> to vector<8x1xf32>
    %1137 = arith.mulf %1132, %1132 : vector<8x32xf32>
    %cst_373 = arith.constant dense<0.000000e+00> : vector<8xf32>
    %1138 = vector.multi_reduction <add>, %1137, %cst_373 [1] : vector<8x32xf32> to vector<8xf32>
    %1139 = vector.shape_cast %1138 : vector<8xf32> to vector<8x1xf32>
    %cst_374 = arith.constant 3.125000e-02 : f32
    %1140 = vector.broadcast %cst_374 : f32 to vector<8x1xf32>
    %1141 = arith.mulf %1136, %1140 : vector<8x1xf32>
    %cst_375 = arith.constant 3.125000e-02 : f32
    %1142 = vector.broadcast %cst_375 : f32 to vector<8x1xf32>
    %1143 = arith.mulf %1139, %1142 : vector<8x1xf32>
    %1144 = arith.mulf %1141, %1141 : vector<8x1xf32>
    %1145 = arith.subf %1143, %1144 : vector<8x1xf32>
    %cst_376 = arith.constant 0.000000e+00 : f32
    %1146 = vector.broadcast %cst_376 : f32 to vector<8x1xf32>
    %1147 = arith.maximumf %1145, %1146 : vector<8x1xf32>
    %1148 = vector.broadcast %1141 : vector<8x1xf32> to vector<8x32xf32>
    %1149 = arith.subf %1132, %1148 : vector<8x32xf32>
    %cst_377 = arith.constant 9.99999974E-6 : f32
    %1150 = vector.broadcast %cst_377 : f32 to vector<8x1xf32>
    %1151 = arith.addf %1147, %1150 : vector<8x1xf32>
    %1152 = math.rsqrt %1151 : vector<8x1xf32>
    %1153 = vector.broadcast %1152 : vector<8x1xf32> to vector<8x32xf32>
    %1154 = arith.mulf %1149, %1153 : vector<8x32xf32>
    %1155 = vector.broadcast %8 : vector<1x32xf32> to vector<8x32xf32>
    %1156 = arith.mulf %1154, %1155 : vector<8x32xf32>
    %1157 = vector.broadcast %9 : vector<1x32xf32> to vector<8x32xf32>
    %1158 = arith.addf %1156, %1157 : vector<8x32xf32>
    %1159 = arith.negf %1132 : vector<8x32xf32>
    %1160 = math.exp %1159 : vector<8x32xf32>
    %cst_378 = arith.constant 1.000000e+00 : f32
    %1161 = vector.broadcast %cst_378 : f32 to vector<8x32xf32>
    %1162 = arith.addf %1161, %1160 : vector<8x32xf32>
    %1163 = arith.divf %1161, %1162 : vector<8x32xf32>
    %1164 = arith.mulf %1132, %1163 : vector<8x32xf32>
    %cst_379 = arith.constant -2.000000e+00 : f32
    %1165 = vector.broadcast %cst_379 : f32 to vector<8x32xf32>
    %1166 = arith.subf %1158, %1165 : vector<8x32xf32>
    %cst_380 = arith.constant 1.000000e+00 : f32
    %1167 = vector.broadcast %cst_380 : f32 to vector<8x32xf32>
    %1168 = arith.mulf %1166, %1167 : vector<8x32xf32>
    %cst_381 = arith.constant 0.000000e+00 : f32
    %1169 = vector.broadcast %cst_381 : f32 to vector<8x32xf32>
    %1170 = arith.subf %1169, %1168 : vector<8x32xf32>
    %1171 = arith.mulf %1170, %1168 : vector<8x32xf32>
    %1172 = math.exp %1171 : vector<8x32xf32>
    %cst_382 = arith.constant -1.000000e+00 : f32
    %1173 = vector.broadcast %cst_382 : f32 to vector<8x32xf32>
    %1174 = arith.subf %1158, %1173 : vector<8x32xf32>
    %cst_383 = arith.constant 1.000000e+00 : f32
    %1175 = vector.broadcast %cst_383 : f32 to vector<8x32xf32>
    %1176 = arith.mulf %1174, %1175 : vector<8x32xf32>
    %cst_384 = arith.constant 0.000000e+00 : f32
    %1177 = vector.broadcast %cst_384 : f32 to vector<8x32xf32>
    %1178 = arith.subf %1177, %1176 : vector<8x32xf32>
    %1179 = arith.mulf %1178, %1176 : vector<8x32xf32>
    %1180 = math.exp %1179 : vector<8x32xf32>
    %cst_385 = arith.constant 0.000000e+00 : f32
    %1181 = vector.broadcast %cst_385 : f32 to vector<8x32xf32>
    %1182 = arith.subf %1158, %1181 : vector<8x32xf32>
    %cst_386 = arith.constant 1.000000e+00 : f32
    %1183 = vector.broadcast %cst_386 : f32 to vector<8x32xf32>
    %1184 = arith.mulf %1182, %1183 : vector<8x32xf32>
    %cst_387 = arith.constant 0.000000e+00 : f32
    %1185 = vector.broadcast %cst_387 : f32 to vector<8x32xf32>
    %1186 = arith.subf %1185, %1184 : vector<8x32xf32>
    %1187 = arith.mulf %1186, %1184 : vector<8x32xf32>
    %1188 = math.exp %1187 : vector<8x32xf32>
    %cst_388 = arith.constant 1.000000e+00 : f32
    %1189 = vector.broadcast %cst_388 : f32 to vector<8x32xf32>
    %1190 = arith.subf %1158, %1189 : vector<8x32xf32>
    %cst_389 = arith.constant 1.000000e+00 : f32
    %1191 = vector.broadcast %cst_389 : f32 to vector<8x32xf32>
    %1192 = arith.mulf %1190, %1191 : vector<8x32xf32>
    %cst_390 = arith.constant 0.000000e+00 : f32
    %1193 = vector.broadcast %cst_390 : f32 to vector<8x32xf32>
    %1194 = arith.subf %1193, %1192 : vector<8x32xf32>
    %1195 = arith.mulf %1194, %1192 : vector<8x32xf32>
    %1196 = math.exp %1195 : vector<8x32xf32>
    %cst_391 = arith.constant 2.000000e+00 : f32
    %1197 = vector.broadcast %cst_391 : f32 to vector<8x32xf32>
    %1198 = arith.subf %1158, %1197 : vector<8x32xf32>
    %cst_392 = arith.constant 1.000000e+00 : f32
    %1199 = vector.broadcast %cst_392 : f32 to vector<8x32xf32>
    %1200 = arith.mulf %1198, %1199 : vector<8x32xf32>
    %cst_393 = arith.constant 0.000000e+00 : f32
    %1201 = vector.broadcast %cst_393 : f32 to vector<8x32xf32>
    %1202 = arith.subf %1201, %1200 : vector<8x32xf32>
    %1203 = arith.mulf %1202, %1200 : vector<8x32xf32>
    %1204 = math.exp %1203 : vector<8x32xf32>
    %1205 = tpu.concatenate %1164, %1172, %1180, %1188, %1196, %1204 in 1 : vector<8x32xf32>, vector<8x32xf32>, vector<8x32xf32>, vector<8x32xf32>, vector<8x32xf32>, vector<8x32xf32> -> vector<8x192xf32>
    %cst_394 = arith.constant dense<0.000000e+00> : vector<8x5xf32>
    %1206 = tpu.matmul %1205, %11, %cst_394 {dimension_numbers = #tpu.dot_dimension_numbers<[1], [0], [0], [1], [0, 0, 1, 1], [], []>} : vector<8x192xf32>, vector<192x5xf32>, vector<8x5xf32> -> vector<8x5xf32>
    %1207 = vector.broadcast %10 : vector<1x5xf32> to vector<8x5xf32>
    %1208 = arith.addf %1206, %1207 : vector<8x5xf32>
    %cst_395 = arith.constant dense<0.000000e+00> : vector<8xf32>
    %1209 = vector.multi_reduction <add>, %1208, %cst_395 [1] : vector<8x5xf32> to vector<8xf32>
    %1210 = vector.shape_cast %1209 : vector<8xf32> to vector<8x1xf32>
    %1211 = arith.mulf %1208, %1208 : vector<8x5xf32>
    %cst_396 = arith.constant dense<0.000000e+00> : vector<8xf32>
    %1212 = vector.multi_reduction <add>, %1211, %cst_396 [1] : vector<8x5xf32> to vector<8xf32>
    %1213 = vector.shape_cast %1212 : vector<8xf32> to vector<8x1xf32>
    %cst_397 = arith.constant 2.000000e-01 : f32
    %1214 = vector.broadcast %cst_397 : f32 to vector<8x1xf32>
    %1215 = arith.mulf %1210, %1214 : vector<8x1xf32>
    %cst_398 = arith.constant 2.000000e-01 : f32
    %1216 = vector.broadcast %cst_398 : f32 to vector<8x1xf32>
    %1217 = arith.mulf %1213, %1216 : vector<8x1xf32>
    %1218 = arith.mulf %1215, %1215 : vector<8x1xf32>
    %1219 = arith.subf %1217, %1218 : vector<8x1xf32>
    %cst_399 = arith.constant 0.000000e+00 : f32
    %1220 = vector.broadcast %cst_399 : f32 to vector<8x1xf32>
    %1221 = arith.maximumf %1219, %1220 : vector<8x1xf32>
    %1222 = vector.broadcast %1215 : vector<8x1xf32> to vector<8x5xf32>
    %1223 = arith.subf %1208, %1222 : vector<8x5xf32>
    %cst_400 = arith.constant 9.99999974E-6 : f32
    %1224 = vector.broadcast %cst_400 : f32 to vector<8x1xf32>
    %1225 = arith.addf %1221, %1224 : vector<8x1xf32>
    %1226 = math.rsqrt %1225 : vector<8x1xf32>
    %1227 = vector.broadcast %1226 : vector<8x1xf32> to vector<8x5xf32>
    %1228 = arith.mulf %1223, %1227 : vector<8x5xf32>
    %1229 = vector.broadcast %12 : vector<1x5xf32> to vector<8x5xf32>
    %1230 = arith.mulf %1228, %1229 : vector<8x5xf32>
    %1231 = vector.broadcast %13 : vector<1x5xf32> to vector<8x5xf32>
    %1232 = arith.addf %1230, %1231 : vector<8x5xf32>
    %1233 = arith.negf %1208 : vector<8x5xf32>
    %1234 = math.exp %1233 : vector<8x5xf32>
    %cst_401 = arith.constant 1.000000e+00 : f32
    %1235 = vector.broadcast %cst_401 : f32 to vector<8x5xf32>
    %1236 = arith.addf %1235, %1234 : vector<8x5xf32>
    %1237 = arith.divf %1235, %1236 : vector<8x5xf32>
    %1238 = arith.mulf %1208, %1237 : vector<8x5xf32>
    %cst_402 = arith.constant -2.000000e+00 : f32
    %1239 = vector.broadcast %cst_402 : f32 to vector<8x5xf32>
    %1240 = arith.subf %1232, %1239 : vector<8x5xf32>
    %cst_403 = arith.constant 1.000000e+00 : f32
    %1241 = vector.broadcast %cst_403 : f32 to vector<8x5xf32>
    %1242 = arith.mulf %1240, %1241 : vector<8x5xf32>
    %cst_404 = arith.constant 0.000000e+00 : f32
    %1243 = vector.broadcast %cst_404 : f32 to vector<8x5xf32>
    %1244 = arith.subf %1243, %1242 : vector<8x5xf32>
    %1245 = arith.mulf %1244, %1242 : vector<8x5xf32>
    %1246 = math.exp %1245 : vector<8x5xf32>
    %cst_405 = arith.constant -1.000000e+00 : f32
    %1247 = vector.broadcast %cst_405 : f32 to vector<8x5xf32>
    %1248 = arith.subf %1232, %1247 : vector<8x5xf32>
    %cst_406 = arith.constant 1.000000e+00 : f32
    %1249 = vector.broadcast %cst_406 : f32 to vector<8x5xf32>
    %1250 = arith.mulf %1248, %1249 : vector<8x5xf32>
    %cst_407 = arith.constant 0.000000e+00 : f32
    %1251 = vector.broadcast %cst_407 : f32 to vector<8x5xf32>
    %1252 = arith.subf %1251, %1250 : vector<8x5xf32>
    %1253 = arith.mulf %1252, %1250 : vector<8x5xf32>
    %1254 = math.exp %1253 : vector<8x5xf32>
    %cst_408 = arith.constant 0.000000e+00 : f32
    %1255 = vector.broadcast %cst_408 : f32 to vector<8x5xf32>
    %1256 = arith.subf %1232, %1255 : vector<8x5xf32>
    %cst_409 = arith.constant 1.000000e+00 : f32
    %1257 = vector.broadcast %cst_409 : f32 to vector<8x5xf32>
    %1258 = arith.mulf %1256, %1257 : vector<8x5xf32>
    %cst_410 = arith.constant 0.000000e+00 : f32
    %1259 = vector.broadcast %cst_410 : f32 to vector<8x5xf32>
    %1260 = arith.subf %1259, %1258 : vector<8x5xf32>
    %1261 = arith.mulf %1260, %1258 : vector<8x5xf32>
    %1262 = math.exp %1261 : vector<8x5xf32>
    %cst_411 = arith.constant 1.000000e+00 : f32
    %1263 = vector.broadcast %cst_411 : f32 to vector<8x5xf32>
    %1264 = arith.subf %1232, %1263 : vector<8x5xf32>
    %cst_412 = arith.constant 1.000000e+00 : f32
    %1265 = vector.broadcast %cst_412 : f32 to vector<8x5xf32>
    %1266 = arith.mulf %1264, %1265 : vector<8x5xf32>
    %cst_413 = arith.constant 0.000000e+00 : f32
    %1267 = vector.broadcast %cst_413 : f32 to vector<8x5xf32>
    %1268 = arith.subf %1267, %1266 : vector<8x5xf32>
    %1269 = arith.mulf %1268, %1266 : vector<8x5xf32>
    %1270 = math.exp %1269 : vector<8x5xf32>
    %cst_414 = arith.constant 2.000000e+00 : f32
    %1271 = vector.broadcast %cst_414 : f32 to vector<8x5xf32>
    %1272 = arith.subf %1232, %1271 : vector<8x5xf32>
    %cst_415 = arith.constant 1.000000e+00 : f32
    %1273 = vector.broadcast %cst_415 : f32 to vector<8x5xf32>
    %1274 = arith.mulf %1272, %1273 : vector<8x5xf32>
    %cst_416 = arith.constant 0.000000e+00 : f32
    %1275 = vector.broadcast %cst_416 : f32 to vector<8x5xf32>
    %1276 = arith.subf %1275, %1274 : vector<8x5xf32>
    %1277 = arith.mulf %1276, %1274 : vector<8x5xf32>
    %1278 = math.exp %1277 : vector<8x5xf32>
    %1279 = tpu.concatenate %1238, %1246, %1254, %1262, %1270, %1278 in 1 : vector<8x5xf32>, vector<8x5xf32>, vector<8x5xf32>, vector<8x5xf32>, vector<8x5xf32>, vector<8x5xf32> -> vector<8x30xf32>
    %cst_417 = arith.constant dense<0.000000e+00> : vector<8x32xf32>
    %1280 = tpu.matmul %1279, %15, %cst_417 {dimension_numbers = #tpu.dot_dimension_numbers<[1], [0], [0], [1], [0, 0, 1, 1], [], []>} : vector<8x30xf32>, vector<30x32xf32>, vector<8x32xf32> -> vector<8x32xf32>
    %1281 = vector.broadcast %14 : vector<1x32xf32> to vector<8x32xf32>
    %1282 = arith.addf %1280, %1281 : vector<8x32xf32>
    %1283 = arith.addf %1134, %1282 : vector<8x32xf32>
    %1284 = arith.negf %1283 : vector<8x32xf32>
    %1285 = math.exp %1284 : vector<8x32xf32>
    %cst_418 = arith.constant 1.000000e+00 : f32
    %1286 = vector.broadcast %cst_418 : f32 to vector<8x32xf32>
    %1287 = arith.addf %1286, %1285 : vector<8x32xf32>
    %1288 = arith.divf %1286, %1287 : vector<8x32xf32>
    %1289 = math.tanh %1283 : vector<8x32xf32>
    %1290 = arith.addf %1130, %1289 : vector<8x32xf32>
    %1291 = arith.mulf %1288, %1290 : vector<8x32xf32>
    %1292 = math.tanh %1291 : vector<8x32xf32>
    %1293 = arith.mulf %1288, %1292 : vector<8x32xf32>
    %c48_419 = arith.constant 48 : index
    %c0_420 = arith.constant 0 : index
    %1294 = vector.load %arg8[%c48_419, %c0_420] : memref<64x32xf32, #tpu.memory_space<vmem>>, vector<8x32xf32>
    tpu.vector_store %arg8[%c48_419, %c0_420], %1293 {strides = array<i32>} : memref<64x32xf32, #tpu.memory_space<vmem>>, vector<8x32xf32>,
    %c56_421 = arith.constant 56 : index
    %c0_422 = arith.constant 0 : index
    %1295 = vector.load %arg7[%c56_421, %c0_422] : memref<64x32xf32, #tpu.memory_space<vmem>>, vector<8x32xf32>
    %cst_423 = arith.constant dense<0.000000e+00> : vector<8xf32>
    %1296 = vector.multi_reduction <add>, %1293, %cst_423 [1] : vector<8x32xf32> to vector<8xf32>
    %1297 = vector.shape_cast %1296 : vector<8xf32> to vector<8x1xf32>
    %1298 = arith.mulf %1293, %1293 : vector<8x32xf32>
    %cst_424 = arith.constant dense<0.000000e+00> : vector<8xf32>
    %1299 = vector.multi_reduction <add>, %1298, %cst_424 [1] : vector<8x32xf32> to vector<8xf32>
    %1300 = vector.shape_cast %1299 : vector<8xf32> to vector<8x1xf32>
    %cst_425 = arith.constant 3.125000e-02 : f32
    %1301 = vector.broadcast %cst_425 : f32 to vector<8x1xf32>
    %1302 = arith.mulf %1297, %1301 : vector<8x1xf32>
    %cst_426 = arith.constant 3.125000e-02 : f32
    %1303 = vector.broadcast %cst_426 : f32 to vector<8x1xf32>
    %1304 = arith.mulf %1300, %1303 : vector<8x1xf32>
    %1305 = arith.mulf %1302, %1302 : vector<8x1xf32>
    %1306 = arith.subf %1304, %1305 : vector<8x1xf32>
    %cst_427 = arith.constant 0.000000e+00 : f32
    %1307 = vector.broadcast %cst_427 : f32 to vector<8x1xf32>
    %1308 = arith.maximumf %1306, %1307 : vector<8x1xf32>
    %1309 = vector.broadcast %1302 : vector<8x1xf32> to vector<8x32xf32>
    %1310 = arith.subf %1293, %1309 : vector<8x32xf32>
    %cst_428 = arith.constant 9.99999974E-6 : f32
    %1311 = vector.broadcast %cst_428 : f32 to vector<8x1xf32>
    %1312 = arith.addf %1308, %1311 : vector<8x1xf32>
    %1313 = math.rsqrt %1312 : vector<8x1xf32>
    %1314 = vector.broadcast %1313 : vector<8x1xf32> to vector<8x32xf32>
    %1315 = arith.mulf %1310, %1314 : vector<8x32xf32>
    %1316 = vector.broadcast %8 : vector<1x32xf32> to vector<8x32xf32>
    %1317 = arith.mulf %1315, %1316 : vector<8x32xf32>
    %1318 = vector.broadcast %9 : vector<1x32xf32> to vector<8x32xf32>
    %1319 = arith.addf %1317, %1318 : vector<8x32xf32>
    %1320 = arith.negf %1293 : vector<8x32xf32>
    %1321 = math.exp %1320 : vector<8x32xf32>
    %cst_429 = arith.constant 1.000000e+00 : f32
    %1322 = vector.broadcast %cst_429 : f32 to vector<8x32xf32>
    %1323 = arith.addf %1322, %1321 : vector<8x32xf32>
    %1324 = arith.divf %1322, %1323 : vector<8x32xf32>
    %1325 = arith.mulf %1293, %1324 : vector<8x32xf32>
    %cst_430 = arith.constant -2.000000e+00 : f32
    %1326 = vector.broadcast %cst_430 : f32 to vector<8x32xf32>
    %1327 = arith.subf %1319, %1326 : vector<8x32xf32>
    %cst_431 = arith.constant 1.000000e+00 : f32
    %1328 = vector.broadcast %cst_431 : f32 to vector<8x32xf32>
    %1329 = arith.mulf %1327, %1328 : vector<8x32xf32>
    %cst_432 = arith.constant 0.000000e+00 : f32
    %1330 = vector.broadcast %cst_432 : f32 to vector<8x32xf32>
    %1331 = arith.subf %1330, %1329 : vector<8x32xf32>
    %1332 = arith.mulf %1331, %1329 : vector<8x32xf32>
    %1333 = math.exp %1332 : vector<8x32xf32>
    %cst_433 = arith.constant -1.000000e+00 : f32
    %1334 = vector.broadcast %cst_433 : f32 to vector<8x32xf32>
    %1335 = arith.subf %1319, %1334 : vector<8x32xf32>
    %cst_434 = arith.constant 1.000000e+00 : f32
    %1336 = vector.broadcast %cst_434 : f32 to vector<8x32xf32>
    %1337 = arith.mulf %1335, %1336 : vector<8x32xf32>
    %cst_435 = arith.constant 0.000000e+00 : f32
    %1338 = vector.broadcast %cst_435 : f32 to vector<8x32xf32>
    %1339 = arith.subf %1338, %1337 : vector<8x32xf32>
    %1340 = arith.mulf %1339, %1337 : vector<8x32xf32>
    %1341 = math.exp %1340 : vector<8x32xf32>
    %cst_436 = arith.constant 0.000000e+00 : f32
    %1342 = vector.broadcast %cst_436 : f32 to vector<8x32xf32>
    %1343 = arith.subf %1319, %1342 : vector<8x32xf32>
    %cst_437 = arith.constant 1.000000e+00 : f32
    %1344 = vector.broadcast %cst_437 : f32 to vector<8x32xf32>
    %1345 = arith.mulf %1343, %1344 : vector<8x32xf32>
    %cst_438 = arith.constant 0.000000e+00 : f32
    %1346 = vector.broadcast %cst_438 : f32 to vector<8x32xf32>
    %1347 = arith.subf %1346, %1345 : vector<8x32xf32>
    %1348 = arith.mulf %1347, %1345 : vector<8x32xf32>
    %1349 = math.exp %1348 : vector<8x32xf32>
    %cst_439 = arith.constant 1.000000e+00 : f32
    %1350 = vector.broadcast %cst_439 : f32 to vector<8x32xf32>
    %1351 = arith.subf %1319, %1350 : vector<8x32xf32>
    %cst_440 = arith.constant 1.000000e+00 : f32
    %1352 = vector.broadcast %cst_440 : f32 to vector<8x32xf32>
    %1353 = arith.mulf %1351, %1352 : vector<8x32xf32>
    %cst_441 = arith.constant 0.000000e+00 : f32
    %1354 = vector.broadcast %cst_441 : f32 to vector<8x32xf32>
    %1355 = arith.subf %1354, %1353 : vector<8x32xf32>
    %1356 = arith.mulf %1355, %1353 : vector<8x32xf32>
    %1357 = math.exp %1356 : vector<8x32xf32>
    %cst_442 = arith.constant 2.000000e+00 : f32
    %1358 = vector.broadcast %cst_442 : f32 to vector<8x32xf32>
    %1359 = arith.subf %1319, %1358 : vector<8x32xf32>
    %cst_443 = arith.constant 1.000000e+00 : f32
    %1360 = vector.broadcast %cst_443 : f32 to vector<8x32xf32>
    %1361 = arith.mulf %1359, %1360 : vector<8x32xf32>
    %cst_444 = arith.constant 0.000000e+00 : f32
    %1362 = vector.broadcast %cst_444 : f32 to vector<8x32xf32>
    %1363 = arith.subf %1362, %1361 : vector<8x32xf32>
    %1364 = arith.mulf %1363, %1361 : vector<8x32xf32>
    %1365 = math.exp %1364 : vector<8x32xf32>
    %1366 = tpu.concatenate %1325, %1333, %1341, %1349, %1357, %1365 in 1 : vector<8x32xf32>, vector<8x32xf32>, vector<8x32xf32>, vector<8x32xf32>, vector<8x32xf32>, vector<8x32xf32> -> vector<8x192xf32>
    %cst_445 = arith.constant dense<0.000000e+00> : vector<8x5xf32>
    %1367 = tpu.matmul %1366, %11, %cst_445 {dimension_numbers = #tpu.dot_dimension_numbers<[1], [0], [0], [1], [0, 0, 1, 1], [], []>} : vector<8x192xf32>, vector<192x5xf32>, vector<8x5xf32> -> vector<8x5xf32>
    %1368 = vector.broadcast %10 : vector<1x5xf32> to vector<8x5xf32>
    %1369 = arith.addf %1367, %1368 : vector<8x5xf32>
    %cst_446 = arith.constant dense<0.000000e+00> : vector<8xf32>
    %1370 = vector.multi_reduction <add>, %1369, %cst_446 [1] : vector<8x5xf32> to vector<8xf32>
    %1371 = vector.shape_cast %1370 : vector<8xf32> to vector<8x1xf32>
    %1372 = arith.mulf %1369, %1369 : vector<8x5xf32>
    %cst_447 = arith.constant dense<0.000000e+00> : vector<8xf32>
    %1373 = vector.multi_reduction <add>, %1372, %cst_447 [1] : vector<8x5xf32> to vector<8xf32>
    %1374 = vector.shape_cast %1373 : vector<8xf32> to vector<8x1xf32>
    %cst_448 = arith.constant 2.000000e-01 : f32
    %1375 = vector.broadcast %cst_448 : f32 to vector<8x1xf32>
    %1376 = arith.mulf %1371, %1375 : vector<8x1xf32>
    %cst_449 = arith.constant 2.000000e-01 : f32
    %1377 = vector.broadcast %cst_449 : f32 to vector<8x1xf32>
    %1378 = arith.mulf %1374, %1377 : vector<8x1xf32>
    %1379 = arith.mulf %1376, %1376 : vector<8x1xf32>
    %1380 = arith.subf %1378, %1379 : vector<8x1xf32>
    %cst_450 = arith.constant 0.000000e+00 : f32
    %1381 = vector.broadcast %cst_450 : f32 to vector<8x1xf32>
    %1382 = arith.maximumf %1380, %1381 : vector<8x1xf32>
    %1383 = vector.broadcast %1376 : vector<8x1xf32> to vector<8x5xf32>
    %1384 = arith.subf %1369, %1383 : vector<8x5xf32>
    %cst_451 = arith.constant 9.99999974E-6 : f32
    %1385 = vector.broadcast %cst_451 : f32 to vector<8x1xf32>
    %1386 = arith.addf %1382, %1385 : vector<8x1xf32>
    %1387 = math.rsqrt %1386 : vector<8x1xf32>
    %1388 = vector.broadcast %1387 : vector<8x1xf32> to vector<8x5xf32>
    %1389 = arith.mulf %1384, %1388 : vector<8x5xf32>
    %1390 = vector.broadcast %12 : vector<1x5xf32> to vector<8x5xf32>
    %1391 = arith.mulf %1389, %1390 : vector<8x5xf32>
    %1392 = vector.broadcast %13 : vector<1x5xf32> to vector<8x5xf32>
    %1393 = arith.addf %1391, %1392 : vector<8x5xf32>
    %1394 = arith.negf %1369 : vector<8x5xf32>
    %1395 = math.exp %1394 : vector<8x5xf32>
    %cst_452 = arith.constant 1.000000e+00 : f32
    %1396 = vector.broadcast %cst_452 : f32 to vector<8x5xf32>
    %1397 = arith.addf %1396, %1395 : vector<8x5xf32>
    %1398 = arith.divf %1396, %1397 : vector<8x5xf32>
    %1399 = arith.mulf %1369, %1398 : vector<8x5xf32>
    %cst_453 = arith.constant -2.000000e+00 : f32
    %1400 = vector.broadcast %cst_453 : f32 to vector<8x5xf32>
    %1401 = arith.subf %1393, %1400 : vector<8x5xf32>
    %cst_454 = arith.constant 1.000000e+00 : f32
    %1402 = vector.broadcast %cst_454 : f32 to vector<8x5xf32>
    %1403 = arith.mulf %1401, %1402 : vector<8x5xf32>
    %cst_455 = arith.constant 0.000000e+00 : f32
    %1404 = vector.broadcast %cst_455 : f32 to vector<8x5xf32>
    %1405 = arith.subf %1404, %1403 : vector<8x5xf32>
    %1406 = arith.mulf %1405, %1403 : vector<8x5xf32>
    %1407 = math.exp %1406 : vector<8x5xf32>
    %cst_456 = arith.constant -1.000000e+00 : f32
    %1408 = vector.broadcast %cst_456 : f32 to vector<8x5xf32>
    %1409 = arith.subf %1393, %1408 : vector<8x5xf32>
    %cst_457 = arith.constant 1.000000e+00 : f32
    %1410 = vector.broadcast %cst_457 : f32 to vector<8x5xf32>
    %1411 = arith.mulf %1409, %1410 : vector<8x5xf32>
    %cst_458 = arith.constant 0.000000e+00 : f32
    %1412 = vector.broadcast %cst_458 : f32 to vector<8x5xf32>
    %1413 = arith.subf %1412, %1411 : vector<8x5xf32>
    %1414 = arith.mulf %1413, %1411 : vector<8x5xf32>
    %1415 = math.exp %1414 : vector<8x5xf32>
    %cst_459 = arith.constant 0.000000e+00 : f32
    %1416 = vector.broadcast %cst_459 : f32 to vector<8x5xf32>
    %1417 = arith.subf %1393, %1416 : vector<8x5xf32>
    %cst_460 = arith.constant 1.000000e+00 : f32
    %1418 = vector.broadcast %cst_460 : f32 to vector<8x5xf32>
    %1419 = arith.mulf %1417, %1418 : vector<8x5xf32>
    %cst_461 = arith.constant 0.000000e+00 : f32
    %1420 = vector.broadcast %cst_461 : f32 to vector<8x5xf32>
    %1421 = arith.subf %1420, %1419 : vector<8x5xf32>
    %1422 = arith.mulf %1421, %1419 : vector<8x5xf32>
    %1423 = math.exp %1422 : vector<8x5xf32>
    %cst_462 = arith.constant 1.000000e+00 : f32
    %1424 = vector.broadcast %cst_462 : f32 to vector<8x5xf32>
    %1425 = arith.subf %1393, %1424 : vector<8x5xf32>
    %cst_463 = arith.constant 1.000000e+00 : f32
    %1426 = vector.broadcast %cst_463 : f32 to vector<8x5xf32>
    %1427 = arith.mulf %1425, %1426 : vector<8x5xf32>
    %cst_464 = arith.constant 0.000000e+00 : f32
    %1428 = vector.broadcast %cst_464 : f32 to vector<8x5xf32>
    %1429 = arith.subf %1428, %1427 : vector<8x5xf32>
    %1430 = arith.mulf %1429, %1427 : vector<8x5xf32>
    %1431 = math.exp %1430 : vector<8x5xf32>
    %cst_465 = arith.constant 2.000000e+00 : f32
    %1432 = vector.broadcast %cst_465 : f32 to vector<8x5xf32>
    %1433 = arith.subf %1393, %1432 : vector<8x5xf32>
    %cst_466 = arith.constant 1.000000e+00 : f32
    %1434 = vector.broadcast %cst_466 : f32 to vector<8x5xf32>
    %1435 = arith.mulf %1433, %1434 : vector<8x5xf32>
    %cst_467 = arith.constant 0.000000e+00 : f32
    %1436 = vector.broadcast %cst_467 : f32 to vector<8x5xf32>
    %1437 = arith.subf %1436, %1435 : vector<8x5xf32>
    %1438 = arith.mulf %1437, %1435 : vector<8x5xf32>
    %1439 = math.exp %1438 : vector<8x5xf32>
    %1440 = tpu.concatenate %1399, %1407, %1415, %1423, %1431, %1439 in 1 : vector<8x5xf32>, vector<8x5xf32>, vector<8x5xf32>, vector<8x5xf32>, vector<8x5xf32>, vector<8x5xf32> -> vector<8x30xf32>
    %cst_468 = arith.constant dense<0.000000e+00> : vector<8x32xf32>
    %1441 = tpu.matmul %1440, %15, %cst_468 {dimension_numbers = #tpu.dot_dimension_numbers<[1], [0], [0], [1], [0, 0, 1, 1], [], []>} : vector<8x30xf32>, vector<30x32xf32>, vector<8x32xf32> -> vector<8x32xf32>
    %1442 = vector.broadcast %14 : vector<1x32xf32> to vector<8x32xf32>
    %1443 = arith.addf %1441, %1442 : vector<8x32xf32>
    %1444 = arith.addf %1295, %1443 : vector<8x32xf32>
    %1445 = arith.negf %1444 : vector<8x32xf32>
    %1446 = math.exp %1445 : vector<8x32xf32>
    %cst_469 = arith.constant 1.000000e+00 : f32
    %1447 = vector.broadcast %cst_469 : f32 to vector<8x32xf32>
    %1448 = arith.addf %1447, %1446 : vector<8x32xf32>
    %1449 = arith.divf %1447, %1448 : vector<8x32xf32>
    %1450 = math.tanh %1444 : vector<8x32xf32>
    %1451 = arith.addf %1291, %1450 : vector<8x32xf32>
    %1452 = arith.mulf %1449, %1451 : vector<8x32xf32>
    %1453 = math.tanh %1452 : vector<8x32xf32>
    %1454 = arith.mulf %1449, %1453 : vector<8x32xf32>
    %c56_470 = arith.constant 56 : index
    %c0_471 = arith.constant 0 : index
    %1455 = vector.load %arg8[%c56_470, %c0_471] : memref<64x32xf32, #tpu.memory_space<vmem>>, vector<8x32xf32>
    tpu.vector_store %arg8[%c56_470, %c0_471], %1454 {strides = array<i32>} : memref<64x32xf32, #tpu.memory_space<vmem>>, vector<8x32xf32>,
    %c0_472 = arith.constant 0 : index
    %c0_473 = arith.constant 0 : index
    %1456 = vector.load %arg5[%c0_472, %c0_473] : memref<8x32xf32, #tpu.memory_space<vmem>>, vector<8x32xf32>
    tpu.vector_store %arg5[%c0_472, %c0_473], %1454 {strides = array<i32>} : memref<8x32xf32, #tpu.memory_space<vmem>>, vector<8x32xf32>,
    %c0_474 = arith.constant 0 : index
    %c0_475 = arith.constant 0 : index
    %1457 = vector.load %arg6[%c0_474, %c0_475] : memref<8x32xf32, #tpu.memory_space<vmem>>, vector<8x32xf32>
    tpu.vector_store %arg6[%c0_474, %c0_475], %1452 {strides = array<i32>} : memref<8x32xf32, #tpu.memory_space<vmem>>, vector<8x32xf32>,
    %c0_476 = arith.constant 0 : index
    %c0_477 = arith.constant 0 : index
    %1458 = vector.load %arg3[%c0_476, %c0_477] : memref<33x128xf32, #tpu.memory_space<vmem>>, vector<32x128xf32>
    %c32_478 = arith.constant 32 : index
    %c0_479 = arith.constant 0 : index
    %1459 = vector.load %arg3[%c32_478, %c0_479] : memref<33x128xf32, #tpu.memory_space<vmem>>, vector<1x128xf32>
    %c0_480 = arith.constant 0 : index
    %c0_481 = arith.constant 0 : index
    %1460 = vector.load %arg8[%c0_480, %c0_481] : memref<64x32xf32, #tpu.memory_space<vmem>>, vector<64x32xf32>
    %cst_482 = arith.constant dense<0.000000e+00> : vector<64x128xf32>
    %1461 = tpu.matmul %1460, %1458, %cst_482 {dimension_numbers = #tpu.dot_dimension_numbers<[1], [0], [0], [1], [0, 0, 1, 1], [], []>} : vector<64x32xf32>, vector<32x128xf32>, vector<64x128xf32> -> vector<64x128xf32>
    %1462 = vector.broadcast %1459 : vector<1x128xf32> to vector<64x128xf32>
    %1463 = arith.addf %1461, %1462 : vector<64x128xf32>
    %c0_483 = arith.constant 0 : index
    %c0_484 = arith.constant 0 : index
    %1464 = vector.load %arg4[%c0_483, %c0_484] : memref<64x128xf32, #tpu.memory_space<vmem>>, vector<64x128xf32>
    tpu.vector_store %arg4[%c0_483, %c0_484], %1463 {strides = array<i32>} : memref<64x128xf32, #tpu.memory_space<vmem>>, vector<64x128xf32>,
    return
  }
}

</mosaic_0001>

<bundles_post_ra>
// kernel: kan_lstm_forward.1
= control target key start
LH: loop header
LB: loop body
LE: loop exit
PB: predicated region body
PF: predicated region fallthrough
CT: control target
= control target key end

     0   :  { %vm75_vm0 = vcmask 31744   ;;  %v5600_v32 = vmov 0.0   ;;  %s5601_s17 = smov 12   ;;  %s5602_s18 = smov 4   ;;  %vm644_vm1 = vcmask 64512   ;;  %vm653_vm2 = vcmask 97280   ;;  %s7179_s0 = inlined_call_operand.vmem [shape: f32[64,4], index: 0, kind: input, shape index: {}]   ;;  %s7180_s2 = inlined_call_operand.vmem [shape: f32[12,32], index: 2, kind: input, shape index: {}]   ;;  %s7181_s1 = inlined_call_operand.vmem [shape: f32[280,32], index: 1, kind: input, shape index: {}]   ;;  %s7182_s3 = inlined_call_operand.vmem [shape: f32[33,128], index: 3, kind: input, shape index: {}]   ;;  %s7183_s4 = inlined_call_operand.vmem [shape: f32[64,128], index: 4, kind: output, shape index: {0}]   ;;  %s7184_s6 = inlined_call_operand.vmem [shape: f32[8,32], index: 6, kind: output, shape index: {2}]   ;;  %s7185_s5 = inlined_call_operand.vmem [shape: f32[8,32], index: 5, kind: output, shape index: {1}]  }
   0x1   :  { %v5654_v0 = vld [vmem:[%s7179_s0] sm:$0xff]  ;;  %v5659_v1 = vld [vmem:[%s7179_s0 + $0x8] sm:$0xff]  ;;  %v5673_v7 = vld [vmem:[%s7179_s0 + $0x10] sm:$0xff]  ;;  %s5603_s19 = smov 8   ;;  %s5604_s20 = smov 16   ;;  %vm662_vm3 = vcmask 130048  }
   0x2   :  { %v76_v2 = vsel %vm75_vm0, %v5654_v0, 0.0  ;;  %v100_v3 = vmul.f32 %v5654_v0, %v5654_v0  ;;  %v101_v4 = vmul.f32 %v5659_v1, %v5659_v1  ;;  %v79_v6 = vsel %vm75_vm0, %v5659_v1, 0.0  ;;  %v5679_v9 = vld [vmem:[%s7179_s0 + $0x18] sm:$0xff]  ;;  %v5693_v15 = vld [vmem:[%s7179_s0 + $0x20] sm:$0xff]  ;;  %v5699_v17 = vld [vmem:[%s7179_s0 + $0x28] sm:$0xff]  ;;  %s5605_s21 = smov 20  }
   0x3   :  { %77 = vadd.xlane.f32.xlu0 %v76_v2  ;;  %v82_v10 = vsel %vm75_vm0, %v5673_v7, 0.0  ;;  %v102_v11 = vmul.f32 %v5673_v7, %v5673_v7  ;;  %v85_v12 = vsel %vm75_vm0, %v5679_v9, 0.0  ;;  %v103_v13 = vmul.f32 %v5679_v9, %v5679_v9  ;;  %v5713_v23 = vld [vmem:[%s7179_s0 + $0x30] sm:$0xff]  ;;  %v5719_v25 = vld [vmem:[%s7179_s0 + $0x38] sm:$0xff]  ;;  %s5607_s8 = smov 64   ;;  %s5608_s9 = smov 96  }
   0x4   :  { %v108_v5 = vsel %vm75_vm0, %v100_v3, 0.0  ;;  %v111_v8 = vsel %vm75_vm0, %v101_v4, 0.0  ;;  %v88_v18 = vsel %vm75_vm0, %v5693_v15, 0.0  ;;  %v104_v19 = vmul.f32 %v5693_v15, %v5693_v15  ;;  %s5609_s10 = smov 32   ;;  %s5610_s22 = smov 15  }
   0x5   :  { %109 = vadd.xlane.f32.xlu1 %v108_v5  ;;  %v114_v14 = vsel %vm75_vm0, %v102_v11, 0.0  ;;  %v117_v16 = vsel %vm75_vm0, %v103_v13, 0.0  ;;  %v91_v20 = vsel %vm75_vm0, %v5699_v17, 0.0  ;;  %v105_v21 = vmul.f32 %v5699_v17, %v5699_v17  ;;  %v5748_v11 = vld [vmem:[%s7180_s2] ss:$0 sm:$0xff]  ;;  %s5611_s23 = smov 5  }
   0x6   :  { %v120_v22 = vsel %vm75_vm0, %v104_v19, 0.0  ;;  %v94_v26 = vsel %vm75_vm0, %v5713_v23, 0.0  ;;  %v106_v27 = vmul.f32 %v5713_v23, %v5713_v23  ;;  %v97_v28 = vsel %vm75_vm0, %v5719_v25, 0.0  ;;  %s5612_s24 = smov 10   ;;  %s5613_s25 = smov 25  }
   0x7   :  { %80 = vadd.xlane.f32.xlu0 %v79_v6  ;;  %v123_v24 = vsel %vm75_vm0, %v105_v21, 0.0  ;;  %v107_v29 = vmul.f32 %v5719_v25, %v5719_v25  ;;  %vm671_vm4 = vcmask 162816   ;;  %vm684_vm5 = vcmask 195584  }
   0x8   :  { %v126_v30 = vsel %vm75_vm0, %v106_v27, 0.0  ;;  %vm1556_vm6 = vcmask 261120   ;;  %vm1626_vm7 = vcmask 523264   ;;  %vm1628_vm8 = vcmask 785408  }
   0x9   :  { %112 = vadd.xlane.f32.xlu1 %v111_v8  ;;  %v129_v31 = vsel %vm75_vm0, %v107_v29, 0.0  ;;  %vm814_vm9 = vcmask 39936   ;;  %vm1447_vm10 = vcmask 1045504   ;;  %vm5614_vm11 = vmmov 1  }
   0xa   :  { %vm6387_vm12 = vmpackc.low %vm1447_vm10, %vm5614_vm11  ;;  %vm1383_vm13 = vcmask 80896   ;;  %vm1392_vm14 = vcmask 121856   ;;  %vm1409_vm15 = vcmask 203776  }
   0xb   :  { %83 = vadd.xlane.f32.xlu0 %v82_v10 }
   0xd   :  { %86 = vadd.xlane.f32.xlu1 %v85_v12 }
   0xf   :  { %115 = vadd.xlane.f32.xlu0 %v114_v14 }
  0x11   :  { %118 = vadd.xlane.f32.xlu1 %v117_v16 }
  0x13   :  { %89 = vadd.xlane.f32.xlu0 %v88_v18 }
  0x15   :  { %92 = vadd.xlane.f32.xlu1 %v91_v20  ;;  %v5757_v20 = vld [vmem:[%s7180_s2 + $0x1] ss:$0 sm:$0xff] }
  0x17   :  { %121 = vadd.xlane.f32.xlu0 %v120_v22 }
  0x19   :  { %124 = vadd.xlane.f32.xlu1 %v123_v24 }
  0x1b   :  { %95 = vadd.xlane.f32.xlu0 %v94_v26 }
  0x1d   :  { %98 = vadd.xlane.f32.xlu1 %v97_v28 }
  0x1f   :  { %127 = vadd.xlane.f32.xlu0 %v126_v30 }
  0x21   :  { %130 = vadd.xlane.f32.xlu1 %v129_v31 }
  0x23   :  { %1565 = vadd.xlane.f32.xlu0 %v5600_v32 }
  0x90   :  { %v78_v33 = vpop.xlane.xlu0 %77 }
  0x91   :  { %v132_v34 = vmul.f32 0.25, %v78_v33 }
  0x92   :  { %v110_v35 = vpop.xlane.xlu1 %109 }
  0x93   :  { %v148_v36 = vmul.f32 %v132_v34, %v132_v34  ;;  %v140_v37 = vmul.f32 0.25, %v110_v35  ;;  %v172_v5 = vsub.f32 %v5654_v0, %v132_v34 }
  0x94   :  { %v81_v38 = vpop.xlane.xlu0 %80 }
  0x95   :  { %v156_v39 = vsub.f32 %v140_v37, %v148_v36  ;;  %v133_v40 = vmul.f32 0.25, %v81_v38 }
  0x96   :  { %v113_v41 = vpop.xlane.xlu1 %112 }
  0x97   :  { %v164_v42 = vmax.f32 %v156_v39, 0.0  ;;  %v149_v43 = vmul.f32 %v133_v40, %v133_v40  ;;  %v141_v44 = vmul.f32 0.25, %v113_v41  ;;  %v173_v26 = vsub.f32 %v5659_v1, %v133_v40 }
  0x98   :  { %v84_v45 = vpop.xlane.xlu0 %83 }
  0x99   :  { %v180_v46 = vadd.f32 1e-05, %v164_v42  ;;  %v157_v47 = vsub.f32 %v141_v44, %v149_v43  ;;  %v5732_v48 = vmul.f32 0.25, %v84_v45 }
  0x9a   :  { %v87_v49 = vpop.xlane.xlu1 %86 }
  0x9b   :  { %5005 = vrsqrt.f32 %v180_v46  ;;  %v165_v50 = vmax.f32 %v157_v47, 0.0  ;;  %v5734_v51 = vmul.f32 0.25, %v87_v49  ;;  %v150_v54 = vmul.f32 %v5732_v48, %v5732_v48 }
  0x9c   :  { %v116_v52 = vpop.xlane.xlu0 %115  ;;  %v174_v46 = vsub.f32 %v5673_v7, %v5732_v48 }
  0x9d   :  { %v181_v53 = vadd.f32 1e-05, %v165_v50  ;;  %v142_v55 = vmul.f32 0.25, %v116_v52  ;;  %v151_v56 = vmul.f32 %v5734_v51, %v5734_v51 }
  0x9e   :  { %v119_v57 = vpop.xlane.xlu1 %118 }
  0x9f   :  { %5007 = vrsqrt.f32 %v181_v53  ;;  %v158_v58 = vsub.f32 %v142_v55, %v150_v54  ;;  %v143_v59 = vmul.f32 0.25, %v119_v57  ;;  %v175_v55 = vsub.f32 %v5679_v9, %v5734_v51 }
  0xa0   :  { %v90_v60 = vpop.xlane.xlu0 %89 }
  0xa1   :  { %v166_v61 = vmax.f32 %v158_v58, 0.0  ;;  %v159_v62 = vsub.f32 %v143_v59, %v151_v56  ;;  %v5740_v63 = vmul.f32 0.25, %v90_v60 }
  0xa2   :  { %v93_v2 = vpop.xlane.xlu1 %92 }
  0xa3   :  { %v182_v3 = vadd.f32 1e-05, %v166_v61  ;;  %v167_v4 = vmax.f32 %v159_v62, 0.0  ;;  %v5743_v6 = vmul.f32 0.25, %v93_v2  ;;  %v152_v13 = vmul.f32 %v5740_v63, %v5740_v63 }
  0xa4   :  { %v122_v8 = vpop.xlane.xlu0 %121 }
  0xa5   :  { %v5006_v10 = vpop.eup %5005  ;;  %5009 = vrsqrt.f32 %v182_v3  ;;  %v183_v12 = vadd.f32 1e-05, %v167_v4  ;;  %v144_v14 = vmul.f32 0.25, %v122_v8  ;;  %v153_v18 = vmul.f32 %v5743_v6, %v5743_v6 }
  0xa6   :  { %v196_v16 = vmul.f32 %v5006_v10, %v172_v5  ;;  %v125_v19 = vpop.xlane.xlu1 %124 }
  0xa7   :  { %5011 = vrsqrt.f32 %v183_v12  ;;  %v160_v21 = vsub.f32 %v144_v14, %v152_v13  ;;  %v145_v22 = vmul.f32 0.25, %v125_v19  ;;  %v176_v13 = vsub.f32 %v5693_v15, %v5740_v63 }
  0xa8   :  { %v208_v24 = vmul.f32 %v5748_v11, %v196_v16  ;;  %v96_v27 = vpop.xlane.xlu0 %95 }
  0xa9   :  { %v5008_v28 = vpop.eup %5007  ;;  %v168_v29 = vmax.f32 %v160_v21, 0.0  ;;  %v161_v30 = vsub.f32 %v145_v22, %v153_v18  ;;  %v5761_v31 = vmul.f32 0.25, %v96_v27  ;;  %v177_v18 = vsub.f32 %v5699_v17, %v5743_v6 }
  0xaa   :  { %v5764_v33 = vadd.f32 %v5757_v20, %v208_v24  ;;  %v197_v34 = vmul.f32 %v5008_v28, %v173_v26  ;;  %v99_v35 = vpop.xlane.xlu1 %98 }
  0xab   :  { %v184_v36 = vadd.f32 1e-05, %v168_v29  ;;  %v169_v37 = vmax.f32 %v161_v30, 0.0  ;;  %v5767_v39 = vmul.f32 0.25, %v99_v35  ;;  %v154_v43 = vmul.f32 %v5761_v31, %v5761_v31 }
  0xac   :  { %v209_v38 = vmul.f32 %v5748_v11, %v197_v34  ;;  %v128_v41 = vpop.xlane.xlu0 %127  ;;  %v364_v40 = vsub.f32 0.0, %v5764_v33  ;;  %v178_v35 = vsub.f32 %v5713_v23, %v5761_v31 }
  0xad   :  { %5013 = vrsqrt.f32 %v184_v36  ;;  %v185_v42 = vadd.f32 1e-05, %v169_v37  ;;  %v146_v44 = vmul.f32 0.25, %v128_v41  ;;  %v155_v47 = vmul.f32 %v5767_v39, %v5767_v39 }
  0xae   :  { %v5773_v45 = vadd.f32 %v5757_v20, %v209_v38  ;;  %v131_v49 = vpop.xlane.xlu1 %130  ;;  %v372_v50 = vmul.f32 %v364_v40, %v5764_v33  ;;  %v4183_v38 = vadd.f32 2.0, %v5764_v33  ;;  %v179_v40 = vsub.f32 %v5719_v25, %v5767_v39 }
  0xaf   :  { %v5010_v52 = vpop.eup %5009  ;;  %5015 = vrsqrt.f32 %v185_v42  ;;  %v162_v53 = vsub.f32 %v146_v44, %v154_v43  ;;  %v147_v54 = vmul.f32 0.25, %v131_v49 }
  0xb0   :  { %v198_v56 = vmul.f32 %v5010_v52, %v174_v46  ;;  %v380_v57 = vmul.f32 1.442695, %v372_v50  ;;  %v365_v58 = vsub.f32 0.0, %v5773_v45  ;;  %v4184_v23 = vadd.f32 2.0, %v5773_v45 }
  0xb1   :  { %v5012_v59 = vpop.eup %5011  ;;  %v170_v60 = vmax.f32 %v162_v53, 0.0  ;;  %v163_v48 = vsub.f32 %v147_v54, %v155_v47  ;;  %v292_v52 = vsub.f32 0.0, %v4183_v38  ;;  %v4191_v53 = vadd.f32 1.0, %v5764_v33 }
  0xb2   :  { %v210_v61 = vmul.f32 %v5748_v11, %v198_v56  ;;  %v199_v62 = vmul.f32 %v5012_v59, %v175_v55  ;;  %5017 = vpow2.f32 %v380_v57  ;;  %v373_v2 = vmul.f32 %v365_v58, %v5773_v45 }
  0xb3   :  { %v186_v3 = vadd.f32 1e-05, %v170_v60  ;;  %v171_v4 = vmax.f32 %v163_v48, 0.0  ;;  %v293_v55 = vsub.f32 0.0, %v4184_v23  ;;  %v4200_v59 = vadd.f32 -1.0, %v5773_v45 }
  0xb4   :  { %v5786_v5 = vadd.f32 %v5757_v20, %v210_v61  ;;  %v211_v51 = vmul.f32 %v5748_v11, %v199_v62  ;;  %v382_v8 = vmul.f32 1.442695, %v373_v2  ;;  %v300_v60 = vmul.f32 %v4183_v38, %v292_v52 }
  0xb5   :  { %5019 = vrsqrt.f32 %v186_v3  ;;  %v187_v10 = vadd.f32 1e-05, %v171_v4  ;;  %v332_v48 = vsub.f32 0.0, %v4191_v53  ;;  %v4192_v2 = vadd.f32 1.0, %v5773_v45 }
  0xb6   :  { %v5790_v12 = vadd.f32 %v5757_v20, %v211_v51  ;;  %5021 = vpow2.f32 %v382_v8  ;;  %v366_v14 = vsub.f32 0.0, %v5786_v5  ;;  %v405_v51 = vsub.f32 0.0, %v4200_v59 }
  0xb7   :  { %v5014_v16 = vpop.eup %5013  ;;  %5023 = vrsqrt.f32 %v187_v10  ;;  %v4208_v8 = vadd.f32 -2.0, %v5773_v45  ;;  %v308_v10 = vmul.f32 1.442695, %v300_v60 }
  0xb8   :  { %v200_v19 = vmul.f32 %v5014_v16, %v176_v13  ;;  %v374_v21 = vmul.f32 %v366_v14, %v5786_v5  ;;  %v367_v22 = vsub.f32 0.0, %v5790_v12  ;;  %v340_v13 = vmul.f32 %v4191_v53, %v332_v48 }
  0xb9   :  { %v5016_v24 = vpop.eup %5015  ;;  %v333_v16 = vsub.f32 0.0, %v4192_v2  ;;  %v4209_v48 = vadd.f32 -2.0, %v5786_v5 }
  0xba   :  { %v212_v26 = vmul.f32 %v5748_v11, %v200_v19  ;;  %v201_v27 = vmul.f32 %v5016_v24, %v177_v18  ;;  %v384_v28 = vmul.f32 1.442695, %v374_v21  ;;  %v375_v63 = vmul.f32 %v367_v22, %v5790_v12  ;;  %v1566_v19 = vpop.xlane.xlu0 %1565 }
  0xbb   :  { %v4199_v18 = vadd.f32 -1.0, %v5764_v33  ;;  %v4186_v21 = vadd.f32 2.0, %v5790_v12 }
  0xbc   :  { %v5018_v29 = vpop.eup %5017  ;;  %v5802_v30 = vadd.f32 %v5757_v20, %v212_v26  ;;  %v213_v34 = vmul.f32 %v5748_v11, %v201_v27  ;;  %5025 = vpow2.f32 %v384_v28  ;;  %v386_v17 = vmul.f32 1.442695, %v375_v63 }
  0xbd   :  { %548 = vrot.lane.b32.xlu1 %v5018_v29, %s5601_s17  ;;  %v413_v26 = vmul.f32 %v4200_v59, %v405_v51  ;;  %v445_v27 = vsub.f32 0.0, %v4208_v8  ;;  %v348_v28 = vmul.f32 1.442695, %v340_v13  ;;  %v5841_v63 = vmul.f32 0.03125, %v1566_v19 }
  0xbe   :  { %v5807_v6 = vadd.f32 %v5757_v20, %v213_v34  ;;  %5027 = vpow2.f32 %v386_v17  ;;  %v368_v36 = vsub.f32 0.0, %v5802_v30  ;;  %v341_v29 = vmul.f32 %v4192_v2, %v333_v16 }
  0xbf   :  { %v5020_v37 = vpop.eup %5019  ;;  %v404_v34 = vsub.f32 0.0, %v4199_v18  ;;  %v4207_v17 = vadd.f32 -2.0, %v5764_v33  ;;  %v453_v38 = vmul.f32 %v4208_v8, %v445_v27  ;;  %v4195_v13 = vadd.f32 1.0, %v5802_v30 }
  0xc0   :  { %v5022_v41 = vpop.eup %5021  ;;  %v202_v42 = vmul.f32 %v5020_v37, %v178_v35  ;;  %v376_v43 = vmul.f32 %v368_v36, %v5802_v30  ;;  %v369_v44 = vsub.f32 0.0, %v5807_v6  ;;  %v295_v35 = vsub.f32 0.0, %v4186_v21 }
  0xc1   :  { %v5024_v46 = vpop.eup %5023  ;;  %550 = vrot.lane.b32.xlu0 %v5022_v41, %s5601_s17  ;;  %v4194_v36 = vadd.f32 1.0, %v5790_v12  ;;  %v422_v37 = vmul.f32 1.442695, %v413_v26  ;;  %v4185_v41 = vadd.f32 2.0, %v5786_v5  ;;  %v336_v27 = vsub.f32 0.0, %v4195_v13 }
  0xc2   :  { %v214_v31 = vmul.f32 %v5748_v11, %v202_v42  ;;  %v203_v47 = vmul.f32 %v5024_v46, %v179_v40  ;;  %v388_v49 = vmul.f32 1.442695, %v376_v43  ;;  %v377_v50 = vmul.f32 %v369_v44, %v5807_v6 }
  0xc3   :  { %v1568_v40 = vmul.f32 %v5841_v63, %v5841_v63  ;;  %v350_v42 = vmul.f32 1.442695, %v341_v29  ;;  %v412_v43 = vmul.f32 %v4199_v18, %v404_v34  ;;  %v444_v44 = vsub.f32 0.0, %v4207_v17 }
  0xc4   :  { %v5823_v25 = vadd.f32 %v5757_v20, %v214_v31  ;;  %v215_v39 = vmul.f32 %v5748_v11, %v203_v47  ;;  %5029 = vpow2.f32 %v388_v49  ;;  %v390_v54 = vmul.f32 1.442695, %v377_v50 }
  0xc5   :  { %v303_v46 = vmul.f32 %v4186_v21, %v295_v35  ;;  %v462_v31 = vmul.f32 1.442695, %v453_v38  ;;  %v294_v47 = vsub.f32 0.0, %v4185_v41  ;;  %v4187_v49 = vadd.f32 2.0, %v5802_v30 }
  0xc6   :  { %v5026_v56 = vpop.eup %5025  ;;  %v5827_v57 = vadd.f32 %v5757_v20, %v215_v39  ;;  %5031 = vpow2.f32 %v390_v54  ;;  %v370_v58 = vsub.f32 0.0, %v5823_v25  ;;  %v301_v20 = vmul.f32 %v4184_v23, %v293_v55 }
  0xc7   :  { %552 = vrot.lane.b32.xlu1 %v5026_v56, %s5601_s17  ;;  %v335_v23 = vsub.f32 0.0, %v4194_v36  ;;  %v1569_v50 = vsub.f32 %v5841_v63, %v1568_v40  ;;  %v420_v53 = vmul.f32 1.442695, %v412_v43  ;;  %v452_v39 = vmul.f32 %v4207_v17, %v444_v44 }
  0xc8   :  { %v5028_v61 = vpop.eup %5027  ;;  %v378_v62 = vmul.f32 %v370_v58, %v5823_v25  ;;  %v371_v11 = vsub.f32 0.0, %v5827_v57  ;;  %v310_v24 = vmul.f32 1.442695, %v301_v20  ;;  %v4193_v54 = vadd.f32 1.0, %v5786_v5 }
  0xc9   :  { %554 = vrot.lane.b32.xlu0 %v5028_v61, %s5601_s17  ;;  %v314_v55 = vmul.f32 1.442695, %v303_v46  ;;  %v343_v56 = vmul.f32 %v4194_v36, %v335_v23  ;;  %v302_v59 = vmul.f32 %v4185_v41, %v294_v47  ;;  %v296_v60 = vsub.f32 0.0, %v4187_v49 }
  0xca   :  { %v392_v3 = vmul.f32 1.442695, %v378_v62  ;;  %v379_v4 = vmul.f32 %v371_v11, %v5827_v57  ;;  %v1570_v61 = vmax.f32 %v1569_v50, 0.0  ;;  %v460_v11 = vmul.f32 1.442695, %v452_v39  ;;  %v23_v50 = vld [vmem:[%s7181_s1] sm:$0xff] }
  0xcb   :  { %v334_v2 = vsub.f32 0.0, %v4193_v54  ;;  %v4201_v20 = vadd.f32 -1.0, %v5786_v5  ;;  %v312_v51 = vmul.f32 1.442695, %v302_v59  ;;  %v304_v8 = vmul.f32 %v4187_v49, %v296_v60 }
  0xcc   :  { %5033 = vpow2.f32 %v392_v3  ;;  %v394_v14 = vmul.f32 1.442695, %v379_v4  ;;  %v354_v3 = vmul.f32 1.442695, %v343_v56  ;;  %v4202_v5 = vadd.f32 -1.0, %v5790_v12 }
  0xcd   :  { %v342_v18 = vmul.f32 %v4193_v54, %v334_v2  ;;  %v406_v19 = vsub.f32 0.0, %v4201_v20  ;;  %v4196_v21 = vadd.f32 1.0, %v5807_v6  ;;  %v4188_v17 = vadd.f32 2.0, %v5807_v6 }
  0xce   :  { %v5030_v22 = vpop.eup %5029  ;;  %5035 = vpow2.f32 %v394_v14  ;;  %v1572_v14 = vadd.f32 1e-05, %v1570_v61  ;;  %v407_v34 = vsub.f32 0.0, %v4202_v5  ;;  %v344_v38 = vmul.f32 %v4195_v13, %v336_v27  ;;  %v4277_v27 = vld [vmem:[%s7180_s2 + $0x5] ss:$0 sm:$0xff] }
  0xcf   :  { %556 = vrot.lane.b32.xlu1 %v5030_v22, %s5601_s17  ;;  %5037 = vpow2.f32 %v308_v10  ;;  %v446_v10 = vsub.f32 0.0, %v4209_v48  ;;  %v414_v29 = vmul.f32 %v4201_v20, %v406_v19  ;;  %v337_v35 = vsub.f32 0.0, %v4196_v21 }
  0xd0   :  { %v5032_v45 = vpop.eup %5031  ;;  %5039 = vpow2.f32 %v310_v24  ;;  %v316_v24 = vmul.f32 1.442695, %v304_v8  ;;  %v4189_v41 = vadd.f32 2.0, %v5823_v25  ;;  %v415_v44 = vmul.f32 %v4202_v5, %v407_v34  ;;  %v4276_v8 = vld [vmem:[%s7180_s2 + $0x4] ss:$0 sm:$0xff] }
  0xd1   :  { %558 = vrot.lane.b32.xlu0 %v5032_v45, %s5601_s17  ;;  %5041 = vpow2.f32 %v348_v28  ;;  %v454_v26 = vmul.f32 %v4209_v48, %v446_v10  ;;  %v352_v45 = vmul.f32 1.442695, %v342_v18  ;;  %v424_v43 = vmul.f32 1.442695, %v414_v29 }
  0xd2   :  { %5043 = vpow2.f32 %v422_v37  ;;  %v297_v46 = vsub.f32 0.0, %v4188_v17  ;;  %v345_v23 = vmul.f32 %v4196_v21, %v337_v35  ;;  %v298_v47 = vsub.f32 0.0, %v4189_v41 }
  0xd3   :  { %5045 = vpow2.f32 %v350_v42  ;;  %v464_v37 = vmul.f32 1.442695, %v454_v26  ;;  %v4210_v42 = vadd.f32 -2.0, %v5790_v12  ;;  %v4211_v49 = vadd.f32 -2.0, %v5802_v30  ;;  %v24_v12 = vld [vmem:[%s7181_s1 + $0x8] sm:$0xff] }
  0xd4   :  { %5047 = vpow2.f32 %v462_v31  ;;  %v356_v31 = vmul.f32 1.442695, %v344_v38  ;;  %v4203_v39 = vadd.f32 -1.0, %v5802_v30  ;;  %v426_v56 = vmul.f32 1.442695, %v415_v44  ;;  %v25_v30 = vld [vmem:[%s7181_s1 + $0x10] sm:$0xff] }
  0xd5   :  { %5049 = vpow2.f32 %v420_v53  ;;  %v447_v53 = vsub.f32 0.0, %v4210_v42  ;;  %v358_v60 = vmul.f32 1.442695, %v345_v23  ;;  %v4197_v48 = vadd.f32 1.0, %v5823_v25 }
  0xd6   :  { %v5034_v33 = vpop.eup %5033  ;;  %5051 = vpow2.f32 %v314_v55  ;;  %v1571_v55 = vsub.f32 0.0, %v5841_v63  ;;  %v4623_v61 = vpack.c.bf16 %v24_v12, %v23_v50  ;;  %v408_v2 = vsub.f32 0.0, %v4203_v39 }
  0xd7   :  { %560 = vrot.lane.b32.xlu1 %v5034_v33, %s5601_s17  ;;  %5053 = vpow2.f32 %v460_v11  ;;  %v448_v11 = vsub.f32 0.0, %v4211_v49  ;;  %v455_v63 = vmul.f32 %v4210_v42, %v447_v53  ;;  %v338_v10 = vsub.f32 0.0, %v4197_v48 }
  0xd8   :  { %v5036_v52 = vpop.eup %5035  ;;  %5055 = vpow2.f32 %v354_v3  ;;  %4624 = vmatprep.subr.bf16.mxu0 %v4623_v61  ;;  %v4198_v18 = vadd.f32 1.0, %v5827_v57  ;;  %v416_v5 = vmul.f32 %v4203_v39, %v408_v2  ;;  %v4190_v26 = vadd.f32 2.0, %v5827_v57 }
  0xd9   :  { %562 = vrot.lane.b32.xlu0 %v5036_v52, %s5601_s17  ;;  %v5038_v58 = vpop.eup %5037  ;;  %5057 = vpow2.f32 %v312_v51  ;;  %v4204_v51 = vadd.f32 -1.0, %v5807_v6  ;;  %4626 = vmatpush3.bf16.msra.mxu0 %v4623_v61  ;;  %v466_v19 = vmul.f32 1.442695, %v455_v63  ;;  %v4206_v35 = vadd.f32 -1.0, %v5827_v57 }
  0xda   :  { %v5040_v62 = vpop.eup %5039  ;;  %5059 = vrsqrt.f32 %v1572_v14  ;;  %4481 = vmatprep.subr.mxu0 %v25_v30  ;;  %v4212_v42 = vadd.f32 -2.0, %v5807_v6 }
  0xdb   :  { %484 = vrot.lane.b32.xlu1 %v5038_v58, %s5602_s18  ;;  %v5042_v4 = vpop.eup %5041  ;;  %5061 = vpow2.f32 %v316_v24  ;;  %v305_v58 = vmul.f32 %v4188_v17, %v297_v46  ;;  %v409_v24 = vsub.f32 0.0, %v4204_v51  ;;  %v339_v17 = vsub.f32 0.0, %v4198_v18 }
  0xdc   :  { %v5044_v16 = vpop.eup %5043  ;;  %5063 = vpow2.f32 %v352_v45  ;;  %v5606_v45 = vmov 0.0|0.0   ;;  %v411_v23 = vsub.f32 0.0, %v4206_v35  ;;  %v449_v12 = vsub.f32 0.0, %v4212_v42 }
  0xdd   :  { %486 = vrot.lane.b32.xlu0 %v5040_v62, %s5602_s18  ;;  %v5046_v22 = vpop.eup %5045  ;;  %5065 = vpow2.f32 %v464_v37  ;;  %v306_v62 = vmul.f32 %v4189_v41, %v298_v47  ;;  %4482 = vmatpush3.msra.mxu0 %v25_v30  ;;  %v417_v41 = vmul.f32 %v4204_v51, %v409_v24  ;;  %v347_v46 = vmul.f32 %v4198_v18, %v339_v17 }
  0xde   :  { %v5048_v28 = vpop.eup %5047  ;;  %5067 = vpow2.f32 %v424_v43  ;;  %4637 = vmatprep.subr.bf16.mxu0 %v5606_v45  ;;  %v4205_v47 = vadd.f32 -1.0, %v5823_v25  ;;  %v419_v39 = vmul.f32 %v4206_v35, %v411_v23  ;;  %v4176_v23 = vmul.f32 -1.442695, %v5659_v1 }
  0xdf   :  { %516 = vrot.lane.b32.xlu1 %v5042_v4, %s5603_s19  ;;  %v5050_v36 = vpop.eup %5049  ;;  %5069 = vpow2.f32 %v356_v31  ;;  %v318_v4 = vmul.f32 1.442695, %v305_v58  ;;  %v320_v14 = vmul.f32 1.442695, %v306_v62  ;;  %v362_v53 = vmul.f32 1.442695, %v347_v46 }
  0xe0   :  { %v5052_v40 = vpop.eup %5051  ;;  %5071 = vpow2.f32 %v426_v56  ;;  %v434_v61 = vmul.f32 1.442695, %v419_v39 }
  0xe1   :  { %582 = vrot.lane.b32.xlu0 %v5044_v16, %s5604_s20  ;;  %v5054_v33 = vpop.eup %5053  ;;  %5073 = vpow2.f32 %v358_v60  ;;  %v456_v16 = vmul.f32 %v4211_v49, %v448_v11  ;;  %v430_v49 = vmul.f32 1.442695, %v417_v41 }
  0xe2   :  { %v5056_v52 = vpop.eup %5055  ;;  %5075 = vpow2.f32 %v318_v4 }
  0xe3   :  { %518 = vrot.lane.b32.xlu1 %v5046_v22, %s5603_s19  ;;  %v5058_v54 = vpop.eup %5057  ;;  %5077 = vpow2.f32 %v320_v14  ;;  %v468_v34 = vmul.f32 1.442695, %v456_v16 }
  0xe4   :  { %v5060_v59 = vpop.eup %5059  ;;  %5079 = vpow2.f32 %v466_v19 }
  0xe5   :  { %614 = vrot.lane.b32.xlu0 %v5048_v28, %s5605_s21  ;;  %v5062_v20 = vpop.eup %5061  ;;  %v1574_v3 = vmul.f32 %v5060_v59, %v1571_v55  ;;  %v346_v28 = vmul.f32 %v4197_v48, %v338_v10  ;;  %5081 = vpow2.f32 %v468_v34  ;;  %v4213_v55 = vadd.f32 -2.0, %v5823_v25 }
  0xe6   :  { %v5064_v13 = vpop.eup %5063  ;;  %v457_v59 = vmul.f32 %v4212_v42, %v449_v12 }
  0xe7   :  { %580 = vrot.lane.b32.xlu1 %v5050_v36, %s5604_s20  ;;  %v5066_v21 = vpop.eup %5065  ;;  %v1579_v22 = vmul.f32 %v4276_v8, %v1574_v3  ;;  %v428_v36 = vmul.f32 1.442695, %v416_v5  ;;  %v360_v43 = vmul.f32 1.442695, %v346_v28  ;;  %v450_v63 = vsub.f32 0.0, %v4213_v55 }
  0xe8   :  { %v5068_v29 = vpop.eup %5067  ;;  %v470_v25 = vmul.f32 1.442695, %v457_v59  ;;  %v4179_v59 = vmul.f32 -1.442695, %v5693_v15 }
  0xe9   :  { %490 = vrot.lane.b32.xlu0 %v5052_v40, %s5602_s18  ;;  %v5070_v37 = vpop.eup %5069  ;;  %v5901_v38 = vadd.f32 %v4277_v27, %v1579_v22  ;;  %v299_v40 = vsub.f32 0.0, %v4190_v26  ;;  %5083 = vpow2.f32 %v428_v36  ;;  %v458_v14 = vmul.f32 %v4213_v55, %v450_v63 }
  0xea   :  { %v5072_v44 = vpop.eup %5071  ;;  %5085 = vpow2.f32 %v360_v43 }
  0xeb   :  { %612 = vrot.lane.b32.xlu1 %v5054_v33, %s5605_s21  ;;  %v4214_v33 = vadd.f32 -2.0, %v5827_v57  ;;  %v5074_v31 = vpop.eup %5073  ;;  %v307_v50 = vmul.f32 %v4190_v26, %v299_v40  ;;  %v4279_v6 = vadd.f32 1.0, %v5901_v38  ;;  %v410_v57 = vsub.f32 0.0, %v4205_v47 }
  0xec   :  { %5087 = vpow2.f32 %v430_v49  ;;  %v4278_v11 = vadd.f32 2.0, %v5901_v38  ;;  %v1595_v3 = vsub.f32 0.0, %v5901_v38  ;;  %v4281_v10 = vadd.f32 -2.0, %v5901_v38 }
  0xed   :  { %522 = vrot.lane.b32.xlu0 %v5056_v52, %s5603_s19  ;;  %v5076_v52 = vpop.eup %5075  ;;  %v322_v58 = vmul.f32 1.442695, %v307_v50  ;;  %v1591_v60 = vsub.f32 0.0, %v4279_v6  ;;  %5089 = vpow2.f32 %v362_v53  ;;  %v418_v30 = vmul.f32 %v4205_v47, %v410_v57 }
  0xee   :  { %v5078_v56 = vpop.eup %5077  ;;  %v1586_v8 = vsub.f32 0.0, %v4278_v11  ;;  %v1596_v19 = vmul.f32 %v1595_v3, %v5901_v38  ;;  %v1605_v22 = vsub.f32 0.0, %v4281_v10  ;;  %v472_v24 = vmul.f32 1.442695, %v458_v14  ;;  %v5961_v3 = vld [vmem:[%s7179_s0 + $0x28] sm:$0xff] }
  0xef   :  { %488 = vrot.lane.b32.xlu1 %v5058_v54, %s5602_s18  ;;  %v451_v54 = vsub.f32 0.0, %v4214_v33  ;;  %v5080_v48 = vpop.eup %5079  ;;  %5091 = vpow2.f32 %v322_v58  ;;  %v4177_v49 = vmul.f32 -1.442695, %v5673_v7  ;;  %v4178_v57 = vmul.f32 -1.442695, %v5679_v9  ;;  %v5578_v9 = vld [vmem:[%s7179_s0] sm:$0xff] }
  0xf0   :  { %v5082_v2 = vpop.eup %5081  ;;  %5093 = vpow2.f32 %v434_v61  ;;  %v1597_v27 = vmul.f32 1.442695, %v1596_v19  ;;  %v1606_v34 = vmul.f32 %v4281_v10, %v1605_v22  ;;  %v37_v19 = vld [vmem:[%s7181_s1 + $0x40] sm:$0xff] }
  0xf1   :  { %492 = vrot.lane.b32.xlu0 %v5062_v20, %s5602_s18  ;;  %v459_v62 = vmul.f32 %v4214_v33, %v451_v54  ;;  %v1592_v20 = vmul.f32 %v4279_v6, %v1591_v60  ;;  %5095 = vpow2.f32 %v470_v25  ;;  %v4175_v33 = vmul.f32 -1.442695, %v5654_v0 }
  0xf2   :  { %v1607_v36 = vmul.f32 1.442695, %v1606_v34 }
  0xf3   :  { %520 = vrot.lane.b32.xlu1 %v5064_v13, %s5603_s19  ;;  %v5084_v4 = vpop.eup %5083  ;;  %v474_v51 = vmul.f32 1.442695, %v459_v62  ;;  %v432_v13 = vmul.f32 1.442695, %v418_v30  ;;  %v1593_v18 = vmul.f32 1.442695, %v1592_v20 }
  0xf4   :  { %v5086_v16 = vpop.eup %5085  ;;  %v5577_v62 = vld [vmem:[%s7179_s0 + $0x8] sm:$0xff] }
  0xf5   :  { %616 = vrot.lane.b32.xlu0 %v5066_v21, %s5605_s21  ;;  %5097 = vpow2.f32 %v474_v51  ;;  %v1587_v21 = vmul.f32 %v4278_v11, %v1586_v8 }
  0xf6   :  { %v5088_v5 = vpop.eup %5087  ;;  %5099 = vpow2.f32 %v432_v13 }
  0xf7   :  { %584 = vrot.lane.b32.xlu1 %v5068_v29, %s5604_s20  ;;  %v5090_v26 = vpop.eup %5089  ;;  %5101 = vpow2.f32 %v1593_v18  ;;  %v1588_v29 = vmul.f32 1.442695, %v1587_v21  ;;  %v36_v18 = vld [vmem:[%s7181_s1 + $0x38] sm:$0xff] }
  0xf8   :  { %5103 = vpow2.f32 %v472_v24 }
  0xf9   :  { %524 = vrot.lane.b32.xlu0 %v5070_v37, %s5603_s19  ;;  %v5092_v28 = vpop.eup %5091  ;;  %5105 = vpow2.f32 %v1597_v27 }
  0xfa   :  { %v5094_v17 = vpop.eup %5093  ;;  %5107 = vpow2.f32 %v1588_v29  ;;  %v5978_v29 = vpack.c.bf16 %v37_v19, %v36_v18 }
  0xfb   :  { %586 = vrot.lane.b32.xlu1 %v5072_v44, %s5604_s20  ;;  %v5096_v35 = vpop.eup %5095  ;;  %5109 = vpow2.f32 %v1607_v36  ;;  %v39_v36 = vld [vmem:[%s7181_s1 + $0x50] sm:$0xff] }
  0xfc   :  { %5111 = vpow2.f32 %v4176_v23 }
  0xfd   :  { %526 = vrot.lane.b32.xlu0 %v5074_v31, %s5603_s19  ;;  %5113 = vpow2.f32 %v4175_v33 }
  0xfe   :  { %5115 = vpow2.f32 %v4177_v49  ;;  %v40_v49 = vld [vmem:[%s7181_s1 + $0x58] sm:$0xff] }
  0xff   :  { %494 = vrot.lane.b32.xlu1 %v5076_v52, %s5602_s18  ;;  %v5098_v37 = vpop.eup %5097 }
 0x100   :  { %v5100_v41 = vpop.eup %5099 }
 0x101   :  { %496 = vrot.lane.b32.xlu0 %v5078_v56, %s5602_s18  ;;  %v5102_v40 = vpop.eup %5101 }
 0x102   :  { %v5104_v42 = vpop.eup %5103 }
 0x103   :  { %618 = vrot.lane.b32.xlu1 %v5080_v48, %s5605_s21  ;;  %v5106_v43 = vpop.eup %5105 }
 0x104   :  { %v5108_v44 = vpop.eup %5107 }
 0x105   :  { %620 = vrot.lane.b32.xlu0 %v5082_v2, %s5605_s21  ;;  %v5110_v46 = vpop.eup %5109 }
 0x106   :  { %v5112_v31 = vpop.eup %5111 }
 0x107   :  { %588 = vrot.lane.b32.xlu1 %v5084_v4, %s5604_s20  ;;  %v5114_v12 = vpop.eup %5113  ;;  %v253_v6 = vadd.f32 1.0, %v5112_v31  ;;  %v4180_v4 = vmul.f32 -1.442695, %v5961_v3  ;;  %v6005_v31 = vld [vmem:[%s7179_s0 + $0x30] sm:$0xff] }
 0x108   :  { %v252_v53 = vadd.f32 1.0, %v5114_v12  ;;  %v5116_v55 = vpop.eup %5115 }
 0x109   :  { %528 = vrot.lane.b32.xlu0 %v5086_v16, %s5603_s19  ;;  %5117 = vrcp.f32 %v253_v6  ;;  %v254_v48 = vadd.f32 1.0, %v5116_v55 }
 0x10a   :  { %5119 = vrcp.f32 %v252_v53 }
 0x10b   :  { %590 = vrot.lane.b32.xlu1 %v5088_v5, %s5604_s20  ;;  %5121 = vpow2.f32 %v4178_v57 }
 0x10c   :  { %5123 = vpow2.f32 %v4179_v59  ;;  %v43_v59 = vld [vmem:[%s7181_s1 + $0x70] sm:$0xff] }
 0x10d   :  { %530 = vrot.lane.b32.xlu0 %v5090_v26, %s5603_s19  ;;  %5125 = vrcp.f32 %v254_v48 }
 0x10e   :  { %5127 = vpow2.f32 %v4180_v4 }
 0x10f   :  { %498 = vrot.lane.b32.xlu1 %v5092_v28, %s5602_s18 }
 0x111   :  { %594 = vrot.lane.b32.xlu0 %v5094_v17, %s5604_s20 }
 0x113   :  { %622 = vrot.lane.b32.xlu1 %v5096_v35, %s5605_s21  ;;  %v5118_v58 = vpop.eup %5117  ;;  %v38_v35 = vld [vmem:[%s7181_s1 + $0x48] sm:$0xff] }
 0x114   :  { %v5120_v61 = vpop.eup %5119  ;;  %v277_v11 = vmul.f32 %v5577_v62, %v5118_v58  ;;  %v6000_v33 = vpack.c.bf16 %v39_v36, %v38_v35  ;;  %v42_v58 = vld [vmem:[%s7181_s1 + $0x68] sm:$0xff] }
 0x115   :  { %626 = vrot.lane.b32.xlu0 %v5098_v37, %s5605_s21  ;;  %v276_v2 = vmul.f32 %v5578_v9, %v5120_v61  ;;  %v5122_v8 = vpop.eup %5121  ;;  %v5990_v37 = vld [vmem:[%s7179_s0 + $0x38] sm:$0xff] }
 0x116   :  { %v255_v5 = vadd.f32 1.0, %v5122_v8  ;;  %v5124_v26 = vpop.eup %5123  ;;  %v44_v9 = vld [vmem:[%s7181_s1 + $0x78] sm:$0xff] }
 0x117   :  { %592 = vrot.lane.b32.xlu1 %v5100_v41, %s5604_s20  ;;  %v5126_v34 = vpop.eup %5125  ;;  %v4182_v41 = vmul.f32 -1.442695, %v5990_v37 }
 0x118   :  { %5129 = vrcp.f32 %v255_v5  ;;  %v5128_v6 = vpop.eup %5127 }
 0x119   :  { %1614 = vrot.lane.b32.xlu0 %v5102_v40, %s5607_s8  ;;  %5131 = vpow2.f32 %v4182_v41  ;;  %v257_v61 = vadd.f32 1.0, %v5128_v6 }
 0x11b   :  { %624 = vrot.lane.b32.xlu1 %v5104_v42, %s5605_s21 }
 0x11d   :  { %1618 = vrot.lane.b32.xlu0 %v5106_v43, %s5608_s9  ;;  %v256_v43 = vadd.f32 1.0, %v5124_v26 }
 0x11f   :  { %1610 = vrot.lane.b32.xlu1 %v5108_v44, %s5609_s10  ;;  %v5581_v44 = vld [vmem:[%s7179_s0 + $0x10] sm:$0xff]  ;;  %5133 = vrcp.f32 %v256_v43 }
 0x122   :  { %v5130_v48 = vpop.eup %5129 }
 0x123   :  { %1622 = vrot.lane.b32.xlu1 %v5110_v46, %s5609_s10  ;;  %v278_v46 = vmul.f32 %v5581_v44, %v5126_v34  ;;  %v5132_v4 = vpop.eup %5131  ;;  %v48_v34 = vld [vmem:[%s7181_s1 + $0x98] sm:$0xff] }
 0x124   :  { %v259_v19 = vadd.f32 1.0, %v5132_v4  ;;  %v56_v4 = vld [vmem:[%s7181_s1 + $0xd8] sm:$0xff] }
 0x12f   :  { %v549_v47 = vpop.permute.xlu1 %548 }
 0x133   :  { %v551_v50 = vpop.permute.xlu0 %550 }
 0x139   :  { %v5936_v52 = vpop.permute.xlu1 %552 }
 0x13b   :  { %v5938_v39 = vpop.permute.xlu0 %554 }
 0x141   :  { %v5940_v54 = vpop.permute.xlu1 %556 }
 0x143   :  { %v5942_v0 = vpop.permute.xlu0 %558 }
 0x149   :  { %v5944_v1 = vpop.permute.xlu1 %560 }
 0x14b   :  { %v5947_v7 = vpop.permute.xlu0 %562 }
 0x14d   :  { %v485_v56 = vpop.permute.xlu1 %484 }
 0x14e   :  { %v636_v10 = vsel %vm75_vm0, %v276_v2, %v485_v56  ;;  %v45_v2 = vld [vmem:[%s7181_s1 + $0x80] sm:$0xff] }
 0x14f   :  { %v487_v60 = vpop.permute.xlu0 %486  ;;  %v6046_v8 = vpack.c.bf16 %v45_v2, %v44_v9 }
 0x150   :  { %v637_v25 = vsel %vm75_vm0, %v277_v11, %v487_v60 }
 0x151   :  { %v517_v30 = vpop.permute.xlu1 %516 }
 0x152   :  { %v645_v13 = vsel %vm644_vm1, %v636_v10, %v517_v30  ;;  %v6030_v30 = vpack.c.bf16 %v43_v59, %v42_v58  ;;  %v5134_v10 = vpop.eup %5133  ;;  %v53_v58 = vld [vmem:[%s7181_s1 + $0xc0] sm:$0xff] }
 0x153   :  { %v583_v63 = vpop.permute.xlu0 %582  ;;  %v654_v24 = vsel %vm653_vm2, %v645_v13, %v549_v47  ;;  %v4181_v47 = vmul.f32 -1.442695, %v6005_v31  ;;  %v46_v13 = vld [vmem:[%s7181_s1 + $0x88] sm:$0xff] }
 0x155   :  { %v519_v15 = vpop.permute.xlu1 %518  ;;  %5135 = vpow2.f32 %v4181_v47 }
 0x156   :  { %v646_v20 = vsel %vm644_vm1, %v637_v25, %v519_v15  ;;  %v5583_v15 = vld [vmem:[%s7179_s0 + $0x18] sm:$0xff]  ;;  %5137 = vrcp.f32 %v257_v61 }
 0x157   :  { %v615_v51 = vpop.permute.xlu0 %614  ;;  %v655_v14 = vsel %vm653_vm2, %v646_v20, %v551_v50  ;;  %v41_v50 = vld [vmem:[%s7181_s1 + $0x60] sm:$0xff]  ;;  %v279_v20 = vmul.f32 %v5583_v15, %v5130_v48  ;;  %5139 = vrcp.f32 %v259_v19 }
 0x158   :  { %v664_v22 = vsel %vm662_vm3, %v655_v14, %v583_v63  ;;  %v6017_v55 = vpack.c.bf16 %v41_v50, %v40_v49  ;;  %v47_v14 = vld [vmem:[%s7181_s1 + $0x90] sm:$0xff] }
 0x159   :  { %v581_v16 = vpop.permute.xlu1 %580  ;;  %v673_v40 = vsel %vm671_vm4, %v664_v22, %v615_v51 }
 0x15a   :  { %v663_v27 = vsel %vm662_vm3, %v654_v24, %v581_v16  ;;  %v5584_v24 = vld [vmem:[%s7179_s0 + $0x20] sm:$0xff] }
 0x15b   :  { %v5973_v21 = vpop.permute.xlu0 %490  ;;  %v280_v26 = vmul.f32 %v5584_v24, %v5134_v10 }
 0x15c   :  { %v639_v5 = vsel %vm75_vm0, %v279_v20, %v5973_v21  ;;  %v49_v21 = vld [vmem:[%s7181_s1 + $0xa0] sm:$0xff] }
 0x15d   :  { %v613_v28 = vpop.permute.xlu1 %612  ;;  %v6078_v43 = vpack.c.bf16 %v49_v21, %v48_v34 }
 0x15e   :  { %v672_v17 = vsel %vm671_vm4, %v663_v27, %v613_v28  ;;  %v6062_v28 = vpack.c.bf16 %v47_v14, %v46_v13 }
 0x15f   :  { %4483 = vmatprep.mubr.msk.f32.mxu0 %vm684_vm5, %v672_v17  ;;  %v523_v42 = vpop.permute.xlu0 %522  ;;  %v5136_v18 = vpop.eup %5135 }
 0x160   :  { %4484 = vmatmul.mubr.msk.f32.vlgmr.msra.gmra.mrb[0].mxu0 %vm684_vm5, %v673_v40  ;;  %v648_v22 = vsel %vm644_vm1, %v639_v5, %v523_v42  ;;  %v258_v17 = vadd.f32 1.0, %v5136_v18  ;;  %v5138_v47 = vpop.eup %5137 }
 0x161   :  { %v489_v23 = vpop.permute.xlu1 %488  ;;  %4639 = vmatpush1.bf16.msra.mxu0 %v5978_v29  ;;  %v657_v36 = vsel %vm653_vm2, %v648_v22, %v5938_v39  ;;  %v51_v39 = vld [vmem:[%s7181_s1 + $0xb0] sm:$0xff]  ;;  %v5140_v61 = vpop.eup %5139 }
 0x162   :  { %4640 = vmatprep.subr.bf16.mxu0 %v5606_v45  ;;  %v638_v53 = vsel %vm75_vm0, %v278_v46, %v489_v23  ;;  %v50_v23 = vld [vmem:[%s7181_s1 + $0xa8] sm:$0xff]  ;;  %5141 = vrcp.f32 %v258_v17 }
 0x163   :  { %v493_v12 = vpop.permute.xlu0 %492  ;;  %v6093_v6 = vpack.c.bf16 %v51_v39, %v50_v23 }
 0x164   :  { %v640_v41 = vsel %vm75_vm0, %v280_v26, %v493_v12 }
 0x165   :  { %v521_v57 = vpop.permute.xlu1 %520  ;;  %4642 = vmatpush1.bf16.msra.mxu0 %v6000_v33 }
 0x166   :  { %v647_v56 = vsel %vm644_vm1, %v638_v53, %v521_v57  ;;  %4643 = vmatprep.subr.bf16.mxu0 %v5606_v45  ;;  %v281_v53 = vmul.f32 %v5961_v3, %v5138_v47 }
 0x167   :  { %v617_v60 = vpop.permute.xlu0 %616  ;;  %v656_v62 = vsel %vm653_vm2, %v647_v56, %v5936_v52  ;;  %v52_v56 = vld [vmem:[%s7181_s1 + $0xb8] sm:$0xff] }
 0x168   :  { %v6108_v48 = vpack.c.bf16 %v53_v58, %v52_v56  ;;  %v4215_v56 = vld [vmem:[%s7180_s2 + $0x8] ss:$0 sm:$0xff] }
 0x169   :  { %v585_v11 = vpop.permute.xlu1 %584  ;;  %4645 = vmatpush1.bf16.msra.mxu0 %v6017_v55 }
 0x16a   :  { %v665_v63 = vsel %vm662_vm3, %v656_v62, %v585_v11  ;;  %4646 = vmatprep.subr.bf16.mxu0 %v5606_v45  ;;  %v54_v11 = vld [vmem:[%s7181_s1 + $0xc8] sm:$0xff] }
 0x16b   :  { %v525_v25 = vpop.permute.xlu0 %524  ;;  %v674_v52 = vsel %vm671_vm4, %v665_v63, %v617_v60  ;;  %v4280_v60 = vadd.f32 -1.0, %v5901_v38  ;;  %v55_v38 = vld [vmem:[%s7181_s1 + $0xd0] sm:$0xff] }
 0x16c   :  { %4486 = vmatprep.mubr.msk.f32.mxu0 %vm684_vm5, %v674_v52  ;;  %v649_v44 = vsel %vm644_vm1, %v640_v41, %v525_v25  ;;  %v5142_v2 = vpop.eup %5141  ;;  %v283_v52 = vmul.f32 %v5990_v37, %v5140_v61  ;;  %v6121_v20 = vpack.c.bf16 %v55_v38, %v54_v11 }
 0x16d   :  { %v587_v51 = vpop.permute.xlu1 %586  ;;  %4648 = vmatpush1.bf16.msra.mxu0 %v6030_v30  ;;  %v658_v12 = vsel %vm653_vm2, %v649_v44, %v5940_v54  ;;  %v1600_v9 = vsub.f32 0.0, %v4280_v60  ;;  %v282_v14 = vmul.f32 %v6005_v31, %v5142_v2  ;;  %v58_v31 = vld [vmem:[%s7181_s1 + $0xe8] sm:$0xff] }
 0x16e   :  { %4649 = vmatprep.subr.bf16.mxu0 %v5606_v45  ;;  %v666_v40 = vsel %vm662_vm3, %v657_v36, %v587_v51  ;;  %v57_v51 = vld [vmem:[%s7181_s1 + $0xe0] sm:$0xff] }
 0x16f   :  { %v527_v16 = vpop.permute.xlu0 %526  ;;  %v1601_v13 = vmul.f32 %v4280_v60, %v1600_v9  ;;  %v6136_v5 = vpack.c.bf16 %v57_v51, %v56_v4 }
 0x171   :  { %v495_v27 = vpop.permute.xlu1 %494  ;;  %4651 = vmatpush1.bf16.msra.mxu0 %v6046_v8  ;;  %v1602_v24 = vmul.f32 1.442695, %v1601_v13 }
 0x172   :  { %4652 = vmatprep.subr.bf16.mxu0 %v5606_v45  ;;  %v641_v62 = vsel %vm75_vm0, %v281_v53, %v495_v27 }
 0x173   :  { %v6071_v35 = vpop.permute.xlu0 %496  ;;  %v650_v25 = vsel %vm644_vm1, %v641_v62, %v527_v16  ;;  %5143 = vpow2.f32 %v1602_v24 }
 0x174   :  { %v659_v37 = vsel %vm653_vm2, %v650_v25, %v5942_v0  ;;  %v59_v0 = vld [vmem:[%s7181_s1 + $0xf0] sm:$0xff]  ;;  %v642_v26 = vsel %vm75_vm0, %v282_v14, %v6071_v35 }
 0x175   :  { %v619_v42 = vpop.permute.xlu1 %618  ;;  %4654 = vmatpush1.bf16.msra.mxu0 %v6062_v28  ;;  %v6152_v36 = vpack.c.bf16 %v59_v0, %v58_v31 }
 0x176   :  { %v675_v46 = vsel %vm671_vm4, %v666_v40, %v619_v42  ;;  %4655 = vmatprep.subr.bf16.mxu0 %v5606_v45 }
 0x177   :  { %4487 = vmatmul.mubr.msk.f32.gmra.mrb[2].mxu0 %vm684_vm5, %v675_v46  ;;  %v621_v49 = vpop.permute.xlu0 %620 }
 0x179   :  { %v589_v50 = vpop.permute.xlu1 %588  ;;  %4657 = vmatpush1.bf16.msra.mxu0 %v6078_v43 }
 0x17a   :  { %v667_v57 = vsel %vm662_vm3, %v658_v12, %v589_v50  ;;  %4658 = vmatprep.subr.bf16.mxu0 %v5606_v45 }
 0x17b   :  { %v529_v59 = vpop.permute.xlu0 %528  ;;  %v676_v54 = vsel %vm671_vm4, %v667_v57, %v621_v49 }
 0x17c   :  { %4489 = vmatprep.mubr.msk.f32.mxu0 %vm684_vm5, %v676_v54  ;;  %v651_v21 = vsel %vm644_vm1, %v642_v26, %v529_v59 }
 0x17d   :  { %v591_v3 = vpop.permute.xlu1 %590  ;;  %4660 = vmatpush1.bf16.msra.mxu0 %v6093_v6  ;;  %v660_v40 = vsel %vm653_vm2, %v651_v21, %v5944_v1  ;;  %v5144_v50 = vpop.eup %5143 }
 0x17e   :  { %4661 = vmatprep.subr.bf16.mxu0 %v5606_v45  ;;  %v668_v16 = vsel %vm662_vm3, %v659_v37, %v591_v3 }
 0x17f   :  { %v531_v63 = vpop.permute.xlu0 %530 }
 0x181   :  { %v499_v15 = vpop.permute.xlu1 %498  ;;  %4663 = vmatpush1.bf16.msra.mxu0 %v6108_v48 }
 0x182   :  { %4664 = vmatprep.subr.bf16.mxu0 %v5606_v45  ;;  %v643_v18 = vsel %vm75_vm0, %v283_v52, %v499_v15  ;;  %vm1422_vm0 = vcmask 244736  }
 0x183   :  { %v595_v10 = vpop.permute.xlu0 %594  ;;  %v652_v27 = vsel %vm644_vm1, %v643_v18, %v531_v63  ;;  %vm5615_vm1 = vmmov 0  }
 0x184   :  { %v661_v41 = vsel %vm653_vm2, %v652_v27, %v5947_v7 }
 0x185   :  { %v623_v19 = vpop.permute.xlu1 %622  ;;  %4666 = vmatpush1.bf16.msra.mxu0 %v6121_v20  ;;  %v670_v46 = vsel %vm662_vm3, %v661_v41, %v595_v10 }
 0x186   :  { %v677_v22 = vsel %vm671_vm4, %v668_v16, %v623_v19  ;;  %4667 = vmatprep.subr.bf16.mxu0 %v5606_v45 }
 0x187   :  { %4490 = vmatmul.mubr.msk.f32.gmra.mrb[4].mxu0 %vm684_vm5, %v677_v22  ;;  %v627_v34 = vpop.permute.xlu0 %626 }
 0x188   :  { %v679_v39 = vsel %vm671_vm4, %v670_v46, %v627_v34  ;;  %v4282_v46 = vld [vmem:[%s7180_s2 + $0xa] ss:$0 sm:$0xff] }
 0x189   :  { %v593_v17 = vpop.permute.xlu1 %592  ;;  %4669 = vmatpush1.bf16.msra.mxu0 %v6136_v5 }
 0x18a   :  { %4670 = vmatprep.subr.bf16.mxu0 %v5606_v45  ;;  %v669_v42 = vsel %vm662_vm3, %v660_v40, %v593_v17 }
 0x18b   :  { %v1615_v35 = vpop.permute.xlu0 %1614 }
 0x18d   :  { %v625_v44 = vpop.permute.xlu1 %624  ;;  %4672 = vmatpush1.bf16.msra.mxu0 %v6152_v36 }
 0x18e   :  { %v678_v23 = vsel %vm671_vm4, %v669_v42, %v625_v44  ;;  %4723 = vmatprep.subr.bf16.mxu0 %v5606_v45 }
 0x18f   :  { %4492 = vmatprep.mubr.msk.f32.mxu0 %vm684_vm5, %v678_v23  ;;  %v1619_v47 = vpop.permute.xlu0 %1618 }
 0x190   :  { %4493 = vmatmul.mubr.msk.f32.gmra.mrb[6].mxu0 %vm684_vm5, %v679_v39 }
 0x191   :  { %v1611_v1 = vpop.permute.xlu1 %1610 }
 0x192   :  { %v1625_v7 = vsel %vm1556_vm6, 0.0, %v1611_v1 }
 0x193   :  { %v1627_v49 = vsel %vm1626_vm7, %v1625_v7, %v1615_v35 }
 0x194   :  { %v1629_v53 = vsel %vm1628_vm8, %v1627_v49, %v1619_v47 }
 0x195   :  { %v1623_v12 = vpop.permute.xlu1 %1622 }
 0x196   :  { %v1630_v57 = vsel %vm1556_vm6, %v5144_v50, %v1623_v12 }
 0x197   :  { %4283 = vmatprep.mubr.msk.f32.mxu0 %vm1626_vm7, %v1630_v57 }
 0x198   :  { %1703 = vmatmul.mubr.f32.vlgmr.msra.gmra.mrb[8].mxu0 %v1629_v53 }
 0x199   :  { %4725 = vmatpush1.bf16.msra.mxu0 %v5978_v29 }
 0x19a   :  { %4726 = vmatprep.subr.bf16.mxu0 %v5606_v45 }
 0x19d   :  { %4728 = vmatpush1.bf16.msra.mxu0 %v6000_v33 }
 0x19e   :  { %4729 = vmatprep.subr.bf16.mxu0 %v5606_v45 }
 0x1a1   :  { %4731 = vmatpush1.bf16.msra.mxu0 %v6017_v55 }
 0x1a2   :  { %4732 = vmatprep.subr.bf16.mxu0 %v5606_v45 }
 0x1a5   :  { %4734 = vmatpush1.bf16.msra.mxu0 %v6030_v30 }
 0x1a6   :  { %4735 = vmatprep.subr.bf16.mxu0 %v5606_v45 }
 0x1a9   :  { %4737 = vmatpush1.bf16.msra.mxu0 %v6046_v8 }
 0x1aa   :  { %4738 = vmatprep.subr.bf16.mxu0 %v5606_v45 }
 0x1ad   :  { %4740 = vmatpush1.bf16.msra.mxu0 %v6062_v28 }
 0x1ae   :  { %4741 = vmatprep.subr.bf16.mxu0 %v5606_v45 }
 0x1b1   :  { %4743 = vmatpush1.bf16.msra.mxu0 %v6078_v43 }
 0x1b2   :  { %4744 = vmatprep.subr.bf16.mxu0 %v5606_v45 }
 0x1b5   :  { %4746 = vmatpush1.bf16.msra.mxu0 %v6093_v6 }
 0x1b6   :  { %4747 = vmatprep.subr.bf16.mxu0 %v5606_v45 }
 0x1b9   :  { %4749 = vmatpush1.bf16.msra.mxu0 %v6108_v48 }
 0x1ba   :  { %4750 = vmatprep.subr.bf16.mxu0 %v5606_v45 }
 0x1bd   :  { %4752 = vmatpush1.bf16.msra.mxu0 %v6121_v20 }
 0x1be   :  { %4753 = vmatprep.subr.bf16.mxu0 %v5606_v45 }
 0x1c1   :  { %4755 = vmatpush1.bf16.msra.mxu0 %v6136_v5 }
 0x1c2   :  { %4756 = vmatprep.subr.bf16.mxu0 %v5606_v45 }
 0x1c5   :  { %4758 = vmatpush1.bf16.msra.mxu0 %v6152_v36 }
 0x1c6   :  { %4802 = vmatprep.subr.bf16.mxu0 %v5606_v45 }
 0x233   :  { %v4485_v58 = vpop.f32.mrb[0].mxu0 }
 0x234   :  { %v6199_v59 = vadd.f32 %v4485_v58, %v4215_v56  ;;  %v775_v54 = vpop.f32.mrb[1].mxu0 }
 0x235   :  { %v6201_v60 = vadd.f32 %v4215_v56, %v775_v54 }
 0x236   :  { %v818_v3 = vsel %vm814_vm9, %v6199_v59, 0.0  ;;  %v840_v61 = vmul.f32 %v6199_v59, %v6199_v59 }
 0x237   :  { %819 = vadd.xlane.f32.xlu0 %v818_v3  ;;  %v815_v62 = vsel %vm814_vm9, %v6201_v60, 0.0  ;;  %v839_v38 = vmul.f32 %v6201_v60, %v6201_v60 }
 0x238   :  { %816 = vadd.xlane.f32.xlu1 %v815_v62  ;;  %v850_v11 = vsel %vm814_vm9, %v840_v61, 0.0 }
 0x239   :  { %v847_v63 = vsel %vm814_vm9, %v839_v38, 0.0 }
 0x23b   :  { %851 = vadd.xlane.f32.xlu0 %v850_v11 }
 0x23f   :  { %848 = vadd.xlane.f32.xlu0 %v847_v63 }
 0x24a   :  { %v4488_v9 = vpop.f32.mrb[2].mxu0 }
 0x24b   :  { %v6213_v2 = vadd.f32 %v4488_v9, %v4215_v56  ;;  %v785_v25 = vpop.f32.mrb[3].mxu0 }
 0x24c   :  { %v6215_v52 = vadd.f32 %v4215_v56, %v785_v25 }
 0x24d   :  { %v824_v15 = vsel %vm814_vm9, %v6213_v2, 0.0  ;;  %v842_v4 = vmul.f32 %v6213_v2, %v6213_v2 }
 0x24e   :  { %825 = vadd.xlane.f32.xlu0 %v824_v15  ;;  %v821_v51 = vsel %vm814_vm9, %v6215_v52, 0.0  ;;  %v841_v10 = vmul.f32 %v6215_v52, %v6215_v52 }
 0x24f   :  { %822 = vadd.xlane.f32.xlu1 %v821_v51  ;;  %v856_v13 = vsel %vm814_vm9, %v842_v4, 0.0 }
 0x250   :  { %v853_v14 = vsel %vm814_vm9, %v841_v10, 0.0 }
 0x252   :  { %857 = vadd.xlane.f32.xlu0 %v856_v13 }
 0x253   :  { %854 = vadd.xlane.f32.xlu1 %v853_v14  ;;  %v6269_v14 = vld [vmem:[%s7180_s2 + $0x2] ss:$0 sm:$0xff] }
 0x25a   :  { %v4491_v37 = vpop.f32.mrb[4].mxu0 }
 0x25b   :  { %v6227_v16 = vadd.f32 %v4491_v37, %v4215_v56  ;;  %v795_v18 = vpop.f32.mrb[5].mxu0 }
 0x25c   :  { %v6229_v19 = vadd.f32 %v4215_v56, %v795_v18 }
 0x25d   :  { %v830_v22 = vsel %vm814_vm9, %v6227_v16, 0.0  ;;  %v844_v31 = vmul.f32 %v6227_v16, %v6227_v16 }
 0x25e   :  { %831 = vadd.xlane.f32.xlu0 %v830_v22  ;;  %v827_v0 = vsel %vm814_vm9, %v6229_v19, 0.0  ;;  %v843_v24 = vmul.f32 %v6229_v19, %v6229_v19 }
 0x25f   :  { %828 = vadd.xlane.f32.xlu1 %v827_v0  ;;  %v862_v26 = vsel %vm814_vm9, %v844_v31, 0.0  ;;  %v6276_v0 = vld [vmem:[%s7180_s2 + $0x3] ss:$0 sm:$0xff] }
 0x260   :  { %v859_v27 = vsel %vm814_vm9, %v843_v24, 0.0 }
 0x262   :  { %863 = vadd.xlane.f32.xlu0 %v862_v26 }
 0x263   :  { %860 = vadd.xlane.f32.xlu1 %v859_v27  ;;  %v4494_v34 = vpop.f32.mrb[6].mxu0 }
 0x264   :  { %v6241_v21 = vadd.f32 %v4494_v34, %v4215_v56  ;;  %v805_v17 = vpop.f32.mrb[7].mxu0 }
 0x265   :  { %v6243_v41 = vadd.f32 %v4215_v56, %v805_v17 }
 0x266   :  { %v836_v40 = vsel %vm814_vm9, %v6241_v21, 0.0  ;;  %v846_v35 = vmul.f32 %v6241_v21, %v6241_v21 }
 0x267   :  { %837 = vadd.xlane.f32.xlu0 %v836_v40  ;;  %v833_v42 = vsel %vm814_vm9, %v6243_v41, 0.0  ;;  %v845_v44 = vmul.f32 %v6243_v41, %v6243_v41 }
 0x268   :  { %834 = vadd.xlane.f32.xlu1 %v833_v42  ;;  %v868_v23 = vsel %vm814_vm9, %v846_v35, 0.0 }
 0x269   :  { %v865_v1 = vsel %vm814_vm9, %v845_v44, 0.0 }
 0x26b   :  { %869 = vadd.xlane.f32.xlu0 %v868_v23  ;;  %v1704_v39 = vpop.f32.mrb[8].mxu0 }
 0x26c   :  { %v6258_v7 = vadd.f32 %v4282_v46, %v1704_v39  ;;  %866 = vadd.xlane.f32.xlu1 %v865_v1  ;;  %v1706_v47 = vpop.f32.mrb[9].mxu0 }
 0x26e   :  { %v1708_v49 = vsel %vm814_vm9, %v6258_v7, 0.0  ;;  %v1711_v50 = vmul.f32 %v6258_v7, %v6258_v7 }
 0x270   :  { %1709 = vadd.xlane.f32.xlu1 %v1708_v49  ;;  %v1712_v12 = vsel %vm814_vm9, %v1711_v50, 0.0 }
 0x271   :  { %1713 = vadd.xlane.f32.xlu0 %v1712_v12 }
 0x2c4   :  { %v820_v53 = vpop.xlane.xlu0 %819 }
 0x2c5   :  { %v872_v57 = vmul.f32 0.2, %v820_v53  ;;  %v817_v56 = vpop.xlane.xlu1 %816 }
 0x2c6   :  { %v871_v3 = vmul.f32 0.2, %v817_v56 }
 0x2c7   :  { %v888_v54 = vmul.f32 %v872_v57, %v872_v57  ;;  %v912_v10 = vsub.f32 %v6199_v59, %v872_v57 }
 0x2c8   :  { %v852_v58 = vpop.xlane.xlu0 %851  ;;  %v887_v38 = vmul.f32 %v871_v3, %v871_v3  ;;  %v911_v26 = vsub.f32 %v6201_v60, %v871_v3 }
 0x2c9   :  { %v880_v61 = vmul.f32 0.2, %v852_v58 }
 0x2cb   :  { %v896_v62 = vsub.f32 %v880_v61, %v888_v54 }
 0x2cc   :  { %v849_v11 = vpop.xlane.xlu0 %848 }
 0x2cd   :  { %v904_v63 = vmax.f32 %v896_v62, 0.0  ;;  %v879_v9 = vmul.f32 0.2, %v849_v11 }
 0x2cf   :  { %v920_v25 = vadd.f32 1e-05, %v904_v63  ;;  %v895_v15 = vsub.f32 %v879_v9, %v887_v38 }
 0x2d1   :  { %5145 = vrsqrt.f32 %v920_v25  ;;  %v903_v4 = vmax.f32 %v895_v15, 0.0 }
 0x2d3   :  { %v919_v51 = vadd.f32 1e-05, %v903_v4 }
 0x2d5   :  { %5147 = vrsqrt.f32 %v919_v51 }
 0x2db   :  { %v5146_v13 = vpop.eup %5145  ;;  %v826_v37 = vpop.xlane.xlu0 %825 }
 0x2dc   :  { %v936_v18 = vmul.f32 %v5146_v13, %v912_v10  ;;  %v6271_v22 = vmul.f32 0.2, %v826_v37  ;;  %v823_v31 = vpop.xlane.xlu1 %822 }
 0x2dd   :  { %v6278_v24 = vmul.f32 0.2, %v823_v31 }
 0x2de   :  { %v948_v27 = vmul.f32 %v6269_v14, %v936_v18  ;;  %v890_v42 = vmul.f32 %v6271_v22, %v6271_v22 }
 0x2df   :  { %v5148_v34 = vpop.eup %5147  ;;  %v858_v17 = vpop.xlane.xlu0 %857  ;;  %v889_v23 = vmul.f32 %v6278_v24, %v6278_v24 }
 0x2e0   :  { %v960_v40 = vadd.f32 %v6276_v0, %v948_v27  ;;  %v935_v35 = vmul.f32 %v5148_v34, %v911_v26  ;;  %v882_v44 = vmul.f32 0.2, %v858_v17  ;;  %v855_v46 = vpop.xlane.xlu1 %854 }
 0x2e1   :  { %v881_v39 = vmul.f32 0.2, %v855_v46 }
 0x2e2   :  { %v947_v1 = vmul.f32 %v6269_v14, %v935_v35  ;;  %v898_v47 = vsub.f32 %v882_v44, %v890_v42  ;;  %v1104_v49 = vsub.f32 0.0, %v960_v40  ;;  %v4235_v50 = vadd.f32 2.0, %v960_v40 }
 0x2e3   :  { %v897_v12 = vsub.f32 %v881_v39, %v889_v23  ;;  %v4243_v53 = vadd.f32 1.0, %v960_v40  ;;  %v4251_v57 = vadd.f32 -1.0, %v960_v40  ;;  %v4259_v11 = vadd.f32 -2.0, %v960_v40 }
 0x2e4   :  { %v959_v56 = vadd.f32 %v6276_v0, %v947_v1  ;;  %v906_v58 = vmax.f32 %v898_v47, 0.0  ;;  %v1112_v54 = vmul.f32 %v1104_v49, %v960_v40  ;;  %v1032_v3 = vsub.f32 0.0, %v4235_v50 }
 0x2e5   :  { %v905_v61 = vmax.f32 %v897_v12, 0.0  ;;  %v1072_v62 = vsub.f32 0.0, %v4243_v53  ;;  %v1144_v51 = vsub.f32 0.0, %v4251_v57  ;;  %v1184_v26 = vsub.f32 0.0, %v4259_v11 }
 0x2e6   :  { %v922_v38 = vadd.f32 1e-05, %v906_v58  ;;  %v1121_v63 = vmul.f32 1.442695, %v1112_v54  ;;  %v1040_v9 = vmul.f32 %v4235_v50, %v1032_v3  ;;  %v1103_v25 = vsub.f32 0.0, %v959_v56 }
 0x2e7   :  { %v921_v15 = vadd.f32 1e-05, %v905_v61  ;;  %v4258_v4 = vadd.f32 -2.0, %v959_v56  ;;  %v1080_v13 = vmul.f32 %v4243_v53, %v1072_v62  ;;  %v1152_v17 = vmul.f32 %v4251_v57, %v1144_v51 }
 0x2e8   :  { %5149 = vrsqrt.f32 %v922_v38  ;;  %v1111_v10 = vmul.f32 %v1103_v25, %v959_v56  ;;  %v1049_v18 = vmul.f32 1.442695, %v1040_v9  ;;  %v4234_v44 = vadd.f32 2.0, %v959_v56 }
 0x2e9   :  { %5151 = vrsqrt.f32 %v921_v15  ;;  %v1183_v37 = vsub.f32 0.0, %v4258_v4  ;;  %v1089_v42 = vmul.f32 1.442695, %v1080_v13  ;;  %v1192_v39 = vmul.f32 %v4259_v11, %v1184_v26 }
 0x2ea   :  { %5153 = vpow2.f32 %v1121_v63  ;;  %v1119_v31 = vmul.f32 1.442695, %v1111_v10  ;;  %v1161_v47 = vmul.f32 1.442695, %v1152_v17  ;;  %v4242_v49 = vadd.f32 1.0, %v959_v56 }
 0x2eb   :  { %v832_v27 = vpop.xlane.xlu0 %831  ;;  %v1191_v34 = vmul.f32 %v4258_v4, %v1183_v37  ;;  %v4250_v50 = vadd.f32 -1.0, %v959_v56  ;;  %v1031_v58 = vsub.f32 0.0, %v4234_v44  ;;  %v914_v54 = vsub.f32 %v6213_v2, %v6271_v22 }
 0x2ec   :  { %v6289_v40 = vmul.f32 0.2, %v832_v27  ;;  %v829_v35 = vpop.xlane.xlu1 %828  ;;  %5155 = vpow2.f32 %v1119_v31  ;;  %v913_v11 = vsub.f32 %v6215_v52, %v6278_v24  ;;  %v1201_v56 = vmul.f32 1.442695, %v1192_v39 }
 0x2ed   :  { %v6291_v46 = vmul.f32 0.2, %v829_v35  ;;  %5157 = vpow2.f32 %v1049_v18  ;;  %v1199_v23 = vmul.f32 1.442695, %v1191_v34  ;;  %v1071_v15 = vsub.f32 0.0, %v4242_v49 }
 0x2ee   :  { %v892_v12 = vmul.f32 %v6289_v40, %v6289_v40  ;;  %5159 = vpow2.f32 %v1089_v42  ;;  %v1039_v13 = vmul.f32 %v4234_v44, %v1031_v58  ;;  %v1143_v37 = vsub.f32 0.0, %v4250_v50 }
 0x2ef   :  { %v864_v1 = vpop.xlane.xlu0 %863  ;;  %v891_v3 = vmul.f32 %v6291_v46, %v6291_v46  ;;  %5161 = vpow2.f32 %v1199_v23  ;;  %v1079_v23 = vmul.f32 %v4242_v49, %v1071_v15 }
 0x2f0   :  { %v884_v53 = vmul.f32 0.2, %v864_v1  ;;  %v861_v57 = vpop.xlane.xlu1 %860  ;;  %5163 = vpow2.f32 %v1161_v47 }
 0x2f1   :  { %v883_v61 = vmul.f32 0.2, %v861_v57  ;;  %5165 = vpow2.f32 %v1201_v56 }
 0x2f2   :  { %v5150_v62 = vpop.eup %5149  ;;  %v900_v38 = vsub.f32 %v884_v53, %v892_v12  ;;  %v1047_v12 = vmul.f32 1.442695, %v1039_v13  ;;  %v1151_v53 = vmul.f32 %v4250_v50, %v1143_v37 }
 0x2f3   :  { %v5152_v63 = vpop.eup %5151  ;;  %v938_v9 = vmul.f32 %v5150_v62, %v914_v54  ;;  %v899_v25 = vsub.f32 %v883_v61, %v891_v3 }
 0x2f4   :  { %v5154_v4 = vpop.eup %5153  ;;  %v937_v51 = vmul.f32 %v5152_v63, %v913_v11  ;;  %v908_v10 = vmax.f32 %v900_v38, 0.0  ;;  %v838_v22 = vpop.xlane.xlu0 %837  ;;  %v1087_v63 = vmul.f32 1.442695, %v1079_v23 }
 0x2f5   :  { %v950_v18 = vmul.f32 %v6269_v14, %v938_v9  ;;  %v907_v31 = vmax.f32 %v899_v25, 0.0  ;;  %1289 = vrot.lane.b32.xlu0 %v5154_v4, %s5610_s22  ;;  %v6303_v24 = vmul.f32 0.2, %v838_v22  ;;  %v835_v26 = vpop.xlane.xlu1 %834 }
 0x2f6   :  { %v5156_v27 = vpop.eup %5155  ;;  %v949_v34 = vmul.f32 %v6269_v14, %v937_v51  ;;  %v924_v17 = vadd.f32 1e-05, %v908_v10  ;;  %v6306_v35 = vmul.f32 0.2, %v835_v26 }
 0x2f7   :  { %v6309_v42 = vadd.f32 %v6276_v0, %v950_v18  ;;  %v923_v44 = vadd.f32 1e-05, %v907_v31  ;;  %1287 = vrot.lane.b32.xlu1 %v5156_v27, %s5610_s22  ;;  %v5158_v39 = vpop.eup %5157  ;;  %v894_v57 = vmul.f32 %v6303_v24, %v6303_v24  ;;  %v1159_v31 = vmul.f32 1.442695, %v1151_v53 }
 0x2f8   :  { %v6313_v1 = vadd.f32 %v6276_v0, %v949_v34  ;;  %5167 = vrsqrt.f32 %v924_v17  ;;  %v870_v47 = vpop.xlane.xlu0 %869  ;;  %v5160_v49 = vpop.eup %5159  ;;  %v893_v61 = vmul.f32 %v6306_v35, %v6306_v35 }
 0x2f9   :  { %5169 = vrsqrt.f32 %v923_v44  ;;  %1225 = vrot.lane.b32.xlu0 %v5158_v39, %s5611_s23  ;;  %v886_v58 = vmul.f32 0.2, %v870_v47  ;;  %v867_v54 = vpop.xlane.xlu1 %866  ;;  %v1106_v3 = vsub.f32 0.0, %v6309_v42  ;;  %v4245_v11 = vadd.f32 1.0, %v6309_v42  ;;  %v5162_v9 = vpop.eup %5161 }
 0x2fa   :  { %v885_v62 = vmul.f32 0.2, %v867_v54  ;;  %v4236_v50 = vadd.f32 2.0, %v6313_v1  ;;  %5171 = vpow2.f32 %v1047_v12  ;;  %v1105_v4 = vsub.f32 0.0, %v6313_v1  ;;  %v5164_v51 = vpop.eup %5163 }
 0x2fb   :  { %v902_v38 = vsub.f32 %v886_v58, %v894_v57  ;;  %1257 = vrot.lane.b32.xlu1 %v5160_v49, %s5612_s24  ;;  %v1114_v56 = vmul.f32 %v1106_v3, %v6309_v42  ;;  %v1074_v15 = vsub.f32 0.0, %v4245_v11  ;;  %v5166_v17 = vpop.eup %5165  ;;  %v916_v44 = vsub.f32 %v6227_v16, %v6289_v40 }
 0x2fc   :  { %v901_v25 = vsub.f32 %v885_v62, %v893_v61  ;;  %v1033_v13 = vsub.f32 0.0, %v4236_v50  ;;  %v1113_v34 = vmul.f32 %v1105_v4, %v6313_v1  ;;  %v915_v12 = vsub.f32 %v6229_v19, %v6291_v46 }
 0x2fd   :  { %v910_v10 = vmax.f32 %v902_v38, 0.0  ;;  %1351 = vrot.lane.b32.xlu0 %v5162_v9, %s5613_s25  ;;  %v1125_v22 = vmul.f32 1.442695, %v1114_v56  ;;  %v1082_v18 = vmul.f32 %v4245_v11, %v1074_v15  ;;  %v917_v4 = vsub.f32 %v6243_v41, %v6306_v35 }
 0x2fe   :  { %v909_v37 = vmax.f32 %v901_v25, 0.0  ;;  %v1041_v39 = vmul.f32 %v4236_v50, %v1033_v13  ;;  %v1123_v54 = vmul.f32 1.442695, %v1113_v34  ;;  %v4260_v34 = vadd.f32 -2.0, %v6313_v1 }
 0x2ff   :  { %v926_v26 = vadd.f32 1e-05, %v910_v10  ;;  %1321 = vrot.lane.b32.xlu1 %v5164_v51, %s5605_s21  ;;  %5173 = vpow2.f32 %v1125_v22  ;;  %v1093_v23 = vmul.f32 1.442695, %v1082_v18  ;;  %v4244_v18 = vadd.f32 1.0, %v6313_v1 }
 0x300   :  { %v925_v27 = vadd.f32 1e-05, %v909_v37  ;;  %5175 = vpow2.f32 %v1087_v63  ;;  %v1051_v49 = vmul.f32 1.442695, %v1041_v39  ;;  %v918_v63 = vsub.f32 %v6241_v21, %v6303_v24 }
 0x301   :  { %5177 = vpow2.f32 %v1159_v31  ;;  %v1073_v31 = vsub.f32 0.0, %v4244_v18 }
 0x302   :  { %v5168_v47 = vpop.eup %5167  ;;  %5179 = vrsqrt.f32 %v926_v26  ;;  %v1710_v26 = vpop.xlane.xlu1 %1709 }
 0x303   :  { %v5170_v53 = vpop.eup %5169  ;;  %v940_v57 = vmul.f32 %v5168_v47, %v916_v44  ;;  %1353 = vrot.lane.b32.xlu1 %v5166_v17, %s5613_s25  ;;  %5181 = vrsqrt.f32 %v925_v27  ;;  %v4237_v27 = vadd.f32 2.0, %v6309_v42  ;;  %v1081_v17 = vmul.f32 %v4244_v18, %v1073_v31 }
 0x304   :  { %v939_v58 = vmul.f32 %v5170_v53, %v915_v12  ;;  %5183 = vpow2.f32 %v1093_v23  ;;  %v5172_v40 = vpop.eup %5171  ;;  %v6364_v44 = vmul.f32 0.2, %v1710_v26  ;;  %v1714_v23 = vpop.xlane.xlu0 %1713  ;;  %v1185_v47 = vsub.f32 0.0, %v4260_v34 }
 0x305   :  { %v952_v3 = vmul.f32 %v6269_v14, %v940_v57  ;;  %5185 = vpow2.f32 %v1123_v54  ;;  %v1034_v39 = vsub.f32 0.0, %v4237_v27  ;;  %v1091_v12 = vmul.f32 1.442695, %v1081_v17 }
 0x306   :  { %v951_v61 = vmul.f32 %v6269_v14, %v939_v58  ;;  %5187 = vpow2.f32 %v1051_v49  ;;  %v4261_v53 = vadd.f32 -2.0, %v6309_v42  ;;  %v1716_v57 = vmul.f32 0.2, %v1714_v23 }
 0x307   :  { %v6337_v62 = vadd.f32 %v6276_v0, %v952_v3  ;;  %1223 = vrot.lane.b32.xlu1 %v5172_v40, %s5611_s23  ;;  %v1042_v58 = vmul.f32 %v4237_v27, %v1034_v39  ;;  %v1193_v49 = vmul.f32 %v4260_v34, %v1185_v47  ;;  %5189 = vpow2.f32 %v1091_v12 }
 0x308   :  { %v6341_v46 = vadd.f32 %v6276_v0, %v951_v61  ;;  %v29_v61 = vld [vmem:[%s7181_s1 + $0x18] sm:$0xff] }
 0x309   :  { %v5174_v11 = vpop.eup %5173  ;;  %v4247_v3 = vadd.f32 1.0, %v6337_v62  ;;  %v1108_v40 = vsub.f32 0.0, %v6337_v62 }
 0x30a   :  { %v5176_v50 = vpop.eup %5175  ;;  %1293 = vrot.lane.b32.xlu0 %v5174_v11, %s5610_s22  ;;  %v30_v11 = vld [vmem:[%s7181_s1 + $0x20] sm:$0xff]  ;;  %v4246_v26 = vadd.f32 1.0, %v6341_v46 }
 0x30b   :  { %1255 = vrot.lane.b32.xlu1 %v5176_v50, %s5612_s24  ;;  %v5178_v38 = vpop.eup %5177  ;;  %v32_v50 = vld [vmem:[%s7181_s1 + $0x30] sm:$0x3f] }
 0x30c   :  { %v5180_v56 = vpop.eup %5179 }
 0x30d   :  { %v5182_v9 = vpop.eup %5181  ;;  %v942_v15 = vmul.f32 %v5180_v56, %v918_v63  ;;  %v4252_v56 = vadd.f32 -1.0, %v6313_v1  ;;  %v4238_v63 = vadd.f32 2.0, %v6341_v46 }
 0x30e   :  { %v5184_v25 = vpop.eup %5183  ;;  %v941_v22 = vmul.f32 %v5182_v9, %v917_v4  ;;  %v4627_v4 = vpack.c.bf16 %v30_v11, %v29_v61  ;;  %v4255_v11 = vadd.f32 -1.0, %v6337_v62 }
 0x30f   :  { %1319 = vrot.lane.b32.xlu1 %v5178_v38, %s5605_s21  ;;  %1261 = vrot.lane.b32.xlu0 %v5184_v25, %s5612_s24  ;;  %v954_v51 = vmul.f32 %v6269_v14, %v942_v15  ;;  %v5186_v10 = vpop.eup %5185  ;;  %v1186_v38 = vsub.f32 0.0, %v4261_v53  ;;  %v1053_v25 = vmul.f32 1.442695, %v1042_v58  ;;  %v1035_v17 = vsub.f32 0.0, %v4238_v63 }
 0x310   :  { %v5188_v13 = vpop.eup %5187  ;;  %v953_v24 = vmul.f32 %v6269_v14, %v941_v22  ;;  %v4253_v14 = vadd.f32 -1.0, %v6309_v42  ;;  %v31_v42 = vld [vmem:[%s7181_s1 + $0x28] sm:$0xff]  ;;  %v1116_v22 = vmul.f32 %v1108_v40, %v6337_v62  ;;  %4628 = vmatprep.subr.bf16.mxu1 %v4627_v4 }
 0x311   :  { %v6353_v37 = vadd.f32 %v6276_v0, %v954_v51  ;;  %v1076_v51 = vsub.f32 0.0, %v4247_v3  ;;  %4630 = vmatpush3.bf16.msra.mxu1 %v4627_v4  ;;  %v1194_v1 = vmul.f32 %v4261_v53, %v1186_v38  ;;  %5191 = vpow2.f32 %v1053_v25  ;;  %v5190_v12 = vpop.eup %5189 }
 0x312   :  { %v6360_v35 = vadd.f32 %v6276_v0, %v953_v24  ;;  %v1717_v0 = vmul.f32 %v6364_v44, %v6364_v44  ;;  %v1146_v54 = vsub.f32 0.0, %v4253_v14  ;;  %v1145_v24 = vsub.f32 0.0, %v4252_v56 }
 0x313   :  { %1291 = vrot.lane.b32.xlu1 %v5186_v10, %s5610_s22  ;;  %1227 = vrot.lane.b32.xlu0 %v5188_v13, %s5611_s23  ;;  %v1203_v10 = vmul.f32 1.442695, %v1193_v49  ;;  %v4631_v13 = vpack.c.bf16 %v32_v50, %v31_v42  ;;  %v1084_v34 = vmul.f32 %v4247_v3, %v1076_v51  ;;  %v1129_v23 = vmul.f32 1.442695, %v1116_v22 }
 0x314   :  { %v1718_v9 = vsub.f32 %v1716_v57, %v1717_v0  ;;  %v1154_v15 = vmul.f32 %v4253_v14, %v1146_v54  ;;  %v1153_v39 = vmul.f32 %v4252_v56, %v1145_v24  ;;  %v1107_v14 = vsub.f32 0.0, %v6341_v46 }
 0x315   :  { %4633 = vmatprep.subr.msk.bf16.mxu1 %vm6387_vm12, %v4631_v13  ;;  %5193 = vpow2.f32 %v1203_v10  ;;  %v1205_v53 = vmul.f32 1.442695, %v1194_v1  ;;  %v4239_v0 = vadd.f32 2.0, %v6337_v62  ;;  %v1075_v57 = vsub.f32 0.0, %v4246_v26 }
 0x316   :  { %v1719_v18 = vmax.f32 %v1718_v9, 0.0  ;;  %v1165_v27 = vmul.f32 1.442695, %v1154_v15  ;;  %4636 = vmatpush3.bf16.msk.msra.mxu1 %vm6387_vm12, %v4631_v13  ;;  %v1097_v58 = vmul.f32 1.442695, %v1084_v34  ;;  %v1043_v54 = vmul.f32 %v4238_v63, %v1035_v17 }
 0x317   :  { %4673 = vmatprep.subr.bf16.mxu1 %v5606_v45  ;;  %v4262_v3 = vadd.f32 -2.0, %v6341_v46  ;;  %1259 = vrot.lane.b32.xlu0 %v5190_v12, %s5612_s24  ;;  %v1163_v49 = vmul.f32 1.442695, %v1153_v39  ;;  %v1115_v40 = vmul.f32 %v1107_v14, %v6341_v46  ;;  %v1036_v61 = vsub.f32 0.0, %v4239_v0 }
 0x318   :  { %v1721_v47 = vadd.f32 1e-05, %v1719_v18  ;;  %5195 = vpow2.f32 %v1165_v27  ;;  %v1083_v42 = vmul.f32 %v4246_v26, %v1075_v57  ;;  %v1055_v50 = vmul.f32 1.442695, %v1043_v54 }
 0x319   :  { %5197 = vpow2.f32 %v1129_v23  ;;  %v1187_v38 = vsub.f32 0.0, %v4262_v3  ;;  %v4263_v63 = vadd.f32 -2.0, %v6337_v62  ;;  %v1127_v25 = vmul.f32 1.442695, %v1115_v40 }
 0x31a   :  { %5199 = vrsqrt.f32 %v1721_v47  ;;  %v1044_v15 = vmul.f32 %v4239_v0, %v1036_v61  ;;  %v1148_v4 = vsub.f32 0.0, %v4255_v11  ;;  %v1095_v51 = vmul.f32 1.442695, %v1083_v42 }
 0x31b   :  { %5201 = vpow2.f32 %v1205_v53  ;;  %v5192_v56 = vpop.eup %5191  ;;  %v1195_v10 = vmul.f32 %v4262_v3, %v1187_v38  ;;  %v4249_v22 = vadd.f32 1.0, %v6353_v37  ;;  %v1110_v13 = vsub.f32 0.0, %v6353_v37 }
 0x31c   :  { %5203 = vpow2.f32 %v1097_v58  ;;  %1229 = vrot.lane.b32.xlu1 %v5192_v56, %s5611_s23  ;;  %v1188_v1 = vsub.f32 0.0, %v4263_v63  ;;  %v4254_v62 = vadd.f32 -1.0, %v6341_v46  ;;  %v1057_v26 = vmul.f32 1.442695, %v1044_v15 }
 0x31d   :  { %5205 = vpow2.f32 %v1163_v49  ;;  %v1156_v27 = vmul.f32 %v4255_v11, %v1148_v4  ;;  %v1207_v17 = vmul.f32 1.442695, %v1195_v10  ;;  %v1078_v23 = vsub.f32 0.0, %v4249_v22 }
 0x31e   :  { %5207 = vpow2.f32 %v1055_v50  ;;  %v1118_v39 = vmul.f32 %v1110_v13, %v6353_v37  ;;  %v4257_v14 = vadd.f32 -1.0, %v6353_v37  ;;  %v1720_v12 = vsub.f32 %v6258_v7, %v6364_v44  ;;  %v6421_v44 = vld [vmem:[%s7180_s2 + $0x6] ss:$0 sm:$0xff] }
 0x31f   :  { %v5194_v9 = vpop.eup %5193  ;;  %5209 = vpow2.f32 %v1127_v25  ;;  %v1196_v46 = vmul.f32 %v4263_v63, %v1188_v1  ;;  %v1147_v0 = vsub.f32 0.0, %v4254_v62  ;;  %v1169_v57 = vmul.f32 1.442695, %v1156_v27 }
 0x320   :  { %1355 = vrot.lane.b32.xlu0 %v5194_v9, %s5613_s25  ;;  %5211 = vpow2.f32 %v1095_v51  ;;  %v4265_v58 = vadd.f32 -2.0, %v6353_v37  ;;  %v1086_v3 = vmul.f32 %v4249_v22, %v1078_v23  ;;  %v1133_v49 = vmul.f32 1.442695, %v1118_v39 }
 0x321   :  { %5213 = vpow2.f32 %v1057_v26  ;;  %v1150_v40 = vsub.f32 0.0, %v4257_v14  ;;  %v1209_v42 = vmul.f32 1.442695, %v1196_v46  ;;  %v1155_v50 = vmul.f32 %v4254_v62, %v1147_v0 }
 0x322   :  { %v5196_v24 = vpop.eup %5195  ;;  %5215 = vpow2.f32 %v1207_v17  ;;  %v4241_v38 = vadd.f32 2.0, %v6353_v37  ;;  %v1190_v56 = vsub.f32 0.0, %v4265_v58  ;;  %v1109_v9 = vsub.f32 0.0, %v6360_v35  ;;  %v6432_v37 = vld [vmem:[%s7180_s2 + $0x7] ss:$0 sm:$0xff] }
 0x323   :  { %v5198_v18 = vpop.eup %5197  ;;  %1325 = vrot.lane.b32.xlu1 %v5196_v24, %s5605_s21  ;;  %5217 = vpow2.f32 %v1169_v57  ;;  %v1101_v15 = vmul.f32 1.442695, %v1086_v3  ;;  %v1158_v4 = vmul.f32 %v4257_v14, %v1150_v40  ;;  %v4240_v51 = vadd.f32 2.0, %v6360_v35 }
 0x324   :  { %1297 = vrot.lane.b32.xlu0 %v5198_v18, %s5610_s22  ;;  %v5200_v34 = vpop.eup %5199  ;;  %5219 = vpow2.f32 %v1133_v49  ;;  %v1167_v22 = vmul.f32 1.442695, %v1155_v50  ;;  %v1038_v13 = vsub.f32 0.0, %v4241_v38  ;;  %v1198_v24 = vmul.f32 %v4265_v58, %v1190_v56 }
 0x325   :  { %v5202_v47 = vpop.eup %5201  ;;  %v1723_v54 = vmul.f32 %v5200_v34, %v1720_v12  ;;  %5221 = vpow2.f32 %v1209_v42  ;;  %v4248_v18 = vadd.f32 1.0, %v6360_v35  ;;  %v1117_v1 = vmul.f32 %v1109_v9, %v6360_v35 }
 0x326   :  { %v5204_v53 = vpop.eup %5203  ;;  %v4256_v62 = vadd.f32 -1.0, %v6360_v35  ;;  %5223 = vpow2.f32 %v1101_v15  ;;  %v1173_v26 = vmul.f32 1.442695, %v1158_v4  ;;  %v1037_v27 = vsub.f32 0.0, %v4240_v51 }
 0x327   :  { %1357 = vrot.lane.b32.xlu1 %v5202_v47, %s5613_s25  ;;  %v5206_v61 = vpop.eup %5205  ;;  %v1728_v63 = vmul.f32 %v6421_v44, %v1723_v54  ;;  %5225 = vpow2.f32 %v1167_v22  ;;  %v1046_v39 = vmul.f32 %v4241_v38, %v1038_v13  ;;  %v1077_v14 = vsub.f32 0.0, %v4248_v18 }
 0x328   :  { %1265 = vrot.lane.b32.xlu0 %v5204_v53, %s5612_s24  ;;  %v5208_v11 = vpop.eup %5207  ;;  %v1131_v47 = vmul.f32 1.442695, %v1117_v1  ;;  %v1149_v12 = vsub.f32 0.0, %v4256_v62  ;;  %v4264_v53 = vadd.f32 -2.0, %v6360_v35  ;;  %5227 = vpow2.f32 %v1173_v26 }
 0x329   :  { %v5210_v25 = vpop.eup %5209  ;;  %v1733_v34 = vadd.f32 %v6432_v37, %v1728_v63  ;;  %v1213_v46 = vmul.f32 1.442695, %v1198_v24  ;;  %v1045_v0 = vmul.f32 %v4240_v51, %v1037_v27  ;;  %v1061_v3 = vmul.f32 1.442695, %v1046_v39 }
 0x32a   :  { %v5212_v10 = vpop.eup %5211  ;;  %v1085_v49 = vmul.f32 %v4248_v18, %v1077_v14  ;;  %5229 = vpow2.f32 %v1131_v47  ;;  %v1157_v40 = vmul.f32 %v4256_v62, %v1149_v12  ;;  %v4227_v22 = vmul.f32 -1.442695, %v6199_v59 }
 0x32b   :  { %1323 = vrot.lane.b32.xlu1 %v5206_v61, %s5605_s21  ;;  %v5214_v17 = vpop.eup %5213  ;;  %v4288_v57 = vadd.f32 1.0, %v1733_v34  ;;  %v1189_v61 = vsub.f32 0.0, %v4264_v53  ;;  %5231 = vpow2.f32 %v1213_v46  ;;  %v1059_v35 = vmul.f32 1.442695, %v1045_v0 }
 0x32c   :  { %1231 = vrot.lane.b32.xlu0 %v5208_v11, %s5611_s23  ;;  %v5216_v23 = vpop.eup %5215  ;;  %v4289_v50 = vadd.f32 -1.0, %v1733_v34  ;;  %v4287_v56 = vadd.f32 2.0, %v1733_v34  ;;  %5233 = vpow2.f32 %v1061_v3  ;;  %v1171_v9 = vmul.f32 1.442695, %v1157_v40 }
 0x32d   :  { %v5218_v58 = vpop.eup %5217  ;;  %v1747_v42 = vsub.f32 0.0, %v4288_v57  ;;  %v1197_v63 = vmul.f32 %v4264_v53, %v1189_v61  ;;  %5235 = vpow2.f32 %v1059_v35  ;;  %v1099_v4 = vmul.f32 1.442695, %v1085_v49 }
 0x32e   :  { %v5220_v54 = vpop.eup %5219  ;;  %v4226_v24 = vmul.f32 -1.442695, %v6201_v60  ;;  %v1742_v18 = vsub.f32 0.0, %v4287_v56  ;;  %5237 = vpow2.f32 %v1171_v9  ;;  %v4290_v26 = vadd.f32 -2.0, %v1733_v34 }
 0x32f   :  { %1295 = vrot.lane.b32.xlu1 %v5210_v25, %s5610_s22  ;;  %v5222_v11 = vpop.eup %5221  ;;  %v1751_v25 = vsub.f32 0.0, %v1733_v34  ;;  %v1748_v51 = vmul.f32 %v4288_v57, %v1747_v42  ;;  %v1211_v1 = vmul.f32 1.442695, %v1197_v63  ;;  %5239 = vpow2.f32 %v1099_v4 }
 0x330   :  { %1263 = vrot.lane.b32.xlu0 %v5212_v10, %s5612_s24  ;;  %v5224_v38 = vpop.eup %5223  ;;  %v1756_v10 = vsub.f32 0.0, %v4289_v50  ;;  %5241 = vpow2.f32 %v4227_v22  ;;  %v1743_v14 = vmul.f32 %v4287_v56, %v1742_v18  ;;  %v1761_v12 = vsub.f32 0.0, %v4290_v26 }
 0x331   :  { %v5226_v15 = vpop.eup %5225  ;;  %v1752_v62 = vmul.f32 %v1751_v25, %v1733_v34  ;;  %v1749_v27 = vmul.f32 1.442695, %v1748_v51  ;;  %5243 = vpow2.f32 %v4226_v24 }
 0x332   :  { %v5228_v13 = vpop.eup %5227  ;;  %5245 = vpow2.f32 %v1211_v1  ;;  %v1744_v0 = vmul.f32 1.442695, %v1743_v14  ;;  %v1762_v57 = vmul.f32 %v4290_v26, %v1761_v12 }
 0x333   :  { %1233 = vrot.lane.b32.xlu1 %v5214_v17, %s5611_s23  ;;  %v1757_v17 = vmul.f32 %v4289_v50, %v1756_v10  ;;  %v1753_v47 = vmul.f32 1.442695, %v1752_v62  ;;  %5247 = vpow2.f32 %v1749_v27 }
 0x334   :  { %1359 = vrot.lane.b32.xlu0 %v5216_v23, %s5613_s25  ;;  %v5230_v23 = vpop.eup %5229  ;;  %v1763_v49 = vmul.f32 1.442695, %v1762_v57  ;;  %v65_v57 = vld [vmem:[%s7181_s1 + $0x108] sm:$0xff] }
 0x335   :  { %v5232_v39 = vpop.eup %5231  ;;  %v1758_v53 = vmul.f32 1.442695, %v1757_v17  ;;  %5249 = vpow2.f32 %v1753_v47 }
 0x336   :  { %v5234_v34 = vpop.eup %5233 }
 0x337   :  { %1329 = vrot.lane.b32.xlu1 %v5218_v58, %s5605_s21  ;;  %v5236_v46 = vpop.eup %5235  ;;  %5251 = vpow2.f32 %v1758_v53 }
 0x338   :  { %1301 = vrot.lane.b32.xlu0 %v5220_v54, %s5610_s22  ;;  %v5238_v58 = vpop.eup %5237  ;;  %5253 = vpow2.f32 %v1744_v0 }
 0x339   :  { %v5240_v54 = vpop.eup %5239  ;;  %5255 = vpow2.f32 %v1763_v49  ;;  %v4229_v49 = vmul.f32 -1.442695, %v6213_v2 }
 0x33a   :  { %v5242_v3 = vpop.eup %5241 }
 0x33b   :  { %1361 = vrot.lane.b32.xlu1 %v5222_v11, %s5613_s25  ;;  %v5244_v40 = vpop.eup %5243 }
 0x33c   :  { %1269 = vrot.lane.b32.xlu0 %v5224_v38, %s5612_s24  ;;  %v5246_v61 = vpop.eup %5245  ;;  %v991_v42 = vadd.f32 1.0, %v5244_v40  ;;  %v992_v38 = vadd.f32 1.0, %v5242_v3  ;;  %v4228_v40 = vmul.f32 -1.442695, %v6215_v52 }
 0x33d   :  { %v5248_v11 = vpop.eup %5247 }
 0x33e   :  { %5257 = vrcp.f32 %v991_v42 }
 0x33f   :  { %1327 = vrot.lane.b32.xlu1 %v5226_v15, %s5605_s21  ;;  %v5250_v50 = vpop.eup %5249  ;;  %5259 = vrcp.f32 %v992_v38 }
 0x340   :  { %1333 = vrot.lane.b32.xlu0 %v5228_v13, %s5605_s21  ;;  %5261 = vpow2.f32 %v4229_v49 }
 0x341   :  { %v5252_v56 = vpop.eup %5251  ;;  %5263 = vpow2.f32 %v4228_v40 }
 0x342   :  { %v5254_v63 = vpop.eup %5253 }
 0x343   :  { %1299 = vrot.lane.b32.xlu1 %v5230_v23, %s5610_s22  ;;  %v5256_v15 = vpop.eup %5255 }
 0x344   :  { %1365 = vrot.lane.b32.xlu0 %v5232_v39, %s5613_s25  ;;  %v63_v39 = vld [vmem:[%s7181_s1 + $0xf8] sm:$0xff] }
 0x347   :  { %1237 = vrot.lane.b32.xlu1 %v5234_v34, %s5611_s23 }
 0x348   :  { %1235 = vrot.lane.b32.xlu0 %v5236_v46, %s5611_s23  ;;  %v5258_v10 = vpop.eup %5257 }
 0x349   :  { %v5260_v22 = vpop.eup %5259  ;;  %v1015_v18 = vmul.f32 %v5258_v10, %v6201_v60  ;;  %v64_v60 = vld [vmem:[%s7181_s1 + $0x100] sm:$0xff] }
 0x34a   :  { %v1016_v1 = vmul.f32 %v5260_v22, %v6199_v59  ;;  %v6478_v34 = vpack.c.bf16 %v64_v60, %v63_v39  ;;  %v4232_v39 = vmul.f32 -1.442695, %v6243_v41 }
 0x34b   :  { %1331 = vrot.lane.b32.xlu1 %v5238_v58, %s5605_s21  ;;  %v66_v58 = vld [vmem:[%s7181_s1 + $0x110] sm:$0x3f] }
 0x34c   :  { %1267 = vrot.lane.b32.xlu0 %v5240_v54, %s5612_s24  ;;  %v6492_v3 = vpack.c.bf16 %v66_v58, %v65_v57 }
 0x34f   :  { %1363 = vrot.lane.b32.xlu1 %v5246_v61, %s5613_s25 }
 0x350   :  { %1770 = vrot.lane.b32.xlu0 %v5248_v11, %s5612_s24  ;;  %v5262_v11 = vpop.eup %5261 }
 0x351   :  { %v5264_v42 = vpop.eup %5263 }
 0x352   :  { %v993_v38 = vadd.f32 1.0, %v5264_v42 }
 0x353   :  { %1774 = vrot.lane.b32.xlu1 %v5250_v50, %s5610_s22  ;;  %v994_v50 = vadd.f32 1.0, %v5262_v11 }
 0x354   :  { %1778 = vrot.lane.b32.xlu0 %v5252_v56, %s5605_s21  ;;  %v4231_v56 = vmul.f32 -1.442695, %v6227_v16 }
 0x355   :  { %5265 = vrcp.f32 %v994_v50  ;;  %v4286_v50 = vmul.f32 -1.442695, %v6258_v7 }
 0x356   :  { %5267 = vrcp.f32 %v993_v38 }
 0x357   :  { %1766 = vrot.lane.b32.xlu1 %v5254_v63, %s5611_s23  ;;  %v4230_v63 = vmul.f32 -1.442695, %v6229_v19  ;;  %5269 = vpow2.f32 %v4231_v56 }
 0x359   :  { %5271 = vpow2.f32 %v4230_v63 }
 0x35b   :  { %1782 = vrot.lane.b32.xlu1 %v5256_v15, %s5613_s25 }
 0x367   :  { %v1290_v4 = vpop.permute.xlu0 %1289 }
 0x369   :  { %v1288_v35 = vpop.permute.xlu1 %1287 }
 0x36b   :  { %v1226_v24 = vpop.permute.xlu0 %1225 }
 0x36c   :  { %v1376_v27 = vsel %vm814_vm9, %v1016_v1, %v1226_v24  ;;  %v4233_v1 = vmul.f32 -1.442695, %v6241_v21 }
 0x36d   :  { %v1258_v9 = vpop.permute.xlu1 %1257 }
 0x36e   :  { %v1385_v23 = vsel %vm1383_vm13, %v1376_v27, %v1258_v9  ;;  %5273 = vpow2.f32 %v4233_v1 }
 0x36f   :  { %v1352_v47 = vpop.permute.xlu0 %1351  ;;  %v1394_v12 = vsel %vm1392_vm14, %v1385_v23, %v1290_v4  ;;  %v5266_v4 = vpop.eup %5265 }
 0x370   :  { %v5268_v22 = vpop.eup %5267  ;;  %v1018_v24 = vmul.f32 %v5266_v4, %v6213_v2 }
 0x371   :  { %v1322_v25 = vpop.permute.xlu1 %1321  ;;  %v1017_v23 = vmul.f32 %v5268_v22, %v6215_v52 }
 0x372   :  { %v1402_v46 = vsel %vm671_vm4, %v1394_v12, %v1322_v25 }
 0x375   :  { %v1354_v51 = vpop.permute.xlu1 %1353 }
 0x376   :  { %v1411_v54 = vsel %vm1409_vm15, %v1402_v46, %v1354_v51 }
 0x379   :  { %v1224_v13 = vpop.permute.xlu1 %1223 }
 0x37a   :  { %v1375_v62 = vsel %vm814_vm9, %v1015_v18, %v1224_v13  ;;  %v5270_v13 = vpop.eup %5269 }
 0x37b   :  { %v5272_v27 = vpop.eup %5271 }
 0x37c   :  { %v1294_v61 = vpop.permute.xlu0 %1293  ;;  %v5274_v11 = vpop.eup %5273 }
 0x37d   :  { %v1256_v26 = vpop.permute.xlu1 %1255 }
 0x37e   :  { %v1384_v17 = vsel %vm1383_vm13, %v1375_v62, %v1256_v26 }
 0x37f   :  { %v1393_v59 = vsel %vm1392_vm14, %v1384_v17, %v1288_v35  ;;  %v996_v17 = vadd.f32 1.0, %v5270_v13 }
 0x381   :  { %v1320_v14 = vpop.permute.xlu1 %1319  ;;  %v1262_v35 = vpop.permute.xlu0 %1261  ;;  %5275 = vrcp.f32 %v996_v17 }
 0x382   :  { %v1401_v53 = vsel %vm671_vm4, %v1393_v59, %v1320_v14  ;;  %5277 = vpow2.f32 %v4232_v39 }
 0x383   :  { %v1410_v0 = vsel %vm1409_vm15, %v1401_v53, %v1352_v47  ;;  %v995_v47 = vadd.f32 1.0, %v5272_v27 }
 0x384   :  { %4503 = vmatprep.mubr.msk.f32.mxu1 %vm1422_vm0, %v1410_v0 }
 0x385   :  { %4504 = vmatmul.mubr.msk.f32.vlgmr.msra.gmra.mrb[0].mxu1 %vm1422_vm0, %v1411_v54  ;;  %v1228_v9 = vpop.permute.xlu0 %1227  ;;  %v1292_v25 = vpop.permute.xlu1 %1291  ;;  %5279 = vrcp.f32 %v995_v47 }
 0x386   :  { %4675 = vmatpush3.bf16.msra.mxu1 %v6478_v34  ;;  %v1377_v60 = vsel %vm814_vm9, %v1017_v23, %v1228_v9  ;;  %v998_v9 = vadd.f32 1.0, %v5274_v11  ;;  %5281 = vpow2.f32 %v4286_v50 }
 0x387   :  { %4676 = vmatprep.subr.bf16.mxu1 %v5606_v45 }
 0x388   :  { %5283 = vrcp.f32 %v998_v9 }
 0x389   :  { %v1260_v15 = vpop.permute.xlu0 %1259 }
 0x38a   :  { %4679 = vmatpush3.bf16.msk.msra.mxu1 %vm6387_vm12, %v6492_v3  ;;  %v1386_v2 = vsel %vm1383_vm13, %v1377_v60, %v1260_v15 }
 0x38b   :  { %4680 = vmatprep.subr.bf16.mxu1 %v5606_v45  ;;  %v1395_v0 = vsel %vm1392_vm14, %v1386_v2, %v1292_v25 }
 0x38e   :  { %v1230_v51 = vpop.permute.xlu1 %1229 }
 0x38f   :  { %v1378_v62 = vsel %vm814_vm9, %v1018_v24, %v1230_v51 }
 0x390   :  { %v1387_v59 = vsel %vm1383_vm13, %v1378_v62, %v1262_v35  ;;  %v5276_v35 = vpop.eup %5275 }
 0x391   :  { %v1396_v53 = vsel %vm1392_vm14, %v1387_v59, %v1294_v61  ;;  %v5278_v56 = vpop.eup %5277  ;;  %v1020_v25 = vmul.f32 %v5276_v35, %v6227_v16 }
 0x392   :  { %v1356_v10 = vpop.permute.xlu0 %1355  ;;  %v5280_v63 = vpop.eup %5279 }
 0x393   :  { %v1019_v22 = vmul.f32 %v5280_v63, %v6229_v19  ;;  %v5282_v59 = vpop.eup %5281 }
 0x394   :  { %v5284_v47 = vpop.eup %5283 }
 0x395   :  { %v1326_v18 = vpop.permute.xlu1 %1325 }
 0x396   :  { %v1298_v26 = vpop.permute.xlu0 %1297  ;;  %v1404_v58 = vsel %vm671_vm4, %v1396_v53, %v1326_v18  ;;  %v1022_v53 = vmul.f32 %v5284_v47, %v6241_v21 }
 0x399   :  { %v1358_v14 = vpop.permute.xlu1 %1357 }
 0x39a   :  { %v1266_v12 = vpop.permute.xlu0 %1265  ;;  %v1413_v49 = vsel %vm1409_vm15, %v1404_v58, %v1358_v14 }
 0x39d   :  { %v1324_v46 = vpop.permute.xlu1 %1323 }
 0x39e   :  { %v1403_v52 = vsel %vm671_vm4, %v1395_v0, %v1324_v46  ;;  %v1232_v57 = vpop.permute.xlu0 %1231 }
 0x39f   :  { %v1412_v54 = vsel %vm1409_vm15, %v1403_v52, %v1356_v10  ;;  %v997_v10 = vadd.f32 1.0, %v5278_v56  ;;  %v1379_v13 = vsel %vm814_vm9, %v1019_v22, %v1232_v57 }
 0x3a0   :  { %4506 = vmatprep.mubr.msk.f32.mxu1 %vm1422_vm0, %v1412_v54 }
 0x3a1   :  { %v1296_v40 = vpop.permute.xlu1 %1295  ;;  %4507 = vmatmul.mubr.msk.f32.gmra.mrb[2].mxu1 %vm1422_vm0, %v1413_v49  ;;  %5285 = vrcp.f32 %v997_v10 }
 0x3a2   :  { %v1264_v61 = vpop.permute.xlu0 %1263 }
 0x3a3   :  { %v1388_v1 = vsel %vm1383_vm13, %v1379_v13, %v1264_v61 }
 0x3a4   :  { %v1397_v17 = vsel %vm1392_vm14, %v1388_v1, %v1296_v40 }
 0x3a5   :  { %v1234_v42 = vpop.permute.xlu1 %1233 }
 0x3a6   :  { %v1360_v38 = vpop.permute.xlu0 %1359  ;;  %v1380_v4 = vsel %vm814_vm9, %v1020_v25, %v1234_v42 }
 0x3a7   :  { %v1389_v24 = vsel %vm1383_vm13, %v1380_v4, %v1266_v12  ;;  %v1737_v12 = vadd.f32 1.0, %v5282_v59 }
 0x3a8   :  { %v1398_v16 = vsel %vm1392_vm14, %v1389_v24, %v1298_v26 }
 0x3a9   :  { %v1330_v15 = vpop.permute.xlu1 %1329  ;;  %5287 = vrcp.f32 %v1737_v12 }
 0x3aa   :  { %v1302_v51 = vpop.permute.xlu0 %1301  ;;  %v1406_v60 = vsel %vm671_vm4, %v1398_v16, %v1330_v15 }
 0x3ab   :  { %v5286_v46 = vpop.eup %5285 }
 0x3ac   :  { %v1021_v54 = vmul.f32 %v5286_v46, %v6243_v41 }
 0x3ad   :  { %v1362_v18 = vpop.permute.xlu1 %1361 }
 0x3ae   :  { %v1270_v62 = vpop.permute.xlu0 %1269  ;;  %v1415_v14 = vsel %vm1409_vm15, %v1406_v60, %v1362_v18 }
 0x3b1   :  { %v1328_v27 = vpop.permute.xlu1 %1327 }
 0x3b2   :  { %v1405_v23 = vsel %vm671_vm4, %v1397_v17, %v1328_v27  ;;  %v1334_v39 = vpop.permute.xlu0 %1333 }
 0x3b3   :  { %v1414_v19 = vsel %vm1409_vm15, %v1405_v23, %v1360_v38  ;;  %v5288_v9 = vpop.eup %5287 }
 0x3b4   :  { %4509 = vmatprep.mubr.msk.f32.mxu1 %vm1422_vm0, %v1414_v19  ;;  %v1740_v15 = vmul.f32 %v5288_v9, %v6258_v7  ;;  %v4266_v7 = vld [vmem:[%s7180_s2 + $0x9] ss:$0 sm:$0xff] }
 0x3b5   :  { %v1300_v2 = vpop.permute.xlu1 %1299  ;;  %4510 = vmatmul.mubr.msk.f32.gmra.mrb[4].mxu1 %vm1422_vm0, %v1415_v14 }
 0x3b6   :  { %v1366_v26 = vpop.permute.xlu0 %1365 }
 0x3b9   :  { %v1238_v0 = vpop.permute.xlu1 %1237 }
 0x3ba   :  { %v1382_v52 = vsel %vm814_vm9, %v1022_v53, %v1238_v0  ;;  %v1236_v57 = vpop.permute.xlu0 %1235  ;;  %v6595_v0 = vld [vmem:[%s7180_s2 + $0xb] ss:$0 sm:$0xff] }
 0x3bb   :  { %v1391_v58 = vsel %vm1383_vm13, %v1382_v52, %v1270_v62  ;;  %v1381_v61 = vsel %vm814_vm9, %v1021_v54, %v1236_v57 }
 0x3bc   :  { %v1400_v49 = vsel %vm1392_vm14, %v1391_v58, %v1302_v51 }
 0x3bd   :  { %v1332_v40 = vpop.permute.xlu1 %1331  ;;  %v1408_v42 = vsel %vm671_vm4, %v1400_v49, %v1334_v39 }
 0x3be   :  { %v1268_v11 = vpop.permute.xlu0 %1267  ;;  %v1417_v41 = vsel %vm1409_vm15, %v1408_v42, %v1366_v26 }
 0x3bf   :  { %v1390_v35 = vsel %vm1383_vm13, %v1381_v61, %v1268_v11 }
 0x3c0   :  { %v1399_v21 = vsel %vm1392_vm14, %v1390_v35, %v1300_v2 }
 0x3c1   :  { %v1364_v50 = vpop.permute.xlu1 %1363  ;;  %v1407_v38 = vsel %vm671_vm4, %v1399_v21, %v1332_v40 }
 0x3c2   :  { %v1416_v56 = vsel %vm1409_vm15, %v1407_v38, %v1364_v50  ;;  %v1771_v25 = vpop.permute.xlu0 %1770 }
 0x3c3   :  { %4512 = vmatprep.mubr.msk.f32.mxu1 %vm1422_vm0, %v1416_v56 }
 0x3c4   :  { %4513 = vmatmul.mubr.msk.f32.gmra.mrb[6].mxu1 %vm1422_vm0, %v1417_v41 }
 0x3c5   :  { %v1775_v63 = vpop.permute.xlu1 %1774  ;;  %4523 = vmatprep.mubr.msk.f32.mxu1 %vm5615_vm1, %v5600_v32 }
 0x3c6   :  { %v1779_v22 = vpop.permute.xlu0 %1778 }
 0x3c9   :  { %v1767_v4 = vpop.permute.xlu1 %1766 }
 0x3ca   :  { %v1785_v51 = vsel %vm814_vm9, %v1740_v15, %v1767_v4 }
 0x3cb   :  { %v1786_v10 = vsel %vm1383_vm13, %v1785_v51, %v1771_v25 }
 0x3cc   :  { %v1787_v13 = vsel %vm1392_vm14, %v1786_v10, %v1775_v63 }
 0x3cd   :  { %v1783_v24 = vpop.permute.xlu1 %1782  ;;  %v1788_v18 = vsel %vm671_vm4, %v1787_v13, %v1779_v22 }
 0x3ce   :  { %v1789_v1 = vsel %vm1409_vm15, %v1788_v18, %v1783_v24 }
 0x3cf   :  { %4524 = vmatmul.mubr.msk.f32.vlgmr.msra.gmra.mrb[8].mxu1 %vm1422_vm0, %v1789_v1 }
 0x3d0   :  { %4682 = vmatpush1.bf16.msra.mxu1 %v5978_v29 }
 0x3d1   :  { %4683 = vmatprep.subr.bf16.mxu1 %v5606_v45 }
 0x3d4   :  { %4685 = vmatpush1.bf16.msra.mxu1 %v6000_v33 }
 0x3d5   :  { %4686 = vmatprep.subr.bf16.mxu1 %v5606_v45 }
 0x3d8   :  { %4688 = vmatpush1.bf16.msra.mxu1 %v6017_v55 }
 0x3d9   :  { %4689 = vmatprep.subr.bf16.mxu1 %v5606_v45 }
 0x3dc   :  { %4691 = vmatpush1.bf16.msra.mxu1 %v6030_v30 }
 0x3dd   :  { %4692 = vmatprep.subr.bf16.mxu1 %v5606_v45 }
 0x3e0   :  { %4694 = vmatpush1.bf16.msra.mxu1 %v6046_v8 }
 0x3e1   :  { %4695 = vmatprep.subr.bf16.mxu1 %v5606_v45 }
 0x3e4   :  { %4697 = vmatpush1.bf16.msra.mxu1 %v6062_v28 }
 0x3e5   :  { %4698 = vmatprep.subr.bf16.mxu1 %v5606_v45 }
 0x3e8   :  { %4700 = vmatpush1.bf16.msra.mxu1 %v6078_v43 }
 0x3e9   :  { %4701 = vmatprep.subr.bf16.mxu1 %v5606_v45 }
 0x3ec   :  { %4703 = vmatpush1.bf16.msra.mxu1 %v6093_v6 }
 0x3ed   :  { %4704 = vmatprep.subr.bf16.mxu1 %v5606_v45 }
 0x3f0   :  { %4706 = vmatpush1.bf16.msra.mxu1 %v6108_v48 }
 0x3f1   :  { %4707 = vmatprep.subr.bf16.mxu1 %v5606_v45 }
 0x3f4   :  { %4709 = vmatpush1.bf16.msra.mxu1 %v6121_v20 }
 0x3f5   :  { %4710 = vmatprep.subr.bf16.mxu1 %v5606_v45 }
 0x3f8   :  { %4712 = vmatpush1.bf16.msra.mxu1 %v6136_v5 }
 0x3f9   :  { %4713 = vmatprep.subr.bf16.mxu1 %v5606_v45 }
 0x3fc   :  { %4715 = vmatpush1.bf16.msra.mxu1 %v6152_v36 }
 0x3fd   :  { %4716 = vmatprep.subr.bf16.mxu1 %v5606_v45 }
 0x458   :  { %v4505_v62 = vpop.f32.mrb[0].mxu1 }
 0x459   :  { %v1523_v16 = vadd.f32 %v4505_v62, %v4266_v7  ;;  %v1517_v27 = vpop.f32.mrb[1].mxu1 }
 0x45a   :  { %v1518_v17 = vadd.f32 %v4266_v7, %v1517_v27 }
 0x45b   :  { %1558 = vst.msk [vmem:[#allocation2 + $0x8] sm:$0xff] %vm1556_vm6, %v1523_v16  ;;  %v6613_v16 = vld [vmem:[%s7180_s2 + $0x5] ss:$0 sm:$0xff] }
 0x45c   :  { %1557 = vst.msk [vmem:[#allocation2] sm:$0xff] %vm1556_vm6, %v1518_v17 }
 0x463   :  { %v1870_v54 = vld [vmem:[#allocation2] sm:$0xff] }
 0x474   :  { %v4508_v23 = vpop.f32.mrb[2].mxu1 }
 0x475   :  { %v1533_v39 = vadd.f32 %v4508_v23, %v4266_v7  ;;  %v1527_v60 = vpop.f32.mrb[3].mxu1 }
 0x476   :  { %v1528_v19 = vadd.f32 %v4266_v7, %v1527_v60 }
 0x477   :  { %1560 = vst.msk [vmem:[#allocation2 + $0x18] sm:$0xff] %vm1556_vm6, %v1533_v39 }
 0x478   :  { %1559 = vst.msk [vmem:[#allocation2 + $0x10] sm:$0xff] %vm1556_vm6, %v1528_v19 }
 0x488   :  { %v4511_v59 = vpop.f32.mrb[4].mxu1 }
 0x489   :  { %v1543_v14 = vadd.f32 %v4511_v59, %v4266_v7  ;;  %v1537_v47 = vpop.f32.mrb[5].mxu1 }
 0x48a   :  { %v1538_v2 = vadd.f32 %v4266_v7, %v1537_v47 }
 0x48b   :  { %1562 = vst.msk [vmem:[#allocation2 + $0x28] sm:$0xff] %vm1556_vm6, %v1543_v14 }
 0x48c   :  { %1561 = vst.msk [vmem:[#allocation2 + $0x20] sm:$0xff] %vm1556_vm6, %v1538_v2 }
 0x497   :  { %v4514_v26 = vpop.f32.mrb[6].mxu1 }
 0x498   :  { %v1553_v12 = vadd.f32 %v4514_v26, %v4266_v7  ;;  %v1547_v53 = vpop.f32.mrb[7].mxu1 }
 0x499   :  { %v1548_v46 = vadd.f32 %v4266_v7, %v1547_v53  ;;  %v6607_v7 = vld [vmem:[%s7180_s2 + $0x4] ss:$0 sm:$0xff] }
 0x49a   :  { %1564 = vst.msk [vmem:[#allocation2 + $0x38] sm:$0xff] %vm1556_vm6, %v1553_v12 }
 0x49b   :  { %1563 = vst.msk [vmem:[#allocation2 + $0x30] sm:$0xff] %vm1556_vm6, %v1548_v46 }
 0x4a2   :  { %v1866_v52 = vpop.f32.mrb[8].mxu1 }
 0x4a3   :  { %v1867_v57 = vadd.f32 %v6595_v0, %v1866_v52  ;;  %v4525_v58 = vpop.f32.mrb[9].mxu1 }
 0x4a5   :  { %v1871_v49 = vadd.f32 %v1870_v54, %v1867_v57 }
 0x4a7   :  { %v4294_v40 = vmul.f32 -1.442695, %v1871_v49 }
 0x4a9   :  { %5289 = vpow2.f32 %v4294_v40 }
 0x4aa   :  { %5291 = vtanh.f32 %v1871_v49 }
 0x4b3   :  { %v5290_v61 = vpop.eup %5289 }
 0x4b4   :  { %v1875_v11 = vadd.f32 1.0, %v5290_v61  ;;  %v5292_v35 = vpop.eup %5291 }
 0x4b6   :  { %5293 = vrcp.f32 %v1875_v11 }
 0x4c0   :  { %v5294_v21 = vpop.eup %5293 }
 0x4c1   :  { %v6598_v42 = vmul.f32 %v5294_v21, %v5292_v35 }
 0x4c3   :  { %5295 = vtanh.f32 %v6598_v42 }
 0x4cd   :  { %v5296_v50 = vpop.eup %5295 }
 0x4ce   :  { %v1882_v38 = vmul.f32 %v5296_v50, %v5294_v21 }
 0x4d0   :  { %1883 = vst.msk [vmem:[#allocation3] sm:$0xff] %vm1556_vm6, %v1882_v38  ;;  %v1885_v56 = vsel %vm1556_vm6, %v1882_v38, 0.0  ;;  %v1888_v41 = vmul.f32 %v1882_v38, %v1882_v38  ;;  %v4295_v61 = vmul.f32 -1.442695, %v1882_v38 }
 0x4d1   :  { %1886 = vadd.xlane.f32.xlu0 %v1885_v56 }
 0x4d2   :  { %v1889_v9 = vsel %vm1556_vm6, %v1888_v41, 0.0 }
 0x4d3   :  { %1890 = vadd.xlane.f32.xlu1 %v1889_v9 }
 0x55e   :  { %v1887_v63 = vpop.xlane.xlu0 %1886 }
 0x55f   :  { %v1892_v25 = vmul.f32 0.03125, %v1887_v63 }
 0x560   :  { %v1891_v15 = vpop.xlane.xlu1 %1890 }
 0x561   :  { %v1894_v4 = vmul.f32 %v1892_v25, %v1892_v25  ;;  %v1893_v51 = vmul.f32 0.03125, %v1891_v15  ;;  %v1897_v24 = vsub.f32 %v1882_v38, %v1892_v25 }
 0x563   :  { %v1895_v10 = vsub.f32 %v1893_v51, %v1894_v4 }
 0x565   :  { %v1896_v22 = vmax.f32 %v1895_v10, 0.0 }
 0x567   :  { %v1898_v13 = vadd.f32 1e-05, %v1896_v22 }
 0x569   :  { %5297 = vrsqrt.f32 %v1898_v13 }
 0x573   :  { %v5298_v18 = vpop.eup %5297 }
 0x574   :  { %v1900_v1 = vmul.f32 %v5298_v18, %v1897_v24 }
 0x576   :  { %v1901_v62 = vmul.f32 %v6607_v7, %v1900_v1  ;;  %v6636_v1 = vld [vmem:[%s7180_s2 + $0xa] ss:$0 sm:$0xff] }
 0x578   :  { %v1902_v27 = vadd.f32 %v6613_v16, %v1901_v62 }
 0x57a   :  { %v4296_v17 = vadd.f32 2.0, %v1902_v27  ;;  %v4297_v23 = vadd.f32 1.0, %v1902_v27  ;;  %v4299_v39 = vadd.f32 -2.0, %v1902_v27  ;;  %v1920_v60 = vsub.f32 0.0, %v1902_v27 }
 0x57b   :  { %v4298_v11 = vadd.f32 -1.0, %v1902_v27 }
 0x57c   :  { %v1911_v19 = vsub.f32 0.0, %v4296_v17  ;;  %v1916_v59 = vsub.f32 0.0, %v4297_v23  ;;  %v1930_v14 = vsub.f32 0.0, %v4299_v39  ;;  %v1921_v12 = vmul.f32 %v1920_v60, %v1902_v27 }
 0x57d   :  { %v1925_v21 = vsub.f32 0.0, %v4298_v11 }
 0x57e   :  { %v1912_v47 = vmul.f32 %v4296_v17, %v1911_v19  ;;  %v1917_v2 = vmul.f32 %v4297_v23, %v1916_v59  ;;  %v1931_v26 = vmul.f32 %v4299_v39, %v1930_v14  ;;  %v1922_v57 = vmul.f32 1.442695, %v1921_v12 }
 0x57f   :  { %v1926_v56 = vmul.f32 %v4298_v11, %v1925_v21 }
 0x580   :  { %v1913_v53 = vmul.f32 1.442695, %v1912_v47  ;;  %v1918_v46 = vmul.f32 1.442695, %v1917_v2  ;;  %v1932_v52 = vmul.f32 1.442695, %v1931_v26 }
 0x581   :  { %v1927_v41 = vmul.f32 1.442695, %v1926_v56 }
 0x582   :  { %5299 = vpow2.f32 %v1913_v53 }
 0x583   :  { %5301 = vpow2.f32 %v1918_v46 }
 0x584   :  { %5303 = vpow2.f32 %v1932_v52 }
 0x585   :  { %5305 = vpow2.f32 %v1922_v57 }
 0x586   :  { %5307 = vpow2.f32 %v4295_v61 }
 0x58c   :  { %v5300_v58 = vpop.eup %5299 }
 0x58d   :  { %v5302_v54 = vpop.eup %5301  ;;  %1935 = vrot.lane.b32.xlu0 %v5300_v58, %s5609_s10 }
 0x58e   :  { %1939 = vrot.lane.b32.xlu1 %v5302_v54, %s5607_s8  ;;  %v5304_v49 = vpop.eup %5303 }
 0x58f   :  { %v5306_v40 = vpop.eup %5305 }
 0x590   :  { %v5308_v35 = vpop.eup %5307 }
 0x591   :  { %1947 = vrot.lane.b32.xlu0 %v5304_v49, %s5609_s10  ;;  %v1906_v50 = vadd.f32 1.0, %v5308_v35 }
 0x592   :  { %1943 = vrot.lane.b32.xlu1 %v5306_v40, %s5608_s9 }
 0x593   :  { %5309 = vrcp.f32 %v1906_v50 }
 0x594   :  { %5311 = vpow2.f32 %v1927_v41 }
 0x59d   :  { %v5310_v9 = vpop.eup %5309 }
 0x59e   :  { %v1909_v63 = vmul.f32 %v5310_v9, %v1882_v38  ;;  %v5312_v51 = vpop.eup %5311 }
 0x5ff   :  { %v1936_v25 = vpop.permute.xlu0 %1935 }
 0x600   :  { %v1940_v15 = vpop.permute.xlu1 %1939  ;;  %v1950_v4 = vsel %vm1556_vm6, %v1909_v63, %v1936_v25 }
 0x601   :  { %v1951_v13 = vsel %vm1626_vm7, %v1950_v4, %v1940_v15 }
 0x603   :  { %v1948_v10 = vpop.permute.xlu0 %1947 }
 0x604   :  { %v1944_v22 = vpop.permute.xlu1 %1943  ;;  %v1953_v24 = vsel %vm1556_vm6, %v5312_v51, %v1948_v10 }
 0x605   :  { %v1952_v18 = vsel %vm1628_vm8, %v1951_v13, %v1944_v22  ;;  %4300 = vmatprep.mubr.msk.f32.mxu1 %vm1626_vm7, %v1953_v24 }
 0x606   :  { %2022 = vmatmul.mubr.f32.vlgmr.msra.gmra.mrb[10].mxu1 %v1952_v18 }
 0x607   :  { %4718 = vmatpush3.bf16.msra.mxu1 %v6478_v34  ;;  %4534 = vmatprep.mubr.msk.f32.mxu1 %vm5615_vm1, %v5600_v32 }
 0x608   :  { %4719 = vmatprep.subr.bf16.mxu1 %v5606_v45 }
 0x60b   :  { %4722 = vmatpush3.bf16.msk.msra.mxu1 %vm6387_vm12, %v6492_v3 }
 0x60c   :  { %4759 = vmatprep.subr.bf16.mxu1 %v5606_v45 }
 0x6d9   :  { %v2023_v38 = vpop.f32.mrb[10].mxu1 }
 0x6da   :  { %v6639_v62 = vadd.f32 %v6636_v1, %v2023_v38  ;;  %v2025_v27 = vpop.f32.mrb[11].mxu1 }
 0x6dc   :  { %v2027_v17 = vsel %vm814_vm9, %v6639_v62, 0.0  ;;  %v2030_v23 = vmul.f32 %v6639_v62, %v6639_v62  ;;  %v4301_v27 = vmul.f32 -1.442695, %v6639_v62 }
 0x6dd   :  { %2028 = vadd.xlane.f32.xlu0 %v2027_v17 }
 0x6de   :  { %v2031_v39 = vsel %vm814_vm9, %v2030_v23, 0.0 }
 0x6df   :  { %2032 = vadd.xlane.f32.xlu1 %v2031_v39 }
 0x76a   :  { %v2029_v60 = vpop.xlane.xlu0 %2028 }
 0x76b   :  { %v2034_v19 = vmul.f32 0.2, %v2029_v60 }
 0x76c   :  { %v2033_v59 = vpop.xlane.xlu1 %2032 }
 0x76d   :  { %v2036_v14 = vmul.f32 %v2034_v19, %v2034_v19  ;;  %v2035_v47 = vmul.f32 0.2, %v2033_v59  ;;  %v2039_v53 = vsub.f32 %v6639_v62, %v2034_v19 }
 0x76f   :  { %v2037_v2 = vsub.f32 %v2035_v47, %v2036_v14 }
 0x771   :  { %v2038_v26 = vmax.f32 %v2037_v2, 0.0 }
 0x773   :  { %v2040_v12 = vadd.f32 1e-05, %v2038_v26 }
 0x775   :  { %5313 = vrsqrt.f32 %v2040_v12 }
 0x77f   :  { %v5314_v46 = vpop.eup %5313 }
 0x780   :  { %v2042_v52 = vmul.f32 %v5314_v46, %v2039_v53 }
 0x782   :  { %v2043_v57 = vmul.f32 %v6421_v44, %v2042_v52 }
 0x784   :  { %v2044_v58 = vadd.f32 %v6432_v37, %v2043_v57 }
 0x786   :  { %v4302_v54 = vadd.f32 2.0, %v2044_v58  ;;  %v4303_v49 = vadd.f32 1.0, %v2044_v58  ;;  %v2062_v40 = vsub.f32 0.0, %v2044_v58  ;;  %v4304_v61 = vadd.f32 -1.0, %v2044_v58 }
 0x787   :  { %v4305_v11 = vadd.f32 -2.0, %v2044_v58 }
 0x788   :  { %v2053_v35 = vsub.f32 0.0, %v4302_v54  ;;  %v2058_v21 = vsub.f32 0.0, %v4303_v49  ;;  %v2063_v50 = vmul.f32 %v2062_v40, %v2044_v58  ;;  %v2067_v56 = vsub.f32 0.0, %v4304_v61 }
 0x789   :  { %v2072_v41 = vsub.f32 0.0, %v4305_v11 }
 0x78a   :  { %v2054_v9 = vmul.f32 %v4302_v54, %v2053_v35  ;;  %v2059_v63 = vmul.f32 %v4303_v49, %v2058_v21  ;;  %v2064_v25 = vmul.f32 1.442695, %v2063_v50  ;;  %v2068_v15 = vmul.f32 %v4304_v61, %v2067_v56  ;;  %v1884_v54 = vld [vmem:[#allocation2 + $0x8] sm:$0xff] }
 0x78b   :  { %v2073_v44 = vmul.f32 %v4305_v11, %v2072_v41 }
 0x78c   :  { %v2055_v4 = vmul.f32 1.442695, %v2054_v9  ;;  %v2060_v51 = vmul.f32 1.442695, %v2059_v63  ;;  %5315 = vpow2.f32 %v2064_v25  ;;  %v2069_v37 = vmul.f32 1.442695, %v2068_v15 }
 0x78d   :  { %v2074_v10 = vmul.f32 1.442695, %v2073_v44 }
 0x78e   :  { %5317 = vpow2.f32 %v2060_v51 }
 0x78f   :  { %5319 = vpow2.f32 %v2055_v4 }
 0x790   :  { %5321 = vpow2.f32 %v2069_v37 }
 0x791   :  { %5323 = vpow2.f32 %v2074_v10 }
 0x792   :  { %5325 = vpow2.f32 %v4301_v27 }
 0x796   :  { %v5316_v22 = vpop.eup %5315 }
 0x797   :  { %2085 = vrot.lane.b32.xlu0 %v5316_v22, %s5610_s22 }
 0x798   :  { %v5318_v13 = vpop.eup %5317 }
 0x799   :  { %v5320_v24 = vpop.eup %5319  ;;  %2081 = vrot.lane.b32.xlu1 %v5318_v13, %s5612_s24 }
 0x79a   :  { %v5322_v18 = vpop.eup %5321 }
 0x79b   :  { %2077 = vrot.lane.b32.xlu0 %v5320_v24, %s5611_s23  ;;  %v5324_v38 = vpop.eup %5323 }
 0x79c   :  { %v5326_v17 = vpop.eup %5325 }
 0x79d   :  { %2089 = vrot.lane.b32.xlu1 %v5322_v18, %s5605_s21  ;;  %v2048_v23 = vadd.f32 1.0, %v5326_v17 }
 0x79f   :  { %2093 = vrot.lane.b32.xlu0 %v5324_v38, %s5613_s25  ;;  %5327 = vrcp.f32 %v2048_v23 }
 0x7a9   :  { %v5328_v39 = vpop.eup %5327 }
 0x7aa   :  { %v2051_v59 = vmul.f32 %v5328_v39, %v6639_v62 }
 0x809   :  { %v2086_v60 = vpop.permute.xlu0 %2085 }
 0x80b   :  { %v2082_v19 = vpop.permute.xlu1 %2081 }
 0x80d   :  { %v2078_v14 = vpop.permute.xlu0 %2077 }
 0x80e   :  { %v2096_v47 = vsel %vm814_vm9, %v2051_v59, %v2078_v14 }
 0x80f   :  { %v2097_v2 = vsel %vm1383_vm13, %v2096_v47, %v2082_v19  ;;  %v2090_v26 = vpop.permute.xlu1 %2089 }
 0x810   :  { %v2098_v12 = vsel %vm1392_vm14, %v2097_v2, %v2086_v60 }
 0x811   :  { %v2099_v53 = vsel %vm671_vm4, %v2098_v12, %v2090_v26  ;;  %v2094_v46 = vpop.permute.xlu0 %2093 }
 0x812   :  { %v2100_v52 = vsel %vm1409_vm15, %v2099_v53, %v2094_v46 }
 0x813   :  { %4535 = vmatmul.mubr.msk.f32.vlgmr.msra.gmra.mrb[12].mxu1 %vm1422_vm0, %v2100_v52 }
 0x814   :  { %4761 = vmatpush3.bf16.msra.mxu1 %v6478_v34  ;;  %4545 = vmatprep.mubr.msk.f32.mxu1 %vm5615_vm1, %v5600_v32 }
 0x815   :  { %4762 = vmatprep.subr.bf16.mxu1 %v5606_v45 }
 0x818   :  { %4765 = vmatpush3.bf16.msk.msra.mxu1 %vm6387_vm12, %v6492_v3 }
 0x819   :  { %4766 = vmatprep.subr.bf16.mxu1 %v5606_v45 }
 0x8e6   :  { %v2170_v62 = vpop.f32.mrb[12].mxu1 }
 0x8e7   :  { %v2171_v57 = vadd.f32 %v6595_v0, %v2170_v62  ;;  %v4536_v58 = vpop.f32.mrb[13].mxu1 }
 0x8e9   :  { %v2174_v49 = vadd.f32 %v2171_v57, %v1884_v54 }
 0x8eb   :  { %v4308_v40 = vmul.f32 -1.442695, %v2174_v49 }
 0x8ed   :  { %5329 = vpow2.f32 %v4308_v40 }
 0x8ee   :  { %5331 = vtanh.f32 %v2174_v49 }
 0x8f7   :  { %v5330_v61 = vpop.eup %5329 }
 0x8f8   :  { %v2178_v11 = vadd.f32 1.0, %v5330_v61  ;;  %v5332_v35 = vpop.eup %5331 }
 0x8f9   :  { %v2182_v21 = vadd.f32 %v5332_v35, %v6598_v42 }
 0x8fa   :  { %5333 = vrcp.f32 %v2178_v11 }
 0x904   :  { %v5334_v50 = vpop.eup %5333 }
 0x905   :  { %v6672_v56 = vmul.f32 %v5334_v50, %v2182_v21 }
 0x907   :  { %5335 = vtanh.f32 %v6672_v56 }
 0x911   :  { %v5336_v41 = vpop.eup %5335 }
 0x912   :  { %v2185_v9 = vmul.f32 %v5336_v41, %v5334_v50 }
 0x914   :  { %2186 = vst.msk [vmem:[#allocation3 + $0x8] sm:$0xff] %vm1556_vm6, %v2185_v9  ;;  %v2188_v63 = vsel %vm1556_vm6, %v2185_v9, 0.0  ;;  %v2191_v25 = vmul.f32 %v2185_v9, %v2185_v9  ;;  %v4309_v61 = vmul.f32 -1.442695, %v2185_v9 }
 0x915   :  { %2189 = vadd.xlane.f32.xlu1 %v2188_v63 }
 0x916   :  { %v2192_v15 = vsel %vm1556_vm6, %v2191_v25, 0.0 }
 0x917   :  { %2193 = vadd.xlane.f32.xlu0 %v2192_v15 }
 0x9a2   :  { %v2190_v4 = vpop.xlane.xlu1 %2189 }
 0x9a3   :  { %v2195_v51 = vmul.f32 0.03125, %v2190_v4 }
 0x9a4   :  { %v2194_v44 = vpop.xlane.xlu0 %2193 }
 0x9a5   :  { %v2197_v42 = vmul.f32 %v2195_v51, %v2195_v51  ;;  %v2196_v37 = vmul.f32 0.03125, %v2194_v44  ;;  %v2200_v24 = vsub.f32 %v2185_v9, %v2195_v51 }
 0x9a7   :  { %v2198_v10 = vsub.f32 %v2196_v37, %v2197_v42 }
 0x9a9   :  { %v2199_v22 = vmax.f32 %v2198_v10, 0.0 }
 0x9ab   :  { %v2201_v13 = vadd.f32 1e-05, %v2199_v22 }
 0x9ad   :  { %5337 = vrsqrt.f32 %v2201_v13 }
 0x9b7   :  { %v5338_v18 = vpop.eup %5337 }
 0x9b8   :  { %v2203_v38 = vmul.f32 %v5338_v18, %v2200_v24 }
 0x9ba   :  { %v2204_v27 = vmul.f32 %v6607_v7, %v2203_v38 }
 0x9bc   :  { %v2205_v17 = vadd.f32 %v6613_v16, %v2204_v27 }
 0x9be   :  { %v4310_v23 = vadd.f32 2.0, %v2205_v17  ;;  %v4311_v39 = vadd.f32 1.0, %v2205_v17  ;;  %v2223_v60 = vsub.f32 0.0, %v2205_v17  ;;  %v4313_v19 = vadd.f32 -2.0, %v2205_v17 }
 0x9bf   :  { %v4312_v35 = vadd.f32 -1.0, %v2205_v17 }
 0x9c0   :  { %v2214_v59 = vsub.f32 0.0, %v4310_v23  ;;  %v2219_v14 = vsub.f32 0.0, %v4311_v39  ;;  %v2233_v47 = vsub.f32 0.0, %v4313_v19  ;;  %v2224_v12 = vmul.f32 %v2223_v60, %v2205_v17 }
 0x9c1   :  { %v2228_v50 = vsub.f32 0.0, %v4312_v35 }
 0x9c2   :  { %v2215_v2 = vmul.f32 %v4310_v23, %v2214_v59  ;;  %v2220_v26 = vmul.f32 %v4311_v39, %v2219_v14  ;;  %v2234_v53 = vmul.f32 %v4313_v19, %v2233_v47  ;;  %v2225_v62 = vmul.f32 1.442695, %v2224_v12 }
 0x9c3   :  { %v2229_v41 = vmul.f32 %v4312_v35, %v2228_v50 }
 0x9c4   :  { %v2216_v46 = vmul.f32 1.442695, %v2215_v2  ;;  %v2221_v52 = vmul.f32 1.442695, %v2220_v26  ;;  %v2235_v57 = vmul.f32 1.442695, %v2234_v53 }
 0x9c5   :  { %v2230_v63 = vmul.f32 1.442695, %v2229_v41 }
 0x9c6   :  { %5339 = vpow2.f32 %v2216_v46 }
 0x9c7   :  { %5341 = vpow2.f32 %v2221_v52  ;;  %v6709_v52 = vld [vmem:[%s7180_s2 + $0x6] ss:$0 sm:$0xff] }
 0x9c8   :  { %5343 = vpow2.f32 %v2225_v62 }
 0x9c9   :  { %5345 = vpow2.f32 %v2235_v57  ;;  %v6715_v57 = vld [vmem:[%s7180_s2 + $0x7] ss:$0 sm:$0xff] }
 0x9ca   :  { %5347 = vpow2.f32 %v4309_v61 }
 0x9d0   :  { %v5340_v58 = vpop.eup %5339 }
 0x9d1   :  { %v5342_v54 = vpop.eup %5341  ;;  %2238 = vrot.lane.b32.xlu0 %v5340_v58, %s5609_s10 }
 0x9d2   :  { %2242 = vrot.lane.b32.xlu1 %v5342_v54, %s5607_s8  ;;  %v5344_v49 = vpop.eup %5343 }
 0x9d3   :  { %v5346_v40 = vpop.eup %5345 }
 0x9d4   :  { %v5348_v11 = vpop.eup %5347 }
 0x9d5   :  { %2246 = vrot.lane.b32.xlu0 %v5344_v49, %s5608_s9  ;;  %v2209_v21 = vadd.f32 1.0, %v5348_v11 }
 0x9d6   :  { %2250 = vrot.lane.b32.xlu1 %v5346_v40, %s5609_s10 }
 0x9d7   :  { %5349 = vrcp.f32 %v2209_v21 }
 0x9d8   :  { %5351 = vpow2.f32 %v2230_v63 }
 0x9e1   :  { %v5350_v25 = vpop.eup %5349 }
 0x9e2   :  { %v2212_v15 = vmul.f32 %v5350_v25, %v2185_v9  ;;  %v5352_v10 = vpop.eup %5351 }
 0xa43   :  { %v2239_v4 = vpop.permute.xlu0 %2238 }
 0xa44   :  { %v2243_v51 = vpop.permute.xlu1 %2242  ;;  %v2253_v44 = vsel %vm1556_vm6, %v2212_v15, %v2239_v4 }
 0xa45   :  { %v2254_v42 = vsel %vm1626_vm7, %v2253_v44, %v2243_v51 }
 0xa47   :  { %v2247_v37 = vpop.permute.xlu0 %2246 }
 0xa48   :  { %v2251_v22 = vpop.permute.xlu1 %2250  ;;  %v2255_v13 = vsel %vm1628_vm8, %v2254_v42, %v2247_v37 }
 0xa49   :  { %v2256_v24 = vsel %vm1556_vm6, %v5352_v10, %v2251_v22 }
 0xa4a   :  { %4314 = vmatprep.mubr.msk.f32.mxu0 %vm1626_vm7, %v2256_v24 }
 0xa4b   :  { %2325 = vmatmul.mubr.f32.vlgmr.msra.gmra.mrb[10].mxu0 %v2255_v13 }
 0xa4c   :  { %4804 = vmatpush3.bf16.msra.mxu0 %v6478_v34  ;;  %4556 = vmatprep.mubr.msk.f32.mxu0 %vm5615_vm1, %v5600_v32 }
 0xa4d   :  { %4805 = vmatprep.subr.bf16.mxu0 %v5606_v45 }
 0xa50   :  { %4808 = vmatpush3.bf16.msk.msra.mxu0 %vm6387_vm12, %v6492_v3 }
 0xa51   :  { %4809 = vmatprep.subr.bf16.mxu0 %v5606_v45 }
 0xb1e   :  { %v2326_v9 = vpop.f32.mrb[10].mxu0 }
 0xb1f   :  { %v6698_v18 = vadd.f32 %v6636_v1, %v2326_v9  ;;  %v2328_v38 = vpop.f32.mrb[11].mxu0 }
 0xb21   :  { %v2330_v27 = vsel %vm814_vm9, %v6698_v18, 0.0  ;;  %v2333_v17 = vmul.f32 %v6698_v18, %v6698_v18 }
 0xb22   :  { %2331 = vadd.xlane.f32.xlu1 %v2330_v27 }
 0xb23   :  { %v2334_v23 = vsel %vm814_vm9, %v2333_v17, 0.0  ;;  %v4315_v17 = vmul.f32 -1.442695, %v6698_v18 }
 0xb24   :  { %2335 = vadd.xlane.f32.xlu0 %v2334_v23 }
 0xbaf   :  { %v2332_v39 = vpop.xlane.xlu1 %2331 }
 0xbb0   :  { %v2337_v60 = vmul.f32 0.2, %v2332_v39 }
 0xbb1   :  { %v2336_v19 = vpop.xlane.xlu0 %2335 }
 0xbb2   :  { %v2339_v59 = vmul.f32 %v2337_v60, %v2337_v60  ;;  %v2338_v14 = vmul.f32 0.2, %v2336_v19  ;;  %v2342_v12 = vsub.f32 %v6698_v18, %v2337_v60 }
 0xbb4   :  { %v2340_v47 = vsub.f32 %v2338_v14, %v2339_v59 }
 0xbb6   :  { %v2341_v2 = vmax.f32 %v2340_v47, 0.0 }
 0xbb8   :  { %v2343_v26 = vadd.f32 1e-05, %v2341_v2 }
 0xbba   :  { %5353 = vrsqrt.f32 %v2343_v26 }
 0xbc4   :  { %v5354_v53 = vpop.eup %5353 }
 0xbc5   :  { %v2345_v46 = vmul.f32 %v5354_v53, %v2342_v12 }
 0xbc7   :  { %v2346_v62 = vmul.f32 %v6709_v52, %v2345_v46 }
 0xbc9   :  { %v2347_v58 = vadd.f32 %v6715_v57, %v2346_v62 }
 0xbcb   :  { %v4316_v54 = vadd.f32 2.0, %v2347_v58  ;;  %v4317_v49 = vadd.f32 1.0, %v2347_v58  ;;  %v2365_v40 = vsub.f32 0.0, %v2347_v58  ;;  %v4318_v61 = vadd.f32 -1.0, %v2347_v58 }
 0xbcc   :  { %v4319_v11 = vadd.f32 -2.0, %v2347_v58 }
 0xbcd   :  { %v2356_v35 = vsub.f32 0.0, %v4316_v54  ;;  %v2361_v21 = vsub.f32 0.0, %v4317_v49  ;;  %v2366_v50 = vmul.f32 %v2365_v40, %v2347_v58  ;;  %v2370_v41 = vsub.f32 0.0, %v4318_v61  ;;  %v2187_v40 = vld [vmem:[#allocation2 + $0x10] sm:$0xff] }
 0xbce   :  { %v2375_v63 = vsub.f32 0.0, %v4319_v11 }
 0xbcf   :  { %v2357_v25 = vmul.f32 %v4316_v54, %v2356_v35  ;;  %v2362_v15 = vmul.f32 %v4317_v49, %v2361_v21  ;;  %v2367_v4 = vmul.f32 1.442695, %v2366_v50  ;;  %v2371_v51 = vmul.f32 %v4318_v61, %v2370_v41 }
 0xbd0   :  { %v2376_v37 = vmul.f32 %v4319_v11, %v2375_v63 }
 0xbd1   :  { %v2358_v44 = vmul.f32 1.442695, %v2357_v25  ;;  %v2363_v42 = vmul.f32 1.442695, %v2362_v15  ;;  %5355 = vpow2.f32 %v2367_v4  ;;  %v2372_v10 = vmul.f32 1.442695, %v2371_v51 }
 0xbd2   :  { %v2377_v22 = vmul.f32 1.442695, %v2376_v37 }
 0xbd3   :  { %5357 = vpow2.f32 %v2358_v44 }
 0xbd4   :  { %5359 = vpow2.f32 %v2363_v42 }
 0xbd5   :  { %5361 = vpow2.f32 %v2372_v10 }
 0xbd6   :  { %5363 = vpow2.f32 %v2377_v22 }
 0xbd7   :  { %5365 = vpow2.f32 %v4315_v17 }
 0xbdb   :  { %v5356_v13 = vpop.eup %5355 }
 0xbdc   :  { %2388 = vrot.lane.b32.xlu1 %v5356_v13, %s5610_s22 }
 0xbdd   :  { %v5358_v24 = vpop.eup %5357 }
 0xbde   :  { %2380 = vrot.lane.b32.xlu0 %v5358_v24, %s5611_s23  ;;  %v5360_v9 = vpop.eup %5359 }
 0xbdf   :  { %v5362_v38 = vpop.eup %5361 }
 0xbe0   :  { %2384 = vrot.lane.b32.xlu1 %v5360_v9, %s5612_s24  ;;  %v5364_v27 = vpop.eup %5363 }
 0xbe1   :  { %v5366_v23 = vpop.eup %5365 }
 0xbe2   :  { %2392 = vrot.lane.b32.xlu0 %v5362_v38, %s5605_s21  ;;  %v2351_v39 = vadd.f32 1.0, %v5366_v23 }
 0xbe4   :  { %2396 = vrot.lane.b32.xlu1 %v5364_v27, %s5613_s25  ;;  %5367 = vrcp.f32 %v2351_v39 }
 0xbee   :  { %v5368_v60 = vpop.eup %5367 }
 0xbef   :  { %v2354_v59 = vmul.f32 %v5368_v60, %v6698_v18 }
 0xc4e   :  { %v2389_v19 = vpop.permute.xlu1 %2388 }
 0xc50   :  { %v2381_v14 = vpop.permute.xlu0 %2380 }
 0xc51   :  { %v2399_v47 = vsel %vm814_vm9, %v2354_v59, %v2381_v14 }
 0xc52   :  { %v2385_v2 = vpop.permute.xlu1 %2384 }
 0xc53   :  { %v2400_v26 = vsel %vm1383_vm13, %v2399_v47, %v2385_v2 }
 0xc54   :  { %v2401_v12 = vsel %vm1392_vm14, %v2400_v26, %v2389_v19  ;;  %v2393_v53 = vpop.permute.xlu0 %2392 }
 0xc55   :  { %v2402_v46 = vsel %vm671_vm4, %v2401_v12, %v2393_v53 }
 0xc56   :  { %v2397_v62 = vpop.permute.xlu1 %2396 }
 0xc57   :  { %v2403_v58 = vsel %vm1409_vm15, %v2402_v46, %v2397_v62 }
 0xc58   :  { %4546 = vmatmul.mubr.msk.f32.vlgmr.msra.gmra.mrb[14].mxu1 %vm1422_vm0, %v2403_v58 }
 0xc59   :  { %4768 = vmatpush1.bf16.msra.mxu1 %v5978_v29 }
 0xc5a   :  { %4769 = vmatprep.subr.bf16.mxu1 %v5606_v45 }
 0xc5d   :  { %4771 = vmatpush1.bf16.msra.mxu1 %v6000_v33 }
 0xc5e   :  { %4772 = vmatprep.subr.bf16.mxu1 %v5606_v45 }
 0xc61   :  { %4774 = vmatpush1.bf16.msra.mxu1 %v6017_v55 }
 0xc62   :  { %4775 = vmatprep.subr.bf16.mxu1 %v5606_v45 }
 0xc65   :  { %4777 = vmatpush1.bf16.msra.mxu1 %v6030_v30 }
 0xc66   :  { %4778 = vmatprep.subr.bf16.mxu1 %v5606_v45 }
 0xc69   :  { %4780 = vmatpush1.bf16.msra.mxu1 %v6046_v8 }
 0xc6a   :  { %4781 = vmatprep.subr.bf16.mxu1 %v5606_v45 }
 0xc6d   :  { %4783 = vmatpush1.bf16.msra.mxu1 %v6062_v28 }
 0xc6e   :  { %4784 = vmatprep.subr.bf16.mxu1 %v5606_v45 }
 0xc71   :  { %4786 = vmatpush1.bf16.msra.mxu1 %v6078_v43 }
 0xc72   :  { %4787 = vmatprep.subr.bf16.mxu1 %v5606_v45 }
 0xc75   :  { %4789 = vmatpush1.bf16.msra.mxu1 %v6093_v6 }
 0xc76   :  { %4790 = vmatprep.subr.bf16.mxu1 %v5606_v45 }
 0xc79   :  { %4792 = vmatpush1.bf16.msra.mxu1 %v6108_v48 }
 0xc7a   :  { %4793 = vmatprep.subr.bf16.mxu1 %v5606_v45 }
 0xc7d   :  { %4795 = vmatpush1.bf16.msra.mxu1 %v6121_v20 }
 0xc7e   :  { %4796 = vmatprep.subr.bf16.mxu1 %v5606_v45 }
 0xc81   :  { %4798 = vmatpush1.bf16.msra.mxu1 %v6136_v5 }
 0xc82   :  { %4799 = vmatprep.subr.bf16.mxu1 %v5606_v45 }
 0xc85   :  { %4801 = vmatpush1.bf16.msra.mxu1 %v6152_v36 }
 0xc86   :  { %4845 = vmatprep.subr.bf16.mxu1 %v5606_v45 }
 0xd2b   :  { %v2473_v18 = vpop.f32.mrb[14].mxu1 }
 0xd2c   :  { %v2474_v54 = vadd.f32 %v6595_v0, %v2473_v18  ;;  %v4547_v49 = vpop.f32.mrb[15].mxu1 }
 0xd2e   :  { %v2477_v61 = vadd.f32 %v2474_v54, %v2187_v40 }
 0xd30   :  { %v4322_v11 = vmul.f32 -1.442695, %v2477_v61 }
 0xd32   :  { %5369 = vpow2.f32 %v4322_v11 }
 0xd33   :  { %5371 = vtanh.f32 %v2477_v61 }
 0xd3c   :  { %v5370_v35 = vpop.eup %5369 }
 0xd3d   :  { %v2481_v21 = vadd.f32 1.0, %v5370_v35  ;;  %v5372_v50 = vpop.eup %5371 }
 0xd3e   :  { %v2485_v41 = vadd.f32 %v5372_v50, %v6672_v56 }
 0xd3f   :  { %5373 = vrcp.f32 %v2481_v21 }
 0xd49   :  { %v5374_v63 = vpop.eup %5373 }
 0xd4a   :  { %v6757_v25 = vmul.f32 %v5374_v63, %v2485_v41 }
 0xd4c   :  { %5375 = vtanh.f32 %v6757_v25 }
 0xd56   :  { %v5376_v15 = vpop.eup %5375 }
 0xd57   :  { %v2488_v4 = vmul.f32 %v5376_v15, %v5374_v63 }
 0xd59   :  { %2489 = vst.msk [vmem:[#allocation3 + $0x10] sm:$0xff] %vm1556_vm6, %v2488_v4  ;;  %v2491_v0 = vsel %vm1556_vm6, %v2488_v4, 0.0  ;;  %v2494_v51 = vmul.f32 %v2488_v4, %v2488_v4  ;;  %v4323_v11 = vmul.f32 -1.442695, %v2488_v4 }
 0xd5a   :  { %2492 = vadd.xlane.f32.xlu0 %v2491_v0 }
 0xd5b   :  { %v2495_v44 = vsel %vm1556_vm6, %v2494_v51, 0.0 }
 0xd5c   :  { %2496 = vadd.xlane.f32.xlu1 %v2495_v44 }
 0xde7   :  { %v2493_v42 = vpop.xlane.xlu0 %2492 }
 0xde8   :  { %v2498_v37 = vmul.f32 0.03125, %v2493_v42 }
 0xde9   :  { %v2497_v10 = vpop.xlane.xlu1 %2496 }
 0xdea   :  { %v2500_v56 = vmul.f32 %v2498_v37, %v2498_v37  ;;  %v2499_v22 = vmul.f32 0.03125, %v2497_v10  ;;  %v2503_v38 = vsub.f32 %v2488_v4, %v2498_v37 }
 0xdec   :  { %v2501_v13 = vsub.f32 %v2499_v22, %v2500_v56 }
 0xdee   :  { %v2502_v24 = vmax.f32 %v2501_v13, 0.0 }
 0xdf0   :  { %v2504_v9 = vadd.f32 1e-05, %v2502_v24 }
 0xdf2   :  { %5377 = vrsqrt.f32 %v2504_v9 }
 0xdfc   :  { %v5378_v27 = vpop.eup %5377 }
 0xdfd   :  { %v2506_v17 = vmul.f32 %v5378_v27, %v2503_v38 }
 0xdff   :  { %v2507_v23 = vmul.f32 %v6607_v7, %v2506_v17 }
 0xe01   :  { %v2508_v39 = vadd.f32 %v6613_v16, %v2507_v23 }
 0xe03   :  { %v4324_v60 = vadd.f32 2.0, %v2508_v39  ;;  %v4325_v19 = vadd.f32 1.0, %v2508_v39  ;;  %v4327_v59 = vadd.f32 -2.0, %v2508_v39  ;;  %v2526_v14 = vsub.f32 0.0, %v2508_v39 }
 0xe04   :  { %v4326_v35 = vadd.f32 -1.0, %v2508_v39 }
 0xe05   :  { %v2517_v47 = vsub.f32 0.0, %v4324_v60  ;;  %v2522_v2 = vsub.f32 0.0, %v4325_v19  ;;  %v2536_v26 = vsub.f32 0.0, %v4327_v59  ;;  %v2527_v62 = vmul.f32 %v2526_v14, %v2508_v39 }
 0xe06   :  { %v2531_v50 = vsub.f32 0.0, %v4326_v35 }
 0xe07   :  { %v2518_v12 = vmul.f32 %v4324_v60, %v2517_v47  ;;  %v2523_v53 = vmul.f32 %v4325_v19, %v2522_v2  ;;  %v2537_v46 = vmul.f32 %v4327_v59, %v2536_v26  ;;  %v2528_v49 = vmul.f32 1.442695, %v2527_v62 }
 0xe08   :  { %v2532_v63 = vmul.f32 %v4326_v35, %v2531_v50 }
 0xe09   :  { %v2519_v58 = vmul.f32 1.442695, %v2518_v12  ;;  %v2524_v18 = vmul.f32 1.442695, %v2523_v53  ;;  %v2538_v54 = vmul.f32 1.442695, %v2537_v46 }
 0xe0a   :  { %v2533_v15 = vmul.f32 1.442695, %v2532_v63 }
 0xe0b   :  { %5379 = vpow2.f32 %v2519_v58 }
 0xe0c   :  { %5381 = vpow2.f32 %v2524_v18 }
 0xe0d   :  { %5383 = vpow2.f32 %v2538_v54 }
 0xe0e   :  { %5385 = vpow2.f32 %v2528_v49 }
 0xe0f   :  { %5387 = vpow2.f32 %v4323_v11 }
 0xe15   :  { %v5380_v7 = vpop.eup %5379 }
 0xe16   :  { %v5382_v16 = vpop.eup %5381  ;;  %2541 = vrot.lane.b32.xlu0 %v5380_v7, %s5609_s10 }
 0xe17   :  { %2545 = vrot.lane.b32.xlu1 %v5382_v16, %s5607_s8  ;;  %v5384_v40 = vpop.eup %5383 }
 0xe18   :  { %v5386_v61 = vpop.eup %5385 }
 0xe19   :  { %v5388_v21 = vpop.eup %5387 }
 0xe1a   :  { %2553 = vrot.lane.b32.xlu0 %v5384_v40, %s5609_s10  ;;  %v2512_v41 = vadd.f32 1.0, %v5388_v21 }
 0xe1b   :  { %2549 = vrot.lane.b32.xlu1 %v5386_v61, %s5608_s9 }
 0xe1c   :  { %5389 = vrcp.f32 %v2512_v41 }
 0xe1d   :  { %5391 = vpow2.f32 %v2533_v15 }
 0xe26   :  { %v5390_v0 = vpop.eup %5389 }
 0xe27   :  { %v2515_v51 = vmul.f32 %v5390_v0, %v2488_v4  ;;  %v5392_v10 = vpop.eup %5391 }
 0xe88   :  { %v2542_v44 = vpop.permute.xlu0 %2541 }
 0xe89   :  { %v2546_v42 = vpop.permute.xlu1 %2545  ;;  %v2556_v37 = vsel %vm1556_vm6, %v2515_v51, %v2542_v44 }
 0xe8a   :  { %v2557_v13 = vsel %vm1626_vm7, %v2556_v37, %v2546_v42 }
 0xe8c   :  { %v2554_v56 = vpop.permute.xlu0 %2553 }
 0xe8d   :  { %v2550_v22 = vpop.permute.xlu1 %2549  ;;  %v2559_v24 = vsel %vm1556_vm6, %v5392_v10, %v2554_v56 }
 0xe8e   :  { %v2558_v9 = vsel %vm1628_vm8, %v2557_v13, %v2550_v22  ;;  %4328 = vmatprep.mubr.msk.f32.mxu1 %vm1626_vm7, %v2559_v24 }
 0xe8f   :  { %2628 = vmatmul.mubr.f32.vlgmr.msra.gmra.mrb[16].mxu1 %v2558_v9 }
 0xe90   :  { %4847 = vmatpush3.bf16.msra.mxu1 %v6478_v34  ;;  %4567 = vmatprep.mubr.msk.f32.mxu1 %vm5615_vm1, %v5600_v32 }
 0xe91   :  { %4848 = vmatprep.subr.bf16.mxu1 %v5606_v45 }
 0xe94   :  { %4851 = vmatpush3.bf16.msk.msra.mxu1 %vm6387_vm12, %v6492_v3 }
 0xe95   :  { %4852 = vmatprep.subr.bf16.mxu1 %v5606_v45 }
 0xf62   :  { %v2629_v4 = vpop.f32.mrb[16].mxu1 }
 0xf63   :  { %v6783_v38 = vadd.f32 %v6636_v1, %v2629_v4  ;;  %v2631_v27 = vpop.f32.mrb[17].mxu1 }
 0xf65   :  { %v2633_v17 = vsel %vm814_vm9, %v6783_v38, 0.0  ;;  %v2636_v23 = vmul.f32 %v6783_v38, %v6783_v38  ;;  %v4329_v9 = vmul.f32 -1.442695, %v6783_v38 }
 0xf66   :  { %2634 = vadd.xlane.f32.xlu0 %v2633_v17 }
 0xf67   :  { %v2637_v39 = vsel %vm814_vm9, %v2636_v23, 0.0 }
 0xf68   :  { %2638 = vadd.xlane.f32.xlu1 %v2637_v39 }
 0xff3   :  { %v2635_v60 = vpop.xlane.xlu0 %2634 }
 0xff4   :  { %v2640_v19 = vmul.f32 0.2, %v2635_v60 }
 0xff5   :  { %v2639_v59 = vpop.xlane.xlu1 %2638 }
 0xff6   :  { %v2642_v14 = vmul.f32 %v2640_v19, %v2640_v19  ;;  %v2641_v47 = vmul.f32 0.2, %v2639_v59  ;;  %v2645_v12 = vsub.f32 %v6783_v38, %v2640_v19 }
 0xff8   :  { %v2643_v2 = vsub.f32 %v2641_v47, %v2642_v14 }
 0xffa   :  { %v2644_v26 = vmax.f32 %v2643_v2, 0.0 }
 0xffc   :  { %v2646_v1 = vadd.f32 1e-05, %v2644_v26 }
 0xffe   :  { %5393 = vrsqrt.f32 %v2646_v1 }
0x1008   :  { %v5394_v53 = vpop.eup %5393 }
0x1009   :  { %v2648_v46 = vmul.f32 %v5394_v53, %v2645_v12  ;;  %v6833_v53 = vld [vmem:[%s7180_s2 + $0xb] ss:$0 sm:$0xff] }
0x100b   :  { %v2649_v62 = vmul.f32 %v6709_v52, %v2648_v46 }
0x100d   :  { %v2650_v58 = vadd.f32 %v6715_v57, %v2649_v62 }
0x100f   :  { %v4330_v18 = vadd.f32 2.0, %v2650_v58  ;;  %v4331_v54 = vadd.f32 1.0, %v2650_v58  ;;  %v2668_v49 = vsub.f32 0.0, %v2650_v58  ;;  %v4332_v7 = vadd.f32 -1.0, %v2650_v58 }
0x1010   :  { %v4333_v16 = vadd.f32 -2.0, %v2650_v58 }
0x1011   :  { %v2659_v40 = vsub.f32 0.0, %v4330_v18  ;;  %v2664_v61 = vsub.f32 0.0, %v4331_v54  ;;  %v2669_v11 = vmul.f32 %v2668_v49, %v2650_v58  ;;  %v2673_v35 = vsub.f32 0.0, %v4332_v7  ;;  %v2490_v58 = vld [vmem:[#allocation2 + $0x18] sm:$0xff] }
0x1012   :  { %v2678_v21 = vsub.f32 0.0, %v4333_v16 }
0x1013   :  { %v2660_v50 = vmul.f32 %v4330_v18, %v2659_v40  ;;  %v2665_v41 = vmul.f32 %v4331_v54, %v2664_v61  ;;  %v2670_v63 = vmul.f32 1.442695, %v2669_v11  ;;  %v2674_v15 = vmul.f32 %v4332_v7, %v2673_v35 }
0x1014   :  { %v2679_v44 = vmul.f32 %v4333_v16, %v2678_v21 }
0x1015   :  { %v2661_v0 = vmul.f32 1.442695, %v2660_v50  ;;  %v2666_v51 = vmul.f32 1.442695, %v2665_v41  ;;  %5395 = vpow2.f32 %v2670_v63  ;;  %v2675_v42 = vmul.f32 1.442695, %v2674_v15 }
0x1016   :  { %v2680_v37 = vmul.f32 1.442695, %v2679_v44 }
0x1017   :  { %5397 = vpow2.f32 %v2666_v51 }
0x1018   :  { %5399 = vpow2.f32 %v2661_v0 }
0x1019   :  { %5401 = vpow2.f32 %v2675_v42 }
0x101a   :  { %5403 = vpow2.f32 %v2680_v37 }
0x101b   :  { %5405 = vpow2.f32 %v4329_v9 }
0x101f   :  { %v5396_v10 = vpop.eup %5395 }
0x1020   :  { %2691 = vrot.lane.b32.xlu0 %v5396_v10, %s5610_s22 }
0x1021   :  { %v5398_v56 = vpop.eup %5397 }
0x1022   :  { %v5400_v22 = vpop.eup %5399  ;;  %2687 = vrot.lane.b32.xlu1 %v5398_v56, %s5612_s24 }
0x1023   :  { %v5402_v13 = vpop.eup %5401 }
0x1024   :  { %2683 = vrot.lane.b32.xlu0 %v5400_v22, %s5611_s23  ;;  %v5404_v24 = vpop.eup %5403 }
0x1025   :  { %v5406_v4 = vpop.eup %5405 }
0x1026   :  { %2695 = vrot.lane.b32.xlu1 %v5402_v13, %s5605_s21  ;;  %v2654_v27 = vadd.f32 1.0, %v5406_v4  ;;  %v6852_v4 = vld [vmem:[%s7180_s2 + $0x5] ss:$0 sm:$0xff] }
0x1028   :  { %2699 = vrot.lane.b32.xlu0 %v5404_v24, %s5613_s25  ;;  %5407 = vrcp.f32 %v2654_v27  ;;  %v6846_v24 = vld [vmem:[%s7180_s2 + $0x4] ss:$0 sm:$0xff] }
0x1032   :  { %v5408_v17 = vpop.eup %5407 }
0x1033   :  { %v2657_v60 = vmul.f32 %v5408_v17, %v6783_v38 }
0x1092   :  { %v2692_v23 = vpop.permute.xlu0 %2691 }
0x1094   :  { %v2688_v39 = vpop.permute.xlu1 %2687 }
0x1096   :  { %v2684_v19 = vpop.permute.xlu0 %2683 }
0x1097   :  { %v2702_v59 = vsel %vm814_vm9, %v2657_v60, %v2684_v19 }
0x1098   :  { %v2703_v14 = vsel %vm1383_vm13, %v2702_v59, %v2688_v39  ;;  %v2696_v47 = vpop.permute.xlu1 %2695 }
0x1099   :  { %v2704_v2 = vsel %vm1392_vm14, %v2703_v14, %v2692_v23 }
0x109a   :  { %v2705_v26 = vsel %vm671_vm4, %v2704_v2, %v2696_v47  ;;  %v2700_v1 = vpop.permute.xlu0 %2699 }
0x109b   :  { %v2706_v12 = vsel %vm1409_vm15, %v2705_v26, %v2700_v1 }
0x109c   :  { %4557 = vmatmul.mubr.msk.f32.vlgmr.msra.gmra.mrb[12].mxu0 %vm1422_vm0, %v2706_v12 }
0x109d   :  { %4811 = vmatpush1.bf16.msra.mxu0 %v5978_v29 }
0x109e   :  { %4812 = vmatprep.subr.bf16.mxu0 %v5606_v45 }
0x10a1   :  { %4814 = vmatpush1.bf16.msra.mxu0 %v6000_v33 }
0x10a2   :  { %4815 = vmatprep.subr.bf16.mxu0 %v5606_v45 }
0x10a5   :  { %4817 = vmatpush1.bf16.msra.mxu0 %v6017_v55 }
0x10a6   :  { %4818 = vmatprep.subr.bf16.mxu0 %v5606_v45 }
0x10a9   :  { %4820 = vmatpush1.bf16.msra.mxu0 %v6030_v30 }
0x10aa   :  { %4821 = vmatprep.subr.bf16.mxu0 %v5606_v45 }
0x10ad   :  { %4823 = vmatpush1.bf16.msra.mxu0 %v6046_v8 }
0x10ae   :  { %4824 = vmatprep.subr.bf16.mxu0 %v5606_v45 }
0x10b1   :  { %4826 = vmatpush1.bf16.msra.mxu0 %v6062_v28 }
0x10b2   :  { %4827 = vmatprep.subr.bf16.mxu0 %v5606_v45 }
0x10b5   :  { %4829 = vmatpush1.bf16.msra.mxu0 %v6078_v43 }
0x10b6   :  { %4830 = vmatprep.subr.bf16.mxu0 %v5606_v45 }
0x10b9   :  { %4832 = vmatpush1.bf16.msra.mxu0 %v6093_v6 }
0x10ba   :  { %4833 = vmatprep.subr.bf16.mxu0 %v5606_v45 }
0x10bd   :  { %4835 = vmatpush1.bf16.msra.mxu0 %v6108_v48 }
0x10be   :  { %4836 = vmatprep.subr.bf16.mxu0 %v5606_v45 }
0x10c1   :  { %4838 = vmatpush1.bf16.msra.mxu0 %v6121_v20 }
0x10c2   :  { %4839 = vmatprep.subr.bf16.mxu0 %v5606_v45 }
0x10c5   :  { %4841 = vmatpush1.bf16.msra.mxu0 %v6136_v5 }
0x10c6   :  { %4842 = vmatprep.subr.bf16.mxu0 %v5606_v45 }
0x10c9   :  { %4844 = vmatpush1.bf16.msra.mxu0 %v6152_v36 }
0x10ca   :  { %4888 = vmatprep.subr.bf16.mxu0 %v5606_v45 }
0x116f   :  { %v2776_v38 = vpop.f32.mrb[12].mxu0 }
0x1170   :  { %v2777_v46 = vadd.f32 %v6833_v53, %v2776_v38  ;;  %v4558_v62 = vpop.f32.mrb[13].mxu0 }
0x1172   :  { %v2780_v18 = vadd.f32 %v2777_v46, %v2490_v58 }
0x1174   :  { %v4336_v54 = vmul.f32 -1.442695, %v2780_v18 }
0x1176   :  { %5409 = vpow2.f32 %v4336_v54 }
0x1177   :  { %5411 = vtanh.f32 %v2780_v18 }
0x1180   :  { %v5410_v49 = vpop.eup %5409 }
0x1181   :  { %v2784_v7 = vadd.f32 1.0, %v5410_v49  ;;  %v5412_v16 = vpop.eup %5411 }
0x1182   :  { %v2788_v40 = vadd.f32 %v5412_v16, %v6757_v25 }
0x1183   :  { %5413 = vrcp.f32 %v2784_v7 }
0x118d   :  { %v5414_v61 = vpop.eup %5413 }
0x118e   :  { %v6837_v11 = vmul.f32 %v5414_v61, %v2788_v40 }
0x1190   :  { %5415 = vtanh.f32 %v6837_v11 }
0x119a   :  { %v5416_v35 = vpop.eup %5415 }
0x119b   :  { %v2791_v21 = vmul.f32 %v5416_v35, %v5414_v61 }
0x119d   :  { %2792 = vst.msk [vmem:[#allocation3 + $0x18] sm:$0xff] %vm1556_vm6, %v2791_v21  ;;  %v2794_v50 = vsel %vm1556_vm6, %v2791_v21, 0.0  ;;  %v2797_v41 = vmul.f32 %v2791_v21, %v2791_v21  ;;  %v4337_v7 = vmul.f32 -1.442695, %v2791_v21 }
0x119e   :  { %2795 = vadd.xlane.f32.xlu1 %v2794_v50 }
0x119f   :  { %v2798_v63 = vsel %vm1556_vm6, %v2797_v41, 0.0 }
0x11a0   :  { %2799 = vadd.xlane.f32.xlu0 %v2798_v63 }
0x122b   :  { %v2796_v15 = vpop.xlane.xlu1 %2795 }
0x122c   :  { %v2801_v0 = vmul.f32 0.03125, %v2796_v15 }
0x122d   :  { %v2800_v51 = vpop.xlane.xlu0 %2799 }
0x122e   :  { %v2803_v25 = vmul.f32 %v2801_v0, %v2801_v0  ;;  %v2802_v44 = vmul.f32 0.03125, %v2800_v51  ;;  %v2806_v56 = vsub.f32 %v2791_v21, %v2801_v0 }
0x1230   :  { %v2804_v42 = vsub.f32 %v2802_v44, %v2803_v25 }
0x1232   :  { %v2805_v37 = vmax.f32 %v2804_v42, 0.0 }
0x1234   :  { %v2807_v10 = vadd.f32 1e-05, %v2805_v37 }
0x1236   :  { %5417 = vrsqrt.f32 %v2807_v10 }
0x1240   :  { %v5418_v22 = vpop.eup %5417 }
0x1241   :  { %v2809_v13 = vmul.f32 %v5418_v22, %v2806_v56 }
0x1243   :  { %v2810_v9 = vmul.f32 %v6846_v24, %v2809_v13  ;;  %v6875_v13 = vld [vmem:[%s7180_s2 + $0xa] ss:$0 sm:$0xff] }
0x1245   :  { %v2811_v27 = vadd.f32 %v6852_v4, %v2810_v9 }
0x1247   :  { %v4338_v17 = vadd.f32 2.0, %v2811_v27  ;;  %v4339_v23 = vadd.f32 1.0, %v2811_v27  ;;  %v2829_v39 = vsub.f32 0.0, %v2811_v27  ;;  %v4341_v60 = vadd.f32 -2.0, %v2811_v27 }
0x1248   :  { %v4340_v40 = vadd.f32 -1.0, %v2811_v27 }
0x1249   :  { %v2820_v19 = vsub.f32 0.0, %v4338_v17  ;;  %v2825_v59 = vsub.f32 0.0, %v4339_v23  ;;  %v2839_v14 = vsub.f32 0.0, %v4341_v60  ;;  %v2830_v26 = vmul.f32 %v2829_v39, %v2811_v27 }
0x124a   :  { %v2834_v35 = vsub.f32 0.0, %v4340_v40 }
0x124b   :  { %v2821_v47 = vmul.f32 %v4338_v17, %v2820_v19  ;;  %v2826_v2 = vmul.f32 %v4339_v23, %v2825_v59  ;;  %v2840_v1 = vmul.f32 %v4341_v60, %v2839_v14  ;;  %v2831_v46 = vmul.f32 1.442695, %v2830_v26 }
0x124c   :  { %v2835_v50 = vmul.f32 %v4340_v40, %v2834_v35 }
0x124d   :  { %v2822_v12 = vmul.f32 1.442695, %v2821_v47  ;;  %v2827_v38 = vmul.f32 1.442695, %v2826_v2  ;;  %v2841_v62 = vmul.f32 1.442695, %v2840_v1 }
0x124e   :  { %v2836_v41 = vmul.f32 1.442695, %v2835_v50 }
0x124f   :  { %5419 = vpow2.f32 %v2822_v12 }
0x1250   :  { %5421 = vpow2.f32 %v2827_v38 }
0x1251   :  { %5423 = vpow2.f32 %v2831_v46 }
0x1252   :  { %5425 = vpow2.f32 %v2841_v62 }
0x1253   :  { %5427 = vpow2.f32 %v4337_v7 }
0x1259   :  { %v5420_v58 = vpop.eup %5419 }
0x125a   :  { %v5422_v18 = vpop.eup %5421  ;;  %2844 = vrot.lane.b32.xlu0 %v5420_v58, %s5609_s10 }
0x125b   :  { %2848 = vrot.lane.b32.xlu1 %v5422_v18, %s5607_s8  ;;  %v5424_v54 = vpop.eup %5423 }
0x125c   :  { %v5426_v49 = vpop.eup %5425 }
0x125d   :  { %v5428_v16 = vpop.eup %5427 }
0x125e   :  { %2852 = vrot.lane.b32.xlu0 %v5424_v54, %s5608_s9  ;;  %v2815_v61 = vadd.f32 1.0, %v5428_v16 }
0x125f   :  { %2856 = vrot.lane.b32.xlu1 %v5426_v49, %s5609_s10 }
0x1260   :  { %5429 = vrcp.f32 %v2815_v61 }
0x1261   :  { %5431 = vpow2.f32 %v2836_v41 }
0x126a   :  { %v5430_v63 = vpop.eup %5429 }
0x126b   :  { %v2818_v15 = vmul.f32 %v5430_v63, %v2791_v21  ;;  %v5432_v37 = vpop.eup %5431 }
0x12cc   :  { %v2845_v0 = vpop.permute.xlu0 %2844 }
0x12cd   :  { %v2849_v51 = vpop.permute.xlu1 %2848  ;;  %v2859_v25 = vsel %vm1556_vm6, %v2818_v15, %v2845_v0 }
0x12ce   :  { %v2860_v44 = vsel %vm1626_vm7, %v2859_v25, %v2849_v51 }
0x12d0   :  { %v2853_v42 = vpop.permute.xlu0 %2852 }
0x12d1   :  { %v2857_v10 = vpop.permute.xlu1 %2856  ;;  %v2861_v56 = vsel %vm1628_vm8, %v2860_v44, %v2853_v42 }
0x12d2   :  { %v2862_v22 = vsel %vm1556_vm6, %v5432_v37, %v2857_v10 }
0x12d3   :  { %4342 = vmatprep.mubr.msk.f32.mxu0 %vm1626_vm7, %v2862_v22 }
0x12d4   :  { %2931 = vmatmul.mubr.f32.vlgmr.msra.gmra.mrb[14].mxu0 %v2861_v56 }
0x12d5   :  { %4890 = vmatpush3.bf16.msra.mxu0 %v6478_v34  ;;  %4578 = vmatprep.mubr.msk.f32.mxu0 %vm5615_vm1, %v5600_v32 }
0x12d6   :  { %4891 = vmatprep.subr.bf16.mxu0 %v5606_v45 }
0x12d9   :  { %4894 = vmatpush3.bf16.msk.msra.mxu0 %vm6387_vm12, %v6492_v3 }
0x12da   :  { %4895 = vmatprep.subr.bf16.mxu0 %v5606_v45 }
0x13a7   :  { %v2932_v21 = vpop.f32.mrb[14].mxu0 }
0x13a8   :  { %v2933_v9 = vadd.f32 %v6875_v13, %v2932_v21  ;;  %v2934_v27 = vpop.f32.mrb[15].mxu0 }
0x13aa   :  { %v2936_v17 = vsel %vm814_vm9, %v2933_v9, 0.0  ;;  %v2939_v23 = vmul.f32 %v2933_v9, %v2933_v9  ;;  %v4343_v27 = vmul.f32 -1.442695, %v2933_v9 }
0x13ab   :  { %2937 = vadd.xlane.f32.xlu1 %v2936_v17 }
0x13ac   :  { %v2940_v39 = vsel %vm814_vm9, %v2939_v23, 0.0 }
0x13ad   :  { %2941 = vadd.xlane.f32.xlu0 %v2940_v39 }
0x1438   :  { %v2938_v60 = vpop.xlane.xlu1 %2937 }
0x1439   :  { %v2943_v19 = vmul.f32 0.2, %v2938_v60 }
0x143a   :  { %v2942_v59 = vpop.xlane.xlu0 %2941 }
0x143b   :  { %v2945_v14 = vmul.f32 %v2943_v19, %v2943_v19  ;;  %v2944_v47 = vmul.f32 0.2, %v2942_v59  ;;  %v2948_v12 = vsub.f32 %v2933_v9, %v2943_v19 }
0x143d   :  { %v2946_v2 = vsub.f32 %v2944_v47, %v2945_v14 }
0x143f   :  { %v2947_v26 = vmax.f32 %v2946_v2, 0.0 }
0x1441   :  { %v2949_v1 = vadd.f32 1e-05, %v2947_v26 }
0x1443   :  { %5433 = vrsqrt.f32 %v2949_v1 }
0x144d   :  { %v5434_v38 = vpop.eup %5433 }
0x144e   :  { %v2951_v46 = vmul.f32 %v5434_v38, %v2948_v12 }
0x1450   :  { %v2952_v62 = vmul.f32 %v6709_v52, %v2951_v46 }
0x1452   :  { %v2953_v58 = vadd.f32 %v6715_v57, %v2952_v62 }
0x1454   :  { %v4344_v18 = vadd.f32 2.0, %v2953_v58  ;;  %v4345_v54 = vadd.f32 1.0, %v2953_v58  ;;  %v2971_v49 = vsub.f32 0.0, %v2953_v58  ;;  %v4346_v7 = vadd.f32 -1.0, %v2953_v58 }
0x1455   :  { %v4347_v16 = vadd.f32 -2.0, %v2953_v58 }
0x1456   :  { %v2962_v40 = vsub.f32 0.0, %v4344_v18  ;;  %v2967_v61 = vsub.f32 0.0, %v4345_v54  ;;  %v2972_v35 = vmul.f32 %v2971_v49, %v2953_v58  ;;  %v2976_v50 = vsub.f32 0.0, %v4346_v7 }
0x1457   :  { %v2981_v41 = vsub.f32 0.0, %v4347_v16 }
0x1458   :  { %v2963_v63 = vmul.f32 %v4344_v18, %v2962_v40  ;;  %v2968_v15 = vmul.f32 %v4345_v54, %v2967_v61  ;;  %v2973_v0 = vmul.f32 1.442695, %v2972_v35  ;;  %v2977_v51 = vmul.f32 %v4346_v7, %v2976_v50  ;;  %v2793_v18 = vld [vmem:[#allocation2 + $0x20] sm:$0xff] }
0x1459   :  { %v2982_v52 = vmul.f32 %v4347_v16, %v2981_v41 }
0x145a   :  { %v2964_v25 = vmul.f32 1.442695, %v2963_v63  ;;  %v2969_v44 = vmul.f32 1.442695, %v2968_v15  ;;  %5435 = vpow2.f32 %v2973_v0  ;;  %v2978_v57 = vmul.f32 1.442695, %v2977_v51 }
0x145b   :  { %v2983_v42 = vmul.f32 1.442695, %v2982_v52 }
0x145c   :  { %5437 = vpow2.f32 %v2964_v25 }
0x145d   :  { %5439 = vpow2.f32 %v2969_v44 }
0x145e   :  { %5441 = vpow2.f32 %v2978_v57 }
0x145f   :  { %5443 = vpow2.f32 %v2983_v42 }
0x1460   :  { %5445 = vpow2.f32 %v4343_v27 }
0x1464   :  { %v5436_v37 = vpop.eup %5435 }
0x1465   :  { %2994 = vrot.lane.b32.xlu1 %v5436_v37, %s5610_s22 }
0x1466   :  { %v5438_v10 = vpop.eup %5437 }
0x1467   :  { %2986 = vrot.lane.b32.xlu0 %v5438_v10, %s5611_s23  ;;  %v5440_v56 = vpop.eup %5439 }
0x1468   :  { %v5442_v22 = vpop.eup %5441 }
0x1469   :  { %2990 = vrot.lane.b32.xlu1 %v5440_v56, %s5612_s24  ;;  %v5444_v21 = vpop.eup %5443 }
0x146a   :  { %v5446_v17 = vpop.eup %5445 }
0x146b   :  { %2998 = vrot.lane.b32.xlu0 %v5442_v22, %s5605_s21  ;;  %v2957_v23 = vadd.f32 1.0, %v5446_v17 }
0x146d   :  { %3002 = vrot.lane.b32.xlu1 %v5444_v21, %s5613_s25  ;;  %5447 = vrcp.f32 %v2957_v23 }
0x1477   :  { %v5448_v39 = vpop.eup %5447 }
0x1478   :  { %v2960_v19 = vmul.f32 %v5448_v39, %v2933_v9 }
0x14d7   :  { %v2995_v60 = vpop.permute.xlu1 %2994 }
0x14d9   :  { %v2987_v59 = vpop.permute.xlu0 %2986 }
0x14da   :  { %v3005_v14 = vsel %vm814_vm9, %v2960_v19, %v2987_v59 }
0x14db   :  { %v2991_v47 = vpop.permute.xlu1 %2990 }
0x14dc   :  { %v3006_v2 = vsel %vm1383_vm13, %v3005_v14, %v2991_v47 }
0x14dd   :  { %v3007_v26 = vsel %vm1392_vm14, %v3006_v2, %v2995_v60  ;;  %v2999_v1 = vpop.permute.xlu0 %2998 }
0x14de   :  { %v3008_v12 = vsel %vm671_vm4, %v3007_v26, %v2999_v1 }
0x14df   :  { %v3003_v38 = vpop.permute.xlu1 %3002 }
0x14e0   :  { %v3009_v46 = vsel %vm1409_vm15, %v3008_v12, %v3003_v38 }
0x14e1   :  { %4568 = vmatmul.mubr.msk.f32.vlgmr.msra.gmra.mrb[18].mxu1 %vm1422_vm0, %v3009_v46 }
0x14e2   :  { %4854 = vmatpush1.bf16.msra.mxu1 %v5978_v29 }
0x14e3   :  { %4855 = vmatprep.subr.bf16.mxu1 %v5606_v45 }
0x14e6   :  { %4857 = vmatpush1.bf16.msra.mxu1 %v6000_v33 }
0x14e7   :  { %4858 = vmatprep.subr.bf16.mxu1 %v5606_v45 }
0x14ea   :  { %4860 = vmatpush1.bf16.msra.mxu1 %v6017_v55 }
0x14eb   :  { %4861 = vmatprep.subr.bf16.mxu1 %v5606_v45 }
0x14ee   :  { %4863 = vmatpush1.bf16.msra.mxu1 %v6030_v30 }
0x14ef   :  { %4864 = vmatprep.subr.bf16.mxu1 %v5606_v45 }
0x14f2   :  { %4866 = vmatpush1.bf16.msra.mxu1 %v6046_v8 }
0x14f3   :  { %4867 = vmatprep.subr.bf16.mxu1 %v5606_v45 }
0x14f6   :  { %4869 = vmatpush1.bf16.msra.mxu1 %v6062_v28 }
0x14f7   :  { %4870 = vmatprep.subr.bf16.mxu1 %v5606_v45 }
0x14fa   :  { %4872 = vmatpush1.bf16.msra.mxu1 %v6078_v43 }
0x14fb   :  { %4873 = vmatprep.subr.bf16.mxu1 %v5606_v45 }
0x14fe   :  { %4875 = vmatpush1.bf16.msra.mxu1 %v6093_v6 }
0x14ff   :  { %4876 = vmatprep.subr.bf16.mxu1 %v5606_v45 }
0x1502   :  { %4878 = vmatpush1.bf16.msra.mxu1 %v6108_v48 }
0x1503   :  { %4879 = vmatprep.subr.bf16.mxu1 %v5606_v45 }
0x1506   :  { %4881 = vmatpush1.bf16.msra.mxu1 %v6121_v20 }
0x1507   :  { %4882 = vmatprep.subr.bf16.mxu1 %v5606_v45 }
0x150a   :  { %4884 = vmatpush1.bf16.msra.mxu1 %v6136_v5 }
0x150b   :  { %4885 = vmatprep.subr.bf16.mxu1 %v5606_v45 }
0x150e   :  { %4887 = vmatpush1.bf16.msra.mxu1 %v6152_v36 }
0x150f   :  { %4931 = vmatprep.subr.bf16.mxu1 %v5606_v45 }
0x15b4   :  { %v3079_v9 = vpop.f32.mrb[18].mxu1 }
0x15b5   :  { %v3080_v62 = vadd.f32 %v6833_v53, %v3079_v9  ;;  %v4569_v58 = vpop.f32.mrb[19].mxu1 }
0x15b7   :  { %v3083_v54 = vadd.f32 %v3080_v62, %v2793_v18 }
0x15b9   :  { %v4350_v49 = vmul.f32 -1.442695, %v3083_v54 }
0x15bb   :  { %5449 = vpow2.f32 %v4350_v49 }
0x15bc   :  { %5451 = vtanh.f32 %v3083_v54 }
0x15c5   :  { %v5450_v7 = vpop.eup %5449 }
0x15c6   :  { %v3087_v16 = vadd.f32 1.0, %v5450_v7  ;;  %v5452_v40 = vpop.eup %5451 }
0x15c7   :  { %v3091_v61 = vadd.f32 %v5452_v40, %v6837_v11 }
0x15c8   :  { %5453 = vrcp.f32 %v3087_v16 }
0x15d2   :  { %v5454_v35 = vpop.eup %5453 }
0x15d3   :  { %v6919_v50 = vmul.f32 %v5454_v35, %v3091_v61 }
0x15d5   :  { %5455 = vtanh.f32 %v6919_v50 }
0x15df   :  { %v5456_v41 = vpop.eup %5455 }
0x15e0   :  { %v3094_v63 = vmul.f32 %v5456_v41, %v5454_v35 }
0x15e2   :  { %3095 = vst.msk [vmem:[#allocation3 + $0x20] sm:$0xff] %vm1556_vm6, %v3094_v63  ;;  %v3097_v15 = vsel %vm1556_vm6, %v3094_v63, 0.0  ;;  %v3100_v0 = vmul.f32 %v3094_v63, %v3094_v63  ;;  %v4351_v7 = vmul.f32 -1.442695, %v3094_v63 }
0x15e3   :  { %3098 = vadd.xlane.f32.xlu0 %v3097_v15 }
0x15e4   :  { %v3101_v51 = vsel %vm1556_vm6, %v3100_v0, 0.0 }
0x15e5   :  { %3102 = vadd.xlane.f32.xlu1 %v3101_v51 }
0x1670   :  { %v3099_v25 = vpop.xlane.xlu0 %3098 }
0x1671   :  { %v3104_v44 = vmul.f32 0.03125, %v3099_v25 }
0x1672   :  { %v3103_v52 = vpop.xlane.xlu1 %3102 }
0x1673   :  { %v3106_v11 = vmul.f32 %v3104_v44, %v3104_v44  ;;  %v3105_v57 = vmul.f32 0.03125, %v3103_v52  ;;  %v3109_v56 = vsub.f32 %v3094_v63, %v3104_v44 }
0x1675   :  { %v3107_v42 = vsub.f32 %v3105_v57, %v3106_v11 }
0x1677   :  { %v3108_v37 = vmax.f32 %v3107_v42, 0.0 }
0x1679   :  { %v3110_v10 = vadd.f32 1e-05, %v3108_v37 }
0x167b   :  { %5457 = vrsqrt.f32 %v3110_v10 }
0x1685   :  { %v5458_v22 = vpop.eup %5457 }
0x1686   :  { %v3112_v21 = vmul.f32 %v5458_v22, %v3109_v56 }
0x1688   :  { %v3113_v27 = vmul.f32 %v6846_v24, %v3112_v21 }
0x168a   :  { %v3114_v17 = vadd.f32 %v6852_v4, %v3113_v27 }
0x168c   :  { %v4352_v23 = vadd.f32 2.0, %v3114_v17  ;;  %v4353_v39 = vadd.f32 1.0, %v3114_v17  ;;  %v4355_v60 = vadd.f32 -2.0, %v3114_v17  ;;  %v3132_v19 = vsub.f32 0.0, %v3114_v17 }
0x168d   :  { %v4354_v16 = vadd.f32 -1.0, %v3114_v17 }
0x168e   :  { %v3123_v59 = vsub.f32 0.0, %v4352_v23  ;;  %v3128_v14 = vsub.f32 0.0, %v4353_v39  ;;  %v3142_v47 = vsub.f32 0.0, %v4355_v60  ;;  %v3133_v12 = vmul.f32 %v3132_v19, %v3114_v17 }
0x168f   :  { %v3137_v61 = vsub.f32 0.0, %v4354_v16 }
0x1690   :  { %v3124_v2 = vmul.f32 %v4352_v23, %v3123_v59  ;;  %v3129_v26 = vmul.f32 %v4353_v39, %v3128_v14  ;;  %v3143_v1 = vmul.f32 %v4355_v60, %v3142_v47  ;;  %v3134_v62 = vmul.f32 1.442695, %v3133_v12 }
0x1691   :  { %v3138_v41 = vmul.f32 %v4354_v16, %v3137_v61 }
0x1692   :  { %v3125_v38 = vmul.f32 1.442695, %v3124_v2  ;;  %v3130_v46 = vmul.f32 1.442695, %v3129_v26  ;;  %v3144_v9 = vmul.f32 1.442695, %v3143_v1 }
0x1693   :  { %v3139_v15 = vmul.f32 1.442695, %v3138_v41 }
0x1694   :  { %5459 = vpow2.f32 %v3125_v38 }
0x1695   :  { %5461 = vpow2.f32 %v3130_v46  ;;  %v6956_v46 = vld [vmem:[%s7180_s2 + $0x6] ss:$0 sm:$0xff] }
0x1696   :  { %5463 = vpow2.f32 %v3144_v9 }
0x1697   :  { %5465 = vpow2.f32 %v3134_v62  ;;  %v6962_v62 = vld [vmem:[%s7180_s2 + $0x7] ss:$0 sm:$0xff] }
0x1698   :  { %5467 = vpow2.f32 %v4351_v7 }
0x169e   :  { %v5460_v58 = vpop.eup %5459 }
0x169f   :  { %v5462_v18 = vpop.eup %5461  ;;  %3147 = vrot.lane.b32.xlu0 %v5460_v58, %s5609_s10 }
0x16a0   :  { %3151 = vrot.lane.b32.xlu1 %v5462_v18, %s5607_s8  ;;  %v5464_v54 = vpop.eup %5463 }
0x16a1   :  { %v5466_v49 = vpop.eup %5465 }
0x16a2   :  { %v5468_v40 = vpop.eup %5467 }
0x16a3   :  { %3159 = vrot.lane.b32.xlu0 %v5464_v54, %s5609_s10  ;;  %v3118_v35 = vadd.f32 1.0, %v5468_v40 }
0x16a4   :  { %3155 = vrot.lane.b32.xlu1 %v5466_v49, %s5608_s9 }
0x16a5   :  { %5469 = vrcp.f32 %v3118_v35 }
0x16a6   :  { %5471 = vpow2.f32 %v3139_v15 }
0x16af   :  { %v5470_v0 = vpop.eup %5469 }
0x16b0   :  { %v3121_v51 = vmul.f32 %v5470_v0, %v3094_v63  ;;  %v5472_v11 = vpop.eup %5471 }
0x1711   :  { %v3148_v25 = vpop.permute.xlu0 %3147 }
0x1712   :  { %v3152_v44 = vpop.permute.xlu1 %3151  ;;  %v3162_v52 = vsel %vm1556_vm6, %v3121_v51, %v3148_v25 }
0x1713   :  { %v3163_v37 = vsel %vm1626_vm7, %v3162_v52, %v3152_v44 }
0x1715   :  { %v3160_v57 = vpop.permute.xlu0 %3159 }
0x1716   :  { %v3156_v42 = vpop.permute.xlu1 %3155  ;;  %v3165_v10 = vsel %vm1556_vm6, %v5472_v11, %v3160_v57 }
0x1717   :  { %v3164_v56 = vsel %vm1628_vm8, %v3163_v37, %v3156_v42  ;;  %4356 = vmatprep.mubr.msk.f32.mxu1 %vm1626_vm7, %v3165_v10 }
0x1718   :  { %3234 = vmatmul.mubr.f32.vlgmr.msra.gmra.mrb[20].mxu1 %v3164_v56 }
0x1719   :  { %4933 = vmatpush3.bf16.msra.mxu1 %v6478_v34  ;;  %4589 = vmatprep.mubr.msk.f32.mxu1 %vm5615_vm1, %v5600_v32 }
0x171a   :  { %4934 = vmatprep.subr.bf16.mxu1 %v5606_v45 }
0x171d   :  { %4937 = vmatpush3.bf16.msk.msra.mxu1 %vm6387_vm12, %v6492_v3 }
0x171e   :  { %4938 = vmatprep.subr.bf16.mxu1 %v5606_v45 }
0x17eb   :  { %v3235_v63 = vpop.f32.mrb[20].mxu1 }
0x17ec   :  { %v6945_v22 = vadd.f32 %v6875_v13, %v3235_v63  ;;  %v3237_v21 = vpop.f32.mrb[21].mxu1 }
0x17ee   :  { %v3239_v27 = vsel %vm814_vm9, %v6945_v22, 0.0  ;;  %v3242_v17 = vmul.f32 %v6945_v22, %v6945_v22 }
0x17ef   :  { %3240 = vadd.xlane.f32.xlu0 %v3239_v27 }
0x17f0   :  { %v3243_v23 = vsel %vm814_vm9, %v3242_v17, 0.0  ;;  %v4357_v17 = vmul.f32 -1.442695, %v6945_v22 }
0x17f1   :  { %3244 = vadd.xlane.f32.xlu1 %v3243_v23 }
0x187c   :  { %v3241_v39 = vpop.xlane.xlu0 %3240 }
0x187d   :  { %v3246_v60 = vmul.f32 0.2, %v3241_v39 }
0x187e   :  { %v3245_v19 = vpop.xlane.xlu1 %3244 }
0x187f   :  { %v3248_v59 = vmul.f32 %v3246_v60, %v3246_v60  ;;  %v3247_v14 = vmul.f32 0.2, %v3245_v19  ;;  %v3251_v1 = vsub.f32 %v6945_v22, %v3246_v60 }
0x1881   :  { %v3249_v47 = vsub.f32 %v3247_v14, %v3248_v59 }
0x1883   :  { %v3250_v2 = vmax.f32 %v3249_v47, 0.0 }
0x1885   :  { %v3252_v26 = vadd.f32 1e-05, %v3250_v2 }
0x1887   :  { %5473 = vrsqrt.f32 %v3252_v26 }
0x1891   :  { %v5474_v12 = vpop.eup %5473 }
0x1892   :  { %v3254_v38 = vmul.f32 %v5474_v12, %v3251_v1 }
0x1894   :  { %v3255_v9 = vmul.f32 %v6956_v46, %v3254_v38 }
0x1896   :  { %v3256_v58 = vadd.f32 %v6962_v62, %v3255_v9 }
0x1898   :  { %v4358_v18 = vadd.f32 2.0, %v3256_v58  ;;  %v4359_v54 = vadd.f32 1.0, %v3256_v58  ;;  %v3274_v49 = vsub.f32 0.0, %v3256_v58  ;;  %v4360_v7 = vadd.f32 -1.0, %v3256_v58 }
0x1899   :  { %v4361_v16 = vadd.f32 -2.0, %v3256_v58 }
0x189a   :  { %v3265_v40 = vsub.f32 0.0, %v4358_v18  ;;  %v3270_v61 = vsub.f32 0.0, %v4359_v54  ;;  %v3275_v35 = vmul.f32 %v3274_v49, %v3256_v58  ;;  %v3279_v41 = vsub.f32 0.0, %v4360_v7  ;;  %v3096_v49 = vld [vmem:[#allocation2 + $0x28] sm:$0xff] }
0x189b   :  { %v3284_v15 = vsub.f32 0.0, %v4361_v16 }
0x189c   :  { %v3266_v0 = vmul.f32 %v4358_v18, %v3265_v40  ;;  %v3271_v51 = vmul.f32 %v4359_v54, %v3270_v61  ;;  %v3276_v25 = vmul.f32 1.442695, %v3275_v35  ;;  %v3280_v44 = vmul.f32 %v4360_v7, %v3279_v41 }
0x189d   :  { %v3285_v57 = vmul.f32 %v4361_v16, %v3284_v15 }
0x189e   :  { %v3267_v52 = vmul.f32 1.442695, %v3266_v0  ;;  %v3272_v11 = vmul.f32 1.442695, %v3271_v51  ;;  %5475 = vpow2.f32 %v3276_v25  ;;  %v3281_v42 = vmul.f32 1.442695, %v3280_v44 }
0x189f   :  { %v3286_v37 = vmul.f32 1.442695, %v3285_v57 }
0x18a0   :  { %5477 = vpow2.f32 %v3272_v11 }
0x18a1   :  { %5479 = vpow2.f32 %v3267_v52 }
0x18a2   :  { %5481 = vpow2.f32 %v3281_v42 }
0x18a3   :  { %5483 = vpow2.f32 %v3286_v37 }
0x18a4   :  { %5485 = vpow2.f32 %v4357_v17 }
0x18a8   :  { %v5476_v10 = vpop.eup %5475 }
0x18a9   :  { %3297 = vrot.lane.b32.xlu0 %v5476_v10, %s5610_s22 }
0x18aa   :  { %v5478_v56 = vpop.eup %5477 }
0x18ab   :  { %v5480_v63 = vpop.eup %5479  ;;  %3293 = vrot.lane.b32.xlu1 %v5478_v56, %s5612_s24 }
0x18ac   :  { %v5482_v21 = vpop.eup %5481 }
0x18ad   :  { %3289 = vrot.lane.b32.xlu0 %v5480_v63, %s5611_s23  ;;  %v5484_v27 = vpop.eup %5483 }
0x18ae   :  { %v5486_v23 = vpop.eup %5485 }
0x18af   :  { %3301 = vrot.lane.b32.xlu1 %v5482_v21, %s5605_s21  ;;  %v3260_v39 = vadd.f32 1.0, %v5486_v23 }
0x18b1   :  { %3305 = vrot.lane.b32.xlu0 %v5484_v27, %s5613_s25  ;;  %5487 = vrcp.f32 %v3260_v39 }
0x18bb   :  { %v5488_v60 = vpop.eup %5487 }
0x18bc   :  { %v3263_v14 = vmul.f32 %v5488_v60, %v6945_v22 }
0x191b   :  { %v3298_v19 = vpop.permute.xlu0 %3297 }
0x191d   :  { %v3294_v59 = vpop.permute.xlu1 %3293 }
0x191f   :  { %v3290_v47 = vpop.permute.xlu0 %3289 }
0x1920   :  { %v3308_v2 = vsel %vm814_vm9, %v3263_v14, %v3290_v47 }
0x1921   :  { %v3309_v26 = vsel %vm1383_vm13, %v3308_v2, %v3294_v59  ;;  %v3302_v1 = vpop.permute.xlu1 %3301 }
0x1922   :  { %v3310_v12 = vsel %vm1392_vm14, %v3309_v26, %v3298_v19 }
0x1923   :  { %v3311_v38 = vsel %vm671_vm4, %v3310_v12, %v3302_v1  ;;  %v3306_v9 = vpop.permute.xlu0 %3305 }
0x1924   :  { %v3312_v58 = vsel %vm1409_vm15, %v3311_v38, %v3306_v9 }
0x1925   :  { %4579 = vmatmul.mubr.msk.f32.vlgmr.msra.gmra.mrb[16].mxu0 %vm1422_vm0, %v3312_v58 }
0x1926   :  { %4897 = vmatpush1.bf16.msra.mxu0 %v5978_v29 }
0x1927   :  { %4898 = vmatprep.subr.bf16.mxu0 %v5606_v45 }
0x192a   :  { %4900 = vmatpush1.bf16.msra.mxu0 %v6000_v33 }
0x192b   :  { %4901 = vmatprep.subr.bf16.mxu0 %v5606_v45 }
0x192e   :  { %4903 = vmatpush1.bf16.msra.mxu0 %v6017_v55 }
0x192f   :  { %4904 = vmatprep.subr.bf16.mxu0 %v5606_v45 }
0x1932   :  { %4906 = vmatpush1.bf16.msra.mxu0 %v6030_v30 }
0x1933   :  { %4907 = vmatprep.subr.bf16.mxu0 %v5606_v45 }
0x1936   :  { %4909 = vmatpush1.bf16.msra.mxu0 %v6046_v8 }
0x1937   :  { %4910 = vmatprep.subr.bf16.mxu0 %v5606_v45 }
0x193a   :  { %4912 = vmatpush1.bf16.msra.mxu0 %v6062_v28 }
0x193b   :  { %4913 = vmatprep.subr.bf16.mxu0 %v5606_v45 }
0x193e   :  { %4915 = vmatpush1.bf16.msra.mxu0 %v6078_v43 }
0x193f   :  { %4916 = vmatprep.subr.bf16.mxu0 %v5606_v45 }
0x1942   :  { %4918 = vmatpush1.bf16.msra.mxu0 %v6093_v6 }
0x1943   :  { %4919 = vmatprep.subr.bf16.mxu0 %v5606_v45 }
0x1946   :  { %4921 = vmatpush1.bf16.msra.mxu0 %v6108_v48 }
0x1947   :  { %4922 = vmatprep.subr.bf16.mxu0 %v5606_v45 }
0x194a   :  { %4924 = vmatpush1.bf16.msra.mxu0 %v6121_v20 }
0x194b   :  { %4925 = vmatprep.subr.bf16.mxu0 %v5606_v45 }
0x194e   :  { %4927 = vmatpush1.bf16.msra.mxu0 %v6136_v5 }
0x194f   :  { %4928 = vmatprep.subr.bf16.mxu0 %v5606_v45 }
0x1952   :  { %4930 = vmatpush1.bf16.msra.mxu0 %v6152_v36 }
0x1953   :  { %4974 = vmatprep.subr.bf16.mxu0 %v5606_v45 }
0x19f8   :  { %v3382_v22 = vpop.f32.mrb[16].mxu0 }
0x19f9   :  { %v3383_v18 = vadd.f32 %v6833_v53, %v3382_v22  ;;  %v4580_v54 = vpop.f32.mrb[17].mxu0 }
0x19fb   :  { %v3386_v7 = vadd.f32 %v3383_v18, %v3096_v49 }
0x19fd   :  { %v4364_v16 = vmul.f32 -1.442695, %v3386_v7 }
0x19ff   :  { %5489 = vpow2.f32 %v4364_v16 }
0x1a00   :  { %5491 = vtanh.f32 %v3386_v7 }
0x1a09   :  { %v5490_v40 = vpop.eup %5489 }
0x1a0a   :  { %v3390_v61 = vadd.f32 1.0, %v5490_v40  ;;  %v5492_v35 = vpop.eup %5491 }
0x1a0b   :  { %v3394_v41 = vadd.f32 %v5492_v35, %v6919_v50 }
0x1a0c   :  { %5493 = vrcp.f32 %v3390_v61 }
0x1a16   :  { %v5494_v15 = vpop.eup %5493 }
0x1a17   :  { %v7004_v0 = vmul.f32 %v5494_v15, %v3394_v41 }
0x1a19   :  { %5495 = vtanh.f32 %v7004_v0 }
0x1a23   :  { %v5496_v51 = vpop.eup %5495 }
0x1a24   :  { %v3397_v25 = vmul.f32 %v5496_v51, %v5494_v15 }
0x1a26   :  { %3398 = vst.msk [vmem:[#allocation3 + $0x28] sm:$0xff] %vm1556_vm6, %v3397_v25  ;;  %v3400_v53 = vsel %vm1556_vm6, %v3397_v25, 0.0  ;;  %v3403_v44 = vmul.f32 %v3397_v25, %v3397_v25  ;;  %v4365_v16 = vmul.f32 -1.442695, %v3397_v25 }
0x1a27   :  { %3401 = vadd.xlane.f32.xlu1 %v3400_v53 }
0x1a28   :  { %v3404_v52 = vsel %vm1556_vm6, %v3403_v44, 0.0 }
0x1a29   :  { %3405 = vadd.xlane.f32.xlu0 %v3404_v52 }
0x1ab4   :  { %v3402_v11 = vpop.xlane.xlu1 %3401 }
0x1ab5   :  { %v3407_v57 = vmul.f32 0.03125, %v3402_v11 }
0x1ab6   :  { %v3406_v42 = vpop.xlane.xlu0 %3405 }
0x1ab7   :  { %v3409_v50 = vmul.f32 %v3407_v57, %v3407_v57  ;;  %v3408_v37 = vmul.f32 0.03125, %v3406_v42  ;;  %v3412_v21 = vsub.f32 %v3397_v25, %v3407_v57 }
0x1ab9   :  { %v3410_v10 = vsub.f32 %v3408_v37, %v3409_v50 }
0x1abb   :  { %v3411_v56 = vmax.f32 %v3410_v10, 0.0 }
0x1abd   :  { %v3413_v63 = vadd.f32 1e-05, %v3411_v56 }
0x1abf   :  { %5497 = vrsqrt.f32 %v3413_v63 }
0x1ac9   :  { %v5498_v27 = vpop.eup %5497 }
0x1aca   :  { %v3415_v17 = vmul.f32 %v5498_v27, %v3412_v21 }
0x1acc   :  { %v3416_v23 = vmul.f32 %v6846_v24, %v3415_v17 }
0x1ace   :  { %v3417_v39 = vadd.f32 %v6852_v4, %v3416_v23 }
0x1ad0   :  { %v4366_v60 = vadd.f32 2.0, %v3417_v39  ;;  %v4367_v19 = vadd.f32 1.0, %v3417_v39  ;;  %v3435_v59 = vsub.f32 0.0, %v3417_v39  ;;  %v4369_v14 = vadd.f32 -2.0, %v3417_v39 }
0x1ad1   :  { %v4368_v61 = vadd.f32 -1.0, %v3417_v39 }
0x1ad2   :  { %v3426_v47 = vsub.f32 0.0, %v4366_v60  ;;  %v3431_v2 = vsub.f32 0.0, %v4367_v19  ;;  %v3445_v26 = vsub.f32 0.0, %v4369_v14  ;;  %v3436_v38 = vmul.f32 %v3435_v59, %v3417_v39 }
0x1ad3   :  { %v3440_v41 = vsub.f32 0.0, %v4368_v61 }
0x1ad4   :  { %v3427_v1 = vmul.f32 %v4366_v60, %v3426_v47  ;;  %v3432_v12 = vmul.f32 %v4367_v19, %v3431_v2  ;;  %v3446_v9 = vmul.f32 %v4369_v14, %v3445_v26  ;;  %v3437_v18 = vmul.f32 1.442695, %v3436_v38 }
0x1ad5   :  { %v3441_v15 = vmul.f32 %v4368_v61, %v3440_v41 }
0x1ad6   :  { %v3428_v58 = vmul.f32 1.442695, %v3427_v1  ;;  %v3433_v22 = vmul.f32 1.442695, %v3432_v12  ;;  %v3447_v54 = vmul.f32 1.442695, %v3446_v9 }
0x1ad7   :  { %v3442_v51 = vmul.f32 1.442695, %v3441_v15 }
0x1ad8   :  { %5499 = vpow2.f32 %v3428_v58 }
0x1ad9   :  { %5501 = vpow2.f32 %v3433_v22 }
0x1ada   :  { %5503 = vpow2.f32 %v3437_v18 }
0x1adb   :  { %5505 = vpow2.f32 %v3447_v54 }
0x1adc   :  { %5507 = vpow2.f32 %v4365_v16 }
0x1ae2   :  { %v5500_v24 = vpop.eup %5499 }
0x1ae3   :  { %v5502_v4 = vpop.eup %5501  ;;  %3450 = vrot.lane.b32.xlu0 %v5500_v24, %s5609_s10 }
0x1ae4   :  { %3454 = vrot.lane.b32.xlu1 %v5502_v4, %s5607_s8  ;;  %v5504_v49 = vpop.eup %5503 }
0x1ae5   :  { %v5506_v7 = vpop.eup %5505 }
0x1ae6   :  { %v5508_v40 = vpop.eup %5507 }
0x1ae7   :  { %3458 = vrot.lane.b32.xlu0 %v5504_v49, %s5608_s9  ;;  %v3421_v35 = vadd.f32 1.0, %v5508_v40 }
0x1ae8   :  { %3462 = vrot.lane.b32.xlu1 %v5506_v7, %s5609_s10 }
0x1ae9   :  { %5509 = vrcp.f32 %v3421_v35 }
0x1aea   :  { %5511 = vpow2.f32 %v3442_v51 }
0x1af3   :  { %v5510_v53 = vpop.eup %5509 }
0x1af4   :  { %v3424_v44 = vmul.f32 %v5510_v53, %v3397_v25  ;;  %v5512_v37 = vpop.eup %5511 }
0x1b55   :  { %v3451_v52 = vpop.permute.xlu0 %3450 }
0x1b56   :  { %v3455_v11 = vpop.permute.xlu1 %3454  ;;  %v3465_v57 = vsel %vm1556_vm6, %v3424_v44, %v3451_v52 }
0x1b57   :  { %v3466_v42 = vsel %vm1626_vm7, %v3465_v57, %v3455_v11 }
0x1b59   :  { %v3459_v50 = vpop.permute.xlu0 %3458 }
0x1b5a   :  { %v3463_v10 = vpop.permute.xlu1 %3462  ;;  %v3467_v56 = vsel %vm1628_vm8, %v3466_v42, %v3459_v50 }
0x1b5b   :  { %v3468_v63 = vsel %vm1556_vm6, %v5512_v37, %v3463_v10 }
0x1b5c   :  { %4370 = vmatprep.mubr.msk.f32.mxu0 %vm1626_vm7, %v3468_v63 }
0x1b5d   :  { %3537 = vmatmul.mubr.f32.vlgmr.msra.gmra.mrb[18].mxu0 %v3467_v56 }
0x1b5e   :  { %4976 = vmatpush3.bf16.msra.mxu0 %v6478_v34  ;;  %4600 = vmatprep.mubr.msk.f32.mxu0 %vm5615_vm1, %v5600_v32 }
0x1b5f   :  { %4977 = vmatprep.subr.bf16.mxu0 %v5606_v45 }
0x1b62   :  { %4980 = vmatpush3.bf16.msk.msra.mxu0 %vm6387_vm12, %v6492_v3 }
0x1c30   :  { %v3538_v25 = vpop.f32.mrb[18].mxu0 }
0x1c31   :  { %v3539_v21 = vadd.f32 %v6875_v13, %v3538_v25  ;;  %v3540_v27 = vpop.f32.mrb[19].mxu0 }
0x1c33   :  { %v3542_v17 = vsel %vm814_vm9, %v3539_v21, 0.0  ;;  %v3545_v23 = vmul.f32 %v3539_v21, %v3539_v21  ;;  %v4371_v50 = vmul.f32 -1.442695, %v3539_v21 }
0x1c34   :  { %3543 = vadd.xlane.f32.xlu1 %v3542_v17 }
0x1c35   :  { %v3546_v39 = vsel %vm814_vm9, %v3545_v23, 0.0 }
0x1c36   :  { %3547 = vadd.xlane.f32.xlu0 %v3546_v39 }
0x1cc1   :  { %v3544_v34 = vpop.xlane.xlu1 %3543 }
0x1cc2   :  { %v3549_v60 = vmul.f32 0.2, %v3544_v34 }
0x1cc3   :  { %v3548_v32 = vpop.xlane.xlu0 %3547 }
0x1cc4   :  { %v3551_v19 = vmul.f32 %v3549_v60, %v3549_v60  ;;  %v3550_v59 = vmul.f32 0.2, %v3548_v32  ;;  %v3554_v3 = vsub.f32 %v3539_v21, %v3549_v60 }
0x1cc6   :  { %v3552_v14 = vsub.f32 %v3550_v59, %v3551_v19 }
0x1cc8   :  { %v3553_v47 = vmax.f32 %v3552_v14, 0.0 }
0x1cca   :  { %v3555_v31 = vadd.f32 1e-05, %v3553_v47 }
0x1ccc   :  { %5513 = vrsqrt.f32 %v3555_v31 }
0x1cd6   :  { %v5514_v2 = vpop.eup %5513 }
0x1cd7   :  { %v3557_v13 = vmul.f32 %v5514_v2, %v3554_v3 }
0x1cd9   :  { %v3558_v26 = vmul.f32 %v6956_v46, %v3557_v13 }
0x1cdb   :  { %v3559_v1 = vadd.f32 %v6962_v62, %v3558_v26 }
0x1cdd   :  { %v4372_v12 = vadd.f32 2.0, %v3559_v1  ;;  %v4373_v38 = vadd.f32 1.0, %v3559_v1  ;;  %v3577_v9 = vsub.f32 0.0, %v3559_v1  ;;  %v4374_v58 = vadd.f32 -1.0, %v3559_v1 }
0x1cde   :  { %v4375_v22 = vadd.f32 -2.0, %v3559_v1 }
0x1cdf   :  { %v3568_v18 = vsub.f32 0.0, %v4372_v12  ;;  %v3573_v54 = vsub.f32 0.0, %v4373_v38  ;;  %v3578_v24 = vmul.f32 %v3577_v9, %v3559_v1  ;;  %v3582_v4 = vsub.f32 0.0, %v4374_v58 }
0x1ce0   :  { %v3587_v49 = vsub.f32 0.0, %v4375_v22 }
0x1ce1   :  { %v3569_v7 = vmul.f32 %v4372_v12, %v3568_v18  ;;  %v3574_v16 = vmul.f32 %v4373_v38, %v3573_v54  ;;  %v3579_v40 = vmul.f32 1.442695, %v3578_v24  ;;  %v3583_v61 = vmul.f32 %v4374_v58, %v3582_v4  ;;  %v5597_v54 = vld [vmem:[%s7180_s2 + $0x4] ss:$0 sm:$0xff]  ;;  %v5598_v4 = vld [vmem:[%s7180_s2 + $0x5] ss:$0 sm:$0xff] }
0x1ce2   :  { %v3588_v15 = vmul.f32 %v4375_v22, %v3587_v49 }
0x1ce3   :  { %v3570_v35 = vmul.f32 1.442695, %v3569_v7  ;;  %v3575_v41 = vmul.f32 1.442695, %v3574_v16  ;;  %5515 = vpow2.f32 %v3579_v40  ;;  %v3584_v51 = vmul.f32 1.442695, %v3583_v61 }
0x1ce4   :  { %v3589_v53 = vmul.f32 1.442695, %v3588_v15 }
0x1ce5   :  { %5517 = vpow2.f32 %v3570_v35 }
0x1ce6   :  { %5519 = vpow2.f32 %v3575_v41 }
0x1ce7   :  { %5521 = vpow2.f32 %v3584_v51 }
0x1ce8   :  { %5523 = vpow2.f32 %v3589_v53 }
0x1ce9   :  { %5525 = vpow2.f32 %v4371_v50 }
0x1ced   :  { %v5516_v44 = vpop.eup %5515 }
0x1cee   :  { %3600 = vrot.lane.b32.xlu1 %v5516_v44, %s5610_s22 }
0x1cef   :  { %v5518_v52 = vpop.eup %5517 }
0x1cf0   :  { %3592 = vrot.lane.b32.xlu0 %v5518_v52, %s5611_s23  ;;  %v5520_v11 = vpop.eup %5519 }
0x1cf1   :  { %v5522_v57 = vpop.eup %5521 }
0x1cf2   :  { %3596 = vrot.lane.b32.xlu1 %v5520_v11, %s5612_s24  ;;  %v5524_v42 = vpop.eup %5523 }
0x1cf3   :  { %v5526_v37 = vpop.eup %5525 }
0x1cf4   :  { %3604 = vrot.lane.b32.xlu0 %v5522_v57, %s5605_s21  ;;  %v3563_v10 = vadd.f32 1.0, %v5526_v37 }
0x1cf6   :  { %3608 = vrot.lane.b32.xlu1 %v5524_v42, %s5613_s25  ;;  %5527 = vrcp.f32 %v3563_v10 }
0x1d00   :  { %v5528_v56 = vpop.eup %5527 }
0x1d01   :  { %v3566_v25 = vmul.f32 %v5528_v56, %v3539_v21 }
0x1d60   :  { %v3601_v63 = vpop.permute.xlu1 %3600 }
0x1d62   :  { %v3593_v27 = vpop.permute.xlu0 %3592 }
0x1d63   :  { %v3611_v17 = vsel %vm814_vm9, %v3566_v25, %v3593_v27 }
0x1d64   :  { %v3597_v23 = vpop.permute.xlu1 %3596 }
0x1d65   :  { %v3612_v39 = vsel %vm1383_vm13, %v3611_v17, %v3597_v23 }
0x1d66   :  { %v3613_v34 = vsel %vm1392_vm14, %v3612_v39, %v3601_v63  ;;  %v3605_v60 = vpop.permute.xlu0 %3604 }
0x1d67   :  { %v3614_v32 = vsel %vm671_vm4, %v3613_v34, %v3605_v60 }
0x1d68   :  { %v3609_v19 = vpop.permute.xlu1 %3608 }
0x1d69   :  { %v3615_v59 = vsel %vm1409_vm15, %v3614_v32, %v3609_v19 }
0x1d6a   :  { %4590 = vmatmul.mubr.msk.f32.vlgmr.msra.gmra.mrb[22].mxu1 %vm1422_vm0, %v3615_v59 }
0x1d6b   :  { %4940 = vmatpush1.bf16.msra.mxu1 %v5978_v29 }
0x1d6c   :  { %4941 = vmatprep.subr.bf16.mxu1 %v5606_v45 }
0x1d6f   :  { %4943 = vmatpush1.bf16.msra.mxu1 %v6000_v33  ;;  %v7070_v33 = vld [vmem:[%s7180_s2 + $0xb] ss:$0 sm:$0xff] }
0x1d70   :  { %4944 = vmatprep.subr.bf16.mxu1 %v5606_v45 }
0x1d73   :  { %4946 = vmatpush1.bf16.msra.mxu1 %v6017_v55 }
0x1d74   :  { %4947 = vmatprep.subr.bf16.mxu1 %v5606_v45 }
0x1d77   :  { %4949 = vmatpush1.bf16.msra.mxu1 %v6030_v30 }
0x1d78   :  { %4950 = vmatprep.subr.bf16.mxu1 %v5606_v45 }
0x1d7b   :  { %4952 = vmatpush1.bf16.msra.mxu1 %v6046_v8  ;;  %v3399_v8 = vld [vmem:[#allocation2 + $0x30] sm:$0xff] }
0x1d7c   :  { %4953 = vmatprep.subr.bf16.mxu1 %v5606_v45 }
0x1d7f   :  { %4955 = vmatpush1.bf16.msra.mxu1 %v6062_v28 }
0x1d80   :  { %4956 = vmatprep.subr.bf16.mxu1 %v5606_v45 }
0x1d83   :  { %4958 = vmatpush1.bf16.msra.mxu1 %v6078_v43 }
0x1d84   :  { %4959 = vmatprep.subr.bf16.mxu1 %v5606_v45 }
0x1d87   :  { %4961 = vmatpush1.bf16.msra.mxu1 %v6093_v6 }
0x1d88   :  { %4962 = vmatprep.subr.bf16.mxu1 %v5606_v45 }
0x1d8b   :  { %4964 = vmatpush1.bf16.msra.mxu1 %v6108_v48 }
0x1d8c   :  { %4965 = vmatprep.subr.bf16.mxu1 %v5606_v45 }
0x1d8f   :  { %4967 = vmatpush1.bf16.msra.mxu1 %v6121_v20 }
0x1d90   :  { %4968 = vmatprep.subr.bf16.mxu1 %v5606_v45 }
0x1d93   :  { %4970 = vmatpush1.bf16.msra.mxu1 %v6136_v5 }
0x1d94   :  { %4971 = vmatprep.subr.bf16.mxu1 %v5606_v45 }
0x1d97   :  { %4973 = vmatpush1.bf16.msra.mxu1 %v6152_v36 }
0x1e3d   :  { %v3685_v29 = vpop.f32.mrb[22].mxu1 }
0x1e3e   :  { %v3686_v55 = vadd.f32 %v7070_v33, %v3685_v29  ;;  %v4591_v30 = vpop.f32.mrb[23].mxu1 }
0x1e40   :  { %v3689_v28 = vadd.f32 %v3686_v55, %v3399_v8 }
0x1e42   :  { %v4378_v43 = vmul.f32 -1.442695, %v3689_v28 }
0x1e44   :  { %5529 = vpow2.f32 %v4378_v43 }
0x1e45   :  { %5531 = vtanh.f32 %v3689_v28 }
0x1e4e   :  { %v5530_v6 = vpop.eup %5529 }
0x1e4f   :  { %v3693_v48 = vadd.f32 1.0, %v5530_v6  ;;  %v5532_v45 = vpop.eup %5531 }
0x1e50   :  { %v3697_v20 = vadd.f32 %v5532_v45, %v7004_v0 }
0x1e51   :  { %5533 = vrcp.f32 %v3693_v48 }
0x1e5b   :  { %v5534_v5 = vpop.eup %5533 }
0x1e5c   :  { %v7074_v36 = vmul.f32 %v5534_v5, %v3697_v20  ;;  %v5599_v20 = vld [vmem:[%s7180_s2 + $0xa] ss:$0 sm:$0xff] }
0x1e5e   :  { %5535 = vtanh.f32 %v7074_v36 }
0x1e68   :  { %v5536_v21 = vpop.eup %5535 }
0x1e69   :  { %v3700_v14 = vmul.f32 %v5536_v21, %v5534_v5 }
0x1e6b   :  { %3701 = vst.msk [vmem:[#allocation3 + $0x30] sm:$0xff] %vm1556_vm6, %v3700_v14  ;;  %v3703_v47 = vsel %vm1556_vm6, %v3700_v14, 0.0  ;;  %v3706_v31 = vmul.f32 %v3700_v14, %v3700_v14  ;;  %v4379_v25 = vmul.f32 -1.442695, %v3700_v14 }
0x1e6c   :  { %3704 = vadd.xlane.f32.xlu0 %v3703_v47 }
0x1e6d   :  { %v3707_v3 = vsel %vm1556_vm6, %v3706_v31, 0.0 }
0x1e6e   :  { %3708 = vadd.xlane.f32.xlu1 %v3707_v3 }
0x1ef9   :  { %v3705_v2 = vpop.xlane.xlu0 %3704 }
0x1efa   :  { %v3710_v13 = vmul.f32 0.03125, %v3705_v2 }
0x1efb   :  { %v3709_v26 = vpop.xlane.xlu1 %3708 }
0x1efc   :  { %v3712_v0 = vmul.f32 %v3710_v13, %v3710_v13  ;;  %v3711_v1 = vmul.f32 0.03125, %v3709_v26  ;;  %v3715_v58 = vsub.f32 %v3700_v14, %v3710_v13 }
0x1efe   :  { %v3713_v12 = vsub.f32 %v3711_v1, %v3712_v0 }
0x1f00   :  { %v3714_v38 = vmax.f32 %v3713_v12, 0.0 }
0x1f02   :  { %v3716_v9 = vadd.f32 1e-05, %v3714_v38 }
0x1f04   :  { %5537 = vrsqrt.f32 %v3716_v9 }
0x1f0e   :  { %v5538_v22 = vpop.eup %5537 }
0x1f0f   :  { %v3718_v18 = vmul.f32 %v5538_v22, %v3715_v58 }
0x1f11   :  { %v3719_v24 = vmul.f32 %v5597_v54, %v3718_v18 }
0x1f13   :  { %v3720_v49 = vadd.f32 %v5598_v4, %v3719_v24 }
0x1f15   :  { %v4380_v7 = vadd.f32 2.0, %v3720_v49  ;;  %v4381_v16 = vadd.f32 1.0, %v3720_v49  ;;  %v4383_v40 = vadd.f32 -2.0, %v3720_v49  ;;  %v3738_v61 = vsub.f32 0.0, %v3720_v49 }
0x1f16   :  { %v4382_v27 = vadd.f32 -1.0, %v3720_v49 }
0x1f17   :  { %v3729_v35 = vsub.f32 0.0, %v4380_v7  ;;  %v3734_v41 = vsub.f32 0.0, %v4381_v16  ;;  %v3748_v15 = vsub.f32 0.0, %v4383_v40  ;;  %v3739_v52 = vmul.f32 %v3738_v61, %v3720_v49 }
0x1f18   :  { %v3743_v23 = vsub.f32 0.0, %v4382_v27 }
0x1f19   :  { %v3730_v51 = vmul.f32 %v4380_v7, %v3729_v35  ;;  %v3735_v53 = vmul.f32 %v4381_v16, %v3734_v41  ;;  %v3749_v44 = vmul.f32 %v4383_v40, %v3748_v15  ;;  %v3740_v50 = vmul.f32 1.442695, %v3739_v52 }
0x1f1a   :  { %v3744_v34 = vmul.f32 %v4382_v27, %v3743_v23 }
0x1f1b   :  { %v3731_v11 = vmul.f32 1.442695, %v3730_v51  ;;  %v3736_v57 = vmul.f32 1.442695, %v3735_v53  ;;  %v3750_v42 = vmul.f32 1.442695, %v3749_v44 }
0x1f1c   :  { %v3745_v60 = vmul.f32 1.442695, %v3744_v34 }
0x1f1d   :  { %5539 = vpow2.f32 %v3731_v11 }
0x1f1e   :  { %5541 = vpow2.f32 %v3736_v57 }
0x1f1f   :  { %5543 = vpow2.f32 %v3750_v42 }
0x1f20   :  { %5545 = vpow2.f32 %v3740_v50  ;;  %v4007_v50 = vld [vmem:[%s7182_s3] sm:$0xff] }
0x1f21   :  { %5547 = vpow2.f32 %v4379_v25 }
0x1f27   :  { %v5540_v37 = vpop.eup %5539 }
0x1f28   :  { %v5542_v10 = vpop.eup %5541  ;;  %3753 = vrot.lane.b32.xlu0 %v5540_v37, %s5609_s10  ;;  %v4008_v37 = vld [vmem:[%s7182_s3 + $0x8] sm:$0xff] }
0x1f29   :  { %3757 = vrot.lane.b32.xlu1 %v5542_v10, %s5607_s8  ;;  %v5544_v56 = vpop.eup %5543  ;;  %v4981_v10 = vpack.c.bf16 %v4008_v37, %v4007_v50 }
0x1f2a   :  { %v5546_v63 = vpop.eup %5545 }
0x1f2b   :  { %v5548_v17 = vpop.eup %5547  ;;  %4982 = vmatprep.subr.bf16.mxu0 %v4981_v10 }
0x1f2c   :  { %3765 = vrot.lane.b32.xlu0 %v5544_v56, %s5609_s10  ;;  %v3724_v39 = vadd.f32 1.0, %v5548_v17 }
0x1f2d   :  { %3761 = vrot.lane.b32.xlu1 %v5546_v63, %s5608_s9 }
0x1f2e   :  { %5549 = vrcp.f32 %v3724_v39 }
0x1f2f   :  { %5551 = vpow2.f32 %v3745_v60 }
0x1f38   :  { %v5550_v32 = vpop.eup %5549 }
0x1f39   :  { %v3727_v19 = vmul.f32 %v5550_v32, %v3700_v14  ;;  %v5552_v30 = vpop.eup %5551 }
0x1f9a   :  { %v3754_v59 = vpop.permute.xlu0 %3753 }
0x1f9b   :  { %v3758_v29 = vpop.permute.xlu1 %3757  ;;  %v3768_v55 = vsel %vm1556_vm6, %v3727_v19, %v3754_v59 }
0x1f9c   :  { %v3769_v43 = vsel %vm1626_vm7, %v3768_v55, %v3758_v29 }
0x1f9e   :  { %v3766_v8 = vpop.permute.xlu0 %3765 }
0x1f9f   :  { %v3762_v28 = vpop.permute.xlu1 %3761  ;;  %v3771_v6 = vsel %vm1556_vm6, %v5552_v30, %v3766_v8  ;;  %v4009_v30 = vld [vmem:[%s7182_s3 + $0x10] sm:$0xff]  ;;  %v4010_v8 = vld [vmem:[%s7182_s3 + $0x18] sm:$0xff] }
0x1fa0   :  { %v3770_v48 = vsel %vm1628_vm8, %v3769_v43, %v3762_v28  ;;  %4384 = vmatprep.mubr.msk.f32.mxu1 %vm1626_vm7, %v3771_v6 }
0x1fa1   :  { %3840 = vmatmul.mubr.f32.vlgmr.msra.gmra.mrb[24].mxu1 %v3770_v48 }
0x2074   :  { %v3841_v45 = vpop.f32.mrb[24].mxu1 }
0x2075   :  { %v7098_v5 = vadd.f32 %v5599_v20, %v3841_v45  ;;  %v3843_v21 = vpop.f32.mrb[25].mxu1  ;;  %v4985_v20 = vpack.c.bf16 %v4010_v8, %v4009_v30 }
0x2076   :  { %v4012_v21 = vld [vmem:[#allocation3] sm:$0xff] }
0x2077   :  { %v3845_v14 = vsel %vm814_vm9, %v7098_v5, 0.0  ;;  %v3848_v47 = vmul.f32 %v7098_v5, %v7098_v5  ;;  %v4385_v23 = vmul.f32 -1.442695, %v7098_v5 }
0x2078   :  { %3846 = vadd.xlane.f32.xlu0 %v3845_v14  ;;  %v4013_v14 = vld [vmem:[#allocation3 + $0x8] sm:$0xff] }
0x2079   :  { %v3849_v31 = vsel %vm814_vm9, %v3848_v47, 0.0  ;;  %v4014_v47 = vld [vmem:[#allocation3 + $0x10] sm:$0xff] }
0x207a   :  { %3850 = vadd.xlane.f32.xlu1 %v3849_v31  ;;  %v4015_v31 = vld [vmem:[#allocation3 + $0x18] sm:$0xff] }
0x2105   :  { %v3847_v3 = vpop.xlane.xlu0 %3846 }
0x2106   :  { %v3852_v2 = vmul.f32 0.2, %v3847_v3  ;;  %v4016_v3 = vld [vmem:[#allocation3 + $0x20] sm:$0xff] }
0x2107   :  { %v3851_v13 = vpop.xlane.xlu1 %3850 }
0x2108   :  { %v3854_v26 = vmul.f32 %v3852_v2, %v3852_v2  ;;  %v3853_v0 = vmul.f32 0.2, %v3851_v13  ;;  %v3857_v9 = vsub.f32 %v7098_v5, %v3852_v2  ;;  %v4017_v2 = vld [vmem:[#allocation3 + $0x28] sm:$0xff]  ;;  %v4018_v13 = vld [vmem:[#allocation3 + $0x30] sm:$0xff] }
0x210a   :  { %v3855_v1 = vsub.f32 %v3853_v0, %v3854_v26 }
0x210c   :  { %v3856_v12 = vmax.f32 %v3855_v1, 0.0 }
0x210e   :  { %v3858_v38 = vadd.f32 1e-05, %v3856_v12  ;;  %v3702_v12 = vld [vmem:[#allocation2 + $0x38] sm:$0xff] }
0x2110   :  { %5553 = vrsqrt.f32 %v3858_v38 }
0x211a   :  { %v5554_v58 = vpop.eup %5553 }
0x211b   :  { %v3860_v22 = vmul.f32 %v5554_v58, %v3857_v9  ;;  %v4393_v58 = vld [vmem:[%s7182_s3 + $0x20] ss:$0 sm:$0xff] }
0x211d   :  { %v3861_v18 = vmul.f32 %v6956_v46, %v3860_v22 }
0x211f   :  { %v3862_v54 = vadd.f32 %v6962_v62, %v3861_v18 }
0x2121   :  { %v4386_v24 = vadd.f32 2.0, %v3862_v54  ;;  %v4387_v4 = vadd.f32 1.0, %v3862_v54  ;;  %v3880_v49 = vsub.f32 0.0, %v3862_v54  ;;  %v4388_v7 = vadd.f32 -1.0, %v3862_v54 }
0x2122   :  { %v4389_v16 = vadd.f32 -2.0, %v3862_v54 }
0x2123   :  { %v3871_v40 = vsub.f32 0.0, %v4386_v24  ;;  %v3876_v61 = vsub.f32 0.0, %v4387_v4  ;;  %v3881_v35 = vmul.f32 %v3880_v49, %v3862_v54  ;;  %v3885_v41 = vsub.f32 0.0, %v4388_v7 }
0x2124   :  { %v3890_v15 = vsub.f32 0.0, %v4389_v16 }
0x2125   :  { %v3872_v51 = vmul.f32 %v4386_v24, %v3871_v40  ;;  %v3877_v53 = vmul.f32 %v4387_v4, %v3876_v61  ;;  %v3882_v44 = vmul.f32 1.442695, %v3881_v35  ;;  %v3886_v52 = vmul.f32 %v4388_v7, %v3885_v41 }
0x2126   :  { %v3891_v46 = vmul.f32 %v4389_v16, %v3890_v15 }
0x2127   :  { %v3873_v11 = vmul.f32 1.442695, %v3872_v51  ;;  %v3878_v57 = vmul.f32 1.442695, %v3877_v53  ;;  %5555 = vpow2.f32 %v3882_v44  ;;  %v3887_v62 = vmul.f32 1.442695, %v3886_v52 }
0x2128   :  { %v3892_v42 = vmul.f32 1.442695, %v3891_v46 }
0x2129   :  { %5557 = vpow2.f32 %v3878_v57 }
0x212a   :  { %5559 = vpow2.f32 %v3873_v11 }
0x212b   :  { %5561 = vpow2.f32 %v3887_v62 }
0x212c   :  { %5563 = vpow2.f32 %v3892_v42 }
0x212d   :  { %5565 = vpow2.f32 %v4385_v23 }
0x2131   :  { %v5556_v56 = vpop.eup %5555 }
0x2132   :  { %3903 = vrot.lane.b32.xlu0 %v5556_v56, %s5610_s22 }
0x2133   :  { %v5558_v63 = vpop.eup %5557 }
0x2134   :  { %v5560_v25 = vpop.eup %5559  ;;  %3899 = vrot.lane.b32.xlu1 %v5558_v63, %s5612_s24 }
0x2135   :  { %v5562_v27 = vpop.eup %5561 }
0x2136   :  { %3895 = vrot.lane.b32.xlu0 %v5560_v25, %s5611_s23  ;;  %v5564_v17 = vpop.eup %5563 }
0x2137   :  { %v5566_v39 = vpop.eup %5565 }
0x2138   :  { %3907 = vrot.lane.b32.xlu1 %v5562_v27, %s5605_s21  ;;  %v3866_v34 = vadd.f32 1.0, %v5566_v39 }
0x213a   :  { %3911 = vrot.lane.b32.xlu0 %v5564_v17, %s5613_s25  ;;  %5567 = vrcp.f32 %v3866_v34 }
0x2144   :  { %v5568_v60 = vpop.eup %5567 }
0x2145   :  { %v3869_v59 = vmul.f32 %v5568_v60, %v7098_v5 }
0x21a4   :  { %v3904_v32 = vpop.permute.xlu0 %3903 }
0x21a6   :  { %v3900_v19 = vpop.permute.xlu1 %3899 }
0x21a8   :  { %v3896_v29 = vpop.permute.xlu0 %3895 }
0x21a9   :  { %v3914_v55 = vsel %vm814_vm9, %v3869_v59, %v3896_v29 }
0x21aa   :  { %v3915_v28 = vsel %vm1383_vm13, %v3914_v55, %v3900_v19  ;;  %v3908_v43 = vpop.permute.xlu1 %3907 }
0x21ab   :  { %v3916_v6 = vsel %vm1392_vm14, %v3915_v28, %v3904_v32 }
0x21ac   :  { %v3917_v48 = vsel %vm671_vm4, %v3916_v6, %v3908_v43  ;;  %v3912_v45 = vpop.permute.xlu0 %3911 }
0x21ad   :  { %v3918_v5 = vsel %vm1409_vm15, %v3917_v48, %v3912_v45 }
0x21ae   :  { %4601 = vmatmul.mubr.msk.f32.vlgmr.msra.gmra.mrb[20].mxu0 %vm1422_vm0, %v3918_v5 }
0x21af   :  { %4984 = vmatpush3.bf16.msra.mxu0 %v4981_v10  ;;  %4611 = vmatprep.mubr.msk.f32.mxu0 %vm1556_vm6, %v4012_v21 }
0x21b0   :  { %4986 = vmatprep.subr.bf16.mxu0 %v4985_v20 }
0x21b3   :  { %4988 = vmatpush3.bf16.msra.mxu0 %v4985_v20 }
0x21b6   :  { %4612 = vmatmul.mubr.msk.f32.vlgmr.msra.gmra.mrb[22].mxu0 %vm1556_vm6, %v4013_v14 }
0x21b7   :  { %4614 = vmatprep.mubr.msk.f32.mxu0 %vm1556_vm6, %v4014_v47 }
0x21ba   :  { %4615 = vmatmul.mubr.msk.f32.gmra.mrb[24].mxu0 %vm1556_vm6, %v4015_v31 }
0x21bb   :  { %4617 = vmatprep.mubr.msk.f32.mxu0 %vm1556_vm6, %v4016_v3 }
0x21be   :  { %4618 = vmatmul.mubr.msk.f32.gmra.mrb[26].mxu0 %vm1556_vm6, %v4017_v2 }
0x21bf   :  { %4620 = vmatprep.mubr.msk.f32.mxu0 %vm1556_vm6, %v4018_v13 }
0x2281   :  { %v3988_v26 = vpop.f32.mrb[20].mxu0 }
0x2282   :  { %v3989_v0 = vadd.f32 %v7070_v33, %v3988_v26  ;;  %v4602_v1 = vpop.f32.mrb[21].mxu0 }
0x2284   :  { %v3992_v38 = vadd.f32 %v3989_v0, %v3702_v12 }
0x2286   :  { %v4392_v9 = vmul.f32 -1.442695, %v3992_v38 }
0x2288   :  { %5569 = vpow2.f32 %v4392_v9 }
0x2289   :  { %v4613_v22 = vpop.f32.mrb[22].mxu0  ;;  %5571 = vtanh.f32 %v3992_v38 }
0x228a   :  { %v4120_v18 = vadd.f32 %v4613_v22, %v4393_v58  ;;  %v4114_v54 = vpop.f32.mrb[23].mxu0 }
0x228b   :  { %v4115_v24 = vadd.f32 %v4393_v58, %v4114_v54 }
0x228c   :  { %4154 = vst [vmem:[%s7183_s4 + $0x8] sm:$0xff] %v4120_v18 }
0x228d   :  { %4153 = vst [vmem:[%s7183_s4] sm:$0xff] %v4115_v24  ;;  %v4616_v33 = vpop.f32.mrb[24].mxu0 }
0x228e   :  { %v4130_v4 = vadd.f32 %v4616_v33, %v4393_v58  ;;  %v4124_v49 = vpop.f32.mrb[25].mxu0 }
0x228f   :  { %v4125_v7 = vadd.f32 %v4393_v58, %v4124_v49 }
0x2290   :  { %4156 = vst [vmem:[%s7183_s4 + $0x18] sm:$0xff] %v4130_v4 }
0x2291   :  { %4155 = vst [vmem:[%s7183_s4 + $0x10] sm:$0xff] %v4125_v7  ;;  %v4619_v16 = vpop.f32.mrb[26].mxu0 }
0x2292   :  { %v5570_v40 = vpop.eup %5569  ;;  %v4140_v61 = vadd.f32 %v4619_v16, %v4393_v58  ;;  %v4134_v35 = vpop.f32.mrb[27].mxu0 }
0x2293   :  { %v3996_v41 = vadd.f32 1.0, %v5570_v40  ;;  %v4135_v15 = vadd.f32 %v4393_v58, %v4134_v35  ;;  %v5572_v51 = vpop.eup %5571 }
0x2294   :  { %4158 = vst [vmem:[%s7183_s4 + $0x28] sm:$0xff] %v4140_v61  ;;  %v4000_v53 = vadd.f32 %v5572_v51, %v7074_v36 }
0x2295   :  { %5573 = vrcp.f32 %v3996_v41  ;;  %4157 = vst [vmem:[%s7183_s4 + $0x20] sm:$0xff] %v4135_v15 }
0x229f   :  { %v5574_v44 = vpop.eup %5573 }
0x22a0   :  { %v4001_v52 = vmul.f32 %v5574_v44, %v4000_v53 }
0x22a2   :  { %5575 = vtanh.f32 %v4001_v52  ;;  %4006 = vst.msk [vmem:[%s7184_s6] sm:$0xff] %vm1556_vm6, %v4001_v52 }
0x22ac   :  { %v5576_v11 = vpop.eup %5575 }
0x22ad   :  { %v4003_v57 = vmul.f32 %v5576_v11, %v5574_v44 }
0x22af   :  { %4004 = vst.msk [vmem:[#allocation3 + $0x38] sm:$0xff] %vm1556_vm6, %v4003_v57  ;;  %4005 = vst.msk [vmem:[%s7185_s5] sm:$0xff] %vm1556_vm6, %v4003_v57 }
0x22b6   :  { %v4019_v46 = vld [vmem:[#allocation3 + $0x38] sm:$0xff] }
0x22b7   :  { %4621 = vmatmul.mubr.msk.f32.gmra.mrb[28].mxu0 %vm1556_vm6, %v4019_v46 }
0x238a   :  { %v4622_v36 = vpop.f32.mrb[28].mxu0 }
0x238b   :  { %v4150_v62 = vadd.f32 %v4622_v36, %v4393_v58  ;;  %v4144_v42 = vpop.f32.mrb[29].mxu0 }
0x238c   :  { %v4145_v50 = vadd.f32 %v4393_v58, %v4144_v42 }
0x238d   :  { %4160 = vst [vmem:[%s7183_s4 + $0x38] sm:$0xff] %v4150_v62 }
0x238e   :  { %4159 = vst [vmem:[%s7183_s4 + $0x30] sm:$0xff] %v4145_v50 }

</bundles_post_ra>
